<compile_context>
chip_gen: v6e
topology: v6e:2x2x1
jax: 0.10.0
libtpu: 0.0.40
codegen_flags: <defaults>
</compile_context>

<pallas_src>
import jax
import jax.numpy as jnp
from jax.experimental import pallas as pl
from jax.experimental.pallas import tpu as pltpu

LANE = 128      # padded out-channel width for conv1/conv2 (lane-dense)
HID_PAD = 512   # fc1 hidden 500 -> 512 (multiple of 128)
KH = KW = 5


# ----------------------------- Pallas kernels ------------------------------

def _conv_relu_pool_kernel(p_ref, w_ref, b_ref, o_ref):
    """Fused conv(+bias)+relu+2x2 maxpool for one image.

    p_ref: [4, Mpi, K]  im2col patches, one slab per pool offset (bf16)
    w_ref: [K, 128]     packed conv weights (bf16, zero-padded out-channels)
    b_ref: [1, 128]     bias (f32, zero-padded)
    o_ref: [Mpi, 128]   pooled activation (bf16), lane-dense
    """
    w = w_ref[...]
    acc = jnp.dot(p_ref[0], w, preferred_element_type=jnp.float32)
    for t in range(1, 4):
        acc = jnp.maximum(acc, jnp.dot(p_ref[t], w,
                                       preferred_element_type=jnp.float32))
    # bias is constant across pool offsets and relu is monotonic -> hoist both.
    acc = jnp.maximum(acc + b_ref[...], 0.0)
    o_ref[...] = acc.astype(o_ref.dtype)


def _mlp_logsoftmax_kernel(x_ref, w1_ref, b1_ref, w2_ref, b2_ref, o_ref):
    """Fused fc1 + relu + fc2 + log_softmax(dim=1)."""
    h = jnp.dot(x_ref[...], w1_ref[...],
                preferred_element_type=jnp.float32) + b1_ref[...]
    h = jnp.maximum(h, 0.0).astype(w2_ref.dtype)          # bf16 into 2nd MXU pass
    logits = jnp.dot(h, w2_ref[...],
                     preferred_element_type=jnp.float32) + b2_ref[...]
    m = jnp.max(logits, axis=-1, keepdims=True)
    s = logits - m
    lse = jnp.log(jnp.sum(jnp.exp(s), axis=-1, keepdims=True))
    o_ref[...] = (s - lse).astype(o_ref.dtype)


# ------------------------------ wrappers ------------------------------------

def _pool_patches(x_nhwc, kh, kw):
    """im2col grouped by 2x2 pool offset.

    Returns patches [4, B*OH2*OW2, kh*kw*C]: slab t=(di*2+dj) holds, for every
    pooled output cell, the patch of the conv output at pool offset (di, dj).
    """
    B, H, W, C = x_nhwc.shape
    oh, ow = H - kh + 1, W - kw + 1           # conv output spatial
    oh2, ow2 = oh // 2, ow // 2               # pooled spatial
    per_offset = []
    for di in range(2):
        for dj in range(2):
            taps = []
            for i in range(kh):
                for j in range(kw):
                    r0, c0 = di + i, dj + j
                    taps.append(x_nhwc[:, r0:r0 + 2 * oh2:2,
                                          c0:c0 + 2 * ow2:2, :])
            p = jnp.stack(taps, axis=3)               # [B, oh2, ow2, kh*kw, C]
            per_offset.append(p.reshape(B * oh2 * ow2, kh * kw * C))
    return jnp.stack(per_offset, axis=0), oh2, ow2


def conv_relu_pool(x_nhwc, w_packed, b_packed):
    """One fused conv stage. x_nhwc: [B,H,W,C] bf16 -> [B,OH2,OW2,128] bf16."""
    B = x_nhwc.shape[0]
    patches, oh2, ow2 = _pool_patches(x_nhwc, KH, KW)   # [4, B*Mpi, K]
    mpi = oh2 * ow2
    k = patches.shape[-1]
    oc = w_packed.shape[-1]                             # 128 (lane-dense)
    out = pl.pallas_call(
        _conv_relu_pool_kernel,
        out_shape=jax.ShapeDtypeStruct((B * mpi, oc), jnp.bfloat16),
        grid=(B,),
        in_specs=[
            pl.BlockSpec((4, mpi, k), lambda b: (0, b, 0)),
            pl.BlockSpec((k, oc), lambda b: (0, 0)),
            pl.BlockSpec((1, oc), lambda b: (0, 0)),
        ],
        out_specs=pl.BlockSpec((mpi, oc), lambda b: (b, 0)),
        compiler_params=pltpu.CompilerParams(
            dimension_semantics=("parallel",)),
    )(patches, w_packed, b_packed)
    return out.reshape(B, oh2, ow2, oc)


def mlp_head(x, w1, b1, w2, b2):
    """log_softmax(relu(x @ w1 + b1) @ w2 + b2) in one kernel. x: [B, 2048]."""
    B, K1 = x.shape
    H = w1.shape[1]
    N = w2.shape[1]
    return pl.pallas_call(
        _mlp_logsoftmax_kernel,
        out_shape=jax.ShapeDtypeStruct((B, N), jnp.float32),
        grid=(1,),
        in_specs=[
            pl.BlockSpec((B, K1), lambda i: (0, 0)),
            pl.BlockSpec((K1, H), lambda i: (0, 0)),
            pl.BlockSpec((1, H), lambda i: (0, 0)),
            pl.BlockSpec((H, N), lambda i: (0, 0)),
            pl.BlockSpec((1, N), lambda i: (0, 0)),
        ],
        out_specs=pl.BlockSpec((B, N), lambda i: (0, 0)),
    )(x, w1, b1, w2, b2)


# ------------------------ params: init + one-time packing -------------------

def init_raw_params(key):
    """PyTorch-layout parameters (deterministic stand-ins for trained weights)."""
    ks = jax.random.split(key, 8)
    return {
        "conv1_w": jax.random.normal(ks[0], (20, 1, 5, 5), jnp.float32) * 0.1,
        "conv1_b": jax.random.normal(ks[1], (20,), jnp.float32) * 0.01,
        "conv2_w": jax.random.normal(ks[2], (50, 20, 5, 5), jnp.float32) * 0.05,
        "conv2_b": jax.random.normal(ks[3], (50,), jnp.float32) * 0.01,
        "fc1_w": jax.random.normal(ks[4], (500, 800), jnp.float32) * 0.03,  # [out,in]
        "fc1_b": jax.random.normal(ks[5], (500,), jnp.float32) * 0.01,
        "fc2_w": jax.random.normal(ks[6], (10, 500), jnp.float32) * 0.03,   # [out,in]
        "fc2_b": jax.random.normal(ks[7], (10,), jnp.float32) * 0.01,
    }


def pack_params(raw):
    """One-time repack: im2col weight matrices, lane-dense zero padding, bf16."""
    # conv1: [20,1,5,5] -> [5*5*1, 128]; row = (i*5+j)*IC + c, cols padded w/ 0.
    w = jnp.transpose(raw["conv1_w"], (2, 3, 1, 0)).reshape(KH * KW * 1, 20)
    c1_w = jnp.pad(w, ((0, 0), (0, LANE - 20))).astype(jnp.bfloat16)
    c1_b = jnp.pad(raw["conv1_b"], (0, LANE - 20)).reshape(1, LANE)

    # conv2: [50,20,5,5] -> [5*5*128, 128]; zero rows for padded in-channels.
    w = jnp.transpose(raw["conv2_w"], (2, 3, 1, 0))                  # [5,5,20,50]
    w = jnp.pad(w, ((0, 0), (0, 0), (0, LANE - 20), (0, LANE - 50)))
    c2_w = w.reshape(KH * KW * LANE, LANE).astype(jnp.bfloat16)
    c2_b = jnp.pad(raw["conv2_b"], (0, LANE - 50)).reshape(1, LANE)

    # fc1: torch [500, 800], input index = c*16 + h*4 + w  ->  [4*4*128, 512]
    # rows permuted so the NHWC(+pad) flatten (h*512 + w*128 + c) feeds it directly.
    w = raw["fc1_w"].reshape(500, 50, 4, 4)          # [O, C, H, W]
    w = jnp.transpose(w, (2, 3, 1, 0))               # [H, W, C, O]
    w = jnp.pad(w, ((0, 0), (0, 0), (0, LANE - 50), (0, HID_PAD - 500)))
    fc1_w = w.reshape(4 * 4 * LANE, HID_PAD).astype(jnp.bfloat16)
    fc1_b = jnp.pad(raw["fc1_b"], (0, HID_PAD - 500)).reshape(1, HID_PAD)

    # fc2: torch [10, 500] -> [512, 10] (zero rows for padded hidden units)
    fc2_w = jnp.pad(raw["fc2_w"].T, ((0, HID_PAD - 500), (0, 0))).astype(jnp.bfloat16)
    fc2_b = raw["fc2_b"].reshape(1, 10)

    return {"c1_w": c1_w, "c1_b": c1_b, "c2_w": c2_w, "c2_b": c2_b,
            "fc1_w": fc1_w, "fc1_b": fc1_b, "fc2_w": fc2_w, "fc2_b": fc2_b}


# ------------------------------- the network --------------------------------

@jax.jit
def net_forward(packed, x_nchw):
    # x: [B, 1, 28, 28] NCHW (PyTorch convention) -> NHWC bf16
    x = jnp.transpose(x_nchw, (0, 2, 3, 1)).astype(jnp.bfloat16)

    x = conv_relu_pool(x, packed["c1_w"], packed["c1_b"])   # [B,12,12,128]
    x = conv_relu_pool(x, packed["c2_w"], packed["c2_b"])   # [B, 4, 4,128]

    B = x.shape[0]
    x = x.reshape(B, 4 * 4 * LANE)                          # lane-dense flatten
    # fc1+relu+fc2+log_softmax fused (fc1 rows pre-permuted to match this flatten)
    return mlp_head(x, packed["fc1_w"], packed["fc1_b"],
                    packed["fc2_w"], packed["fc2_b"])


if __name__ == "__main__":
    key = jax.random.PRNGKey(0)
    k_param, k_x = jax.random.split(key)
    raw = init_raw_params(k_param)
    packed = pack_params(raw)          # one-time weight packing (outside forward)
    x = jax.random.normal(k_x, (2, 1, 28, 28), jnp.float32)   # batch=2, MNIST-sized

    out = net_forward(packed, x)
    out = jax.block_until_ready(out)

    assert out.shape == (2, 10)
    # sanity: rows of log_softmax should (approximately) exp-sum to 1
    assert jnp.allclose(jnp.sum(jnp.exp(out), axis=1), 1.0, atol=1e-4)
    print("KERNEL_OK")
</pallas_src>

<mosaic_0001>
module attributes {stable_mosaic.version = 11 : i64} {
  func.func @_conv_relu_pool_kernel(%arg0: i32, %arg1: memref<4x144x25xbf16, #tpu.memory_space<vmem>>, %arg2: memref<25x128xbf16, #tpu.memory_space<vmem>>, %arg3: memref<1x128xf32, #tpu.memory_space<vmem>>, %arg4: memref<144x128xbf16, #tpu.memory_space<vmem>>) attributes {dimension_semantics = [#tpu.dimension_semantics<parallel>], iteration_bounds = array<i64: 2>, scalar_prefetch = 0 : i64, scratch_operands = 0 : i64, tpu.core_type = #tpu.core_type<tc>, window_params = [{transform_indices = @transform_0, window_bounds = array<i64: 4, 144, 25>}, {pipeline_mode = #tpu.pipeline_mode<synchronous>, transform_indices = @transform_1, window_bounds = array<i64: 25, 128>}, {pipeline_mode = #tpu.pipeline_mode<synchronous>, transform_indices = @transform_2, window_bounds = array<i64: 1, 128>}, {transform_indices = @transform_3, window_bounds = array<i64: 144, 128>}]} {
    %c0 = arith.constant 0 : index
    %c0_0 = arith.constant 0 : index
    %0 = vector.load %arg2[%c0, %c0_0] : memref<25x128xbf16, #tpu.memory_space<vmem>>, vector<25x128xbf16>
    %c0_1 = arith.constant 0 : index
    %c0_2 = arith.constant 0 : index
    %c0_3 = arith.constant 0 : index
    %1 = vector.load %arg1[%c0_1, %c0_2, %c0_3] : memref<4x144x25xbf16, #tpu.memory_space<vmem>>, vector<1x144x25xbf16>
    %2 = vector.shape_cast %1 : vector<1x144x25xbf16> to vector<144x25xbf16>
    %cst = arith.constant dense<0.000000e+00> : vector<144x128xf32>
    %3 = tpu.matmul %2, %0, %cst {dimension_numbers = #tpu.dot_dimension_numbers<[1], [0], [0], [1], [0, 0, 1, 1], [], []>} : vector<144x25xbf16>, vector<25x128xbf16>, vector<144x128xf32> -> vector<144x128xf32>
    %c1 = arith.constant 1 : index
    %c0_4 = arith.constant 0 : index
    %c0_5 = arith.constant 0 : index
    %4 = vector.load %arg1[%c1, %c0_4, %c0_5] : memref<4x144x25xbf16, #tpu.memory_space<vmem>>, vector<1x144x25xbf16>
    %5 = vector.shape_cast %4 : vector<1x144x25xbf16> to vector<144x25xbf16>
    %cst_6 = arith.constant dense<0.000000e+00> : vector<144x128xf32>
    %6 = tpu.matmul %5, %0, %cst_6 {dimension_numbers = #tpu.dot_dimension_numbers<[1], [0], [0], [1], [0, 0, 1, 1], [], []>} : vector<144x25xbf16>, vector<25x128xbf16>, vector<144x128xf32> -> vector<144x128xf32>
    %7 = arith.maximumf %3, %6 : vector<144x128xf32>
    %c2 = arith.constant 2 : index
    %c0_7 = arith.constant 0 : index
    %c0_8 = arith.constant 0 : index
    %8 = vector.load %arg1[%c2, %c0_7, %c0_8] : memref<4x144x25xbf16, #tpu.memory_space<vmem>>, vector<1x144x25xbf16>
    %9 = vector.shape_cast %8 : vector<1x144x25xbf16> to vector<144x25xbf16>
    %cst_9 = arith.constant dense<0.000000e+00> : vector<144x128xf32>
    %10 = tpu.matmul %9, %0, %cst_9 {dimension_numbers = #tpu.dot_dimension_numbers<[1], [0], [0], [1], [0, 0, 1, 1], [], []>} : vector<144x25xbf16>, vector<25x128xbf16>, vector<144x128xf32> -> vector<144x128xf32>
    %11 = arith.maximumf %7, %10 : vector<144x128xf32>
    %c3 = arith.constant 3 : index
    %c0_10 = arith.constant 0 : index
    %c0_11 = arith.constant 0 : index
    %12 = vector.load %arg1[%c3, %c0_10, %c0_11] : memref<4x144x25xbf16, #tpu.memory_space<vmem>>, vector<1x144x25xbf16>
    %13 = vector.shape_cast %12 : vector<1x144x25xbf16> to vector<144x25xbf16>
    %cst_12 = arith.constant dense<0.000000e+00> : vector<144x128xf32>
    %14 = tpu.matmul %13, %0, %cst_12 {dimension_numbers = #tpu.dot_dimension_numbers<[1], [0], [0], [1], [0, 0, 1, 1], [], []>} : vector<144x25xbf16>, vector<25x128xbf16>, vector<144x128xf32> -> vector<144x128xf32>
    %15 = arith.maximumf %11, %14 : vector<144x128xf32>
    %c0_13 = arith.constant 0 : index
    %c0_14 = arith.constant 0 : index
    %16 = vector.load %arg3[%c0_13, %c0_14] : memref<1x128xf32, #tpu.memory_space<vmem>>, vector<1x128xf32>
    %17 = vector.broadcast %16 : vector<1x128xf32> to vector<144x128xf32>
    %18 = arith.addf %15, %17 : vector<144x128xf32>
    %cst_15 = arith.constant 0.000000e+00 : f32
    %19 = vector.broadcast %cst_15 : f32 to vector<144x128xf32>
    %20 = arith.maximumf %18, %19 : vector<144x128xf32>
    %21 = arith.truncf %20 : vector<144x128xf32> to vector<144x128xbf16>
    %c0_16 = arith.constant 0 : index
    %c0_17 = arith.constant 0 : index
    %22 = vector.load %arg4[%c0_16, %c0_17] : memref<144x128xbf16, #tpu.memory_space<vmem>>, vector<144x128xbf16>
    tpu.vector_store %arg4[%c0_16, %c0_17], %21 {strides = array<i32>} : memref<144x128xbf16, #tpu.memory_space<vmem>>, vector<144x128xbf16>,
    return
  }
  func.func @transform_0(%arg0: i32) -> (i32, i32, i32) {
    %c0_i32 = arith.constant 0 : i32
    %c0_i32_0 = arith.constant 0 : i32
    %c0_i32_1 = arith.constant 0 : i32
    return %c0_i32, %arg0, %c0_i32_0 : i32, i32, i32
  }
  func.func @transform_1(%arg0: i32) -> (i32, i32) {
    %c0_i32 = arith.constant 0 : i32
    %c0_i32_0 = arith.constant 0 : i32
    %c0_i32_1 = arith.constant 0 : i32
    return %c0_i32, %c0_i32_0 : i32, i32
  }
  func.func @transform_2(%arg0: i32) -> (i32, i32) {
    %c0_i32 = arith.constant 0 : i32
    %c0_i32_0 = arith.constant 0 : i32
    %c0_i32_1 = arith.constant 0 : i32
    return %c0_i32, %c0_i32_0 : i32, i32
  }
  func.func @transform_3(%arg0: i32) -> (i32, i32) {
    %c0_i32 = arith.constant 0 : i32
    %c0_i32_0 = arith.constant 0 : i32
    return %arg0, %c0_i32 : i32, i32
  }
}

module attributes {stable_mosaic.version = 11 : i64} {
  func.func @_conv_relu_pool_kernel(%arg0: i32, %arg1: memref<4x16x3200xbf16, #tpu.memory_space<vmem>>, %arg2: memref<3200x128xbf16, #tpu.memory_space<vmem>>, %arg3: memref<1x128xf32, #tpu.memory_space<vmem>>, %arg4: memref<16x128xbf16, #tpu.memory_space<vmem>>) attributes {dimension_semantics = [#tpu.dimension_semantics<parallel>], iteration_bounds = array<i64: 2>, scalar_prefetch = 0 : i64, scratch_operands = 0 : i64, tpu.core_type = #tpu.core_type<tc>, window_params = [{transform_indices = @transform_0, window_bounds = array<i64: 4, 16, 3200>}, {pipeline_mode = #tpu.pipeline_mode<synchronous>, transform_indices = @transform_1, window_bounds = array<i64: 3200, 128>}, {pipeline_mode = #tpu.pipeline_mode<synchronous>, transform_indices = @transform_2, window_bounds = array<i64: 1, 128>}, {transform_indices = @transform_3, window_bounds = array<i64: 16, 128>}]} {
    %c0 = arith.constant 0 : index
    %c0_0 = arith.constant 0 : index
    %0 = vector.load %arg2[%c0, %c0_0] : memref<3200x128xbf16, #tpu.memory_space<vmem>>, vector<3200x128xbf16>
    %c0_1 = arith.constant 0 : index
    %c0_2 = arith.constant 0 : index
    %c0_3 = arith.constant 0 : index
    %1 = vector.load %arg1[%c0_1, %c0_2, %c0_3] : memref<4x16x3200xbf16, #tpu.memory_space<vmem>>, vector<1x16x3200xbf16>
    %2 = vector.shape_cast %1 : vector<1x16x3200xbf16> to vector<16x3200xbf16>
    %cst = arith.constant dense<0.000000e+00> : vector<16x128xf32>
    %3 = tpu.matmul %2, %0, %cst {dimension_numbers = #tpu.dot_dimension_numbers<[1], [0], [0], [1], [0, 0, 1, 1], [], []>} : vector<16x3200xbf16>, vector<3200x128xbf16>, vector<16x128xf32> -> vector<16x128xf32>
    %c1 = arith.constant 1 : index
    %c0_4 = arith.constant 0 : index
    %c0_5 = arith.constant 0 : index
    %4 = vector.load %arg1[%c1, %c0_4, %c0_5] : memref<4x16x3200xbf16, #tpu.memory_space<vmem>>, vector<1x16x3200xbf16>
    %5 = vector.shape_cast %4 : vector<1x16x3200xbf16> to vector<16x3200xbf16>
    %cst_6 = arith.constant dense<0.000000e+00> : vector<16x128xf32>
    %6 = tpu.matmul %5, %0, %cst_6 {dimension_numbers = #tpu.dot_dimension_numbers<[1], [0], [0], [1], [0, 0, 1, 1], [], []>} : vector<16x3200xbf16>, vector<3200x128xbf16>, vector<16x128xf32> -> vector<16x128xf32>
    %7 = arith.maximumf %3, %6 : vector<16x128xf32>
    %c2 = arith.constant 2 : index
    %c0_7 = arith.constant 0 : index
    %c0_8 = arith.constant 0 : index
    %8 = vector.load %arg1[%c2, %c0_7, %c0_8] : memref<4x16x3200xbf16, #tpu.memory_space<vmem>>, vector<1x16x3200xbf16>
    %9 = vector.shape_cast %8 : vector<1x16x3200xbf16> to vector<16x3200xbf16>
    %cst_9 = arith.constant dense<0.000000e+00> : vector<16x128xf32>
    %10 = tpu.matmul %9, %0, %cst_9 {dimension_numbers = #tpu.dot_dimension_numbers<[1], [0], [0], [1], [0, 0, 1, 1], [], []>} : vector<16x3200xbf16>, vector<3200x128xbf16>, vector<16x128xf32> -> vector<16x128xf32>
    %11 = arith.maximumf %7, %10 : vector<16x128xf32>
    %c3 = arith.constant 3 : index
    %c0_10 = arith.constant 0 : index
    %c0_11 = arith.constant 0 : index
    %12 = vector.load %arg1[%c3, %c0_10, %c0_11] : memref<4x16x3200xbf16, #tpu.memory_space<vmem>>, vector<1x16x3200xbf16>
    %13 = vector.shape_cast %12 : vector<1x16x3200xbf16> to vector<16x3200xbf16>
    %cst_12 = arith.constant dense<0.000000e+00> : vector<16x128xf32>
    %14 = tpu.matmul %13, %0, %cst_12 {dimension_numbers = #tpu.dot_dimension_numbers<[1], [0], [0], [1], [0, 0, 1, 1], [], []>} : vector<16x3200xbf16>, vector<3200x128xbf16>, vector<16x128xf32> -> vector<16x128xf32>
    %15 = arith.maximumf %11, %14 : vector<16x128xf32>
    %c0_13 = arith.constant 0 : index
    %c0_14 = arith.constant 0 : index
    %16 = vector.load %arg3[%c0_13, %c0_14] : memref<1x128xf32, #tpu.memory_space<vmem>>, vector<1x128xf32>
    %17 = vector.broadcast %16 : vector<1x128xf32> to vector<16x128xf32>
    %18 = arith.addf %15, %17 : vector<16x128xf32>
    %cst_15 = arith.constant 0.000000e+00 : f32
    %19 = vector.broadcast %cst_15 : f32 to vector<16x128xf32>
    %20 = arith.maximumf %18, %19 : vector<16x128xf32>
    %21 = arith.truncf %20 : vector<16x128xf32> to vector<16x128xbf16>
    %c0_16 = arith.constant 0 : index
    %c0_17 = arith.constant 0 : index
    %22 = vector.load %arg4[%c0_16, %c0_17] : memref<16x128xbf16, #tpu.memory_space<vmem>>, vector<16x128xbf16>
    tpu.vector_store %arg4[%c0_16, %c0_17], %21 {strides = array<i32>} : memref<16x128xbf16, #tpu.memory_space<vmem>>, vector<16x128xbf16>,
    return
  }
  func.func @transform_0(%arg0: i32) -> (i32, i32, i32) {
    %c0_i32 = arith.constant 0 : i32
    %c0_i32_0 = arith.constant 0 : i32
    %c0_i32_1 = arith.constant 0 : i32
    return %c0_i32, %arg0, %c0_i32_0 : i32, i32, i32
  }
  func.func @transform_1(%arg0: i32) -> (i32, i32) {
    %c0_i32 = arith.constant 0 : i32
    %c0_i32_0 = arith.constant 0 : i32
    %c0_i32_1 = arith.constant 0 : i32
    return %c0_i32, %c0_i32_0 : i32, i32
  }
  func.func @transform_2(%arg0: i32) -> (i32, i32) {
    %c0_i32 = arith.constant 0 : i32
    %c0_i32_0 = arith.constant 0 : i32
    %c0_i32_1 = arith.constant 0 : i32
    return %c0_i32, %c0_i32_0 : i32, i32
  }
  func.func @transform_3(%arg0: i32) -> (i32, i32) {
    %c0_i32 = arith.constant 0 : i32
    %c0_i32_0 = arith.constant 0 : i32
    return %arg0, %c0_i32 : i32, i32
  }
}

module attributes {stable_mosaic.version = 11 : i64} {
  func.func @_mlp_logsoftmax_kernel(%arg0: i32, %arg1: memref<2x2048xbf16, #tpu.memory_space<vmem>>, %arg2: memref<2048x512xbf16, #tpu.memory_space<vmem>>, %arg3: memref<1x512xf32, #tpu.memory_space<vmem>>, %arg4: memref<512x10xbf16, #tpu.memory_space<vmem>>, %arg5: memref<1x10xf32, #tpu.memory_space<vmem>>, %arg6: memref<2x10xf32, #tpu.memory_space<vmem>>) attributes {dimension_semantics = [#tpu.dimension_semantics<arbitrary>], iteration_bounds = array<i64: 1>, scalar_prefetch = 0 : i64, scratch_operands = 0 : i64, tpu.core_type = #tpu.core_type<tc>, window_params = [{pipeline_mode = #tpu.pipeline_mode<synchronous>, transform_indices = @transform_0, window_bounds = array<i64: 2, 2048>}, {pipeline_mode = #tpu.pipeline_mode<synchronous>, transform_indices = @transform_1, window_bounds = array<i64: 2048, 512>}, {pipeline_mode = #tpu.pipeline_mode<synchronous>, transform_indices = @transform_2, window_bounds = array<i64: 1, 512>}, {pipeline_mode = #tpu.pipeline_mode<synchronous>, transform_indices = @transform_3, window_bounds = array<i64: 512, 10>}, {pipeline_mode = #tpu.pipeline_mode<synchronous>, transform_indices = @transform_4, window_bounds = array<i64: 1, 10>}, {pipeline_mode = #tpu.pipeline_mode<synchronous>, transform_indices = @transform_5, window_bounds = array<i64: 2, 10>}]} {
    %c0 = arith.constant 0 : index
    %c0_0 = arith.constant 0 : index
    %0 = vector.load %arg1[%c0, %c0_0] : memref<2x2048xbf16, #tpu.memory_space<vmem>>, vector<2x2048xbf16>
    %c0_1 = arith.constant 0 : index
    %c0_2 = arith.constant 0 : index
    %1 = vector.load %arg2[%c0_1, %c0_2] : memref<2048x512xbf16, #tpu.memory_space<vmem>>, vector<2048x512xbf16>
    %cst = arith.constant dense<0.000000e+00> : vector<2x512xf32>
    %2 = tpu.matmul %0, %1, %cst {dimension_numbers = #tpu.dot_dimension_numbers<[1], [0], [0], [1], [0, 0, 1, 1], [], []>} : vector<2x2048xbf16>, vector<2048x512xbf16>, vector<2x512xf32> -> vector<2x512xf32>
    %c0_3 = arith.constant 0 : index
    %c0_4 = arith.constant 0 : index
    %3 = vector.load %arg3[%c0_3, %c0_4] : memref<1x512xf32, #tpu.memory_space<vmem>>, vector<1x512xf32>
    %4 = vector.broadcast %3 : vector<1x512xf32> to vector<2x512xf32>
    %5 = arith.addf %2, %4 : vector<2x512xf32>
    %cst_5 = arith.constant 0.000000e+00 : f32
    %6 = vector.broadcast %cst_5 : f32 to vector<2x512xf32>
    %7 = arith.maximumf %5, %6 : vector<2x512xf32>
    %8 = arith.truncf %7 : vector<2x512xf32> to vector<2x512xbf16>
    %c0_6 = arith.constant 0 : index
    %c0_7 = arith.constant 0 : index
    %9 = vector.load %arg4[%c0_6, %c0_7] : memref<512x10xbf16, #tpu.memory_space<vmem>>, vector<512x10xbf16>
    %cst_8 = arith.constant dense<0.000000e+00> : vector<2x10xf32>
    %10 = tpu.matmul %8, %9, %cst_8 {dimension_numbers = #tpu.dot_dimension_numbers<[1], [0], [0], [1], [0, 0, 1, 1], [], []>} : vector<2x512xbf16>, vector<512x10xbf16>, vector<2x10xf32> -> vector<2x10xf32>
    %c0_9 = arith.constant 0 : index
    %c0_10 = arith.constant 0 : index
    %11 = vector.load %arg5[%c0_9, %c0_10] : memref<1x10xf32, #tpu.memory_space<vmem>>, vector<1x10xf32>
    %12 = vector.broadcast %11 : vector<1x10xf32> to vector<2x10xf32>
    %13 = arith.addf %10, %12 : vector<2x10xf32>
    %cst_11 = arith.constant dense<0xFF800000> : vector<2xf32>
    %14 = vector.multi_reduction <maximumf>, %13, %cst_11 [1] : vector<2x10xf32> to vector<2xf32>
    %15 = vector.shape_cast %14 : vector<2xf32> to vector<2x1xf32>
    %16 = vector.broadcast %15 : vector<2x1xf32> to vector<2x10xf32>
    %17 = arith.subf %13, %16 : vector<2x10xf32>
    %18 = math.exp %17 : vector<2x10xf32>
    %cst_12 = arith.constant dense<0.000000e+00> : vector<2xf32>
    %19 = vector.multi_reduction <add>, %18, %cst_12 [1] : vector<2x10xf32> to vector<2xf32>
    %20 = vector.shape_cast %19 : vector<2xf32> to vector<2x1xf32>
    %21 = math.log %20 : vector<2x1xf32>
    %22 = vector.broadcast %21 : vector<2x1xf32> to vector<2x10xf32>
    %23 = arith.subf %17, %22 : vector<2x10xf32>
    %c0_13 = arith.constant 0 : index
    %c0_14 = arith.constant 0 : index
    %24 = vector.load %arg6[%c0_13, %c0_14] : memref<2x10xf32, #tpu.memory_space<vmem>>, vector<2x10xf32>
    tpu.vector_store %arg6[%c0_13, %c0_14], %23 {strides = array<i32>} : memref<2x10xf32, #tpu.memory_space<vmem>>, vector<2x10xf32>,
    return
  }
  func.func @transform_0(%arg0: i32) -> (i32, i32) {
    %c0_i32 = arith.constant 0 : i32
    %c0_i32_0 = arith.constant 0 : i32
    %c0_i32_1 = arith.constant 0 : i32
    return %c0_i32, %c0_i32_0 : i32, i32
  }
  func.func @transform_1(%arg0: i32) -> (i32, i32) {
    %c0_i32 = arith.constant 0 : i32
    %c0_i32_0 = arith.constant 0 : i32
    %c0_i32_1 = arith.constant 0 : i32
    return %c0_i32, %c0_i32_0 : i32, i32
  }
  func.func @transform_2(%arg0: i32) -> (i32, i32) {
    %c0_i32 = arith.constant 0 : i32
    %c0_i32_0 = arith.constant 0 : i32
    %c0_i32_1 = arith.constant 0 : i32
    return %c0_i32, %c0_i32_0 : i32, i32
  }
  func.func @transform_3(%arg0: i32) -> (i32, i32) {
    %c0_i32 = arith.constant 0 : i32
    %c0_i32_0 = arith.constant 0 : i32
    %c0_i32_1 = arith.constant 0 : i32
    return %c0_i32, %c0_i32_0 : i32, i32
  }
  func.func @transform_4(%arg0: i32) -> (i32, i32) {
    %c0_i32 = arith.constant 0 : i32
    %c0_i32_0 = arith.constant 0 : i32
    %c0_i32_1 = arith.constant 0 : i32
    return %c0_i32, %c0_i32_0 : i32, i32
  }
  func.func @transform_5(%arg0: i32) -> (i32, i32) {
    %c0_i32 = arith.constant 0 : i32
    %c0_i32_0 = arith.constant 0 : i32
    %c0_i32_1 = arith.constant 0 : i32
    return %c0_i32, %c0_i32_0 : i32, i32
  }
}

</mosaic_0001>

<bundles_post_ra>
// kernel: net_forward.3
= control target key start
LH: loop header
LB: loop body
LE: loop exit
PB: predicated region body
PF: predicated region fallthrough
CT: control target
= control target key end

     0   :  { %s2103_s12 = smov 0   ;;  %s2105_s13 = smov 0   ;;  %s2587_s0 = inlined_call_operand.vmem [shape: bf16[4,288,25], index: 0, kind: input, shape index: {}]   ;;  %s2588_s1 = inlined_call_operand.vmem [shape: bf16[25,128], index: 1, kind: input, shape index: {}]   ;;  %s2589_s2 = inlined_call_operand.vmem [shape: f32[1,128], index: 2, kind: input, shape index: {}]   ;;  %s2590_s3 = inlined_call_operand.vmem [shape: bf16[288,128], index: 3, kind: output, shape index: {}]  }
   0x1   :  { %s2107_s14 = smov 0  }
   0x2 LB: > { %s1557_s15 = sadd.s32 4294967295, %s2078_s14   ;;  %s2120_s16 = sadd.s32 1, %s2078_s14   ;;  %s2078_s14 = sphi %s2107_s14, %s2596_s14   ;;  %s2074_s13 = sphi %s2105_s13, %s2595_s13   ;;  %s2070_s12 = sphi %s2103_s12, %s2594_s12  }
   0x3   : > { %s17_s17 = ssub.s32 %s2078_s14, %s2120_s16  ;;  %s20_s18 = sadd.s32 1, %s2074_s13 }
   0x4   : > { %p18_p0 = scmp.eq.s32.totalorder %s17_s17, 0  ;;  %p27_p1 = scmp.ne.s32.totalorder %s2074_s13, %s2070_s12 }
   0x5   : > { %p28_p2 = scmp.eq.s32.totalorder %s2078_s14, 0  ;;  %p1560_p4 = scmp.ge.s32.totalorder %s2078_s14, 2 }
   0x6   : > { %s2129_s19 = scalar_select %p18_p0, %s2074_s13, %s20_s18  }
   0x7   : > { %p29_p3 = por %p28_p2, %p27_p1  ;;  %127 = sbr.rel (%p1560_p4) target bundleno = 35 (0x23), region = 24 }
   0xc   : > { %130 = sbr.rel (!%p29_p3) target bundleno = 35 (0x23), region = 28  ;;  %s132_s20 = sand.u32 (%p29_p3), 1, %s2074_s13  }
   0xd   : > { %s1713_s21 = smul.u32 (%p29_p3), 72, %s2078_s14 }
   0xe   : > { %s1989_s22 = smul.u32 (%p29_p3), 288, %s132_s20 }
   0xf   : > { %s2137_s25 = scalar_lea.vmem (%p29_p3), %s2587_s0, %s1713_s21 }
  0x10   : > { %v154_v0 = vld [vmem:[%s2137_s25] sm:$0xff] (%p29_p3)   ;;  %v158_v1 = vld [vmem:[%s2137_s25 + $0x8] sm:$0xff] (%p29_p3)   ;;  %v162_v2 = vld [vmem:[%s2137_s25 + $0x10] sm:$0xff] (%p29_p3)   ;;  %s2142_s26 = scalar_lea.vmem (%p29_p3), [#allocation2], %s1989_s22 }
  0x11   : > { %155 = vst [vmem:[%s2142_s26] sm:$0xff] %v154_v0   ;;  %159 = vst [vmem:[%s2142_s26 + $0x8] sm:$0xff] %v158_v1   ;;  %v166_v3 = vld [vmem:[%s2137_s25 + $0x18] sm:$0xff]   ;;  %v170_v4 = vld [vmem:[%s2137_s25 + $0x20] sm:$0xff]  }
  0x12   : > { %163 = vst [vmem:[%s2142_s26 + $0x10] sm:$0xff] %v162_v2   ;;  %v174_v5 = vld [vmem:[%s2137_s25 + $0x28] sm:$0xff]   ;;  %167 = vst [vmem:[%s2142_s26 + $0x18] sm:$0xff] %v166_v3   ;;  %v178_v6 = vld [vmem:[%s2137_s25 + $0x30] sm:$0xff]  }
  0x13   : > { %171 = vst [vmem:[%s2142_s26 + $0x20] sm:$0xff] %v170_v4   ;;  %175 = vst [vmem:[%s2142_s26 + $0x28] sm:$0xff] %v174_v5   ;;  %v182_v7 = vld [vmem:[%s2137_s25 + $0x38] sm:$0xff]   ;;  %v186_v8 = vld [vmem:[%s2137_s25 + $0x40] sm:$0xff]  }
  0x14   : > { %179 = vst [vmem:[%s2142_s26 + $0x30] sm:$0xff] %v178_v6   ;;  %183 = vst [vmem:[%s2142_s26 + $0x38] sm:$0xff] %v182_v7   ;;  %v190_v9 = vld [vmem:[%s2137_s25 + $0x90] sm:$0xff]   ;;  %v194_v10 = vld [vmem:[%s2137_s25 + $0x98] sm:$0xff]  }
  0x15   : > { %187 = vst [vmem:[%s2142_s26 + $0x40] sm:$0xff] %v186_v8   ;;  %v198_v11 = vld [vmem:[%s2137_s25 + $0xa0] sm:$0xff]   ;;  %191 = vst [vmem:[%s2142_s26 + $0x48] sm:$0xff] %v190_v9   ;;  %v202_v12 = vld [vmem:[%s2137_s25 + $0xa8] sm:$0xff]  }
  0x16   : > { %195 = vst [vmem:[%s2142_s26 + $0x50] sm:$0xff] %v194_v10   ;;  %199 = vst [vmem:[%s2142_s26 + $0x58] sm:$0xff] %v198_v11   ;;  %v206_v13 = vld [vmem:[%s2137_s25 + $0xb0] sm:$0xff]   ;;  %v210_v14 = vld [vmem:[%s2137_s25 + $0xb8] sm:$0xff]  }
  0x17   : > { %203 = vst [vmem:[%s2142_s26 + $0x60] sm:$0xff] %v202_v12   ;;  %207 = vst [vmem:[%s2142_s26 + $0x68] sm:$0xff] %v206_v13   ;;  %v214_v15 = vld [vmem:[%s2137_s25 + $0xc0] sm:$0xff]   ;;  %v218_v16 = vld [vmem:[%s2137_s25 + $0xc8] sm:$0xff]  }
  0x18   : > { %211 = vst [vmem:[%s2142_s26 + $0x70] sm:$0xff] %v210_v14   ;;  %v222_v17 = vld [vmem:[%s2137_s25 + $0xd0] sm:$0xff]   ;;  %215 = vst [vmem:[%s2142_s26 + $0x78] sm:$0xff] %v214_v15   ;;  %v226_v18 = vld [vmem:[%s2137_s25 + $0x120] sm:$0xff]  }
  0x19   : > { %219 = vst [vmem:[%s2142_s26 + $0x80] sm:$0xff] %v218_v16   ;;  %223 = vst [vmem:[%s2142_s26 + $0x88] sm:$0xff] %v222_v17   ;;  %v230_v19 = vld [vmem:[%s2137_s25 + $0x128] sm:$0xff]   ;;  %v234_v20 = vld [vmem:[%s2137_s25 + $0x130] sm:$0xff]  }
  0x1a   : > { %227 = vst [vmem:[%s2142_s26 + $0x90] sm:$0xff] %v226_v18   ;;  %231 = vst [vmem:[%s2142_s26 + $0x98] sm:$0xff] %v230_v19   ;;  %v238_v21 = vld [vmem:[%s2137_s25 + $0x138] sm:$0xff]   ;;  %v242_v22 = vld [vmem:[%s2137_s25 + $0x140] sm:$0xff]  }
  0x1b   : > { %235 = vst [vmem:[%s2142_s26 + $0xa0] sm:$0xff] %v234_v20   ;;  %v246_v23 = vld [vmem:[%s2137_s25 + $0x148] sm:$0xff]   ;;  %239 = vst [vmem:[%s2142_s26 + $0xa8] sm:$0xff] %v238_v21   ;;  %v250_v24 = vld [vmem:[%s2137_s25 + $0x150] sm:$0xff]  }
  0x1c   : > { %243 = vst [vmem:[%s2142_s26 + $0xb0] sm:$0xff] %v242_v22   ;;  %247 = vst [vmem:[%s2142_s26 + $0xb8] sm:$0xff] %v246_v23   ;;  %v254_v25 = vld [vmem:[%s2137_s25 + $0x158] sm:$0xff]   ;;  %v258_v26 = vld [vmem:[%s2137_s25 + $0x160] sm:$0xff]  }
  0x1d   : > { %251 = vst [vmem:[%s2142_s26 + $0xc0] sm:$0xff] %v250_v24   ;;  %255 = vst [vmem:[%s2142_s26 + $0xc8] sm:$0xff] %v254_v25   ;;  %v262_v27 = vld [vmem:[%s2137_s25 + $0x1b0] sm:$0xff]   ;;  %v266_v28 = vld [vmem:[%s2137_s25 + $0x1b8] sm:$0xff]  }
  0x1e   : > { %259 = vst [vmem:[%s2142_s26 + $0xd0] sm:$0xff] %v258_v26   ;;  %v270_v29 = vld [vmem:[%s2137_s25 + $0x1c0] sm:$0xff]   ;;  %263 = vst [vmem:[%s2142_s26 + $0xd8] sm:$0xff] %v262_v27   ;;  %v274_v30 = vld [vmem:[%s2137_s25 + $0x1c8] sm:$0xff]  }
  0x1f   : > { %267 = vst [vmem:[%s2142_s26 + $0xe0] sm:$0xff] %v266_v28   ;;  %271 = vst [vmem:[%s2142_s26 + $0xe8] sm:$0xff] %v270_v29   ;;  %v278_v31 = vld [vmem:[%s2137_s25 + $0x1d0] sm:$0xff]   ;;  %v282_v32 = vld [vmem:[%s2137_s25 + $0x1d8] sm:$0xff]  }
  0x20   : > { %275 = vst [vmem:[%s2142_s26 + $0xf0] sm:$0xff] %v274_v30   ;;  %279 = vst [vmem:[%s2142_s26 + $0xf8] sm:$0xff] %v278_v31   ;;  %v286_v33 = vld [vmem:[%s2137_s25 + $0x1e0] sm:$0xff]   ;;  %v290_v34 = vld [vmem:[%s2137_s25 + $0x1e8] sm:$0xff]  }
  0x21   : > { %283 = vst [vmem:[%s2142_s26 + $0x100] sm:$0xff] %v282_v32   ;;  %v294_v35 = vld [vmem:[%s2137_s25 + $0x1f0] sm:$0xff]   ;;  %287 = vst [vmem:[%s2142_s26 + $0x108] sm:$0xff] %v286_v33  }
  0x22   : > { %291 = vst [vmem:[%s2142_s26 + $0x110] sm:$0xff] %v290_v34   ;;  %295 = vst [vmem:[%s2142_s26 + $0x118] sm:$0xff] %v294_v35  }
  0x23 PF: > { %p1562_p5 = scmp.ge.s32.totalorder %s2078_s14, 1  ;;  %p464_p6 = scmp.lt.s32.totalorder %s2078_s14, 3 }
  0x25   : > { %p465_p7 = pnand %p1562_p5, %p464_p6 }
  0x26   : > { %s471_s29 = sand.u32 (!%p465_p7), 1, %s2070_s12   ;;  %s495_s7 = smul.u32 (!%p465_p7), 18, %s1557_s15 }
  0x27   : > { %468 = sbr.rel (%p465_p7) target bundleno = 400 (0x190), region = 69 }
  0x28   : > { %s1990_s30 = smul.u32 (!%p465_p7), 288, %s471_s29  ;;  %p496_p8 = scmp.lt.s32.totalorder (!%p465_p7), %s495_s7, 35 }
  0x2a   : > { %s2228_s6 = scalar_lea.vmem (!%p465_p7), [#allocation2], %s1990_s30 }
  0x2c   : > { %vm608_vm0 = vcmask 1043456   ;;  %v2080_v36 = vmov 0.0   ;;  %v2018_v37 = vld [vmem:[%s2588_s1 + $0x8] sm:$0x1f]   ;;  %vm609_vm1 = vcmask 1044480   ;;  %v2081_v38 = vmov 65535  }
  0x2d   : > { %1829 = vmatprep.subr.bf16.mxu0 %v2080_v36  ;;  %1869 = vmatprep.subr.bf16.mxu1 %v2080_v36  ;;  %v610_v39 = vsel %vm608_vm0, 4294967295, %v2081_v38  ;;  %vm2082_vm2 = vmmov 0   ;;  %v2019_v42 = vld [vmem:[%s2588_s1] sm:$0xff]   ;;  %v2021_v44 = vld [vmem:[%s2228_s6 + $0x48] sm:$0xff]   ;;  %vm580_vm3 = vcmask 203776   ;;  %v2023_v46 = vld [vmem:[%s2228_s6 + $0x50] sm:$0xff]  }
  0x2e   : > { %v611_v40 = vsel %vm609_vm1, %v610_v39, 0  ;;  %1833 = vmatprep.mubr.msk.bf16.mxu0 %vm2082_vm2, %v2080_v36  ;;  %1873 = vmatprep.mubr.msk.bf16.mxu1 %vm2082_vm2, %v2080_v36  ;;  %v2020_v43 = vld [vmem:[%s2228_s6] sm:$0xff]   ;;  %v2022_v45 = vld [vmem:[%s2228_s6 + $0x8] sm:$0xff]   ;;  %v2024_v47 = vld [vmem:[%s2228_s6 + $0x10] sm:$0xff]   ;;  %s2598_s7 = smov (!%p496_p8, %s495_s7), 35 }
  0x2f   : > { %v613_v41 = vand.u32 %v2018_v37, %v611_v40  ;;  %v2025_v48 = vld [vmem:[%s2228_s6 + $0x58] sm:$0xff]   ;;  %v2027_v50 = vld [vmem:[%s2228_s6 + $0x60] sm:$0xff]   ;;  %v2029_v52 = vld [vmem:[%s2228_s6 + $0x68] sm:$0xff]   ;;  %s1563_s10 = sshll.u32 %s2598_s7, 2 }
  0x30   : > { %v2026_v49 = vld [vmem:[%s2228_s6 + $0x18] sm:$0xff]   ;;  %v2028_v51 = vld [vmem:[%s2228_s6 + $0x20] sm:$0xff]   ;;  %v2030_v53 = vld [vmem:[%s2228_s6 + $0x28] sm:$0xff]   ;;  %s2505_s14 = scalar_lea.vmem %s2590_s3, %s1563_s10 }
  0x31   : > { %1830 = vmatpush3.bf16.msra.mxu0 %v613_v41  ;;  %1870 = vmatpush3.bf16.msra.mxu1 %v613_v41  ;;  %v2031_v54 = vld [vmem:[%s2228_s6 + $0x70] sm:$0xff]   ;;  %v2033_v56 = vld [vmem:[%s2228_s6 + $0x78] sm:$0xff]   ;;  %v2035_v58 = vld [vmem:[%s2228_s6 + $0x80] sm:$0xff]  }
  0x32   : > { %1831 = vmatprep.subr.bf16.mxu0 %v2080_v36  ;;  %1871 = vmatprep.subr.bf16.mxu1 %v2080_v36  ;;  %v2032_v55 = vld [vmem:[%s2228_s6 + $0x30] sm:$0xff]   ;;  %v2034_v57 = vld [vmem:[%s2228_s6 + $0x38] sm:$0xff]   ;;  %v2036_v59 = vld [vmem:[%s2228_s6 + $0x40] sm:$0xff]  }
  0x33   : > { %v2037_v60 = vld [vmem:[%s2228_s6 + $0x88] sm:$0xff]   ;;  %v2038_v61 = vld [vmem:[%s2228_s6 + $0x90] sm:$0xff]   ;;  %v2039_v62 = vld [vmem:[%s2228_s6 + $0xd8] sm:$0xff]  }
  0x34   : > { %v2040_v63 = vld [vmem:[%s2228_s6 + $0x98] sm:$0xff]   ;;  %v2041_v0 = vld [vmem:[%s2228_s6 + $0xe0] sm:$0xff]   ;;  %v2043_v2 = vld [vmem:[%s2228_s6 + $0xe8] sm:$0xff]  }
  0x35   : > { %1832 = vmatpush3.bf16.msra.mxu0 %v2019_v42  ;;  %1872 = vmatpush3.bf16.msra.mxu1 %v2019_v42  ;;  %v2042_v1 = vld [vmem:[%s2228_s6 + $0xa0] sm:$0xff]   ;;  %v2044_v3 = vld [vmem:[%s2228_s6 + $0xa8] sm:$0xff]   ;;  %v2045_v4 = vld [vmem:[%s2228_s6 + $0xf0] sm:$0xff]  }
  0x36   : > { %1909 = vmatprep.subr.bf16.mxu0 %v2080_v36  ;;  %1949 = vmatprep.subr.bf16.mxu1 %v2080_v36  ;;  %v2046_v5 = vld [vmem:[%s2228_s6 + $0xb0] sm:$0xff]   ;;  %v2047_v6 = vld [vmem:[%s2228_s6 + $0xf8] sm:$0xff]   ;;  %v2049_v8 = vld [vmem:[%s2228_s6 + $0x100] sm:$0xff]  }
  0x37   : > { %v2048_v7 = vld [vmem:[%s2228_s6 + $0xb8] sm:$0xff]   ;;  %v2050_v9 = vld [vmem:[%s2228_s6 + $0xc0] sm:$0xff]   ;;  %v2051_v10 = vld [vmem:[%s2228_s6 + $0x108] sm:$0xff]  }
  0x38   : > { %1834 = vmatmul.mubr.msk.bf16.vlgmr.msra.gmra.mxu0 %vm580_vm3, %v2020_v43  ;;  %1874 = vmatmul.mubr.msk.bf16.vlgmr.msra.gmra.mxu1 %vm580_vm3, %v2021_v44  ;;  %v2052_v11 = vld [vmem:[%s2228_s6 + $0xc8] sm:$0xff]   ;;  %v2053_v12 = vld [vmem:[%s2228_s6 + $0x110] sm:$0xff]   ;;  %v2055_v14 = vld [vmem:[%s2228_s6 + $0x118] sm:$0xff]  }
  0x39   : > { %1910 = vmatpush3.bf16.msra.mxu0 %v613_v41  ;;  %1950 = vmatpush3.bf16.msra.mxu1 %v613_v41  ;;  %v2054_v13 = vld [vmem:[%s2228_s6 + $0xd0] sm:$0xff]  }
  0x3a   : > { %1837 = vmatprep.mubr.msk.bf16.mxu0 %vm2082_vm2, %v2080_v36  ;;  %1877 = vmatprep.mubr.msk.bf16.mxu1 %vm2082_vm2, %v2080_v36 }
  0x3b   : > { %1911 = vmatprep.subr.bf16.mxu0 %v2080_v36  ;;  %1951 = vmatprep.subr.bf16.mxu1 %v2080_v36 }
  0x3d   : > { %1912 = vmatpush3.bf16.msra.mxu0 %v2019_v42  ;;  %1952 = vmatpush3.bf16.msra.mxu1 %v2019_v42 }
  0x40   : > { %1838 = vmatmul.mubr.msk.bf16.gmra.mxu0 %vm580_vm3, %v2022_v45  ;;  %1878 = vmatmul.mubr.msk.bf16.gmra.mxu1 %vm580_vm3, %v2023_v46 }
  0x41   : > { %1841 = vmatprep.mubr.msk.bf16.mxu0 %vm2082_vm2, %v2080_v36  ;;  %1881 = vmatprep.mubr.msk.bf16.mxu1 %vm2082_vm2, %v2080_v36 }
  0x48   : > { %1842 = vmatmul.mubr.msk.bf16.gmra.mxu0 %vm580_vm3, %v2024_v47  ;;  %1882 = vmatmul.mubr.msk.bf16.gmra.mxu1 %vm580_vm3, %v2025_v48 }
  0x49   : > { %1845 = vmatprep.mubr.msk.bf16.mxu0 %vm2082_vm2, %v2080_v36  ;;  %1885 = vmatprep.mubr.msk.bf16.mxu1 %vm2082_vm2, %v2080_v36 }
  0x50   : > { %1846 = vmatmul.mubr.msk.bf16.gmra.mxu0 %vm580_vm3, %v2026_v49  ;;  %1886 = vmatmul.mubr.msk.bf16.gmra.mxu1 %vm580_vm3, %v2027_v50 }
  0x51   : > { %1849 = vmatprep.mubr.msk.bf16.mxu0 %vm2082_vm2, %v2080_v36  ;;  %1889 = vmatprep.mubr.msk.bf16.mxu1 %vm2082_vm2, %v2080_v36 }
  0x58   : > { %1850 = vmatmul.mubr.msk.bf16.gmra.mxu0 %vm580_vm3, %v2028_v51  ;;  %1890 = vmatmul.mubr.msk.bf16.gmra.mxu1 %vm580_vm3, %v2029_v52 }
  0x59   : > { %1853 = vmatprep.mubr.msk.bf16.mxu0 %vm2082_vm2, %v2080_v36  ;;  %1893 = vmatprep.mubr.msk.bf16.mxu1 %vm2082_vm2, %v2080_v36 }
  0x60   : > { %1854 = vmatmul.mubr.msk.bf16.gmra.mxu0 %vm580_vm3, %v2030_v53  ;;  %1894 = vmatmul.mubr.msk.bf16.gmra.mxu1 %vm580_vm3, %v2031_v54 }
  0x61   : > { %1857 = vmatprep.mubr.msk.bf16.mxu0 %vm2082_vm2, %v2080_v36  ;;  %1897 = vmatprep.mubr.msk.bf16.mxu1 %vm2082_vm2, %v2080_v36 }
  0x68   : > { %1858 = vmatmul.mubr.msk.bf16.gmra.mxu0 %vm580_vm3, %v2032_v55  ;;  %1898 = vmatmul.mubr.msk.bf16.gmra.mxu1 %vm580_vm3, %v2033_v56 }
  0x69   : > { %1861 = vmatprep.mubr.msk.bf16.mxu0 %vm2082_vm2, %v2080_v36  ;;  %1901 = vmatprep.mubr.msk.bf16.mxu1 %vm2082_vm2, %v2080_v36 }
  0x70   : > { %1862 = vmatmul.mubr.msk.bf16.gmra.mxu0 %vm580_vm3, %v2034_v57  ;;  %1902 = vmatmul.mubr.msk.bf16.gmra.mxu1 %vm580_vm3, %v2035_v58 }
  0x71   : > { %1865 = vmatprep.mubr.msk.bf16.mxu0 %vm2082_vm2, %v2080_v36  ;;  %1905 = vmatprep.mubr.msk.bf16.mxu1 %vm2082_vm2, %v2080_v36 }
  0x78   : > { %1866 = vmatmul.mubr.msk.bf16.gmra.mxu0 %vm580_vm3, %v2036_v59  ;;  %1906 = vmatmul.mubr.msk.bf16.gmra.mxu1 %vm580_vm3, %v2037_v60 }
  0x79   : > { %1913 = vmatprep.mubr.msk.bf16.mxu0 %vm2082_vm2, %v2080_v36  ;;  %1953 = vmatprep.mubr.msk.bf16.mxu1 %vm2082_vm2, %v2080_v36 }
  0x80   : > { %1914 = vmatmul.mubr.msk.bf16.vlgmr.msra.gmra.mxu0 %vm580_vm3, %v2038_v61  ;;  %1954 = vmatmul.mubr.msk.bf16.vlgmr.msra.gmra.mxu1 %vm580_vm3, %v2039_v62 }
  0x81   : > { %1917 = vmatprep.mubr.msk.bf16.mxu0 %vm2082_vm2, %v2080_v36  ;;  %1957 = vmatprep.mubr.msk.bf16.mxu1 %vm2082_vm2, %v2080_v36 }
  0x88   : > { %1918 = vmatmul.mubr.msk.bf16.gmra.mxu0 %vm580_vm3, %v2040_v63  ;;  %1958 = vmatmul.mubr.msk.bf16.gmra.mxu1 %vm580_vm3, %v2041_v0 }
  0x89   : > { %1921 = vmatprep.mubr.msk.bf16.mxu0 %vm2082_vm2, %v2080_v36  ;;  %1961 = vmatprep.mubr.msk.bf16.mxu1 %vm2082_vm2, %v2080_v36 }
  0x90   : > { %1922 = vmatmul.mubr.msk.bf16.gmra.mxu0 %vm580_vm3, %v2042_v1  ;;  %1962 = vmatmul.mubr.msk.bf16.gmra.mxu1 %vm580_vm3, %v2043_v2 }
  0x91   : > { %1925 = vmatprep.mubr.msk.bf16.mxu0 %vm2082_vm2, %v2080_v36  ;;  %1965 = vmatprep.mubr.msk.bf16.mxu1 %vm2082_vm2, %v2080_v36 }
  0x98   : > { %1926 = vmatmul.mubr.msk.bf16.gmra.mxu0 %vm580_vm3, %v2044_v3  ;;  %1966 = vmatmul.mubr.msk.bf16.gmra.mxu1 %vm580_vm3, %v2045_v4 }
  0x99   : > { %1929 = vmatprep.mubr.msk.bf16.mxu0 %vm2082_vm2, %v2080_v36  ;;  %1969 = vmatprep.mubr.msk.bf16.mxu1 %vm2082_vm2, %v2080_v36 }
  0xa0   : > { %1930 = vmatmul.mubr.msk.bf16.gmra.mxu0 %vm580_vm3, %v2046_v5  ;;  %1970 = vmatmul.mubr.msk.bf16.gmra.mxu1 %vm580_vm3, %v2047_v6 }
  0xa1   : > { %1933 = vmatprep.mubr.msk.bf16.mxu0 %vm2082_vm2, %v2080_v36  ;;  %1973 = vmatprep.mubr.msk.bf16.mxu1 %vm2082_vm2, %v2080_v36 }
  0xa8   : > { %1934 = vmatmul.mubr.msk.bf16.gmra.mxu0 %vm580_vm3, %v2048_v7  ;;  %1974 = vmatmul.mubr.msk.bf16.gmra.mxu1 %vm580_vm3, %v2049_v8 }
  0xa9   : > { %1937 = vmatprep.mubr.msk.bf16.mxu0 %vm2082_vm2, %v2080_v36  ;;  %1977 = vmatprep.mubr.msk.bf16.mxu1 %vm2082_vm2, %v2080_v36 }
  0xb0   : > { %1938 = vmatmul.mubr.msk.bf16.gmra.mxu0 %vm580_vm3, %v2050_v9  ;;  %1978 = vmatmul.mubr.msk.bf16.gmra.mxu1 %vm580_vm3, %v2051_v10 }
  0xb1   : > { %1941 = vmatprep.mubr.msk.bf16.mxu0 %vm2082_vm2, %v2080_v36  ;;  %1981 = vmatprep.mubr.msk.bf16.mxu1 %vm2082_vm2, %v2080_v36 }
  0xb8   : > { %1942 = vmatmul.mubr.msk.bf16.gmra.mxu0 %vm580_vm3, %v2052_v11  ;;  %1982 = vmatmul.mubr.msk.bf16.gmra.mxu1 %vm580_vm3, %v2053_v12 }
  0xb9   : > { %1945 = vmatprep.mubr.msk.bf16.mxu0 %vm2082_vm2, %v2080_v36  ;;  %1985 = vmatprep.mubr.msk.bf16.mxu1 %vm2082_vm2, %v2080_v36 }
  0xc0   : > { %1946 = vmatmul.mubr.msk.bf16.gmra.mxu0 %vm580_vm3, %v2054_v13  ;;  %1986 = vmatmul.mubr.msk.bf16.gmra.mxu1 %vm580_vm3, %v2055_v14 }
  0xf8   : > { %v2376_v15 = vpop.f32.mrf.mxu0  ;;  %v2378_v16 = vpop.f32.mrf.mxu1 }
  0xf9   : > { %v916_v17 = vmax.f32 %v2376_v15, %v2378_v16 }
  0xfa   : > { %v1835_v18 = vpop.f32.mrf.mxu0  ;;  %v1875_v19 = vpop.f32.mrf.mxu1 }
  0xfc   : > { %v2382_v20 = vpop.f32.mrf.mxu0  ;;  %v2384_v21 = vpop.f32.mrf.mxu1 }
  0xfd   : > { %v917_v22 = vmax.f32 %v2382_v20, %v2384_v21 }
  0xfe   : > { %v1836_v23 = vpop.f32.mrf.mxu0  ;;  %v1876_v24 = vpop.f32.mrf.mxu1 }
 0x100   : > { %v2388_v25 = vpop.f32.mrf.mxu0  ;;  %v2390_v26 = vpop.f32.mrf.mxu1 }
 0x101   : > { %v918_v27 = vmax.f32 %v2388_v25, %v2390_v26 }
 0x102   : > { %v1839_v28 = vpop.f32.mrf.mxu0  ;;  %v1879_v29 = vpop.f32.mrf.mxu1 }
 0x104   : > { %v2394_v30 = vpop.f32.mrf.mxu0  ;;  %v2396_v31 = vpop.f32.mrf.mxu1 }
 0x105   : > { %v919_v32 = vmax.f32 %v2394_v30, %v2396_v31 }
 0x106   : > { %v1840_v33 = vpop.f32.mrf.mxu0  ;;  %v1880_v34 = vpop.f32.mrf.mxu1 }
 0x108   : > { %v2400_v35 = vpop.f32.mrf.mxu0  ;;  %v2402_v36 = vpop.f32.mrf.mxu1 }
 0x109   : > { %v920_v37 = vmax.f32 %v2400_v35, %v2402_v36 }
 0x10a   : > { %v1843_v38 = vpop.f32.mrf.mxu0  ;;  %v1883_v39 = vpop.f32.mrf.mxu1 }
 0x10c   : > { %v2406_v40 = vpop.f32.mrf.mxu0  ;;  %v2408_v41 = vpop.f32.mrf.mxu1 }
 0x10d   : > { %v921_v42 = vmax.f32 %v2406_v40, %v2408_v41 }
 0x10e   : > { %v1844_v43 = vpop.f32.mrf.mxu0  ;;  %v1884_v44 = vpop.f32.mrf.mxu1 }
 0x110   : > { %v2412_v45 = vpop.f32.mrf.mxu0  ;;  %v2414_v46 = vpop.f32.mrf.mxu1 }
 0x111   : > { %v922_v47 = vmax.f32 %v2412_v45, %v2414_v46 }
 0x112   : > { %v1847_v48 = vpop.f32.mrf.mxu0  ;;  %v1887_v49 = vpop.f32.mrf.mxu1 }
 0x114   : > { %v2418_v50 = vpop.f32.mrf.mxu0  ;;  %v2420_v51 = vpop.f32.mrf.mxu1 }
 0x115   : > { %v923_v52 = vmax.f32 %v2418_v50, %v2420_v51 }
 0x116   : > { %v1848_v53 = vpop.f32.mrf.mxu0  ;;  %v1888_v54 = vpop.f32.mrf.mxu1 }
 0x118   : > { %v2424_v55 = vpop.f32.mrf.mxu0  ;;  %v2426_v56 = vpop.f32.mrf.mxu1 }
 0x119   : > { %v924_v57 = vmax.f32 %v2424_v55, %v2426_v56 }
 0x11a   : > { %v1851_v58 = vpop.f32.mrf.mxu0  ;;  %v1891_v59 = vpop.f32.mrf.mxu1 }
 0x11c   : > { %v2430_v60 = vpop.f32.mrf.mxu0  ;;  %v2432_v61 = vpop.f32.mrf.mxu1 }
 0x11d   : > { %v925_v62 = vmax.f32 %v2430_v60, %v2432_v61 }
 0x11e   : > { %v1852_v63 = vpop.f32.mrf.mxu0  ;;  %v1892_v0 = vpop.f32.mrf.mxu1 }
 0x120   : > { %v2436_v1 = vpop.f32.mrf.mxu0  ;;  %v2438_v2 = vpop.f32.mrf.mxu1 }
 0x121   : > { %v926_v3 = vmax.f32 %v2436_v1, %v2438_v2 }
 0x122   : > { %v1855_v4 = vpop.f32.mrf.mxu0  ;;  %v1895_v5 = vpop.f32.mrf.mxu1 }
 0x124   : > { %v2442_v6 = vpop.f32.mrf.mxu0  ;;  %v2444_v7 = vpop.f32.mrf.mxu1 }
 0x125   : > { %v927_v8 = vmax.f32 %v2442_v6, %v2444_v7 }
 0x126   : > { %v1856_v9 = vpop.f32.mrf.mxu0  ;;  %v1896_v10 = vpop.f32.mrf.mxu1 }
 0x128   : > { %v2448_v11 = vpop.f32.mrf.mxu0  ;;  %v2450_v12 = vpop.f32.mrf.mxu1 }
 0x129   : > { %v928_v13 = vmax.f32 %v2448_v11, %v2450_v12 }
 0x12a   : > { %v1859_v14 = vpop.f32.mrf.mxu0  ;;  %v1899_v18 = vpop.f32.mrf.mxu1 }
 0x12c   : > { %v2454_v19 = vpop.f32.mrf.mxu0  ;;  %v2456_v23 = vpop.f32.mrf.mxu1 }
 0x12d   : > { %v929_v24 = vmax.f32 %v2454_v19, %v2456_v23 }
 0x12e   : > { %v1860_v28 = vpop.f32.mrf.mxu0  ;;  %v1900_v29 = vpop.f32.mrf.mxu1 }
 0x130   : > { %v2460_v33 = vpop.f32.mrf.mxu0  ;;  %v2462_v34 = vpop.f32.mrf.mxu1 }
 0x131   : > { %v930_v38 = vmax.f32 %v2460_v33, %v2462_v34 }
 0x132   : > { %v1863_v39 = vpop.f32.mrf.mxu0  ;;  %v1903_v43 = vpop.f32.mrf.mxu1 }
 0x134   : > { %v2466_v44 = vpop.f32.mrf.mxu0  ;;  %v2468_v48 = vpop.f32.mrf.mxu1 }
 0x136   : > { %v1864_v53 = vpop.f32.mrf.mxu0  ;;  %v1904_v54 = vpop.f32.mrf.mxu1 }
 0x138   : > { %v2472_v58 = vpop.f32.mrf.mxu0  ;;  %v2474_v59 = vpop.f32.mrf.mxu1 }
 0x13a   : > { %v1867_v0 = vpop.f32.mrf.mxu0  ;;  %v1907_v4 = vpop.f32.mrf.mxu1 }
 0x13b   : > { %v2492_v0 = vld [vmem:[%s2589_s2] ss:$0 sm:$0xff] }
 0x13c   : > { %v2478_v5 = vpop.f32.mrf.mxu0  ;;  %v2480_v9 = vpop.f32.mrf.mxu1 }
 0x13e   : > { %v1868_v14 = vpop.f32.mrf.mxu0  ;;  %v1908_v18 = vpop.f32.mrf.mxu1 }
 0x140   : > { %v1059_v28 = vpop.f32.mrf.mxu0  ;;  %v1273_v29 = vpop.f32.mrf.mxu1 }
 0x141   : > { %v1130_v39 = vmax.f32 %v916_v17, %v1059_v28 }
 0x142   : > { %v1915_v43 = vpop.f32.mrf.mxu0  ;;  %v1955_v53 = vpop.f32.mrf.mxu1 }
 0x143   : > { %v1344_v54 = vmax.f32 %v1130_v39, %v1273_v29 }
 0x144   : > { %v1062_v4 = vpop.f32.mrf.mxu0  ;;  %v1276_v10 = vpop.f32.mrf.mxu1 }
 0x145   : > { %v1131_v14 = vmax.f32 %v917_v22, %v1062_v4  ;;  %v1369_v15 = vadd.f32 %v2492_v0, %v1344_v54 }
 0x146   : > { %v1916_v18 = vpop.f32.mrf.mxu0  ;;  %v1956_v63 = vpop.f32.mrf.mxu1 }
 0x147   : > { %v1345_v16 = vmax.f32 %v1131_v14, %v1276_v10  ;;  %v1387_v49 = vmax.f32 %v1369_v15, 0.0 }
 0x148   : > { %v1067_v17 = vpop.f32.mrf.mxu0  ;;  %v1281_v28 = vpop.f32.mrf.mxu1 }
 0x149   : > { %v1370_v29 = vadd.f32 %v2492_v0, %v1345_v16  ;;  %v1132_v39 = vmax.f32 %v918_v27, %v1067_v17 }
 0x14a   : > { %v1919_v43 = vpop.f32.mrf.mxu0  ;;  %v1959_v53 = vpop.f32.mrf.mxu1 }
 0x14b   : > { %v1388_v20 = vmax.f32 %v1370_v29, 0.0  ;;  %v1346_v21 = vmax.f32 %v1132_v39, %v1281_v28 }
 0x14c   : > { %v1070_v22 = vpop.f32.mrf.mxu0  ;;  %v1284_v63 = vpop.f32.mrf.mxu1 }
 0x14d   : > { %v1735_v10 = vpack.c.bf16 %v1388_v20, %v1387_v49  ;;  %v1133_v54 = vmax.f32 %v919_v32, %v1070_v22  ;;  %v1371_v27 = vadd.f32 %v2492_v0, %v1346_v21 }
 0x14e   : > { %v1920_v25 = vpop.f32.mrf.mxu0  ;;  %v1960_v26 = vpop.f32.mrf.mxu1 }
 0x14f   : > { %1736 = vst [vmem:[%s2505_s14] sm:$0xff] %v1735_v10   ;;  %v1347_v4 = vmax.f32 %v1133_v54, %v1284_v63  ;;  %v1389_v28 = vmax.f32 %v1371_v27, 0.0 }
 0x150   : > { %v1075_v14 = vpop.f32.mrf.mxu0  ;;  %v1289_v18 = vpop.f32.mrf.mxu1 }
 0x151   : > { %v1372_v15 = vadd.f32 %v2492_v0, %v1347_v4  ;;  %v1134_v16 = vmax.f32 %v920_v37, %v1075_v14 }
 0x152   : > { %v1923_v49 = vpop.f32.mrf.mxu0  ;;  %v1963_v17 = vpop.f32.mrf.mxu1 }
 0x153   : > { %v1390_v30 = vmax.f32 %v1372_v15, 0.0  ;;  %v1348_v31 = vmax.f32 %v1134_v16, %v1289_v18 }
 0x154   : > { %v1078_v32 = vpop.f32.mrf.mxu0  ;;  %v1292_v29 = vpop.f32.mrf.mxu1 }
 0x155   : > { %v1740_v39 = vpack.c.bf16 %v1390_v30, %v1389_v28  ;;  %v1135_v43 = vmax.f32 %v921_v42, %v1078_v32  ;;  %v1373_v21 = vadd.f32 %v2492_v0, %v1348_v31 }
 0x156   : > { %v1924_v53 = vpop.f32.mrf.mxu0  ;;  %v1964_v20 = vpop.f32.mrf.mxu1 }
 0x157   : > { %1777 = vst [vmem:[%s2505_s14 + $0x8] sm:$0xff] %v1740_v39   ;;  %v1349_v22 = vmax.f32 %v1135_v43, %v1292_v29  ;;  %v1391_v25 = vmax.f32 %v1373_v21, 0.0 }
 0x158   : > { %v1083_v35 = vpop.f32.mrf.mxu0  ;;  %v1297_v36 = vpop.f32.mrf.mxu1 }
 0x159   : > { %v1374_v37 = vadd.f32 %v2492_v0, %v1349_v22  ;;  %v1136_v63 = vmax.f32 %v922_v47, %v1083_v35 }
 0x15a   : > { %v1927_v10 = vpop.f32.mrf.mxu0  ;;  %v1967_v54 = vpop.f32.mrf.mxu1 }
 0x15b   : > { %v1392_v40 = vmax.f32 %v1374_v37, 0.0  ;;  %v1350_v41 = vmax.f32 %v1136_v63, %v1297_v36 }
 0x15c   : > { %v1086_v42 = vpop.f32.mrf.mxu0  ;;  %v1300_v26 = vpop.f32.mrf.mxu1 }
 0x15d   : > { %v1745_v27 = vpack.c.bf16 %v1392_v40, %v1391_v25  ;;  %v1137_v4 = vmax.f32 %v923_v52, %v1086_v42  ;;  %v1375_v15 = vadd.f32 %v2492_v0, %v1350_v41 }
 0x15e   : > { %v1928_v14 = vpop.f32.mrf.mxu0  ;;  %v1968_v18 = vpop.f32.mrf.mxu1 }
 0x15f   : > { %1778 = vst [vmem:[%s2505_s14 + $0x10] sm:$0xff] %v1745_v27   ;;  %v1351_v16 = vmax.f32 %v1137_v4, %v1300_v26  ;;  %v1393_v30 = vmax.f32 %v1375_v15, 0.0 }
 0x160   : > { %v1091_v45 = vpop.f32.mrf.mxu0  ;;  %v1305_v46 = vpop.f32.mrf.mxu1 }
 0x161   : > { %v1376_v47 = vadd.f32 %v2492_v0, %v1351_v16  ;;  %v1138_v49 = vmax.f32 %v924_v57, %v1091_v45 }
 0x162   : > { %v1931_v17 = vpop.f32.mrf.mxu0  ;;  %v1971_v28 = vpop.f32.mrf.mxu1 }
 0x163   : > { %v1394_v50 = vmax.f32 %v1376_v47, 0.0  ;;  %v1352_v51 = vmax.f32 %v1138_v49, %v1305_v46 }
 0x164   : > { %v1094_v52 = vpop.f32.mrf.mxu0  ;;  %v1308_v31 = vpop.f32.mrf.mxu1 }
 0x165   : > { %v1750_v32 = vpack.c.bf16 %v1394_v50, %v1393_v30  ;;  %v1139_v29 = vmax.f32 %v925_v62, %v1094_v52  ;;  %v1377_v53 = vadd.f32 %v2492_v0, %v1352_v51  ;;  %v2591_v52 = vmax.f32 %v2466_v44, %v2468_v48 }
 0x166   : > { %v1932_v39 = vpop.f32.mrf.mxu0  ;;  %v1972_v43 = vpop.f32.mrf.mxu1 }
 0x167   : > { %1779 = vst [vmem:[%s2505_s14 + $0x18] sm:$0xff] %v1750_v32   ;;  %v1353_v20 = vmax.f32 %v1139_v29, %v1308_v31  ;;  %v1395_v36 = vmax.f32 %v1377_v53, 0.0  ;;  %v2592_v53 = vmax.f32 %v2472_v58, %v2474_v59 }
 0x168   : > { %v1099_v55 = vpop.f32.mrf.mxu0  ;;  %v1313_v56 = vpop.f32.mrf.mxu1 }
 0x169   : > { %v1378_v57 = vadd.f32 %v2492_v0, %v1353_v20  ;;  %v1140_v21 = vmax.f32 %v926_v3, %v1099_v55 }
 0x16a   : > { %v1935_v22 = vpop.f32.mrf.mxu0  ;;  %v1975_v35 = vpop.f32.mrf.mxu1 }
 0x16b   : > { %v1396_v60 = vmax.f32 %v1378_v57, 0.0  ;;  %v1354_v61 = vmax.f32 %v1140_v21, %v1313_v56 }
 0x16c   : > { %v1102_v62 = vpop.f32.mrf.mxu0  ;;  %v1316_v37 = vpop.f32.mrf.mxu1 }
 0x16d   : > { %v1755_v63 = vpack.c.bf16 %v1396_v60, %v1395_v36  ;;  %v1141_v10 = vmax.f32 %v927_v8, %v1102_v62  ;;  %v1379_v40 = vadd.f32 %v2492_v0, %v1354_v61  ;;  %v2593_v60 = vmax.f32 %v2478_v5, %v2480_v9 }
 0x16e   : > { %v1936_v54 = vpop.f32.mrf.mxu0  ;;  %v1976_v25 = vpop.f32.mrf.mxu1 }
 0x16f   : > { %1780 = vst [vmem:[%s2505_s14 + $0x20] sm:$0xff] %v1755_v63   ;;  %v1355_v41 = vmax.f32 %v1141_v10, %v1316_v37  ;;  %v1397_v4 = vmax.f32 %v1379_v40, 0.0 }
 0x170   : > { %v1107_v1 = vpop.f32.mrf.mxu0  ;;  %v1321_v2 = vpop.f32.mrf.mxu1 }
 0x171   : > { %v1380_v3 = vadd.f32 %v2492_v0, %v1355_v41  ;;  %v1142_v42 = vmax.f32 %v928_v13, %v1107_v1 }
 0x172   : > { %v1939_v26 = vpop.f32.mrf.mxu0  ;;  %v1979_v27 = vpop.f32.mrf.mxu1 }
 0x173   : > { %v1398_v6 = vmax.f32 %v1380_v3, 0.0  ;;  %v1356_v7 = vmax.f32 %v1142_v42, %v1321_v2 }
 0x174   : > { %v1110_v8 = vpop.f32.mrf.mxu0  ;;  %v1324_v14 = vpop.f32.mrf.mxu1 }
 0x175   : > { %v1760_v18 = vpack.c.bf16 %v1398_v6, %v1397_v4  ;;  %v1143_v15 = vmax.f32 %v929_v24, %v1110_v8  ;;  %v1381_v46 = vadd.f32 %v2492_v0, %v1356_v7 }
 0x176   : > { %v1940_v16 = vpop.f32.mrf.mxu0  ;;  %v1980_v45 = vpop.f32.mrf.mxu1 }
 0x177   : > { %1781 = vst [vmem:[%s2505_s14 + $0x28] sm:$0xff] %v1760_v18   ;;  %v1357_v47 = vmax.f32 %v1143_v15, %v1324_v14  ;;  %v1399_v30 = vmax.f32 %v1381_v46, 0.0 }
 0x178   : > { %v1115_v11 = vpop.f32.mrf.mxu0  ;;  %v1329_v12 = vpop.f32.mrf.mxu1 }
 0x179   : > { %v1382_v13 = vadd.f32 %v2492_v0, %v1357_v47  ;;  %v1144_v49 = vmax.f32 %v930_v38, %v1115_v11 }
 0x17a   : > { %v1943_v17 = vpop.f32.mrf.mxu0  ;;  %v1983_v28 = vpop.f32.mrf.mxu1 }
 0x17b   : > { %v1400_v19 = vmax.f32 %v1382_v13, 0.0  ;;  %v1358_v23 = vmax.f32 %v1144_v49, %v1329_v12 }
 0x17c   : > { %v1118_v24 = vpop.f32.mrf.mxu0  ;;  %v1332_v50 = vpop.f32.mrf.mxu1 }
 0x17d   : > { %v1765_v51 = vpack.c.bf16 %v1400_v19, %v1399_v30  ;;  %v1145_v31 = vmax.f32 %v2591_v52, %v1118_v24  ;;  %v1383_v39 = vadd.f32 %v2492_v0, %v1358_v23 }
 0x17e   : > { %v1944_v32 = vpop.f32.mrf.mxu0  ;;  %v1984_v29 = vpop.f32.mrf.mxu1 }
 0x17f   : > { %1782 = vst [vmem:[%s2505_s14 + $0x30] sm:$0xff] %v1765_v51   ;;  %v1359_v43 = vmax.f32 %v1145_v31, %v1332_v50  ;;  %v1401_v57 = vmax.f32 %v1383_v39, 0.0 }
 0x180   : > { %v1123_v33 = vpop.f32.mrf.mxu0  ;;  %v1337_v34 = vpop.f32.mrf.mxu1 }
 0x181   : > { %v1384_v38 = vadd.f32 %v2492_v0, %v1359_v43  ;;  %v1146_v20 = vmax.f32 %v2592_v53, %v1123_v33 }
 0x182   : > { %v1947_v55 = vpop.f32.mrf.mxu0  ;;  %v1987_v56 = vpop.f32.mrf.mxu1 }
 0x183   : > { %v1402_v44 = vmax.f32 %v1384_v38, 0.0  ;;  %v1360_v48 = vmax.f32 %v1146_v20, %v1337_v34 }
 0x184   : > { %v1126_v21 = vpop.f32.mrf.mxu0  ;;  %v1340_v22 = vpop.f32.mrf.mxu1 }
 0x185   : > { %v1770_v35 = vpack.c.bf16 %v1402_v44, %v1401_v57  ;;  %v1385_v36 = vadd.f32 %v2492_v0, %v1360_v48  ;;  %v1147_v61 = vmax.f32 %v2593_v60, %v1126_v21 }
 0x186   : > { %v1948_v62 = vpop.f32.mrf.mxu0  ;;  %v1988_v37 = vpop.f32.mrf.mxu1 }
 0x187   : > { %1783 = vst [vmem:[%s2505_s14 + $0x38] sm:$0xff] %v1770_v35   ;;  %v1361_v58 = vmax.f32 %v1147_v61, %v1340_v22  ;;  %v1403_v63 = vmax.f32 %v1385_v36, 0.0 }
 0x189   : > { %v1386_v59 = vadd.f32 %v2492_v0, %v1361_v58 }
 0x18b   : > { %v1404_v10 = vmax.f32 %v1386_v59, 0.0 }
 0x18d   : > { %v1775_v54 = vpack.c.bf16 %v1404_v10, %v1403_v63 }
 0x18f   : > { %1784 = vst [vmem:[%s2505_s14 + $0x40] sm:$0xff] %v1775_v54  }
 0x190 PF: > { %p10_p9 = scmp.ge.s32.totalorder %s2120_s16, 4   ;;  %s2594_s12 = smov %s2074_s13 }
 0x191   : > { %s2595_s13 = smov %s2129_s19  ;;  %s2596_s14 = smov %s2120_s16 }
 0x192   :  { %12 = sbr.rel (!%p10_p9) target bundleno = 2 (0x2), region = 111 }

// kernel: net_forward.4
= control target key start
LH: loop header
LB: loop body
LE: loop exit
PB: predicated region body
PF: predicated region fallthrough
CT: control target
= control target key end

     0   :  { %s7229_s12 = smov 0   ;;  %s7231_s13 = smov 0   ;;  %s10357_s0 = inlined_call_operand.vmem [shape: bf16[4,32,3200], index: 0, kind: input, shape index: {}]   ;;  %s10358_s1 = inlined_call_operand.vmem [shape: bf16[3200,128], index: 1, kind: input, shape index: {}]   ;;  %s10359_s2 = inlined_call_operand.vmem [shape: f32[1,128], index: 2, kind: input, shape index: {}]   ;;  %s10360_s3 = inlined_call_operand.vmem [shape: bf16[32,128], index: 3, kind: output, shape index: {}]  }
   0x1   :  { %s7233_s14 = smov 0  }
   0x2 LB: > { %s4847_s15 = sadd.s32 4294967295, %s7205_s14   ;;  %s7246_s16 = sadd.s32 1, %s7205_s14   ;;  %s7205_s14 = sphi %s7233_s14, %s10741_s14   ;;  %s7201_s13 = sphi %s7231_s13, %s10740_s13   ;;  %s7197_s12 = sphi %s7229_s12, %s10739_s12  }
   0x3   : > { %s17_s17 = ssub.s32 %s7205_s14, %s7246_s16  ;;  %s20_s18 = sadd.s32 1, %s7201_s13 }
   0x4   : > { %p18_p0 = scmp.eq.s32.totalorder %s17_s17, 0  ;;  %p27_p1 = scmp.ne.s32.totalorder %s7201_s13, %s7197_s12 }
   0x5   : > { %p28_p2 = scmp.eq.s32.totalorder %s7205_s14, 0  ;;  %p4850_p4 = scmp.ge.s32.totalorder %s7205_s14, 2 }
   0x6   : > { %s7255_s19 = scalar_select %p18_p0, %s7201_s13, %s20_s18  }
   0x7   : > { %p29_p3 = por %p28_p2, %p27_p1  ;;  %127 = sbr.rel (%p4850_p4) target bundleno = 70 (0x46), region = 24 }
   0xc   : > { %130 = sbr.rel (!%p29_p3) target bundleno = 70 (0x46), region = 28  ;;  %s132_s20 = sand.u32 (%p29_p3), 1, %s7201_s13  }
   0xd   : > { %s6436_s21 = smul.u32 (%p29_p3), 200, %s7205_s14 }
   0xe   : > { %s6435_s22 = smul.u32 (%p29_p3), 800, %s132_s20 }
   0xf   : > { %s7263_s25 = scalar_lea.vmem (%p29_p3), %s10357_s0, %s6436_s21 }
  0x10   : > { %v153_v0 = vld [vmem:[%s7263_s25] sm:$0xff] (%p29_p3)  ;;  %v155_v1 = vld [vmem:[%s7263_s25 + $0x8] sm:$0xff] (%p29_p3)  ;;  %v157_v2 = vld [vmem:[%s7263_s25 + $0x10] sm:$0xff] (%p29_p3)  ;;  %s7268_s26 = scalar_lea.vmem (%p29_p3), [#allocation2], %s6435_s22 }
  0x11   : > { %154 = vst [vmem:[%s7268_s26] sm:$0xff] %v153_v0  ;;  %156 = vst [vmem:[%s7268_s26 + $0x8] sm:$0xff] %v155_v1  ;;  %v159_v3 = vld [vmem:[%s7263_s25 + $0x18] sm:$0xff]  ;;  %v161_v4 = vld [vmem:[%s7263_s25 + $0x20] sm:$0xff] }
  0x12   : > { %158 = vst [vmem:[%s7268_s26 + $0x10] sm:$0xff] %v157_v2  ;;  %v163_v5 = vld [vmem:[%s7263_s25 + $0x28] sm:$0xff]  ;;  %160 = vst [vmem:[%s7268_s26 + $0x18] sm:$0xff] %v159_v3  ;;  %v165_v6 = vld [vmem:[%s7263_s25 + $0x30] sm:$0xff] }
  0x13   : > { %162 = vst [vmem:[%s7268_s26 + $0x20] sm:$0xff] %v161_v4  ;;  %164 = vst [vmem:[%s7268_s26 + $0x28] sm:$0xff] %v163_v5  ;;  %v167_v7 = vld [vmem:[%s7263_s25 + $0x38] sm:$0xff]  ;;  %v169_v8 = vld [vmem:[%s7263_s25 + $0x40] sm:$0xff] }
  0x14   : > { %166 = vst [vmem:[%s7268_s26 + $0x30] sm:$0xff] %v165_v6  ;;  %168 = vst [vmem:[%s7268_s26 + $0x38] sm:$0xff] %v167_v7  ;;  %v171_v9 = vld [vmem:[%s7263_s25 + $0x48] sm:$0xff]  ;;  %v173_v10 = vld [vmem:[%s7263_s25 + $0x50] sm:$0xff] }
  0x15   : > { %170 = vst [vmem:[%s7268_s26 + $0x40] sm:$0xff] %v169_v8  ;;  %v175_v11 = vld [vmem:[%s7263_s25 + $0x58] sm:$0xff]  ;;  %172 = vst [vmem:[%s7268_s26 + $0x48] sm:$0xff] %v171_v9  ;;  %v177_v12 = vld [vmem:[%s7263_s25 + $0x64] sm:$0xff] }
  0x16   : > { %174 = vst [vmem:[%s7268_s26 + $0x50] sm:$0xff] %v173_v10  ;;  %176 = vst [vmem:[%s7268_s26 + $0x58] sm:$0xff] %v175_v11  ;;  %v179_v13 = vld [vmem:[%s7263_s25 + $0x6c] sm:$0xff]  ;;  %v181_v14 = vld [vmem:[%s7263_s25 + $0x74] sm:$0xff] }
  0x17   : > { %178 = vst [vmem:[%s7268_s26 + $0x64] sm:$0xff] %v177_v12  ;;  %180 = vst [vmem:[%s7268_s26 + $0x6c] sm:$0xff] %v179_v13  ;;  %v183_v15 = vld [vmem:[%s7263_s25 + $0x7c] sm:$0xff]  ;;  %v185_v16 = vld [vmem:[%s7263_s25 + $0x84] sm:$0xff] }
  0x18   : > { %182 = vst [vmem:[%s7268_s26 + $0x74] sm:$0xff] %v181_v14  ;;  %v187_v17 = vld [vmem:[%s7263_s25 + $0x8c] sm:$0xff]  ;;  %184 = vst [vmem:[%s7268_s26 + $0x7c] sm:$0xff] %v183_v15  ;;  %v189_v18 = vld [vmem:[%s7263_s25 + $0x94] sm:$0xff] }
  0x19   : > { %186 = vst [vmem:[%s7268_s26 + $0x84] sm:$0xff] %v185_v16  ;;  %188 = vst [vmem:[%s7268_s26 + $0x8c] sm:$0xff] %v187_v17  ;;  %v191_v19 = vld [vmem:[%s7263_s25 + $0x9c] sm:$0xff]  ;;  %v193_v20 = vld [vmem:[%s7263_s25 + $0xa4] sm:$0xff] }
  0x1a   : > { %190 = vst [vmem:[%s7268_s26 + $0x94] sm:$0xff] %v189_v18  ;;  %192 = vst [vmem:[%s7268_s26 + $0x9c] sm:$0xff] %v191_v19  ;;  %v195_v21 = vld [vmem:[%s7263_s25 + $0xac] sm:$0xff]  ;;  %v197_v22 = vld [vmem:[%s7263_s25 + $0xb4] sm:$0xff] }
  0x1b   : > { %194 = vst [vmem:[%s7268_s26 + $0xa4] sm:$0xff] %v193_v20  ;;  %v199_v23 = vld [vmem:[%s7263_s25 + $0xbc] sm:$0xff]  ;;  %196 = vst [vmem:[%s7268_s26 + $0xac] sm:$0xff] %v195_v21  ;;  %v201_v24 = vld [vmem:[%s7263_s25 + $0x190] sm:$0xff] }
  0x1c   : > { %198 = vst [vmem:[%s7268_s26 + $0xb4] sm:$0xff] %v197_v22  ;;  %200 = vst [vmem:[%s7268_s26 + $0xbc] sm:$0xff] %v199_v23  ;;  %v203_v25 = vld [vmem:[%s7263_s25 + $0x198] sm:$0xff]  ;;  %v205_v26 = vld [vmem:[%s7263_s25 + $0x1a0] sm:$0xff] }
  0x1d   : > { %202 = vst [vmem:[%s7268_s26 + $0xc8] sm:$0xff] %v201_v24  ;;  %204 = vst [vmem:[%s7268_s26 + $0xd0] sm:$0xff] %v203_v25  ;;  %v207_v27 = vld [vmem:[%s7263_s25 + $0x1a8] sm:$0xff]  ;;  %v209_v28 = vld [vmem:[%s7263_s25 + $0x1b0] sm:$0xff] }
  0x1e   : > { %206 = vst [vmem:[%s7268_s26 + $0xd8] sm:$0xff] %v205_v26  ;;  %v211_v29 = vld [vmem:[%s7263_s25 + $0x1b8] sm:$0xff]  ;;  %208 = vst [vmem:[%s7268_s26 + $0xe0] sm:$0xff] %v207_v27  ;;  %v213_v30 = vld [vmem:[%s7263_s25 + $0x1c0] sm:$0xff] }
  0x1f   : > { %210 = vst [vmem:[%s7268_s26 + $0xe8] sm:$0xff] %v209_v28  ;;  %212 = vst [vmem:[%s7268_s26 + $0xf0] sm:$0xff] %v211_v29  ;;  %v215_v31 = vld [vmem:[%s7263_s25 + $0x1c8] sm:$0xff]  ;;  %v217_v32 = vld [vmem:[%s7263_s25 + $0x1d0] sm:$0xff] }
  0x20   : > { %214 = vst [vmem:[%s7268_s26 + $0xf8] sm:$0xff] %v213_v30  ;;  %216 = vst [vmem:[%s7268_s26 + $0x100] sm:$0xff] %v215_v31  ;;  %v219_v33 = vld [vmem:[%s7263_s25 + $0x1d8] sm:$0xff]  ;;  %v221_v34 = vld [vmem:[%s7263_s25 + $0x1e0] sm:$0xff] }
  0x21   : > { %218 = vst [vmem:[%s7268_s26 + $0x108] sm:$0xff] %v217_v32  ;;  %v223_v35 = vld [vmem:[%s7263_s25 + $0x1e8] sm:$0xff]  ;;  %220 = vst [vmem:[%s7268_s26 + $0x110] sm:$0xff] %v219_v33  ;;  %v225_v36 = vld [vmem:[%s7263_s25 + $0x1f4] sm:$0xff] }
  0x22   : > { %222 = vst [vmem:[%s7268_s26 + $0x118] sm:$0xff] %v221_v34  ;;  %224 = vst [vmem:[%s7268_s26 + $0x120] sm:$0xff] %v223_v35  ;;  %v227_v37 = vld [vmem:[%s7263_s25 + $0x1fc] sm:$0xff]  ;;  %v229_v38 = vld [vmem:[%s7263_s25 + $0x204] sm:$0xff] }
  0x23   : > { %226 = vst [vmem:[%s7268_s26 + $0x12c] sm:$0xff] %v225_v36  ;;  %228 = vst [vmem:[%s7268_s26 + $0x134] sm:$0xff] %v227_v37  ;;  %v231_v39 = vld [vmem:[%s7263_s25 + $0x20c] sm:$0xff]  ;;  %v233_v40 = vld [vmem:[%s7263_s25 + $0x214] sm:$0xff] }
  0x24   : > { %230 = vst [vmem:[%s7268_s26 + $0x13c] sm:$0xff] %v229_v38  ;;  %v235_v41 = vld [vmem:[%s7263_s25 + $0x21c] sm:$0xff]  ;;  %232 = vst [vmem:[%s7268_s26 + $0x144] sm:$0xff] %v231_v39  ;;  %v237_v42 = vld [vmem:[%s7263_s25 + $0x224] sm:$0xff] }
  0x25   : > { %234 = vst [vmem:[%s7268_s26 + $0x14c] sm:$0xff] %v233_v40  ;;  %236 = vst [vmem:[%s7268_s26 + $0x154] sm:$0xff] %v235_v41  ;;  %v239_v43 = vld [vmem:[%s7263_s25 + $0x22c] sm:$0xff]  ;;  %v241_v44 = vld [vmem:[%s7263_s25 + $0x234] sm:$0xff] }
  0x26   : > { %238 = vst [vmem:[%s7268_s26 + $0x15c] sm:$0xff] %v237_v42  ;;  %240 = vst [vmem:[%s7268_s26 + $0x164] sm:$0xff] %v239_v43  ;;  %v243_v45 = vld [vmem:[%s7263_s25 + $0x23c] sm:$0xff]  ;;  %v245_v46 = vld [vmem:[%s7263_s25 + $0x244] sm:$0xff] }
  0x27   : > { %242 = vst [vmem:[%s7268_s26 + $0x16c] sm:$0xff] %v241_v44  ;;  %v247_v47 = vld [vmem:[%s7263_s25 + $0x24c] sm:$0xff]  ;;  %244 = vst [vmem:[%s7268_s26 + $0x174] sm:$0xff] %v243_v45  ;;  %v249_v48 = vld [vmem:[%s7263_s25 + $0x320] sm:$0xff] }
  0x28   : > { %246 = vst [vmem:[%s7268_s26 + $0x17c] sm:$0xff] %v245_v46  ;;  %248 = vst [vmem:[%s7268_s26 + $0x184] sm:$0xff] %v247_v47  ;;  %v251_v49 = vld [vmem:[%s7263_s25 + $0x328] sm:$0xff]  ;;  %v253_v50 = vld [vmem:[%s7263_s25 + $0x330] sm:$0xff] }
  0x29   : > { %250 = vst [vmem:[%s7268_s26 + $0x190] sm:$0xff] %v249_v48  ;;  %252 = vst [vmem:[%s7268_s26 + $0x198] sm:$0xff] %v251_v49  ;;  %v255_v51 = vld [vmem:[%s7263_s25 + $0x338] sm:$0xff]  ;;  %v257_v52 = vld [vmem:[%s7263_s25 + $0x340] sm:$0xff] }
  0x2a   : > { %254 = vst [vmem:[%s7268_s26 + $0x1a0] sm:$0xff] %v253_v50  ;;  %v259_v53 = vld [vmem:[%s7263_s25 + $0x348] sm:$0xff]  ;;  %256 = vst [vmem:[%s7268_s26 + $0x1a8] sm:$0xff] %v255_v51  ;;  %v261_v54 = vld [vmem:[%s7263_s25 + $0x350] sm:$0xff] }
  0x2b   : > { %258 = vst [vmem:[%s7268_s26 + $0x1b0] sm:$0xff] %v257_v52  ;;  %260 = vst [vmem:[%s7268_s26 + $0x1b8] sm:$0xff] %v259_v53  ;;  %v263_v55 = vld [vmem:[%s7263_s25 + $0x358] sm:$0xff]  ;;  %v265_v56 = vld [vmem:[%s7263_s25 + $0x360] sm:$0xff] }
  0x2c   : > { %262 = vst [vmem:[%s7268_s26 + $0x1c0] sm:$0xff] %v261_v54  ;;  %264 = vst [vmem:[%s7268_s26 + $0x1c8] sm:$0xff] %v263_v55  ;;  %v267_v57 = vld [vmem:[%s7263_s25 + $0x368] sm:$0xff]  ;;  %v269_v58 = vld [vmem:[%s7263_s25 + $0x370] sm:$0xff] }
  0x2d   : > { %266 = vst [vmem:[%s7268_s26 + $0x1d0] sm:$0xff] %v265_v56  ;;  %v271_v59 = vld [vmem:[%s7263_s25 + $0x378] sm:$0xff]  ;;  %268 = vst [vmem:[%s7268_s26 + $0x1d8] sm:$0xff] %v267_v57  ;;  %v273_v60 = vld [vmem:[%s7263_s25 + $0x384] sm:$0xff] }
  0x2e   : > { %270 = vst [vmem:[%s7268_s26 + $0x1e0] sm:$0xff] %v269_v58  ;;  %272 = vst [vmem:[%s7268_s26 + $0x1e8] sm:$0xff] %v271_v59  ;;  %v275_v61 = vld [vmem:[%s7263_s25 + $0x38c] sm:$0xff]  ;;  %v277_v62 = vld [vmem:[%s7263_s25 + $0x394] sm:$0xff] }
  0x2f   : > { %274 = vst [vmem:[%s7268_s26 + $0x1f4] sm:$0xff] %v273_v60  ;;  %276 = vst [vmem:[%s7268_s26 + $0x1fc] sm:$0xff] %v275_v61  ;;  %v279_v63 = vld [vmem:[%s7263_s25 + $0x39c] sm:$0xff]  ;;  %v281_v0 = vld [vmem:[%s7263_s25 + $0x3a4] sm:$0xff] }
  0x30   : > { %278 = vst [vmem:[%s7268_s26 + $0x204] sm:$0xff] %v277_v62  ;;  %v283_v1 = vld [vmem:[%s7263_s25 + $0x3ac] sm:$0xff]  ;;  %280 = vst [vmem:[%s7268_s26 + $0x20c] sm:$0xff] %v279_v63  ;;  %v285_v2 = vld [vmem:[%s7263_s25 + $0x3b4] sm:$0xff] }
  0x31   : > { %282 = vst [vmem:[%s7268_s26 + $0x214] sm:$0xff] %v281_v0  ;;  %284 = vst [vmem:[%s7268_s26 + $0x21c] sm:$0xff] %v283_v1  ;;  %v287_v3 = vld [vmem:[%s7263_s25 + $0x3bc] sm:$0xff]  ;;  %v289_v4 = vld [vmem:[%s7263_s25 + $0x3c4] sm:$0xff] }
  0x32   : > { %286 = vst [vmem:[%s7268_s26 + $0x224] sm:$0xff] %v285_v2  ;;  %288 = vst [vmem:[%s7268_s26 + $0x22c] sm:$0xff] %v287_v3  ;;  %v291_v5 = vld [vmem:[%s7263_s25 + $0x3cc] sm:$0xff]  ;;  %v293_v6 = vld [vmem:[%s7263_s25 + $0x3d4] sm:$0xff] }
  0x33   : > { %290 = vst [vmem:[%s7268_s26 + $0x234] sm:$0xff] %v289_v4  ;;  %v295_v7 = vld [vmem:[%s7263_s25 + $0x3dc] sm:$0xff]  ;;  %292 = vst [vmem:[%s7268_s26 + $0x23c] sm:$0xff] %v291_v5  ;;  %v297_v8 = vld [vmem:[%s7263_s25 + $0x4b0] sm:$0xff] }
  0x34   : > { %294 = vst [vmem:[%s7268_s26 + $0x244] sm:$0xff] %v293_v6  ;;  %296 = vst [vmem:[%s7268_s26 + $0x24c] sm:$0xff] %v295_v7  ;;  %v299_v9 = vld [vmem:[%s7263_s25 + $0x4b8] sm:$0xff]  ;;  %v301_v10 = vld [vmem:[%s7263_s25 + $0x4c0] sm:$0xff] }
  0x35   : > { %298 = vst [vmem:[%s7268_s26 + $0x258] sm:$0xff] %v297_v8  ;;  %300 = vst [vmem:[%s7268_s26 + $0x260] sm:$0xff] %v299_v9  ;;  %v303_v11 = vld [vmem:[%s7263_s25 + $0x4c8] sm:$0xff]  ;;  %v305_v12 = vld [vmem:[%s7263_s25 + $0x4d0] sm:$0xff] }
  0x36   : > { %302 = vst [vmem:[%s7268_s26 + $0x268] sm:$0xff] %v301_v10  ;;  %v307_v13 = vld [vmem:[%s7263_s25 + $0x4d8] sm:$0xff]  ;;  %304 = vst [vmem:[%s7268_s26 + $0x270] sm:$0xff] %v303_v11  ;;  %v309_v14 = vld [vmem:[%s7263_s25 + $0x4e0] sm:$0xff] }
  0x37   : > { %306 = vst [vmem:[%s7268_s26 + $0x278] sm:$0xff] %v305_v12  ;;  %308 = vst [vmem:[%s7268_s26 + $0x280] sm:$0xff] %v307_v13  ;;  %v311_v15 = vld [vmem:[%s7263_s25 + $0x4e8] sm:$0xff]  ;;  %v313_v16 = vld [vmem:[%s7263_s25 + $0x4f0] sm:$0xff] }
  0x38   : > { %310 = vst [vmem:[%s7268_s26 + $0x288] sm:$0xff] %v309_v14  ;;  %312 = vst [vmem:[%s7268_s26 + $0x290] sm:$0xff] %v311_v15  ;;  %v315_v17 = vld [vmem:[%s7263_s25 + $0x4f8] sm:$0xff]  ;;  %v317_v18 = vld [vmem:[%s7263_s25 + $0x500] sm:$0xff] }
  0x39   : > { %314 = vst [vmem:[%s7268_s26 + $0x298] sm:$0xff] %v313_v16  ;;  %v319_v19 = vld [vmem:[%s7263_s25 + $0x508] sm:$0xff]  ;;  %316 = vst [vmem:[%s7268_s26 + $0x2a0] sm:$0xff] %v315_v17  ;;  %v321_v20 = vld [vmem:[%s7263_s25 + $0x514] sm:$0xff] }
  0x3a   : > { %318 = vst [vmem:[%s7268_s26 + $0x2a8] sm:$0xff] %v317_v18  ;;  %320 = vst [vmem:[%s7268_s26 + $0x2b0] sm:$0xff] %v319_v19  ;;  %v323_v21 = vld [vmem:[%s7263_s25 + $0x51c] sm:$0xff]  ;;  %v325_v22 = vld [vmem:[%s7263_s25 + $0x524] sm:$0xff] }
  0x3b   : > { %322 = vst [vmem:[%s7268_s26 + $0x2bc] sm:$0xff] %v321_v20  ;;  %324 = vst [vmem:[%s7268_s26 + $0x2c4] sm:$0xff] %v323_v21  ;;  %v327_v23 = vld [vmem:[%s7263_s25 + $0x52c] sm:$0xff]  ;;  %v329_v24 = vld [vmem:[%s7263_s25 + $0x534] sm:$0xff] }
  0x3c   : > { %326 = vst [vmem:[%s7268_s26 + $0x2cc] sm:$0xff] %v325_v22  ;;  %v331_v25 = vld [vmem:[%s7263_s25 + $0x53c] sm:$0xff]  ;;  %328 = vst [vmem:[%s7268_s26 + $0x2d4] sm:$0xff] %v327_v23  ;;  %v333_v26 = vld [vmem:[%s7263_s25 + $0x544] sm:$0xff] }
  0x3d   : > { %330 = vst [vmem:[%s7268_s26 + $0x2dc] sm:$0xff] %v329_v24  ;;  %332 = vst [vmem:[%s7268_s26 + $0x2e4] sm:$0xff] %v331_v25  ;;  %v335_v27 = vld [vmem:[%s7263_s25 + $0x54c] sm:$0xff]  ;;  %v337_v28 = vld [vmem:[%s7263_s25 + $0x554] sm:$0xff] }
  0x3e   : > { %334 = vst [vmem:[%s7268_s26 + $0x2ec] sm:$0xff] %v333_v26  ;;  %336 = vst [vmem:[%s7268_s26 + $0x2f4] sm:$0xff] %v335_v27  ;;  %v339_v29 = vld [vmem:[%s7263_s25 + $0x55c] sm:$0xff]  ;;  %v341_v30 = vld [vmem:[%s7263_s25 + $0x564] sm:$0xff] }
  0x3f   : > { %338 = vst [vmem:[%s7268_s26 + $0x2fc] sm:$0xff] %v337_v28  ;;  %v343_v31 = vld [vmem:[%s7263_s25 + $0x56c] sm:$0xff]  ;;  %340 = vst [vmem:[%s7268_s26 + $0x304] sm:$0xff] %v339_v29  ;;  %v4854_v32 = vld [vmem:[%s7263_s25 + $0x60] sm:$0xf] }
  0x40   : > { %342 = vst [vmem:[%s7268_s26 + $0x30c] sm:$0xff] %v341_v30  ;;  %344 = vst [vmem:[%s7268_s26 + $0x314] sm:$0xff] %v343_v31  ;;  %v4856_v33 = vld [vmem:[%s7263_s25 + $0xc4] sm:$0xf]  ;;  %v4858_v34 = vld [vmem:[%s7263_s25 + $0x1f0] sm:$0xf] }
  0x41   : > { %4855 = vst [vmem:[%s7268_s26 + $0x60] sm:$0xf] %v4854_v32  ;;  %4857 = vst [vmem:[%s7268_s26 + $0xc4] sm:$0xf] %v4856_v33  ;;  %v4860_v35 = vld [vmem:[%s7263_s25 + $0x254] sm:$0xf] }
  0x42   : > { %4859 = vst [vmem:[%s7268_s26 + $0x128] sm:$0xf] %v4858_v34  ;;  %v4862_v36 = vld [vmem:[%s7263_s25 + $0x380] sm:$0xf]  ;;  %v4864_v37 = vld [vmem:[%s7263_s25 + $0x3e4] sm:$0xf] }
  0x43   : > { %4861 = vst [vmem:[%s7268_s26 + $0x18c] sm:$0xf] %v4860_v35  ;;  %4863 = vst [vmem:[%s7268_s26 + $0x1f0] sm:$0xf] %v4862_v36  ;;  %v4866_v38 = vld [vmem:[%s7263_s25 + $0x510] sm:$0xf] }
  0x44   : > { %4865 = vst [vmem:[%s7268_s26 + $0x254] sm:$0xf] %v4864_v37  ;;  %v4868_v39 = vld [vmem:[%s7263_s25 + $0x574] sm:$0xf]  ;;  %4867 = vst [vmem:[%s7268_s26 + $0x2b8] sm:$0xf] %v4866_v38 }
  0x45   : > { %4869 = vst [vmem:[%s7268_s26 + $0x31c] sm:$0xf] %v4868_v39 }
  0x46 PF: > { %p4870_p5 = scmp.ge.s32.totalorder %s7205_s14, 1  ;;  %p373_p6 = scmp.lt.s32.totalorder %s7205_s14, 3 }
  0x48   : > { %p374_p7 = pnand %p4870_p5, %p373_p6 }
  0x4a   : > { %377 = sbr.rel (%p374_p7) target bundleno = 1136 (0x470), region = 54 }
  0x4f   : > { %v6464_v40 = vld [vmem:[%s10358_s1 + $0x78] sm:$0xff]   ;;  %v6468_v44 = vld [vmem:[%s10358_s1 + $0x70] sm:$0xff]   ;;  %v6472_v48 = vld [vmem:[%s10358_s1 + $0x68] sm:$0xff]   ;;  %s380_s4 = sand.u32 1, %s7197_s12   ;;  %vm7208_vm0 = vmmov 0  }
  0x50   : > { %v6465_v41 = vld [vmem:[%s10358_s1 + $0xf8] sm:$0xff]   ;;  %5263 = vmatprep.subr.bf16.mxu0 %v6464_v40  ;;  %v6469_v45 = vld [vmem:[%s10358_s1 + $0xf0] sm:$0xff]   ;;  %v6473_v49 = vld [vmem:[%s10358_s1 + $0xe8] sm:$0xff]   ;;  %s6437_s11 = smul.u32 800, %s380_s4 }
  0x51   : > { %v6466_v42 = vld [vmem:[%s10358_s1 + $0x38] sm:$0xff]   ;;  %5285 = vmatprep.subr.bf16.mxu1 %v6465_v41  ;;  %v6470_v46 = vld [vmem:[%s10358_s1 + $0x30] sm:$0xff]   ;;  %v6474_v50 = vld [vmem:[%s10358_s1 + $0x28] sm:$0xff]  }
  0x52   : > { %v6467_v43 = vld [vmem:[%s10358_s1 + $0xb8] sm:$0xff]   ;;  %5264 = vmatpush3.bf16.msra.mxu0 %v6466_v42  ;;  %v6471_v47 = vld [vmem:[%s10358_s1 + $0xb0] sm:$0xff]   ;;  %v6475_v51 = vld [vmem:[%s10358_s1 + $0xa8] sm:$0xff]   ;;  %s7574_s29 = scalar_lea.vmem [#allocation2], %s6437_s11 }
  0x53   : > { %5286 = vmatpush3.bf16.msra.mxu1 %v6467_v43  ;;  %5265 = vmatprep.subr.bf16.mxu0 %v6468_v44  ;;  %v6476_v52 = vld [vmem:[%s10358_s1 + $0x60] sm:$0xff]   ;;  %v6480_v56 = vld [vmem:[%s10358_s1 + $0x58] sm:$0xff]   ;;  %v6484_v60 = vld [vmem:[%s10358_s1 + $0x50] sm:$0xff]  }
  0x54   : > { %5287 = vmatprep.subr.bf16.mxu1 %v6469_v45  ;;  %v6477_v53 = vld [vmem:[%s10358_s1 + $0xe0] sm:$0xff]   ;;  %v6481_v57 = vld [vmem:[%s10358_s1 + $0xd8] sm:$0xff]   ;;  %v6485_v61 = vld [vmem:[%s10358_s1 + $0xd0] sm:$0xff]  }
  0x55   : > { %v6478_v54 = vld [vmem:[%s10358_s1 + $0x20] sm:$0xff]   ;;  %v6482_v58 = vld [vmem:[%s10358_s1 + $0x18] sm:$0xff]   ;;  %v6486_v62 = vld [vmem:[%s10358_s1 + $0x10] sm:$0xff]  }
  0x56   : > { %5266 = vmatpush3.bf16.msra.mxu0 %v6470_v46  ;;  %v6479_v55 = vld [vmem:[%s10358_s1 + $0xa0] sm:$0xff]   ;;  %v6483_v59 = vld [vmem:[%s10358_s1 + $0x98] sm:$0xff]   ;;  %v6487_v63 = vld [vmem:[%s10358_s1 + $0x90] sm:$0xff]  }
  0x57   : > { %5288 = vmatpush3.bf16.msra.mxu1 %v6471_v47  ;;  %5267 = vmatprep.subr.bf16.mxu0 %v6472_v48  ;;  %v6488_v0 = vld [vmem:[%s10358_s1 + $0x48] sm:$0xff]   ;;  %v6492_v4 = vld [vmem:[%s10358_s1 + $0x40] sm:$0xff]   ;;  %v6502_v12 = vld [vmem:[%s10358_s1 + $0x178] sm:$0xff]  }
  0x58   : > { %5289 = vmatprep.subr.bf16.mxu1 %v6473_v49  ;;  %v6489_v1 = vld [vmem:[%s10358_s1 + $0xc8] sm:$0xff]   ;;  %v6493_v5 = vld [vmem:[%s10358_s1 + $0xc0] sm:$0xff]   ;;  %v6503_v13 = vld [vmem:[%s10358_s1 + $0x1f8] sm:$0xff]  }
  0x59   : > { %v6490_v2 = vld [vmem:[%s10358_s1 + $0x8] sm:$0xff]   ;;  %v6494_v6 = vld [vmem:[%s10358_s1] sm:$0xff]   ;;  %v6504_v14 = vld [vmem:[%s10358_s1 + $0x138] sm:$0xff]  }
  0x5a   : > { %5268 = vmatpush3.bf16.msra.mxu0 %v6474_v50  ;;  %v6491_v3 = vld [vmem:[%s10358_s1 + $0x88] sm:$0xff]   ;;  %v6495_v7 = vld [vmem:[%s10358_s1 + $0x80] sm:$0xff]   ;;  %v6505_v15 = vld [vmem:[%s10358_s1 + $0x1b8] sm:$0xff]  }
  0x5b   : > { %5290 = vmatpush3.bf16.msra.mxu1 %v6475_v51  ;;  %5269 = vmatprep.subr.bf16.mxu0 %v6476_v52  ;;  %v6496_v8 = vld [vmem:[%s7574_s29] ss:$100 sps:$4 sm:$0xff]   ;;  %v6499_v10 = vld [vmem:[%s7574_s29 + $0x8] ss:$100 sps:$4 sm:$0xff]   ;;  %v6506_v16 = vld [vmem:[%s10358_s1 + $0x170] sm:$0xff]  }
  0x5c   : > { %5291 = vmatprep.subr.bf16.mxu1 %v6477_v53  ;;  %v6498_v9 = vld [vmem:[%s7574_s29 + $0x4] ss:$100 sps:$4 sm:$0xff]   ;;  %v6501_v11 = vld [vmem:[%s7574_s29 + $0xc] ss:$100 sps:$4 sm:$0xff]   ;;  %v6518_v28 = vld [vmem:[%s10358_s1 + $0x158] sm:$0xff]  }
  0x5d   : > { %2195 = vmatprep.mubr.bf16.mxu0 %v6498_v9  ;;  %2236 = vmatprep.mubr.bf16.mxu1 %v6501_v11  ;;  %v6507_v17 = vld [vmem:[%s10358_s1 + $0x1f0] sm:$0xff]   ;;  %v6510_v20 = vld [vmem:[%s10358_s1 + $0x168] sm:$0xff]   ;;  %v6514_v24 = vld [vmem:[%s10358_s1 + $0x160] sm:$0xff]  }
  0x5e   : > { %5270 = vmatpush3.bf16.msra.mxu0 %v6478_v54  ;;  %v6508_v18 = vld [vmem:[%s10358_s1 + $0x130] sm:$0xff]   ;;  %v6511_v21 = vld [vmem:[%s10358_s1 + $0x1e8] sm:$0xff]   ;;  %v6515_v25 = vld [vmem:[%s10358_s1 + $0x1e0] sm:$0xff]  }
  0x5f   : > { %5292 = vmatpush3.bf16.msra.mxu1 %v6479_v55  ;;  %5271 = vmatprep.subr.bf16.mxu0 %v6480_v56  ;;  %v6509_v19 = vld [vmem:[%s10358_s1 + $0x1b0] sm:$0xff]   ;;  %v6512_v22 = vld [vmem:[%s10358_s1 + $0x128] sm:$0xff]   ;;  %v6516_v26 = vld [vmem:[%s10358_s1 + $0x120] sm:$0xff]  }
  0x60   : > { %5293 = vmatprep.subr.bf16.mxu1 %v6481_v57  ;;  %v6513_v23 = vld [vmem:[%s10358_s1 + $0x1a8] sm:$0xff]   ;;  %v6517_v27 = vld [vmem:[%s10358_s1 + $0x1a0] sm:$0xff]   ;;  %v6519_v29 = vld [vmem:[%s10358_s1 + $0x1d8] sm:$0xff]  }
  0x61   : > { %v6520_v30 = vld [vmem:[%s10358_s1 + $0x118] sm:$0xff]   ;;  %v6522_v32 = vld [vmem:[%s10358_s1 + $0x150] sm:$0xff]   ;;  %v6526_v36 = vld [vmem:[%s10358_s1 + $0x148] sm:$0xff]  }
  0x62   : > { %5272 = vmatpush3.bf16.msra.mxu0 %v6482_v58  ;;  %v6521_v31 = vld [vmem:[%s10358_s1 + $0x198] sm:$0xff]   ;;  %v6523_v33 = vld [vmem:[%s10358_s1 + $0x1d0] sm:$0xff]   ;;  %v6527_v37 = vld [vmem:[%s10358_s1 + $0x1c8] sm:$0xff]  }
  0x63   : > { %5294 = vmatpush3.bf16.msra.mxu1 %v6483_v59  ;;  %5273 = vmatprep.subr.bf16.mxu0 %v6484_v60  ;;  %v6524_v34 = vld [vmem:[%s10358_s1 + $0x110] sm:$0xff]   ;;  %v6528_v38 = vld [vmem:[%s10358_s1 + $0x108] sm:$0xff]   ;;  %v6530_v40 = vld [vmem:[%s10358_s1 + $0x140] sm:$0xff]  }
  0x64   : > { %5295 = vmatprep.subr.bf16.mxu1 %v6485_v61  ;;  %v6525_v35 = vld [vmem:[%s10358_s1 + $0x190] sm:$0xff]   ;;  %v6529_v39 = vld [vmem:[%s10358_s1 + $0x188] sm:$0xff]   ;;  %v6531_v41 = vld [vmem:[%s10358_s1 + $0x1c0] sm:$0xff]  }
  0x65   : > { %v6532_v42 = vld [vmem:[%s10358_s1 + $0x100] sm:$0xff]   ;;  %v6534_v44 = vld [vmem:[%s7574_s29 + $0x10] ss:$100 sps:$4 sm:$0xff]   ;;  %v6537_v46 = vld [vmem:[%s7574_s29 + $0x18] ss:$100 sps:$4 sm:$0xff]  }
  0x66   : > { %5274 = vmatpush3.bf16.msra.mxu0 %v6486_v62  ;;  %v6533_v43 = vld [vmem:[%s10358_s1 + $0x180] sm:$0xff]   ;;  %v6536_v45 = vld [vmem:[%s7574_s29 + $0x14] ss:$100 sps:$4 sm:$0xff]   ;;  %v6548_v56 = vld [vmem:[%s10358_s1 + $0x268] sm:$0xff]  }
  0x67   : > { %5296 = vmatpush3.bf16.msra.mxu1 %v6487_v63  ;;  %5275 = vmatprep.subr.bf16.mxu0 %v6488_v0  ;;  %v6539_v47 = vld [vmem:[%s7574_s29 + $0x1c] ss:$100 sps:$4 sm:$0xff]   ;;  %v6544_v52 = vld [vmem:[%s10358_s1 + $0x270] sm:$0xff]   ;;  %v6549_v57 = vld [vmem:[%s10358_s1 + $0x2e8] sm:$0xff]  }
  0x68   : > { %5297 = vmatprep.subr.bf16.mxu1 %v6489_v1  ;;  %v6540_v48 = vld [vmem:[%s10358_s1 + $0x278] sm:$0xff]   ;;  %v6545_v53 = vld [vmem:[%s10358_s1 + $0x2f0] sm:$0xff]   ;;  %v6550_v58 = vld [vmem:[%s10358_s1 + $0x228] sm:$0xff]  }
  0x69   : > { %v6541_v49 = vld [vmem:[%s10358_s1 + $0x2f8] sm:$0xff]   ;;  %v6546_v54 = vld [vmem:[%s10358_s1 + $0x230] sm:$0xff]   ;;  %v6551_v59 = vld [vmem:[%s10358_s1 + $0x2a8] sm:$0xff]  }
  0x6a   : > { %5276 = vmatpush3.bf16.msra.mxu0 %v6490_v2  ;;  %v6542_v50 = vld [vmem:[%s10358_s1 + $0x238] sm:$0xff]   ;;  %v6547_v55 = vld [vmem:[%s10358_s1 + $0x2b0] sm:$0xff]   ;;  %v6552_v60 = vld [vmem:[%s10358_s1 + $0x260] sm:$0xff]  }
  0x6b   : > { %5298 = vmatpush3.bf16.msra.mxu1 %v6491_v3  ;;  %5277 = vmatprep.subr.bf16.mxu0 %v6492_v4  ;;  %v6543_v51 = vld [vmem:[%s10358_s1 + $0x2b8] sm:$0xff]   ;;  %v6553_v61 = vld [vmem:[%s10358_s1 + $0x2e0] sm:$0xff]   ;;  %v6560_v4 = vld [vmem:[%s10358_s1 + $0x250] sm:$0xff]  }
  0x6c   : > { %5299 = vmatprep.subr.bf16.mxu1 %v6493_v5  ;;  %v6554_v62 = vld [vmem:[%s10358_s1 + $0x220] sm:$0xff]   ;;  %v6556_v0 = vld [vmem:[%s10358_s1 + $0x258] sm:$0xff]   ;;  %v6561_v5 = vld [vmem:[%s10358_s1 + $0x2d0] sm:$0xff]  }
  0x6d   : > { %v6555_v63 = vld [vmem:[%s10358_s1 + $0x2a0] sm:$0xff]   ;;  %v6557_v1 = vld [vmem:[%s10358_s1 + $0x2d8] sm:$0xff]   ;;  %v6565_v9 = vld [vmem:[%s10358_s1 + $0x2c8] sm:$0xff]  }
  0x6e   : > { %5278 = vmatpush3.bf16.msra.mxu0 %v6494_v6  ;;  %v6558_v2 = vld [vmem:[%s10358_s1 + $0x218] sm:$0xff]   ;;  %v6562_v6 = vld [vmem:[%s10358_s1 + $0x210] sm:$0xff]   ;;  %v6567_v11 = vld [vmem:[%s10358_s1 + $0x288] sm:$0xff]  }
  0x6f   : > { %5300 = vmatpush3.bf16.msra.mxu1 %v6495_v7  ;;  %5307 = vmatprep.subr.bf16.mxu0 %v6502_v12  ;;  %v6559_v3 = vld [vmem:[%s10358_s1 + $0x298] sm:$0xff]   ;;  %v6563_v7 = vld [vmem:[%s10358_s1 + $0x290] sm:$0xff]   ;;  %v6568_v12 = vld [vmem:[%s10358_s1 + $0x240] sm:$0xff]  }
  0x70   : > { %5329 = vmatprep.subr.bf16.mxu1 %v6503_v13  ;;  %v6569_v13 = vld [vmem:[%s10358_s1 + $0x2c0] sm:$0xff]  }
  0x71   : > { %2196 = vmatmul.mubr.bf16.vlgmr.msra.gmra.mxu0 %v6496_v8  ;;  %v6564_v8 = vld [vmem:[%s10358_s1 + $0x248] sm:$0xff]  }
  0x72   : > { %2237 = vmatmul.mubr.bf16.vlgmr.msra.gmra.mxu1 %v6499_v10  ;;  %5308 = vmatpush3.bf16.msra.mxu0 %v6504_v14  ;;  %v6566_v10 = vld [vmem:[%s10358_s1 + $0x208] sm:$0xff]   ;;  %v6570_v14 = vld [vmem:[%s10358_s1 + $0x200] sm:$0xff]  }
  0x73   : > { %5330 = vmatpush3.bf16.msra.mxu1 %v6505_v15  ;;  %5309 = vmatprep.subr.bf16.mxu0 %v6506_v16  ;;  %v6571_v15 = vld [vmem:[%s10358_s1 + $0x280] sm:$0xff]  }
  0x74   : > { %5331 = vmatprep.subr.bf16.mxu1 %v6507_v17  ;;  %2277 = vmatprep.mubr.bf16.mxu0 %v6536_v45  ;;  %v6572_v16 = vld [vmem:[%s7574_s29 + $0x20] ss:$100 sps:$4 sm:$0xff]   ;;  %v6603_v45 = vld [vmem:[%s10358_s1 + $0x3c8] sm:$0xff]  }
  0x75   : > { %2318 = vmatprep.mubr.bf16.mxu1 %v6539_v47  ;;  %v6574_v17 = vld [vmem:[%s7574_s29 + $0x24] ss:$100 sps:$4 sm:$0xff]  }
  0x76   : > { %5310 = vmatpush3.bf16.msra.mxu0 %v6508_v18  ;;  %v6575_v18 = vld [vmem:[%s7574_s29 + $0x28] ss:$100 sps:$4 sm:$0xff]  }
  0x77   : > { %5332 = vmatpush3.bf16.msra.mxu1 %v6509_v19  ;;  %5311 = vmatprep.subr.bf16.mxu0 %v6510_v20  ;;  %v6577_v19 = vld [vmem:[%s7574_s29 + $0x2c] ss:$100 sps:$4 sm:$0xff]   ;;  %v6578_v20 = vld [vmem:[%s10358_s1 + $0x378] sm:$0xff]  }
  0x78   : > { %5333 = vmatprep.subr.bf16.mxu1 %v6511_v21  ;;  %v6579_v21 = vld [vmem:[%s10358_s1 + $0x3f8] sm:$0xff]   ;;  %v6605_v47 = vld [vmem:[%s10358_s1 + $0x388] sm:$0xff]  }
  0x7a   : > { %5312 = vmatpush3.bf16.msra.mxu0 %v6512_v22  ;;  %v6580_v22 = vld [vmem:[%s10358_s1 + $0x338] sm:$0xff]  }
  0x7b   : > { %5334 = vmatpush3.bf16.msra.mxu1 %v6513_v23  ;;  %5313 = vmatprep.subr.bf16.mxu0 %v6514_v24  ;;  %v6581_v23 = vld [vmem:[%s10358_s1 + $0x3b8] sm:$0xff]   ;;  %v6582_v24 = vld [vmem:[%s10358_s1 + $0x370] sm:$0xff]  }
  0x7c   : > { %5335 = vmatprep.subr.bf16.mxu1 %v6515_v25  ;;  %v6583_v25 = vld [vmem:[%s10358_s1 + $0x3f0] sm:$0xff]  }
  0x7e   : > { %5314 = vmatpush3.bf16.msra.mxu0 %v6516_v26  ;;  %v6584_v26 = vld [vmem:[%s10358_s1 + $0x330] sm:$0xff]  }
  0x7f   : > { %5336 = vmatpush3.bf16.msra.mxu1 %v6517_v27  ;;  %5315 = vmatprep.subr.bf16.mxu0 %v6518_v28  ;;  %v6585_v27 = vld [vmem:[%s10358_s1 + $0x3b0] sm:$0xff]   ;;  %v6586_v28 = vld [vmem:[%s10358_s1 + $0x368] sm:$0xff]  }
  0x80   : > { %5337 = vmatprep.subr.bf16.mxu1 %v6519_v29  ;;  %v6587_v29 = vld [vmem:[%s10358_s1 + $0x3e8] sm:$0xff]  }
  0x82   : > { %5316 = vmatpush3.bf16.msra.mxu0 %v6520_v30  ;;  %v6588_v30 = vld [vmem:[%s10358_s1 + $0x328] sm:$0xff]  }
  0x83   : > { %5338 = vmatpush3.bf16.msra.mxu1 %v6521_v31  ;;  %5317 = vmatprep.subr.bf16.mxu0 %v6522_v32  ;;  %v6589_v31 = vld [vmem:[%s10358_s1 + $0x3a8] sm:$0xff]   ;;  %v6590_v32 = vld [vmem:[%s10358_s1 + $0x360] sm:$0xff]  }
  0x84   : > { %5339 = vmatprep.subr.bf16.mxu1 %v6523_v33  ;;  %v6591_v33 = vld [vmem:[%s10358_s1 + $0x3e0] sm:$0xff]  }
  0x86   : > { %5318 = vmatpush3.bf16.msra.mxu0 %v6524_v34  ;;  %v6592_v34 = vld [vmem:[%s10358_s1 + $0x320] sm:$0xff]  }
  0x87   : > { %5340 = vmatpush3.bf16.msra.mxu1 %v6525_v35  ;;  %5319 = vmatprep.subr.bf16.mxu0 %v6526_v36  ;;  %v6593_v35 = vld [vmem:[%s10358_s1 + $0x3a0] sm:$0xff]   ;;  %v6594_v36 = vld [vmem:[%s10358_s1 + $0x358] sm:$0xff]  }
  0x88   : > { %5341 = vmatprep.subr.bf16.mxu1 %v6527_v37  ;;  %v6595_v37 = vld [vmem:[%s10358_s1 + $0x3d8] sm:$0xff]  }
  0x8a   : > { %5320 = vmatpush3.bf16.msra.mxu0 %v6528_v38  ;;  %v6596_v38 = vld [vmem:[%s10358_s1 + $0x318] sm:$0xff]  }
  0x8b   : > { %5342 = vmatpush3.bf16.msra.mxu1 %v6529_v39  ;;  %5321 = vmatprep.subr.bf16.mxu0 %v6530_v40  ;;  %v6597_v39 = vld [vmem:[%s10358_s1 + $0x398] sm:$0xff]   ;;  %v6598_v40 = vld [vmem:[%s10358_s1 + $0x350] sm:$0xff]  }
  0x8c   : > { %5343 = vmatprep.subr.bf16.mxu1 %v6531_v41  ;;  %v6599_v41 = vld [vmem:[%s10358_s1 + $0x3d0] sm:$0xff]  }
  0x8e   : > { %5322 = vmatpush3.bf16.msra.mxu0 %v6532_v42  ;;  %v6600_v42 = vld [vmem:[%s10358_s1 + $0x310] sm:$0xff]  }
  0x8f   : > { %5344 = vmatpush3.bf16.msra.mxu1 %v6533_v43  ;;  %5351 = vmatprep.subr.bf16.mxu0 %v6540_v48  ;;  %v6601_v43 = vld [vmem:[%s10358_s1 + $0x390] sm:$0xff]   ;;  %v6606_v48 = vld [vmem:[%s10358_s1 + $0x340] sm:$0xff]  }
  0x90   : > { %5373 = vmatprep.subr.bf16.mxu1 %v6541_v49  ;;  %v6607_v49 = vld [vmem:[%s10358_s1 + $0x3c0] sm:$0xff]  }
  0x91   : > { %2278 = vmatmul.mubr.bf16.vlgmr.msra.gmra.mxu0 %v6534_v44  ;;  %v6602_v44 = vld [vmem:[%s10358_s1 + $0x348] sm:$0xff]  }
  0x92   : > { %2319 = vmatmul.mubr.bf16.vlgmr.msra.gmra.mxu1 %v6537_v46  ;;  %5352 = vmatpush3.bf16.msra.mxu0 %v6542_v50  ;;  %v6604_v46 = vld [vmem:[%s10358_s1 + $0x308] sm:$0xff]   ;;  %v6608_v50 = vld [vmem:[%s10358_s1 + $0x300] sm:$0xff]  }
  0x93   : > { %5374 = vmatpush3.bf16.msra.mxu1 %v6543_v51  ;;  %5353 = vmatprep.subr.bf16.mxu0 %v6544_v52  ;;  %v6609_v51 = vld [vmem:[%s10358_s1 + $0x380] sm:$0xff]   ;;  %v6610_v52 = vld [vmem:[%s7574_s29 + $0x30] ss:$100 sps:$4 sm:$0xff]  }
  0x94   : > { %5375 = vmatprep.subr.bf16.mxu1 %v6545_v53  ;;  %2359 = vmatprep.mubr.bf16.mxu0 %v6574_v17  ;;  %v6612_v53 = vld [vmem:[%s7574_s29 + $0x34] ss:$100 sps:$4 sm:$0xff]   ;;  %v6641_v17 = vld [vmem:[%s10358_s1 + $0x4c8] sm:$0xff]  }
  0x95   : > { %2400 = vmatprep.mubr.bf16.mxu1 %v6577_v19  ;;  %v6643_v19 = vld [vmem:[%s10358_s1 + $0x488] sm:$0xff]  }
  0x96   : > { %5354 = vmatpush3.bf16.msra.mxu0 %v6546_v54  ;;  %v6613_v54 = vld [vmem:[%s7574_s29 + $0x38] ss:$100 sps:$4 sm:$0xff]  }
  0x97   : > { %5376 = vmatpush3.bf16.msra.mxu1 %v6547_v55  ;;  %5355 = vmatprep.subr.bf16.mxu0 %v6548_v56  ;;  %v6615_v55 = vld [vmem:[%s7574_s29 + $0x3c] ss:$100 sps:$4 sm:$0xff]  }
  0x98   : > { %5377 = vmatprep.subr.bf16.mxu1 %v6549_v57  ;;  %v6616_v56 = vld [vmem:[%s10358_s1 + $0x478] sm:$0xff]  }
  0x99   : > { %v6617_v57 = vld [vmem:[%s10358_s1 + $0x4f8] sm:$0xff]  }
  0x9a   : > { %5356 = vmatpush3.bf16.msra.mxu0 %v6550_v58  ;;  %v6618_v58 = vld [vmem:[%s10358_s1 + $0x438] sm:$0xff]  }
  0x9b   : > { %5378 = vmatpush3.bf16.msra.mxu1 %v6551_v59  ;;  %5357 = vmatprep.subr.bf16.mxu0 %v6552_v60  ;;  %v6619_v59 = vld [vmem:[%s10358_s1 + $0x4b8] sm:$0xff]   ;;  %v6620_v60 = vld [vmem:[%s10358_s1 + $0x470] sm:$0xff]  }
  0x9c   : > { %5379 = vmatprep.subr.bf16.mxu1 %v6553_v61  ;;  %v6621_v61 = vld [vmem:[%s10358_s1 + $0x4f0] sm:$0xff]  }
  0x9e   : > { %5358 = vmatpush3.bf16.msra.mxu0 %v6554_v62  ;;  %v6622_v62 = vld [vmem:[%s10358_s1 + $0x430] sm:$0xff]  }
  0x9f   : > { %5380 = vmatpush3.bf16.msra.mxu1 %v6555_v63  ;;  %5359 = vmatprep.subr.bf16.mxu0 %v6556_v0  ;;  %v6623_v63 = vld [vmem:[%s10358_s1 + $0x4b0] sm:$0xff]   ;;  %v6624_v0 = vld [vmem:[%s10358_s1 + $0x468] sm:$0xff]  }
  0xa0   : > { %5381 = vmatprep.subr.bf16.mxu1 %v6557_v1  ;;  %v6625_v1 = vld [vmem:[%s10358_s1 + $0x4e8] sm:$0xff]  }
  0xa2   : > { %5360 = vmatpush3.bf16.msra.mxu0 %v6558_v2  ;;  %v6626_v2 = vld [vmem:[%s10358_s1 + $0x428] sm:$0xff]  }
  0xa3   : > { %5382 = vmatpush3.bf16.msra.mxu1 %v6559_v3  ;;  %5361 = vmatprep.subr.bf16.mxu0 %v6560_v4  ;;  %v6627_v3 = vld [vmem:[%s10358_s1 + $0x4a8] sm:$0xff]   ;;  %v6628_v4 = vld [vmem:[%s10358_s1 + $0x460] sm:$0xff]  }
  0xa4   : > { %5383 = vmatprep.subr.bf16.mxu1 %v6561_v5  ;;  %v6629_v5 = vld [vmem:[%s10358_s1 + $0x4e0] sm:$0xff]  }
  0xa6   : > { %5362 = vmatpush3.bf16.msra.mxu0 %v6562_v6  ;;  %v6630_v6 = vld [vmem:[%s10358_s1 + $0x420] sm:$0xff]  }
  0xa7   : > { %5384 = vmatpush3.bf16.msra.mxu1 %v6563_v7  ;;  %5363 = vmatprep.subr.bf16.mxu0 %v6564_v8  ;;  %v6631_v7 = vld [vmem:[%s10358_s1 + $0x4a0] sm:$0xff]   ;;  %v6632_v8 = vld [vmem:[%s10358_s1 + $0x458] sm:$0xff]  }
  0xa8   : > { %5385 = vmatprep.subr.bf16.mxu1 %v6565_v9  ;;  %v6633_v9 = vld [vmem:[%s10358_s1 + $0x4d8] sm:$0xff]  }
  0xaa   : > { %5364 = vmatpush3.bf16.msra.mxu0 %v6566_v10  ;;  %v6634_v10 = vld [vmem:[%s10358_s1 + $0x418] sm:$0xff]  }
  0xab   : > { %5386 = vmatpush3.bf16.msra.mxu1 %v6567_v11  ;;  %5365 = vmatprep.subr.bf16.mxu0 %v6568_v12  ;;  %v6635_v11 = vld [vmem:[%s10358_s1 + $0x498] sm:$0xff]   ;;  %v6636_v12 = vld [vmem:[%s10358_s1 + $0x450] sm:$0xff]  }
  0xac   : > { %5387 = vmatprep.subr.bf16.mxu1 %v6569_v13  ;;  %v6637_v13 = vld [vmem:[%s10358_s1 + $0x4d0] sm:$0xff]  }
  0xae   : > { %5366 = vmatpush3.bf16.msra.mxu0 %v6570_v14  ;;  %v6638_v14 = vld [vmem:[%s10358_s1 + $0x410] sm:$0xff]  }
  0xaf   : > { %5388 = vmatpush3.bf16.msra.mxu1 %v6571_v15  ;;  %5395 = vmatprep.subr.bf16.mxu0 %v6578_v20  ;;  %v6639_v15 = vld [vmem:[%s10358_s1 + $0x490] sm:$0xff]   ;;  %v6644_v20 = vld [vmem:[%s10358_s1 + $0x440] sm:$0xff]  }
  0xb0   : > { %5417 = vmatprep.subr.bf16.mxu1 %v6579_v21  ;;  %v6645_v21 = vld [vmem:[%s10358_s1 + $0x4c0] sm:$0xff]  }
  0xb1   : > { %2360 = vmatmul.mubr.bf16.vlgmr.msra.gmra.mxu0 %v6572_v16  ;;  %v6640_v16 = vld [vmem:[%s10358_s1 + $0x448] sm:$0xff]  }
  0xb2   : > { %2401 = vmatmul.mubr.bf16.vlgmr.msra.gmra.mxu1 %v6575_v18  ;;  %5396 = vmatpush3.bf16.msra.mxu0 %v6580_v22  ;;  %v6642_v18 = vld [vmem:[%s10358_s1 + $0x408] sm:$0xff]   ;;  %v6646_v22 = vld [vmem:[%s10358_s1 + $0x400] sm:$0xff]  }
  0xb3   : > { %5418 = vmatpush3.bf16.msra.mxu1 %v6581_v23  ;;  %5397 = vmatprep.subr.bf16.mxu0 %v6582_v24  ;;  %v6647_v23 = vld [vmem:[%s10358_s1 + $0x480] sm:$0xff]  }
  0xb4   : > { %5419 = vmatprep.subr.bf16.mxu1 %v6583_v25  ;;  %2441 = vmatprep.mubr.bf16.mxu0 %v6612_v53  ;;  %v6648_v24 = vld [vmem:[%s7574_s29 + $0x40] ss:$100 sps:$4 sm:$0xff]   ;;  %v8099_v53 = vld [vmem:[%s10358_s1 + $0x5c8] sm:$0xff]  }
  0xb5   : > { %2482 = vmatprep.mubr.bf16.mxu1 %v6615_v55  ;;  %v6650_v25 = vld [vmem:[%s7574_s29 + $0x44] ss:$100 sps:$4 sm:$0xff]  }
  0xb6   : > { %5398 = vmatpush3.bf16.msra.mxu0 %v6584_v26  ;;  %v6651_v26 = vld [vmem:[%s7574_s29 + $0x48] ss:$100 sps:$4 sm:$0xff]  }
  0xb7   : > { %5420 = vmatpush3.bf16.msra.mxu1 %v6585_v27  ;;  %5399 = vmatprep.subr.bf16.mxu0 %v6586_v28  ;;  %v6653_v27 = vld [vmem:[%s7574_s29 + $0x4c] ss:$100 sps:$4 sm:$0xff]   ;;  %v7983_v28 = vld [vmem:[%s10358_s1 + $0x578] sm:$0xff]  }
  0xb8   : > { %5421 = vmatprep.subr.bf16.mxu1 %v6587_v29  ;;  %v6655_v29 = vld [vmem:[%s10358_s1 + $0x5f8] sm:$0xff]   ;;  %v8111_v55 = vld [vmem:[%s10358_s1 + $0x588] sm:$0xff]  }
  0xba   : > { %5400 = vmatpush3.bf16.msra.mxu0 %v6588_v30  ;;  %v7992_v30 = vld [vmem:[%s10358_s1 + $0x538] sm:$0xff]  }
  0xbb   : > { %5422 = vmatpush3.bf16.msra.mxu1 %v6589_v31  ;;  %5401 = vmatprep.subr.bf16.mxu0 %v6590_v32  ;;  %v6657_v31 = vld [vmem:[%s10358_s1 + $0x5b8] sm:$0xff]   ;;  %v8001_v32 = vld [vmem:[%s10358_s1 + $0x570] sm:$0xff]  }
  0xbc   : > { %5423 = vmatprep.subr.bf16.mxu1 %v6591_v33  ;;  %v6659_v33 = vld [vmem:[%s10358_s1 + $0x5f0] sm:$0xff]  }
  0xbe   : > { %5402 = vmatpush3.bf16.msra.mxu0 %v6592_v34  ;;  %v8010_v34 = vld [vmem:[%s10358_s1 + $0x530] sm:$0xff]  }
  0xbf   : > { %5424 = vmatpush3.bf16.msra.mxu1 %v6593_v35  ;;  %5403 = vmatprep.subr.bf16.mxu0 %v6594_v36  ;;  %v6661_v35 = vld [vmem:[%s10358_s1 + $0x5b0] sm:$0xff]   ;;  %v8019_v36 = vld [vmem:[%s10358_s1 + $0x568] sm:$0xff]  }
  0xc0   : > { %5425 = vmatprep.subr.bf16.mxu1 %v6595_v37  ;;  %v6663_v37 = vld [vmem:[%s10358_s1 + $0x5e8] sm:$0xff]  }
  0xc2   : > { %5404 = vmatpush3.bf16.msra.mxu0 %v6596_v38  ;;  %v8028_v38 = vld [vmem:[%s10358_s1 + $0x528] sm:$0xff]  }
  0xc3   : > { %5426 = vmatpush3.bf16.msra.mxu1 %v6597_v39  ;;  %5405 = vmatprep.subr.bf16.mxu0 %v6598_v40  ;;  %v6665_v39 = vld [vmem:[%s10358_s1 + $0x5a8] sm:$0xff]   ;;  %v8037_v40 = vld [vmem:[%s10358_s1 + $0x560] sm:$0xff]  }
  0xc4   : > { %5427 = vmatprep.subr.bf16.mxu1 %v6599_v41  ;;  %v6667_v41 = vld [vmem:[%s10358_s1 + $0x5e0] sm:$0xff]  }
  0xc6   : > { %5406 = vmatpush3.bf16.msra.mxu0 %v6600_v42  ;;  %v8046_v42 = vld [vmem:[%s10358_s1 + $0x520] sm:$0xff]  }
  0xc7   : > { %5428 = vmatpush3.bf16.msra.mxu1 %v6601_v43  ;;  %5407 = vmatprep.subr.bf16.mxu0 %v6602_v44  ;;  %v6669_v43 = vld [vmem:[%s10358_s1 + $0x5a0] sm:$0xff]   ;;  %v8055_v44 = vld [vmem:[%s10358_s1 + $0x558] sm:$0xff]  }
  0xc8   : > { %5429 = vmatprep.subr.bf16.mxu1 %v6603_v45  ;;  %v6671_v45 = vld [vmem:[%s10358_s1 + $0x5d8] sm:$0xff]  }
  0xca   : > { %5408 = vmatpush3.bf16.msra.mxu0 %v6604_v46  ;;  %v8064_v46 = vld [vmem:[%s10358_s1 + $0x518] sm:$0xff]  }
  0xcb   : > { %5430 = vmatpush3.bf16.msra.mxu1 %v6605_v47  ;;  %5409 = vmatprep.subr.bf16.mxu0 %v6606_v48  ;;  %v6673_v47 = vld [vmem:[%s10358_s1 + $0x598] sm:$0xff]   ;;  %v8073_v48 = vld [vmem:[%s10358_s1 + $0x550] sm:$0xff]  }
  0xcc   : > { %5431 = vmatprep.subr.bf16.mxu1 %v6607_v49  ;;  %v6675_v49 = vld [vmem:[%s10358_s1 + $0x5d0] sm:$0xff]  }
  0xce   : > { %5410 = vmatpush3.bf16.msra.mxu0 %v6608_v50  ;;  %v8082_v50 = vld [vmem:[%s10358_s1 + $0x510] sm:$0xff]  }
  0xcf   : > { %5432 = vmatpush3.bf16.msra.mxu1 %v6609_v51  ;;  %5439 = vmatprep.subr.bf16.mxu0 %v6616_v56  ;;  %v8087_v51 = vld [vmem:[%s10358_s1 + $0x590] sm:$0xff]   ;;  %v8117_v56 = vld [vmem:[%s10358_s1 + $0x540] sm:$0xff]  }
  0xd0   : > { %5461 = vmatprep.subr.bf16.mxu1 %v6617_v57  ;;  %v8123_v57 = vld [vmem:[%s10358_s1 + $0x5c0] sm:$0xff]  }
  0xd1   : > { %2442 = vmatmul.mubr.bf16.vlgmr.msra.gmra.mxu0 %v6610_v52  ;;  %v8093_v52 = vld [vmem:[%s10358_s1 + $0x548] sm:$0xff]  }
  0xd2   : > { %2483 = vmatmul.mubr.bf16.vlgmr.msra.gmra.mxu1 %v6613_v54  ;;  %5440 = vmatpush3.bf16.msra.mxu0 %v6618_v58  ;;  %v8105_v54 = vld [vmem:[%s10358_s1 + $0x508] sm:$0xff]   ;;  %v8129_v58 = vld [vmem:[%s10358_s1 + $0x500] sm:$0xff]  }
  0xd3   : > { %5462 = vmatpush3.bf16.msra.mxu1 %v6619_v59  ;;  %5441 = vmatprep.subr.bf16.mxu0 %v6620_v60  ;;  %v8135_v59 = vld [vmem:[%s10358_s1 + $0x580] sm:$0xff]   ;;  %v6686_v60 = vld [vmem:[%s7574_s29 + $0x50] ss:$100 sps:$4 sm:$0xff]  }
  0xd4   : > { %5463 = vmatprep.subr.bf16.mxu1 %v6621_v61  ;;  %2523 = vmatprep.mubr.bf16.mxu0 %v6650_v25  ;;  %v6688_v61 = vld [vmem:[%s7574_s29 + $0x54] ss:$100 sps:$4 sm:$0xff]  }
  0xd5   : > { %2564 = vmatprep.mubr.bf16.mxu1 %v6653_v27  ;;  %v8275_v27 = vld [vmem:[%s10358_s1 + $0x600] sm:$0xff]  }
  0xd6   : > { %5442 = vmatpush3.bf16.msra.mxu0 %v6622_v62  ;;  %v6689_v62 = vld [vmem:[%s7574_s29 + $0x58] ss:$100 sps:$4 sm:$0xff]  }
  0xd7   : > { %5464 = vmatpush3.bf16.msra.mxu1 %v6623_v63  ;;  %5443 = vmatprep.subr.bf16.mxu0 %v6624_v0  ;;  %v6691_v63 = vld [vmem:[%s7574_s29 + $0x5c] ss:$100 sps:$4 sm:$0xff]   ;;  %v10361_v0 = vmov 0.0  }
  0xd8   : > { %5465 = vmatprep.subr.bf16.mxu1 %v6625_v1  ;;  %v8147_v1 = vld [vmem:[%s10358_s1 + $0x78] sm:$0xff]  }
  0xda   : > { %5444 = vmatpush3.bf16.msra.mxu0 %v6626_v2  ;;  %v8153_v2 = vld [vmem:[%s10358_s1 + $0x638] sm:$0xff]  }
  0xdb   : > { %5466 = vmatpush3.bf16.msra.mxu1 %v6627_v3  ;;  %5445 = vmatprep.subr.bf16.mxu0 %v6628_v4  ;;  %v8159_v3 = vld [vmem:[%s10358_s1 + $0x630] sm:$0xff]   ;;  %v8164_v4 = vld [vmem:[%s10358_s1 + $0x38] sm:$0xff]  }
  0xdc   : > { %5467 = vmatprep.subr.bf16.mxu1 %v6629_v5  ;;  %v8171_v5 = vld [vmem:[%s10358_s1 + $0x70] sm:$0xff]  }
  0xde   : > { %5446 = vmatpush3.bf16.msra.mxu0 %v6630_v6  ;;  %v8180_v6 = vld [vmem:[%s10358_s1 + $0x628] sm:$0xff]  }
  0xdf   : > { %5468 = vmatpush3.bf16.msra.mxu1 %v6631_v7  ;;  %5447 = vmatprep.subr.bf16.mxu0 %v6632_v8  ;;  %v8185_v7 = vld [vmem:[%s10358_s1 + $0x30] sm:$0xff]   ;;  %v8192_v8 = vld [vmem:[%s10358_s1 + $0x68] sm:$0xff]  }
  0xe0   : > { %5469 = vmatprep.subr.bf16.mxu1 %v6633_v9  ;;  %v8198_v9 = vld [vmem:[%s10358_s1 + $0x620] sm:$0xff]  }
  0xe2   : > { %5448 = vmatpush3.bf16.msra.mxu0 %v6634_v10  ;;  %v6703_v10 = vld [vmem:[%s7574_s29 + $0xcc] ss:$100 sps:$4 sm:$0xff]  }
  0xe3   : > { %5470 = vmatpush3.bf16.msra.mxu1 %v6635_v11  ;;  %5449 = vmatprep.subr.bf16.mxu0 %v6636_v12  ;;  %v8205_v11 = vld [vmem:[%s10358_s1 + $0x28] sm:$0xff]   ;;  %v8212_v12 = vld [vmem:[%s10358_s1 + $0x60] sm:$0xff]  }
  0xe4   : > { %5471 = vmatprep.subr.bf16.mxu1 %v6637_v13  ;;  %v8219_v13 = vld [vmem:[%s10358_s1 + $0x618] sm:$0xff]  }
  0xe6   : > { %5450 = vmatpush3.bf16.msra.mxu0 %v6638_v14  ;;  %v8224_v14 = vld [vmem:[%s10358_s1 + $0x20] sm:$0xff]  }
  0xe7   : > { %5472 = vmatpush3.bf16.msra.mxu1 %v6639_v15  ;;  %5451 = vmatprep.subr.bf16.mxu0 %v6640_v16  ;;  %v8231_v15 = vld [vmem:[%s10358_s1 + $0x58] sm:$0xff]   ;;  %v8238_v16 = vld [vmem:[%s10358_s1 + $0x610] sm:$0xff]  }
  0xe8   : > { %5473 = vmatprep.subr.bf16.mxu1 %v6641_v17  ;;  %v8243_v17 = vld [vmem:[%s10358_s1 + $0x18] sm:$0xff]  }
  0xe9   : > { %10488 = vst [vmem:[#allocation3_spill] sm:$0xff] %v8243_v17 }
  0xea   : > { %5452 = vmatpush3.bf16.msra.mxu0 %v6642_v18  ;;  %v8250_v18 = vld [vmem:[%s10358_s1 + $0x50] sm:$0xff]  }
  0xeb   : > { %5474 = vmatpush3.bf16.msra.mxu1 %v6643_v19  ;;  %5453 = vmatprep.subr.bf16.mxu0 %v6644_v20  ;;  %10489 = vst [vmem:[#allocation4_spill] sm:$0xff] %v8250_v18  ;;  %v8256_v19 = vld [vmem:[%s10358_s1 + $0x608] sm:$0xff]  }
  0xec   : > { %5475 = vmatprep.subr.bf16.mxu1 %v6645_v21 }
  0xee   : > { %5454 = vmatpush3.bf16.msra.mxu0 %v6646_v22 }
  0xef   : > { %5476 = vmatpush3.bf16.msra.mxu1 %v6647_v23  ;;  %5483 = vmatprep.subr.bf16.mxu0 %v7983_v28  ;;  %v8262_v23 = vld [vmem:[%s10358_s1 + $0x10] sm:$0xff]  }
  0xf0   : > { %5505 = vmatprep.subr.bf16.mxu1 %v6655_v29  ;;  %10490 = vst [vmem:[#allocation5_spill] sm:$0xff] %v8262_v23 }
  0xf1   : > { %2524 = vmatmul.mubr.bf16.vlgmr.msra.gmra.mxu0 %v6648_v24 }
  0xf2   : > { %2565 = vmatmul.mubr.bf16.vlgmr.msra.gmra.mxu1 %v6651_v26  ;;  %5484 = vmatpush3.bf16.msra.mxu0 %v7992_v30  ;;  %v8269_v26 = vld [vmem:[%s10358_s1 + $0x48] sm:$0xff]  }
  0xf3   : > { %5506 = vmatpush3.bf16.msra.mxu1 %v6657_v31  ;;  %5485 = vmatprep.subr.bf16.mxu0 %v8001_v32  ;;  %10491 = vst [vmem:[#allocation6_spill] sm:$0xff] %v8269_v26 }
  0xf4   : > { %5507 = vmatprep.subr.bf16.mxu1 %v6659_v33  ;;  %2605 = vmatprep.mubr.bf16.mxu0 %v6688_v61 }
  0xf5   : > { %2646 = vmatprep.mubr.bf16.mxu1 %v6691_v63  ;;  %v8307_v63 = vld [vmem:[%s10358_s1 + $0xf8] sm:$0xff]  }
  0xf6   : > { %5486 = vmatpush3.bf16.msra.mxu0 %v8010_v34 }
  0xf7   : > { %5508 = vmatpush3.bf16.msra.mxu1 %v6661_v35  ;;  %5487 = vmatprep.subr.bf16.mxu0 %v8019_v36 }
  0xf8   : > { %5509 = vmatprep.subr.bf16.mxu1 %v6663_v37 }
  0xfa   : > { %5488 = vmatpush3.bf16.msra.mxu0 %v8028_v38 }
  0xfb   : > { %5510 = vmatpush3.bf16.msra.mxu1 %v6665_v39  ;;  %5489 = vmatprep.subr.bf16.mxu0 %v8037_v40  ;;  %v8283_v39 = vld [vmem:[%s10358_s1 + $0x8] sm:$0xff]  }
  0xfc   : > { %5511 = vmatprep.subr.bf16.mxu1 %v6667_v41  ;;  %10492 = vst [vmem:[#allocation7_spill] sm:$0xff] %v8283_v39  ;;  %v6700_v41 = vld [vmem:[%s7574_s29 + $0x60] ss:$100 sps:$4 sm:$0xff]  }
  0xfe   : > { %5490 = vmatpush3.bf16.msra.mxu0 %v8046_v42 }
  0xff   : > { %5512 = vmatpush3.bf16.msra.mxu1 %v6669_v43  ;;  %5491 = vmatprep.subr.bf16.mxu0 %v8055_v44 }
 0x100   : > { %5513 = vmatprep.subr.bf16.mxu1 %v6671_v45 }
 0x102   : > { %5492 = vmatpush3.bf16.msra.mxu0 %v8064_v46 }
 0x103   : > { %5514 = vmatpush3.bf16.msra.mxu1 %v6673_v47  ;;  %5493 = vmatprep.subr.bf16.mxu0 %v8073_v48  ;;  %v8291_v47 = vld [vmem:[%s10358_s1 + $0x40] sm:$0xff]  }
 0x104   : > { %5515 = vmatprep.subr.bf16.mxu1 %v6675_v49  ;;  %10493 = vst [vmem:[#allocation8_spill] sm:$0xff] %v8291_v47  ;;  %v6701_v49 = vld [vmem:[%s7574_s29 + $0xc8] ss:$100 sps:$4 sm:$0xff]  }
 0x106   : > { %5494 = vmatpush3.bf16.msra.mxu0 %v8082_v50 }
 0x107   : > { %5516 = vmatpush3.bf16.msra.mxu1 %v8087_v51  ;;  %5495 = vmatprep.subr.bf16.mxu0 %v8093_v52 }
 0x108   : > { %5517 = vmatprep.subr.bf16.mxu1 %v8099_v53 }
 0x10a   : > { %5496 = vmatpush3.bf16.msra.mxu0 %v8105_v54 }
 0x10b   : > { %5518 = vmatpush3.bf16.msra.mxu1 %v8111_v55  ;;  %5497 = vmatprep.subr.bf16.mxu0 %v8117_v56 }
 0x10c   : > { %5519 = vmatprep.subr.bf16.mxu1 %v8123_v57 }
 0x10e   : > { %5498 = vmatpush3.bf16.msra.mxu0 %v8129_v58 }
 0x10f   : > { %5520 = vmatpush3.bf16.msra.mxu1 %v8135_v59  ;;  %6355 = vmatprep.subr.bf16.mxu0 %v10361_v0 }
 0x110   : > { %5536 = vmatprep.subr.bf16.mxu1 %v8147_v1 }
 0x111   : > { %2606 = vmatmul.mubr.bf16.vlgmr.msra.gmra.mxu0 %v6686_v60 }
 0x112   : > { %2647 = vmatmul.mubr.bf16.vlgmr.msra.gmra.mxu1 %v6689_v62  ;;  %6356 = vmatpush3.bf16.msra.mxu0 %v8153_v2  ;;  %v8301_v62 = vld [vmem:[%s10358_s1] sm:$0xff]  }
 0x113   : > { %5537 = vmatpush3.bf16.msra.mxu1 %v8164_v4  ;;  %6357 = vmatprep.subr.bf16.mxu0 %v10361_v0  ;;  %10494 = vst [vmem:[#allocation9_spill] sm:$0xff] %v8301_v62 }
 0x114   : > { %5538 = vmatprep.subr.bf16.mxu1 %v8171_v5  ;;  %6371 = vmatprep.mubr.msk.bf16.mxu0 %vm7208_vm0, %v10361_v0 }
 0x115   : > { %2881 = vmatprep.mubr.bf16.mxu1 %v6703_v10  ;;  %v8313_v10 = vld [vmem:[%s10358_s1 + $0x178] sm:$0xff]  }
 0x116   : > { %6358 = vmatpush3.bf16.msra.mxu0 %v8159_v3  ;;  %10495 = vst [vmem:[#allocation10_spill] sm:$0xff] %v8313_v10 }
 0x117   : > { %5539 = vmatpush3.bf16.msra.mxu1 %v8185_v7  ;;  %6359 = vmatprep.subr.bf16.mxu0 %v10361_v0 }
 0x118   : > { %5540 = vmatprep.subr.bf16.mxu1 %v8192_v8 }
 0x11a   : > { %6360 = vmatpush3.bf16.msra.mxu0 %v8180_v6 }
 0x11b   : > { %5541 = vmatpush3.bf16.msra.mxu1 %v8205_v11  ;;  %6361 = vmatprep.subr.bf16.mxu0 %v10361_v0 }
 0x11c   : > { %5542 = vmatprep.subr.bf16.mxu1 %v8212_v12 }
 0x11e   : > { %6362 = vmatpush3.bf16.msra.mxu0 %v8198_v9 }
 0x11f   : > { %5543 = vmatpush3.bf16.msra.mxu1 %v8224_v14  ;;  %6363 = vmatprep.subr.bf16.mxu0 %v10361_v0 }
 0x120   : > { %5544 = vmatprep.subr.bf16.mxu1 %v8231_v15 }
 0x122   : > { %6364 = vmatpush3.bf16.msra.mxu0 %v8219_v13 }
 0x123   : > { %5545 = vmatpush3.bf16.msra.mxu1 %v8243_v17  ;;  %6365 = vmatprep.subr.bf16.mxu0 %v10361_v0 }
 0x124   : > { %5546 = vmatprep.subr.bf16.mxu1 %v8250_v18 }
 0x126   : > { %6366 = vmatpush3.bf16.msra.mxu0 %v8238_v16 }
 0x127   : > { %5547 = vmatpush3.bf16.msra.mxu1 %v8262_v23  ;;  %6367 = vmatprep.subr.bf16.mxu0 %v10361_v0 }
 0x128   : > { %5548 = vmatprep.subr.bf16.mxu1 %v8269_v26  ;;  %v8471_v26 = vld [vmem:[%s10358_s1 + $0x108] sm:$0xff]  }
 0x129   : > { %10513 = vst [vmem:[#allocation28_spill] sm:$0xff] %v8471_v26 }
 0x12a   : > { %6368 = vmatpush3.bf16.msra.mxu0 %v8256_v19 }
 0x12b   : > { %5549 = vmatpush3.bf16.msra.mxu1 %v8283_v39  ;;  %6369 = vmatprep.subr.bf16.mxu0 %v10361_v0  ;;  %v8405_v0 = vld [vmem:[%s10358_s1 + $0xd8] sm:$0xff]  }
 0x12c   : > { %5550 = vmatprep.subr.bf16.mxu1 %v8291_v47 }
 0x12e   : > { %6370 = vmatpush3.bf16.msra.mxu0 %v8275_v27 }
 0x12f   : > { %5551 = vmatpush3.bf16.msra.mxu1 %v8301_v62  ;;  %5558 = vmatprep.subr.bf16.mxu0 %v8307_v63 }
 0x130   : > { %5580 = vmatprep.subr.bf16.mxu1 %v8313_v10 }
 0x131   : > { %v5279_v20 = vpop.f32.mrf.mxu0  ;;  %6372 = vmatmul.mubr.bf16.vlgmr.msra.gmra.mxu0 %v6700_v41  ;;  %v8363_v41 = vld [vmem:[%s10358_s1 + $0x168] sm:$0xff]  }
 0x132   : > { %v5301_v21 = vpop.f32.mrf.mxu1  ;;  %2882 = vmatmul.mubr.bf16.vlgmr.msra.gmra.mxu1 %v6701_v49  ;;  %10499 = vst [vmem:[#allocation14_spill] sm:$0xff] %v8363_v41  ;;  %v8381_v49 = vld [vmem:[%s10358_s1 + $0xe0] sm:$0xff]  }
 0x133   : > { %v5280_v22 = vpop.f32.mrf.mxu0 }
 0x134   : > { %v5281_v24 = vadd.f32 %v5280_v22, %v5279_v20  ;;  %v5302_v25 = vpop.f32.mrf.mxu1  ;;  %v6706_v20 = vld [vmem:[%s7574_s29 + $0xd4] ss:$100 sps:$4 sm:$0xff]  }
 0x135   : > { %v5303_v29 = vadd.f32 %v5302_v25, %v5301_v21  ;;  %v5282_v31 = vpop.f32.mrf.mxu0  ;;  %v6709_v21 = vld [vmem:[%s7574_s29 + $0xdc] ss:$100 sps:$4 sm:$0xff]   ;;  %v8333_v25 = vld [vmem:[%s10358_s1 + $0xf0] sm:$0xff]   ;;  %2922 = vmatprep.mubr.bf16.mxu0 %v6706_v20 }
 0x136   : > { %v5304_v33 = vpop.f32.mrf.mxu1  ;;  %v8321_v22 = vld [vmem:[%s10358_s1 + $0xb8] sm:$0xff]   ;;  %2963 = vmatprep.mubr.bf16.mxu1 %v6709_v21  ;;  %v8393_v20 = vld [vmem:[%s10358_s1 + $0xa0] sm:$0xff]  }
 0x137   : > { %v8278_v35 = vadd.f32 %v5303_v29, %v5281_v24  ;;  %v5283_v37 = vpop.f32.mrf.mxu0  ;;  %5559 = vmatpush3.bf16.msra.mxu0 %v8321_v22  ;;  %v8327_v24 = vld [vmem:[%s10358_s1 + $0x138] sm:$0xff]   ;;  %v8339_v29 = vld [vmem:[%s10358_s1 + $0x170] sm:$0xff]   ;;  %v8399_v21 = vld [vmem:[%s10358_s1 + $0x120] sm:$0xff]  }
 0x138   : > { %v5284_v43 = vadd.f32 %v5283_v37, %v5282_v31  ;;  %v5305_v45 = vpop.f32.mrf.mxu1  ;;  %10496 = vst [vmem:[#allocation11_spill] sm:$0xff] %v8327_v24  ;;  %5581 = vmatpush3.bf16.msra.mxu1 %v8327_v24  ;;  %5560 = vmatprep.subr.bf16.mxu0 %v8333_v25  ;;  %10497 = vst [vmem:[#allocation12_spill] sm:$0xff] %v8339_v29  ;;  %v8345_v31 = vld [vmem:[%s10358_s1 + $0xb0] sm:$0xff]   ;;  %v8357_v37 = vld [vmem:[%s10358_s1 + $0xe8] sm:$0xff]  }
 0x139   : > { %v5306_v60 = vadd.f32 %v5305_v45, %v5304_v33  ;;  %5582 = vmatprep.subr.bf16.mxu1 %v8339_v29  ;;  %v8351_v33 = vld [vmem:[%s10358_s1 + $0x130] sm:$0xff]   ;;  %v8375_v45 = vld [vmem:[%s10358_s1 + $0x128] sm:$0xff]   ;;  %10502 = vst [vmem:[#allocation17_spill] sm:$0xff] %v8399_v21 }
 0x13a   : > { %10498 = vst [vmem:[#allocation13_spill] sm:$0xff] %v8351_v33  ;;  %10500 = vst [vmem:[#allocation15_spill] sm:$0xff] %v8375_v45  ;;  %v8447_v29 = vld [vmem:[%s10358_s1 + $0x110] sm:$0xff]   ;;  %v8453_v24 = vld [vmem:[%s10358_s1 + $0xc8] sm:$0xff]  }
 0x13b   : > { %v8296_v61 = vadd.f32 %v5306_v60, %v5284_v43  ;;  %5561 = vmatpush3.bf16.msra.mxu0 %v8345_v31  ;;  %v8369_v43 = vld [vmem:[%s10358_s1 + $0xa8] sm:$0xff]   ;;  %v8387_v60 = vld [vmem:[%s10358_s1 + $0x160] sm:$0xff]   ;;  %10509 = vst [vmem:[#allocation24_spill] sm:$0xff] %v8447_v29  ;;  %10510 = vst [vmem:[#allocation25_spill] sm:$0xff] %v8453_v24 }
 0x13c   : > { %5583 = vmatpush3.bf16.msra.mxu1 %v8351_v33  ;;  %5562 = vmatprep.subr.bf16.mxu0 %v8357_v37  ;;  %10501 = vst [vmem:[#allocation16_spill] sm:$0xff] %v8387_v60  ;;  %v8441_v33 = vld [vmem:[%s10358_s1 + $0x90] sm:$0xff]  }
 0x13d   : > { %5584 = vmatprep.subr.bf16.mxu1 %v8363_v41  ;;  %v8429_v41 = vld [vmem:[%s10358_s1 + $0xd0] sm:$0xff]   ;;  %10508 = vst [vmem:[#allocation23_spill] sm:$0xff] %v8441_v33 }
 0x13e   : > { %10506 = vst [vmem:[#allocation21_spill] sm:$0xff] %v8429_v41 }
 0x13f   : > { %5563 = vmatpush3.bf16.msra.mxu0 %v8369_v43 }
 0x140   : > { %5585 = vmatpush3.bf16.msra.mxu1 %v8375_v45  ;;  %5564 = vmatprep.subr.bf16.mxu0 %v8381_v49  ;;  %v8417_v45 = vld [vmem:[%s10358_s1 + $0x98] sm:$0xff]  }
 0x141   : > { %5586 = vmatprep.subr.bf16.mxu1 %v8387_v60  ;;  %v8411_v60 = vld [vmem:[%s10358_s1 + $0x158] sm:$0xff]   ;;  %10504 = vst [vmem:[#allocation19_spill] sm:$0xff] %v8417_v45 }
 0x142   : > { %10503 = vst [vmem:[#allocation18_spill] sm:$0xff] %v8411_v60 }
 0x143   : > { %5565 = vmatpush3.bf16.msra.mxu0 %v8393_v20 }
 0x144   : > { %5587 = vmatpush3.bf16.msra.mxu1 %v8399_v21  ;;  %5566 = vmatprep.subr.bf16.mxu0 %v8405_v0  ;;  %v8423_v21 = vld [vmem:[%s10358_s1 + $0x118] sm:$0xff]  }
 0x145   : > { %5588 = vmatprep.subr.bf16.mxu1 %v8411_v60  ;;  %10505 = vst [vmem:[#allocation20_spill] sm:$0xff] %v8423_v21  ;;  %v8435_v60 = vld [vmem:[%s10358_s1 + $0x150] sm:$0xff]  }
 0x146   : > { %10507 = vst [vmem:[#allocation22_spill] sm:$0xff] %v8435_v60 }
 0x147   : > { %5567 = vmatpush3.bf16.msra.mxu0 %v8417_v45  ;;  %v6721_v45 = vld [vmem:[%s7574_s29 + $0xfc] ss:$100 sps:$4 sm:$0xff]  }
 0x148   : > { %5589 = vmatpush3.bf16.msra.mxu1 %v8423_v21  ;;  %5568 = vmatprep.subr.bf16.mxu0 %v8429_v41 }
 0x149   : > { %5590 = vmatprep.subr.bf16.mxu1 %v8435_v60  ;;  %v8459_v60 = vld [vmem:[%s10358_s1 + $0x148] sm:$0xff]  }
 0x14a   : > { %10511 = vst [vmem:[#allocation26_spill] sm:$0xff] %v8459_v60 }
 0x14b   : > { %5569 = vmatpush3.bf16.msra.mxu0 %v8441_v33 }
 0x14c   : > { %5591 = vmatpush3.bf16.msra.mxu1 %v8447_v29  ;;  %5570 = vmatprep.subr.bf16.mxu0 %v8453_v24  ;;  %v8465_v29 = vld [vmem:[%s10358_s1 + $0x88] sm:$0xff]  }
 0x14d   : > { %5592 = vmatprep.subr.bf16.mxu1 %v8459_v60  ;;  %10512 = vst [vmem:[#allocation27_spill] sm:$0xff] %v8465_v29 }
 0x14f   : > { %5571 = vmatpush3.bf16.msra.mxu0 %v8465_v29  ;;  %v8484_v29 = vld [vmem:[%s10358_s1 + $0x140] sm:$0xff]  }
 0x150   : > { %5593 = vmatpush3.bf16.msra.mxu1 %v8471_v26  ;;  %10515 = vst [vmem:[#allocation30_spill] sm:$0xff] %v8484_v29  ;;  %v6704_v26 = vld [vmem:[%s7574_s29 + $0xd0] ss:$100 sps:$4 sm:$0xff]  }
 0x151   : > { %v5323_v21 = vpop.f32.mrf.mxu0  ;;  %5594 = vmatprep.subr.bf16.mxu1 %v8484_v29  ;;  %v6712_v29 = vld [vmem:[%s7574_s29 + $0xe4] ss:$100 sps:$4 sm:$0xff]  }
 0x152   : > { %v5345_v10 = vpop.f32.mrf.mxu1 }
 0x153   : > { %v5324_v62 = vpop.f32.mrf.mxu0 }
 0x154   : > { %v5325_v47 = vadd.f32 %v5324_v62, %v5323_v21  ;;  %v5346_v39 = vpop.f32.mrf.mxu1  ;;  %v8477_v62 = vld [vmem:[%s10358_s1 + $0xc0] sm:$0xff]  }
 0x155   : > { %v5326_v24 = vpop.f32.mrf.mxu0  ;;  %10514 = vst [vmem:[#allocation29_spill] sm:$0xff] %v8477_v62  ;;  %5572 = vmatprep.subr.bf16.mxu0 %v8477_v62  ;;  %v5347_v60 = vadd.f32 %v5346_v39, %v5345_v10  ;;  %v6707_v39 = vld [vmem:[%s7574_s29 + $0xd8] ss:$100 sps:$4 sm:$0xff]   ;;  %v8500_v10 = vld [vmem:[%s10358_s1 + $0x100] sm:$0xff]  }
 0x156   : > { %v2280_v21 = vadd.f32 %v5325_v47, %v8278_v35  ;;  %v5348_v33 = vpop.f32.mrf.mxu1  ;;  %v8493_v35 = vld [vmem:[%s10358_s1 + $0x80] sm:$0xff]   ;;  %10517 = vst [vmem:[#allocation32_spill] sm:$0xff] %v8500_v10  ;;  %5595 = vmatpush3.bf16.msra.mxu1 %v8500_v10 }
 0x157   : > { %v5327_v23 = vpop.f32.mrf.mxu0  ;;  %10516 = vst [vmem:[#allocation31_spill] sm:$0xff] %v8493_v35  ;;  %5573 = vmatpush3.bf16.msra.mxu0 %v8493_v35  ;;  %v6715_v35 = vld [vmem:[%s7574_s29 + $0xec] ss:$100 sps:$4 sm:$0xff]  }
 0x158   : > { %v8488_v41 = vadd.f32 %v5347_v60, %v2280_v21  ;;  %v5328_v18 = vadd.f32 %v5327_v23, %v5326_v24  ;;  %v5349_v47 = vpop.f32.mrf.mxu1  ;;  %v8506_v23 = vld [vmem:[%s10358_s1 + $0x1f8] sm:$0xff]  }
 0x159   : > { %10518 = vst [vmem:[#allocation33_spill] sm:$0xff] %v8506_v23  ;;  %5602 = vmatprep.subr.bf16.mxu0 %v8506_v23  ;;  %v5350_v60 = vadd.f32 %v5349_v47, %v5348_v33  ;;  %v8513_v21 = vld [vmem:[%s10358_s1 + $0x278] sm:$0xff]   ;;  %2964 = vmatmul.mubr.bf16.vlgmr.msra.gmra.mxu1 %v6707_v39  ;;  %v8547_v33 = vld [vmem:[%s10358_s1 + $0x1b0] sm:$0xff]   ;;  %v8559_v47 = vld [vmem:[%s10358_s1 + $0x1e8] sm:$0xff]  }
 0x15a   : > { %v2283_v24 = vadd.f32 %v5328_v18, %v8296_v61  ;;  %10519 = vst [vmem:[#allocation34_spill] sm:$0xff] %v8513_v21  ;;  %5624 = vmatprep.subr.bf16.mxu1 %v8513_v21  ;;  %2923 = vmatmul.mubr.bf16.vlgmr.msra.gmra.mxu0 %v6704_v26  ;;  %v8523_v23 = vld [vmem:[%s10358_s1 + $0x1b8] sm:$0xff]   ;;  %v8535_v26 = vld [vmem:[%s10358_s1 + $0x1f0] sm:$0xff]   ;;  %10524 = vst [vmem:[#allocation39_spill] sm:$0xff] %v8547_v33 }
 0x15b   : > { %10520 = vst [vmem:[#allocation35_spill] sm:$0xff] %v8523_v23  ;;  %5603 = vmatpush3.bf16.msra.mxu0 %v8523_v23  ;;  %v8529_v18 = vld [vmem:[%s10358_s1 + $0x238] sm:$0xff]   ;;  %10522 = vst [vmem:[#allocation37_spill] sm:$0xff] %v8535_v26  ;;  %v8541_v61 = vld [vmem:[%s10358_s1 + $0x270] sm:$0xff]   ;;  %3004 = vmatprep.mubr.bf16.mxu0 %v6712_v29 }
 0x15c   : > { %v8517_v10 = vadd.f32 %v5350_v60, %v2283_v24  ;;  %10521 = vst [vmem:[#allocation36_spill] sm:$0xff] %v8529_v18  ;;  %5625 = vmatpush3.bf16.msra.mxu1 %v8529_v18  ;;  %5604 = vmatprep.subr.bf16.mxu0 %v8535_v26  ;;  %10523 = vst [vmem:[#allocation38_spill] sm:$0xff] %v8541_v61  ;;  %v8553_v39 = vld [vmem:[%s10358_s1 + $0x230] sm:$0xff]   ;;  %v8565_v29 = vld [vmem:[%s10358_s1 + $0x268] sm:$0xff]  }
 0x15d   : > { %5626 = vmatprep.subr.bf16.mxu1 %v8541_v61  ;;  %3045 = vmatprep.mubr.bf16.mxu1 %v6715_v35  ;;  %10525 = vst [vmem:[#allocation40_spill] sm:$0xff] %v8553_v39  ;;  %10526 = vst [vmem:[#allocation41_spill] sm:$0xff] %v8559_v47  ;;  %v8571_v35 = vld [vmem:[%s10358_s1 + $0x1a8] sm:$0xff]   ;;  %v8583_v60 = vld [vmem:[%s10358_s1 + $0x1e0] sm:$0xff]  }
 0x15e   : > { %10527 = vst [vmem:[#allocation42_spill] sm:$0xff] %v8565_v29  ;;  %10528 = vst [vmem:[#allocation43_spill] sm:$0xff] %v8571_v35  ;;  %v8577_v24 = vld [vmem:[%s10358_s1 + $0x228] sm:$0xff]   ;;  %v8607_v61 = vld [vmem:[%s10358_s1 + $0x1d8] sm:$0xff]  }
 0x15f   : > { %5605 = vmatpush3.bf16.msra.mxu0 %v8547_v33  ;;  %10529 = vst [vmem:[#allocation44_spill] sm:$0xff] %v8577_v24  ;;  %10530 = vst [vmem:[#allocation45_spill] sm:$0xff] %v8583_v60  ;;  %v8619_v18 = vld [vmem:[%s10358_s1 + $0x198] sm:$0xff]   ;;  %v8631_v21 = vld [vmem:[%s10358_s1 + $0x1d0] sm:$0xff]  }
 0x160   : > { %5627 = vmatpush3.bf16.msra.mxu1 %v8553_v39  ;;  %5606 = vmatprep.subr.bf16.mxu0 %v8559_v47  ;;  %v8595_v39 = vld [vmem:[%s10358_s1 + $0x1a0] sm:$0xff]   ;;  %10534 = vst [vmem:[#allocation49_spill] sm:$0xff] %v8607_v61  ;;  %10536 = vst [vmem:[#allocation51_spill] sm:$0xff] %v8619_v18 }
 0x161   : > { %5628 = vmatprep.subr.bf16.mxu1 %v8565_v29  ;;  %v8589_v29 = vld [vmem:[%s10358_s1 + $0x260] sm:$0xff]   ;;  %10532 = vst [vmem:[#allocation47_spill] sm:$0xff] %v8595_v39  ;;  %10538 = vst [vmem:[#allocation53_spill] sm:$0xff] %v8631_v21 }
 0x162   : > { %10531 = vst [vmem:[#allocation46_spill] sm:$0xff] %v8589_v29  ;;  %v6710_v47 = vld [vmem:[%s7574_s29 + $0xe0] ss:$100 sps:$4 sm:$0xff]  }
 0x163   : > { %5607 = vmatpush3.bf16.msra.mxu0 %v8571_v35  ;;  %v8692_v26 = vld [vmem:[%s10358_s1 + $0x180] sm:$0xff]  }
 0x164   : > { %5629 = vmatpush3.bf16.msra.mxu1 %v8577_v24  ;;  %5608 = vmatprep.subr.bf16.mxu0 %v8583_v60  ;;  %v8601_v24 = vld [vmem:[%s10358_s1 + $0x220] sm:$0xff]   ;;  %10548 = vst [vmem:[#allocation63_spill] sm:$0xff] %v8692_v26 }
 0x165   : > { %5630 = vmatprep.subr.bf16.mxu1 %v8589_v29  ;;  %10533 = vst [vmem:[#allocation48_spill] sm:$0xff] %v8601_v24  ;;  %v8613_v29 = vld [vmem:[%s10358_s1 + $0x258] sm:$0xff]  }
 0x166   : > { %10535 = vst [vmem:[#allocation50_spill] sm:$0xff] %v8613_v29 }
 0x167   : > { %5609 = vmatpush3.bf16.msra.mxu0 %v8595_v39 }
 0x168   : > { %5631 = vmatpush3.bf16.msra.mxu1 %v8601_v24  ;;  %5610 = vmatprep.subr.bf16.mxu0 %v8607_v61  ;;  %v8625_v24 = vld [vmem:[%s10358_s1 + $0x218] sm:$0xff]  }
 0x169   : > { %5632 = vmatprep.subr.bf16.mxu1 %v8613_v29  ;;  %10537 = vst [vmem:[#allocation52_spill] sm:$0xff] %v8625_v24  ;;  %v8637_v29 = vld [vmem:[%s10358_s1 + $0x250] sm:$0xff]  }
 0x16a   : > { %10539 = vst [vmem:[#allocation54_spill] sm:$0xff] %v8637_v29 }
 0x16b   : > { %5611 = vmatpush3.bf16.msra.mxu0 %v8619_v18  ;;  %v8643_v18 = vld [vmem:[%s10358_s1 + $0x190] sm:$0xff]  }
 0x16c   : > { %5633 = vmatpush3.bf16.msra.mxu1 %v8625_v24  ;;  %5612 = vmatprep.subr.bf16.mxu0 %v8631_v21  ;;  %10540 = vst [vmem:[#allocation55_spill] sm:$0xff] %v8643_v18  ;;  %v8649_v24 = vld [vmem:[%s10358_s1 + $0x210] sm:$0xff]   ;;  %v8655_v21 = vld [vmem:[%s10358_s1 + $0x1c8] sm:$0xff]  }
 0x16d   : > { %5634 = vmatprep.subr.bf16.mxu1 %v8637_v29  ;;  %10541 = vst [vmem:[#allocation56_spill] sm:$0xff] %v8649_v24  ;;  %10542 = vst [vmem:[#allocation57_spill] sm:$0xff] %v8655_v21  ;;  %v8661_v29 = vld [vmem:[%s10358_s1 + $0x248] sm:$0xff]  }
 0x16e   : > { %10543 = vst [vmem:[#allocation58_spill] sm:$0xff] %v8661_v29 }
 0x16f   : > { %5613 = vmatpush3.bf16.msra.mxu0 %v8643_v18 }
 0x170   : > { %5635 = vmatpush3.bf16.msra.mxu1 %v8649_v24  ;;  %5614 = vmatprep.subr.bf16.mxu0 %v8655_v21  ;;  %v8667_v24 = vld [vmem:[%s10358_s1 + $0x188] sm:$0xff]  }
 0x171   : > { %5636 = vmatprep.subr.bf16.mxu1 %v8661_v29  ;;  %v5367_v18 = vpop.f32.mrf.mxu0  ;;  %10544 = vst [vmem:[#allocation59_spill] sm:$0xff] %v8667_v24  ;;  %v8673_v21 = vld [vmem:[%s10358_s1 + $0x208] sm:$0xff]   ;;  %v8679_v29 = vld [vmem:[%s10358_s1 + $0x1c0] sm:$0xff]  }
 0x172   : > { %v5389_v61 = vpop.f32.mrf.mxu1  ;;  %10545 = vst [vmem:[#allocation60_spill] sm:$0xff] %v8673_v21  ;;  %10546 = vst [vmem:[#allocation61_spill] sm:$0xff] %v8679_v29 }
 0x173   : > { %5615 = vmatpush3.bf16.msra.mxu0 %v8667_v24  ;;  %v5368_v39 = vpop.f32.mrf.mxu0  ;;  %v8685_v24 = vld [vmem:[%s10358_s1 + $0x240] sm:$0xff]  }
 0x174   : > { %5637 = vmatpush3.bf16.msra.mxu1 %v8673_v21  ;;  %5616 = vmatprep.subr.bf16.mxu0 %v8679_v29  ;;  %10547 = vst [vmem:[#allocation62_spill] sm:$0xff] %v8685_v24  ;;  %v5369_v60 = vadd.f32 %v5368_v39, %v5367_v18  ;;  %v5390_v35 = vpop.f32.mrf.mxu1  ;;  %v6713_v29 = vld [vmem:[%s7574_s29 + $0xe8] ss:$100 sps:$4 sm:$0xff]   ;;  %v8700_v18 = vld [vmem:[%s10358_s1 + $0x200] sm:$0xff]  }
 0x175   : > { %5638 = vmatprep.subr.bf16.mxu1 %v8685_v24  ;;  %v5391_v33 = vadd.f32 %v5390_v35, %v5389_v61  ;;  %v5370_v21 = vpop.f32.mrf.mxu0  ;;  %10549 = vst [vmem:[#allocation64_spill] sm:$0xff] %v8700_v18  ;;  %v8706_v61 = vld [vmem:[%s10358_s1 + $0x2f8] sm:$0xff]  }
 0x176   : > { %v2362_v23 = vadd.f32 %v5369_v60, %v8488_v41  ;;  %v5392_v62 = vpop.f32.mrf.mxu1  ;;  %10550 = vst [vmem:[#allocation65_spill] sm:$0xff] %v8706_v61  ;;  %v8712_v41 = vld [vmem:[%s10358_s1 + $0x378] sm:$0xff]  }
 0x177   : > { %5617 = vmatpush3.bf16.msra.mxu0 %v8692_v26  ;;  %v5371_v39 = vpop.f32.mrf.mxu0  ;;  %10551 = vst [vmem:[#allocation66_spill] sm:$0xff] %v8712_v41 }
 0x178   : > { %5639 = vmatpush3.bf16.msra.mxu1 %v8700_v18  ;;  %5646 = vmatprep.subr.bf16.mxu0 %v8706_v61  ;;  %v8715_v35 = vadd.f32 %v5391_v33, %v2362_v23  ;;  %v5372_v60 = vadd.f32 %v5371_v39, %v5370_v21  ;;  %v5393_v24 = vpop.f32.mrf.mxu1  ;;  %v6718_v18 = vld [vmem:[%s7574_s29 + $0xf4] ss:$100 sps:$4 sm:$0xff]   ;;  %v8797_v39 = vld [vmem:[%s10358_s1 + $0x2a0] sm:$0xff]  }
 0x179   : > { %5668 = vmatprep.subr.bf16.mxu1 %v8712_v41  ;;  %v5394_v26 = vadd.f32 %v5393_v24, %v5392_v62  ;;  %v8722_v61 = vld [vmem:[%s10358_s1 + $0x2b8] sm:$0xff]   ;;  %v8735_v62 = vld [vmem:[%s10358_s1 + $0x2f0] sm:$0xff]   ;;  %v8785_v24 = vld [vmem:[%s10358_s1 + $0x2e0] sm:$0xff]   ;;  %10564 = vst [vmem:[#allocation79_spill] sm:$0xff] %v8797_v39 }
 0x17a   : > { %3005 = vmatmul.mubr.bf16.vlgmr.msra.gmra.mxu0 %v6710_v47  ;;  %10552 = vst [vmem:[#allocation67_spill] sm:$0xff] %v8722_v61  ;;  %v2365_v17 = vadd.f32 %v5372_v60, %v8517_v10  ;;  %v8729_v23 = vld [vmem:[%s10358_s1 + $0x338] sm:$0xff]   ;;  %10554 = vst [vmem:[#allocation69_spill] sm:$0xff] %v8735_v62  ;;  %v8741_v21 = vld [vmem:[%s10358_s1 + $0x370] sm:$0xff]  }
 0x17b   : > { %3046 = vmatmul.mubr.bf16.vlgmr.msra.gmra.mxu1 %v6713_v29  ;;  %5647 = vmatpush3.bf16.msra.mxu0 %v8722_v61  ;;  %10553 = vst [vmem:[#allocation68_spill] sm:$0xff] %v8729_v23  ;;  %10555 = vst [vmem:[#allocation70_spill] sm:$0xff] %v8741_v21  ;;  %v8749_v33 = vld [vmem:[%s10358_s1 + $0x2b0] sm:$0xff]   ;;  %v8779_v29 = vld [vmem:[%s10358_s1 + $0x328] sm:$0xff]  }
 0x17c   : > { %5669 = vmatpush3.bf16.msra.mxu1 %v8729_v23  ;;  %5648 = vmatprep.subr.bf16.mxu0 %v8735_v62  ;;  %v8744_v10 = vadd.f32 %v5394_v26, %v2365_v17  ;;  %10556 = vst [vmem:[#allocation71_spill] sm:$0xff] %v8749_v33  ;;  %v8755_v47 = vld [vmem:[%s10358_s1 + $0x330] sm:$0xff]   ;;  %v8761_v17 = vld [vmem:[%s10358_s1 + $0x2e8] sm:$0xff]   ;;  %10561 = vst [vmem:[#allocation76_spill] sm:$0xff] %v8779_v29 }
 0x17d   : > { %5670 = vmatprep.subr.bf16.mxu1 %v8741_v21  ;;  %3086 = vmatprep.mubr.bf16.mxu0 %v6718_v18  ;;  %10557 = vst [vmem:[#allocation72_spill] sm:$0xff] %v8755_v47  ;;  %10558 = vst [vmem:[#allocation73_spill] sm:$0xff] %v8761_v17  ;;  %v8773_v26 = vld [vmem:[%s10358_s1 + $0x2a8] sm:$0xff]   ;;  %v8791_v18 = vld [vmem:[%s10358_s1 + $0x360] sm:$0xff]  }
 0x17e   : > { %3127 = vmatprep.mubr.bf16.mxu1 %v6721_v45  ;;  %v8767_v45 = vld [vmem:[%s10358_s1 + $0x368] sm:$0xff]   ;;  %10560 = vst [vmem:[#allocation75_spill] sm:$0xff] %v8773_v26  ;;  %10562 = vst [vmem:[#allocation77_spill] sm:$0xff] %v8785_v24  ;;  %v8803_v60 = vld [vmem:[%s10358_s1 + $0x320] sm:$0xff]  }
 0x17f   : > { %5649 = vmatpush3.bf16.msra.mxu0 %v8749_v33  ;;  %10559 = vst [vmem:[#allocation74_spill] sm:$0xff] %v8767_v45  ;;  %10563 = vst [vmem:[#allocation78_spill] sm:$0xff] %v8791_v18  ;;  %v8845_v21 = vld [vmem:[%s10358_s1 + $0x290] sm:$0xff]   ;;  %v8857_v23 = vld [vmem:[%s10358_s1 + $0x2c8] sm:$0xff]  }
 0x180   : > { %5671 = vmatpush3.bf16.msra.mxu1 %v8755_v47  ;;  %5650 = vmatprep.subr.bf16.mxu0 %v8761_v17  ;;  %10565 = vst [vmem:[#allocation80_spill] sm:$0xff] %v8803_v60  ;;  %v8833_v47 = vld [vmem:[%s10358_s1 + $0x2d0] sm:$0xff]   ;;  %10572 = vst [vmem:[#allocation87_spill] sm:$0xff] %v8845_v21  ;;  %v8869_v41 = vld [vmem:[%s10358_s1 + $0x288] sm:$0xff]  }
 0x181   : > { %5672 = vmatprep.subr.bf16.mxu1 %v8767_v45  ;;  %v8821_v45 = vld [vmem:[%s10358_s1 + $0x298] sm:$0xff]   ;;  %10570 = vst [vmem:[#allocation85_spill] sm:$0xff] %v8833_v47  ;;  %10574 = vst [vmem:[#allocation89_spill] sm:$0xff] %v8857_v23  ;;  %v6724_v33 = vld [vmem:[%s7574_s29 + $0x104] ss:$100 sps:$4 sm:$0xff]  }
 0x182   : > { %10568 = vst [vmem:[#allocation83_spill] sm:$0xff] %v8821_v45  ;;  %10576 = vst [vmem:[#allocation91_spill] sm:$0xff] %v8869_v41  ;;  %v6727_v61 = vld [vmem:[%s7574_s29 + $0x10c] ss:$100 sps:$4 sm:$0xff]  }
 0x183   : > { %5651 = vmatpush3.bf16.msra.mxu0 %v8773_v26 }
 0x184   : > { %5673 = vmatpush3.bf16.msra.mxu1 %v8779_v29  ;;  %5652 = vmatprep.subr.bf16.mxu0 %v8785_v24  ;;  %v8809_v29 = vld [vmem:[%s10358_s1 + $0x2d8] sm:$0xff]  }
 0x185   : > { %5674 = vmatprep.subr.bf16.mxu1 %v8791_v18  ;;  %10566 = vst [vmem:[#allocation81_spill] sm:$0xff] %v8809_v29  ;;  %v8815_v18 = vld [vmem:[%s10358_s1 + $0x358] sm:$0xff]  }
 0x186   : > { %10567 = vst [vmem:[#allocation82_spill] sm:$0xff] %v8815_v18 }
 0x187   : > { %5653 = vmatpush3.bf16.msra.mxu0 %v8797_v39 }
 0x188   : > { %5675 = vmatpush3.bf16.msra.mxu1 %v8803_v60  ;;  %5654 = vmatprep.subr.bf16.mxu0 %v8809_v29  ;;  %v8827_v60 = vld [vmem:[%s10358_s1 + $0x318] sm:$0xff]   ;;  %v8901_v29 = vld [vmem:[%s10358_s1 + $0x300] sm:$0xff]  }
 0x189   : > { %5676 = vmatprep.subr.bf16.mxu1 %v8815_v18  ;;  %10569 = vst [vmem:[#allocation84_spill] sm:$0xff] %v8827_v60  ;;  %v8839_v18 = vld [vmem:[%s10358_s1 + $0x350] sm:$0xff]   ;;  %10581 = vst [vmem:[#allocation96_spill] sm:$0xff] %v8901_v29 }
 0x18a   : > { %10571 = vst [vmem:[#allocation86_spill] sm:$0xff] %v8839_v18 }
 0x18b   : > { %5655 = vmatpush3.bf16.msra.mxu0 %v8821_v45  ;;  %v6719_v45 = vld [vmem:[%s7574_s29 + $0xf8] ss:$100 sps:$4 sm:$0xff]  }
 0x18c   : > { %5677 = vmatpush3.bf16.msra.mxu1 %v8827_v60  ;;  %5656 = vmatprep.subr.bf16.mxu0 %v8833_v47  ;;  %v8851_v60 = vld [vmem:[%s10358_s1 + $0x310] sm:$0xff]  }
 0x18d   : > { %5678 = vmatprep.subr.bf16.mxu1 %v8839_v18  ;;  %10573 = vst [vmem:[#allocation88_spill] sm:$0xff] %v8851_v60  ;;  %v8863_v18 = vld [vmem:[%s10358_s1 + $0x348] sm:$0xff]  }
 0x18e   : > { %10575 = vst [vmem:[#allocation90_spill] sm:$0xff] %v8863_v18 }
 0x18f   : > { %5657 = vmatpush3.bf16.msra.mxu0 %v8845_v21  ;;  %v6716_v21 = vld [vmem:[%s7574_s29 + $0xf0] ss:$100 sps:$4 sm:$0xff]  }
 0x190   : > { %5679 = vmatpush3.bf16.msra.mxu1 %v8851_v60  ;;  %5658 = vmatprep.subr.bf16.mxu0 %v8857_v23  ;;  %v8875_v60 = vld [vmem:[%s10358_s1 + $0x308] sm:$0xff]   ;;  %v8881_v23 = vld [vmem:[%s10358_s1 + $0x2c0] sm:$0xff]  }
 0x191   : > { %5680 = vmatprep.subr.bf16.mxu1 %v8863_v18  ;;  %10577 = vst [vmem:[#allocation92_spill] sm:$0xff] %v8875_v60  ;;  %10578 = vst [vmem:[#allocation93_spill] sm:$0xff] %v8881_v23  ;;  %v8887_v18 = vld [vmem:[%s10358_s1 + $0x340] sm:$0xff]  }
 0x192   : > { %10579 = vst [vmem:[#allocation94_spill] sm:$0xff] %v8887_v18  ;;  %v5433_v47 = vpop.f32.mrf.mxu1 }
 0x193   : > { %5659 = vmatpush3.bf16.msra.mxu0 %v8869_v41  ;;  %v5411_v41 = vpop.f32.mrf.mxu0 }
 0x194   : > { %5681 = vmatpush3.bf16.msra.mxu1 %v8875_v60  ;;  %5660 = vmatprep.subr.bf16.mxu0 %v8881_v23  ;;  %v8894_v60 = vld [vmem:[%s10358_s1 + $0x280] sm:$0xff]   ;;  %v5434_v24 = vpop.f32.mrf.mxu1 }
 0x195   : > { %5682 = vmatprep.subr.bf16.mxu1 %v8887_v18  ;;  %10580 = vst [vmem:[#allocation95_spill] sm:$0xff] %v8894_v60  ;;  %v5412_v23 = vpop.f32.mrf.mxu0  ;;  %v8907_v18 = vld [vmem:[%s10358_s1 + $0x3f8] sm:$0xff]   ;;  %v5435_v26 = vadd.f32 %v5434_v24, %v5433_v47 }
 0x196   : > { %v5413_v39 = vadd.f32 %v5412_v23, %v5411_v41  ;;  %v5436_v62 = vpop.f32.mrf.mxu1  ;;  %v8922_v41 = vld [vmem:[%s10358_s1 + $0x3b8] sm:$0xff]  }
 0x197   : > { %5661 = vmatpush3.bf16.msra.mxu0 %v8894_v60  ;;  %v8913_v60 = vld [vmem:[%s10358_s1 + $0x478] sm:$0xff]   ;;  %v5414_v17 = vpop.f32.mrf.mxu0 }
 0x198   : > { %5683 = vmatpush3.bf16.msra.mxu1 %v8901_v29  ;;  %5690 = vmatprep.subr.bf16.mxu0 %v8907_v18  ;;  %10582 = vst [vmem:[#allocation97_spill] sm:$0xff] %v8913_v60  ;;  %v2444_v29 = vadd.f32 %v5413_v39, %v8715_v35  ;;  %v8928_v47 = vld [vmem:[%s10358_s1 + $0x438] sm:$0xff]   ;;  %v8936_v35 = vld [vmem:[%s10358_s1 + $0x3f0] sm:$0xff]   ;;  %v5437_v24 = vpop.f32.mrf.mxu1 }
 0x199   : > { %5712 = vmatprep.subr.bf16.mxu1 %v8913_v60  ;;  %v5415_v23 = vpop.f32.mrf.mxu0  ;;  %10583 = vst [vmem:[#allocation98_spill] sm:$0xff] %v8928_v47  ;;  %v8942_v39 = vld [vmem:[%s10358_s1 + $0x470] sm:$0xff]   ;;  %v5438_v60 = vadd.f32 %v5437_v24, %v5436_v62  ;;  %v8969_v62 = vld [vmem:[%s10358_s1 + $0x468] sm:$0xff]   ;;  %v8999_v24 = vld [vmem:[%s10358_s1 + $0x3a0] sm:$0xff]  }
 0x19a   : > { %3087 = vmatmul.mubr.bf16.vlgmr.msra.gmra.mxu0 %v6716_v21  ;;  %v8931_v21 = vadd.f32 %v5435_v26, %v2444_v29  ;;  %10584 = vst [vmem:[#allocation99_spill] sm:$0xff] %v8942_v39  ;;  %v8949_v29 = vld [vmem:[%s10358_s1 + $0x3b0] sm:$0xff]   ;;  %10588 = vst [vmem:[#allocation103_spill] sm:$0xff] %v8969_v62 }
 0x19b   : > { %3128 = vmatmul.mubr.bf16.vlgmr.msra.gmra.mxu1 %v6719_v45  ;;  %5691 = vmatpush3.bf16.msra.mxu0 %v8922_v41  ;;  %v5416_v45 = vadd.f32 %v5415_v23, %v5414_v17  ;;  %10585 = vst [vmem:[#allocation100_spill] sm:$0xff] %v8949_v29  ;;  %v8955_v17 = vld [vmem:[%s10358_s1 + $0x430] sm:$0xff]   ;;  %10593 = vst [vmem:[#allocation108_spill] sm:$0xff] %v8999_v24 }
 0x19c   : > { %5713 = vmatpush3.bf16.msra.mxu1 %v8928_v47  ;;  %5692 = vmatprep.subr.bf16.mxu0 %v8936_v35  ;;  %10586 = vst [vmem:[#allocation101_spill] sm:$0xff] %v8955_v17  ;;  %v9059_v47 = vld [vmem:[%s10358_s1 + $0x3c8] sm:$0xff]  }
 0x19d   : > { %5714 = vmatprep.subr.bf16.mxu1 %v8942_v39  ;;  %3168 = vmatprep.mubr.bf16.mxu0 %v6724_v33  ;;  %v2447_v26 = vadd.f32 %v5416_v45, %v8744_v10  ;;  %v8975_v10 = vld [vmem:[%s10358_s1 + $0x3a8] sm:$0xff]   ;;  %v8993_v45 = vld [vmem:[%s10358_s1 + $0x460] sm:$0xff]   ;;  %v9047_v39 = vld [vmem:[%s10358_s1 + $0x390] sm:$0xff]   ;;  %10603 = vst [vmem:[#allocation118_spill] sm:$0xff] %v9059_v47 }
 0x19e   : > { %3209 = vmatprep.mubr.bf16.mxu1 %v6727_v61  ;;  %v8963_v61 = vld [vmem:[%s10358_s1 + $0x3e8] sm:$0xff]   ;;  %10589 = vst [vmem:[#allocation104_spill] sm:$0xff] %v8975_v10  ;;  %10592 = vst [vmem:[#allocation107_spill] sm:$0xff] %v8993_v45 }
 0x19f   : > { %5693 = vmatpush3.bf16.msra.mxu0 %v8949_v29  ;;  %v8958_v23 = vadd.f32 %v5438_v60, %v2447_v26  ;;  %10587 = vst [vmem:[#allocation102_spill] sm:$0xff] %v8963_v61  ;;  %v8981_v33 = vld [vmem:[%s10358_s1 + $0x428] sm:$0xff]   ;;  %v8987_v60 = vld [vmem:[%s10358_s1 + $0x3e0] sm:$0xff]   ;;  %10601 = vst [vmem:[#allocation116_spill] sm:$0xff] %v9047_v39 }
 0x1a0   : > { %5715 = vmatpush3.bf16.msra.mxu1 %v8955_v17  ;;  %5694 = vmatprep.subr.bf16.mxu0 %v8963_v61  ;;  %10590 = vst [vmem:[#allocation105_spill] sm:$0xff] %v8981_v33  ;;  %10591 = vst [vmem:[#allocation106_spill] sm:$0xff] %v8987_v60  ;;  %v9005_v26 = vld [vmem:[%s10358_s1 + $0x420] sm:$0xff]   ;;  %v9035_v17 = vld [vmem:[%s10358_s1 + $0x3d0] sm:$0xff]  }
 0x1a1   : > { %5716 = vmatprep.subr.bf16.mxu1 %v8969_v62  ;;  %10594 = vst [vmem:[#allocation109_spill] sm:$0xff] %v9005_v26  ;;  %v9023_v62 = vld [vmem:[%s10358_s1 + $0x398] sm:$0xff]   ;;  %10599 = vst [vmem:[#allocation114_spill] sm:$0xff] %v9035_v17 }
 0x1a2   : > { %10597 = vst [vmem:[#allocation112_spill] sm:$0xff] %v9023_v62 }
 0x1a3   : > { %5695 = vmatpush3.bf16.msra.mxu0 %v8975_v10  ;;  %v6733_v10 = vld [vmem:[%s7574_s29 + $0x11c] ss:$100 sps:$4 sm:$0xff]  }
 0x1a4   : > { %5717 = vmatpush3.bf16.msra.mxu1 %v8981_v33  ;;  %5696 = vmatprep.subr.bf16.mxu0 %v8987_v60  ;;  %v9011_v33 = vld [vmem:[%s10358_s1 + $0x3d8] sm:$0xff]  }
 0x1a5   : > { %5718 = vmatprep.subr.bf16.mxu1 %v8993_v45  ;;  %10595 = vst [vmem:[#allocation110_spill] sm:$0xff] %v9011_v33  ;;  %v9017_v45 = vld [vmem:[%s10358_s1 + $0x458] sm:$0xff]  }
 0x1a6   : > { %10596 = vst [vmem:[#allocation111_spill] sm:$0xff] %v9017_v45 }
 0x1a7   : > { %5697 = vmatpush3.bf16.msra.mxu0 %v8999_v24  ;;  %v6730_v24 = vld [vmem:[%s7574_s29 + $0x114] ss:$100 sps:$4 sm:$0xff]  }
 0x1a8   : > { %5719 = vmatpush3.bf16.msra.mxu1 %v9005_v26  ;;  %5698 = vmatprep.subr.bf16.mxu0 %v9011_v33  ;;  %v9029_v26 = vld [vmem:[%s10358_s1 + $0x418] sm:$0xff]  }
 0x1a9   : > { %5720 = vmatprep.subr.bf16.mxu1 %v9017_v45  ;;  %10598 = vst [vmem:[#allocation113_spill] sm:$0xff] %v9029_v26  ;;  %v9041_v45 = vld [vmem:[%s10358_s1 + $0x450] sm:$0xff]  }
 0x1aa   : > { %10600 = vst [vmem:[#allocation115_spill] sm:$0xff] %v9041_v45 }
 0x1ab   : > { %5699 = vmatpush3.bf16.msra.mxu0 %v9023_v62  ;;  %v6725_v62 = vld [vmem:[%s7574_s29 + $0x108] ss:$100 sps:$4 sm:$0xff]  }
 0x1ac   : > { %5721 = vmatpush3.bf16.msra.mxu1 %v9029_v26  ;;  %5700 = vmatprep.subr.bf16.mxu0 %v9035_v17  ;;  %v9053_v26 = vld [vmem:[%s10358_s1 + $0x410] sm:$0xff]  }
 0x1ad   : > { %5722 = vmatprep.subr.bf16.mxu1 %v9041_v45  ;;  %10602 = vst [vmem:[#allocation117_spill] sm:$0xff] %v9053_v26  ;;  %v9065_v45 = vld [vmem:[%s10358_s1 + $0x448] sm:$0xff]  }
 0x1ae   : > { %10604 = vst [vmem:[#allocation119_spill] sm:$0xff] %v9065_v45 }
 0x1af   : > { %5701 = vmatpush3.bf16.msra.mxu0 %v9047_v39  ;;  %v9071_v39 = vld [vmem:[%s10358_s1 + $0x388] sm:$0xff]  }
 0x1b0   : > { %5723 = vmatpush3.bf16.msra.mxu1 %v9053_v26  ;;  %5702 = vmatprep.subr.bf16.mxu0 %v9059_v47  ;;  %10605 = vst [vmem:[#allocation120_spill] sm:$0xff] %v9071_v39  ;;  %v9077_v26 = vld [vmem:[%s10358_s1 + $0x408] sm:$0xff]   ;;  %v9083_v47 = vld [vmem:[%s10358_s1 + $0x3c0] sm:$0xff]  }
 0x1b1   : > { %5724 = vmatprep.subr.bf16.mxu1 %v9065_v45  ;;  %10606 = vst [vmem:[#allocation121_spill] sm:$0xff] %v9077_v26  ;;  %10607 = vst [vmem:[#allocation122_spill] sm:$0xff] %v9083_v47  ;;  %v9089_v45 = vld [vmem:[%s10358_s1 + $0x440] sm:$0xff]   ;;  %v5455_v17 = vpop.f32.mrf.mxu0 }
 0x1b2   : > { %10608 = vst [vmem:[#allocation123_spill] sm:$0xff] %v9089_v45  ;;  %v5477_v33 = vpop.f32.mrf.mxu1 }
 0x1b3   : > { %5703 = vmatpush3.bf16.msra.mxu0 %v9071_v39  ;;  %v6722_v39 = vld [vmem:[%s7574_s29 + $0x100] ss:$100 sps:$4 sm:$0xff]  }
 0x1b4   : > { %5725 = vmatpush3.bf16.msra.mxu1 %v9077_v26  ;;  %5704 = vmatprep.subr.bf16.mxu0 %v9083_v47  ;;  %v9096_v26 = vld [vmem:[%s10358_s1 + $0x380] sm:$0xff]   ;;  %v5478_v61 = vpop.f32.mrf.mxu1 }
 0x1b5   : > { %5726 = vmatprep.subr.bf16.mxu1 %v9089_v45  ;;  %10609 = vst [vmem:[#allocation124_spill] sm:$0xff] %v9096_v26  ;;  %v9103_v47 = vld [vmem:[%s10358_s1 + $0x400] sm:$0xff]   ;;  %v9109_v45 = vld [vmem:[%s10358_s1 + $0x4f8] sm:$0xff]  }
 0x1b6   : > { %10610 = vst [vmem:[#allocation125_spill] sm:$0xff] %v9103_v47  ;;  %10611 = vst [vmem:[#allocation126_spill] sm:$0xff] %v9109_v45 }
 0x1b7   : > { %5705 = vmatpush3.bf16.msra.mxu0 %v9096_v26  ;;  %v5456_v26 = vpop.f32.mrf.mxu0 }
 0x1b8   : > { %5727 = vmatpush3.bf16.msra.mxu1 %v9103_v47  ;;  %5734 = vmatprep.subr.bf16.mxu0 %v9109_v45  ;;  %v5457_v60 = vadd.f32 %v5456_v26, %v5455_v17  ;;  %v9118_v47 = vld [vmem:[%s10358_s1 + $0x4b8] sm:$0xff]   ;;  %v5479_v45 = vadd.f32 %v5478_v61, %v5477_v33  ;;  %v5480_v17 = vpop.f32.mrf.mxu1  ;;  %v9143_v33 = vld [vmem:[%s10358_s1 + $0x4e8] sm:$0xff]  }
 0x1b9   : > { %5756 = vmatprep.subr.bf16.mxu1 %v7983_v28  ;;  %10612 = vst [vmem:[#allocation127_spill] sm:$0xff] %v9118_v47  ;;  %v5458_v29 = vpop.f32.mrf.mxu0 }
 0x1ba   : > { %3169 = vmatmul.mubr.bf16.vlgmr.msra.gmra.mxu0 %v6722_v39  ;;  %v2526_v28 = vadd.f32 %v5457_v60, %v8931_v21  ;;  %v9126_v39 = vld [vmem:[%s10358_s1 + $0x4f0] sm:$0xff]   ;;  %v5481_v21 = vpop.f32.mrf.mxu1  ;;  %v10613_v60 = vmov 0.0  }
 0x1bb   : > { %3210 = vmatmul.mubr.bf16.vlgmr.msra.gmra.mxu1 %v6725_v62  ;;  %5735 = vmatpush3.bf16.msra.mxu0 %v9118_v47  ;;  %v5459_v62 = vpop.f32.mrf.mxu0 }
 0x1bc   : > { %5757 = vmatpush3.bf16.msra.mxu1 %v7992_v30  ;;  %5736 = vmatprep.subr.bf16.mxu0 %v9126_v39  ;;  %v9130_v26 = vadd.f32 %v5479_v45, %v2526_v28  ;;  %v5460_v47 = vadd.f32 %v5459_v62, %v5458_v29  ;;  %v9135_v30 = vld [vmem:[%s10358_s1 + $0x4b0] sm:$0xff]   ;;  %v9239_v28 = vld [vmem:[%s10358_s1 + $0x5b8] sm:$0xff]  }
 0x1bd   : > { %5758 = vmatprep.subr.bf16.mxu1 %v8001_v32  ;;  %3250 = vmatprep.mubr.bf16.mxu0 %v6730_v24  ;;  %v5482_v32 = vadd.f32 %v5481_v21, %v5480_v17  ;;  %v9246_v17 = vld [vmem:[%s10358_s1 + $0x5f0] sm:$0xff]  }
 0x1be   : > { %3291 = vmatprep.mubr.bf16.mxu1 %v6733_v10  ;;  %v2529_v61 = vadd.f32 %v5460_v47, %v8958_v23  ;;  %v9152_v10 = vld [vmem:[%s10358_s1 + $0x4a8] sm:$0xff]   ;;  %v6728_v47 = vld [vmem:[%s7574_s29 + $0x110] ss:$100 sps:$4 sm:$0xff]   ;;  %v6731_v23 = vld [vmem:[%s7574_s29 + $0x118] ss:$100 sps:$4 sm:$0xff]  }
 0x1bf   : > { %5737 = vmatpush3.bf16.msra.mxu0 %v9135_v30 }
 0x1c0   : > { %5759 = vmatpush3.bf16.msra.mxu1 %v8010_v34  ;;  %5738 = vmatprep.subr.bf16.mxu0 %v9143_v33  ;;  %v9147_v29 = vadd.f32 %v5482_v32, %v2529_v61  ;;  %v9159_v34 = vld [vmem:[%s10358_s1 + $0x4e0] sm:$0xff]  }
 0x1c1   : > { %5760 = vmatprep.subr.bf16.mxu1 %v8019_v36  ;;  %v9166_v36 = vld [vmem:[%s10358_s1 + $0x4a0] sm:$0xff]  }
 0x1c3   : > { %5739 = vmatpush3.bf16.msra.mxu0 %v9152_v10 }
 0x1c4   : > { %5761 = vmatpush3.bf16.msra.mxu1 %v8028_v38  ;;  %5740 = vmatprep.subr.bf16.mxu0 %v9159_v34  ;;  %v9173_v38 = vld [vmem:[%s10358_s1 + $0x4d8] sm:$0xff]  }
 0x1c5   : > { %5762 = vmatprep.subr.bf16.mxu1 %v8037_v40  ;;  %v9180_v40 = vld [vmem:[%s10358_s1 + $0x498] sm:$0xff]  }
 0x1c7   : > { %5741 = vmatpush3.bf16.msra.mxu0 %v9166_v36 }
 0x1c8   : > { %5763 = vmatpush3.bf16.msra.mxu1 %v8046_v42  ;;  %5742 = vmatprep.subr.bf16.mxu0 %v9173_v38  ;;  %v9187_v42 = vld [vmem:[%s10358_s1 + $0x4d0] sm:$0xff]  }
 0x1c9   : > { %5764 = vmatprep.subr.bf16.mxu1 %v8055_v44  ;;  %v9194_v44 = vld [vmem:[%s10358_s1 + $0x490] sm:$0xff]  }
 0x1cb   : > { %5743 = vmatpush3.bf16.msra.mxu0 %v9180_v40 }
 0x1cc   : > { %5765 = vmatpush3.bf16.msra.mxu1 %v8064_v46  ;;  %5744 = vmatprep.subr.bf16.mxu0 %v9187_v42  ;;  %v9201_v46 = vld [vmem:[%s10358_s1 + $0x4c8] sm:$0xff]  }
 0x1cd   : > { %5766 = vmatprep.subr.bf16.mxu1 %v8073_v48  ;;  %v9208_v48 = vld [vmem:[%s10358_s1 + $0x488] sm:$0xff]  }
 0x1cf   : > { %5745 = vmatpush3.bf16.msra.mxu0 %v9194_v44 }
 0x1d0   : > { %5767 = vmatpush3.bf16.msra.mxu1 %v8082_v50  ;;  %5746 = vmatprep.subr.bf16.mxu0 %v9201_v46  ;;  %v9215_v50 = vld [vmem:[%s10358_s1 + $0x4c0] sm:$0xff]  }
 0x1d1   : > { %5768 = vmatprep.subr.bf16.mxu1 %v8093_v52  ;;  %v9223_v52 = vld [vmem:[%s10358_s1 + $0x480] sm:$0xff]   ;;  %v5499_v45 = vpop.f32.mrf.mxu0 }
 0x1d2   : > { %v5521_v24 = vpop.f32.mrf.mxu1 }
 0x1d3   : > { %5747 = vmatpush3.bf16.msra.mxu0 %v9208_v48 }
 0x1d4   : > { %5769 = vmatpush3.bf16.msra.mxu1 %v8105_v54  ;;  %5748 = vmatprep.subr.bf16.mxu0 %v9215_v50  ;;  %v9231_v54 = vld [vmem:[%s10358_s1 + $0x5f8] sm:$0xff]   ;;  %v5522_v21 = vpop.f32.mrf.mxu1 }
 0x1d5   : > { %5770 = vmatprep.subr.bf16.mxu1 %v8117_v56  ;;  %v6736_v56 = vld [vmem:[%s7574_s29 + $0x124] ss:$100 sps:$4 sm:$0xff]   ;;  %v5523_v61 = vadd.f32 %v5522_v21, %v5521_v24 }
 0x1d7   : > { %5749 = vmatpush3.bf16.msra.mxu0 %v9223_v52 }
 0x1d8   : > { %5771 = vmatpush3.bf16.msra.mxu1 %v8129_v58  ;;  %5778 = vmatprep.subr.bf16.mxu0 %v9231_v54  ;;  %v5500_v58 = vpop.f32.mrf.mxu0 }
 0x1d9   : > { %6375 = vmatprep.subr.bf16.mxu1 %v10613_v60  ;;  %v5501_v62 = vadd.f32 %v5500_v58, %v5499_v45 }
 0x1da   : > { %3251 = vmatmul.mubr.bf16.vlgmr.msra.gmra.mxu0 %v6728_v47  ;;  %v5502_v32 = vpop.f32.mrf.mxu0  ;;  %v5524_v47 = vpop.f32.mrf.mxu1 }
 0x1db   : > { %3292 = vmatmul.mubr.bf16.vlgmr.msra.gmra.mxu1 %v6731_v23  ;;  %5779 = vmatpush3.bf16.msra.mxu0 %v9239_v28  ;;  %v9256_v23 = vld [vmem:[%s10358_s1 + $0x5b0] sm:$0xff]  }
 0x1dc   : > { %6376 = vmatpush3.bf16.msra.mxu1 %v8153_v2  ;;  %5780 = vmatprep.subr.bf16.mxu0 %v9246_v17  ;;  %v2608_v2 = vadd.f32 %v5501_v62, %v9130_v26  ;;  %v5503_v45 = vpop.f32.mrf.mxu0  ;;  %v5525_v26 = vpop.f32.mrf.mxu1 }
 0x1dd   : > { %6377 = vmatprep.subr.bf16.mxu1 %v10613_v60  ;;  %3332 = vmatprep.mubr.bf16.mxu0 %v6736_v56  ;;  %v9263_v56 = vld [vmem:[%s10358_s1 + $0x5e8] sm:$0xff]   ;;  %v5504_v24 = vadd.f32 %v5503_v45, %v5502_v32  ;;  %v5526_v62 = vadd.f32 %v5525_v26, %v5524_v47  ;;  %v9278_v32 = vld [vmem:[%s10358_s1 + $0x5e0] sm:$0xff]   ;;  %v6741_v26 = vld [vmem:[%s7574_s29 + $0x198] ss:$100 sps:$4 sm:$0xff]  }
 0x1de   : > { %6391 = vmatprep.mubr.msk.bf16.mxu1 %vm7208_vm0, %v10613_v60  ;;  %v2649_v58 = vadd.f32 %v5523_v61, %v2608_v2  ;;  %v9299_v2 = vld [vmem:[%s10358_s1 + $0x598] sm:$0xff]   ;;  %v6737_v47 = vld [vmem:[%s7574_s29 + $0x128] ss:$100 sps:$4 sm:$0xff]  }
 0x1df   : > { %5781 = vmatpush3.bf16.msra.mxu0 %v9256_v23  ;;  %v2611_v21 = vadd.f32 %v5504_v24, %v9147_v29  ;;  %v9285_v29 = vld [vmem:[%s10358_s1 + $0x5a0] sm:$0xff]   ;;  %v10626_v24 = vld [vmem:[#allocation9_spill] sm:$0xff] }
 0x1e0   : > { %6378 = vmatpush3.bf16.msra.mxu1 %v8159_v3  ;;  %5782 = vmatprep.subr.bf16.mxu0 %v9263_v56  ;;  %v9271_v3 = vld [vmem:[%s10358_s1 + $0x5a8] sm:$0xff]  }
 0x1e1   : > { %6379 = vmatprep.subr.bf16.mxu1 %v10613_v60  ;;  %v2652_v61 = vadd.f32 %v5526_v62, %v2611_v21  ;;  %v10628_v62 = vld [vmem:[#allocation10_spill] sm:$0xff]  ;;  %v10629_v21 = vld [vmem:[#allocation33_spill] sm:$0xff] }
 0x1e3   : > { %5783 = vmatpush3.bf16.msra.mxu0 %v9271_v3 }
 0x1e4   : > { %6380 = vmatpush3.bf16.msra.mxu1 %v8180_v6  ;;  %5784 = vmatprep.subr.bf16.mxu0 %v9278_v32  ;;  %v9292_v6 = vld [vmem:[%s10358_s1 + $0x5d8] sm:$0xff]  }
 0x1e5   : > { %6381 = vmatprep.subr.bf16.mxu1 %v10613_v60 }
 0x1e7   : > { %5785 = vmatpush3.bf16.msra.mxu0 %v9285_v29 }
 0x1e8   : > { %6382 = vmatpush3.bf16.msra.mxu1 %v8198_v9  ;;  %5786 = vmatprep.subr.bf16.mxu0 %v9292_v6  ;;  %v9306_v9 = vld [vmem:[%s10358_s1 + $0x5d0] sm:$0xff]  }
 0x1e9   : > { %6383 = vmatprep.subr.bf16.mxu1 %v10613_v60 }
 0x1eb   : > { %5787 = vmatpush3.bf16.msra.mxu0 %v9299_v2 }
 0x1ec   : > { %6384 = vmatpush3.bf16.msra.mxu1 %v8219_v13  ;;  %5788 = vmatprep.subr.bf16.mxu0 %v9306_v9  ;;  %v6734_v13 = vld [vmem:[%s7574_s29 + $0x120] ss:$100 sps:$4 sm:$0xff]  }
 0x1ed   : > { %6385 = vmatprep.subr.bf16.mxu1 %v10613_v60 }
 0x1ef   : > { %5789 = vmatpush3.bf16.msra.mxu0 %v8087_v51  ;;  %v6740_v51 = vld [vmem:[%s7574_s29 + $0x194] ss:$100 sps:$4 sm:$0xff]  }
 0x1f0   : > { %6386 = vmatpush3.bf16.msra.mxu1 %v8238_v16  ;;  %5790 = vmatprep.subr.bf16.mxu0 %v8099_v53 }
 0x1f1   : > { %6387 = vmatprep.subr.bf16.mxu1 %v10613_v60  ;;  %v2689_v53 = vpop.f32.mrf.mxu0 }
 0x1f2   : > { %v9326_v16 = vadd.f32 %v2689_v53, %v2649_v58  ;;  %v10627_v58 = vld [vmem:[#allocation31_spill] sm:$0xff] }
 0x1f3   : > { %5791 = vmatpush3.bf16.msra.mxu0 %v8111_v55  ;;  %v6743_v55 = vld [vmem:[%s7574_s29 + $0x19c] ss:$100 sps:$4 sm:$0xff]  }
 0x1f4   : > { %6388 = vmatpush3.bf16.msra.mxu1 %v8256_v19  ;;  %5792 = vmatprep.subr.bf16.mxu0 %v8123_v57  ;;  %v5552_v19 = vpop.f32.mrf.mxu1  ;;  %v6373_v57 = vpop.f32.mrf.mxu0  ;;  %v10630_v53 = vld [vmem:[#allocation11_spill] sm:$0xff] }
 0x1f5   : > { %6389 = vmatprep.subr.bf16.mxu1 %v10613_v60  ;;  %v10632_v57 = vld [vmem:[#allocation12_spill] sm:$0xff] }
 0x1f7   : > { %5793 = vmatpush3.bf16.msra.mxu0 %v8135_v59  ;;  %v5553_v59 = vpop.f32.mrf.mxu1 }
 0x1f8   : > { %6390 = vmatpush3.bf16.msra.mxu1 %v8275_v27  ;;  %5809 = vmatprep.subr.bf16.mxu0 %v8147_v1  ;;  %v5554_v1 = vadd.f32 %v5553_v59, %v5552_v19  ;;  %v2692_v27 = vpop.f32.mrf.mxu0 }
 0x1f9   : > { %5831 = vmatprep.subr.bf16.mxu1 %v8307_v63  ;;  %v9332_v63 = vadd.f32 %v2692_v27, %v2652_v61  ;;  %v5555_v45 = vpop.f32.mrf.mxu1  ;;  %v6746_v61 = vld [vmem:[%s7574_s29 + $0x1a4] ss:$100 sps:$4 sm:$0xff]  }
 0x1fa   : > { %3333 = vmatmul.mubr.bf16.vlgmr.msra.gmra.mxu0 %v6734_v13 }
 0x1fb   : > { %6392 = vmatmul.mubr.bf16.vlgmr.msra.gmra.mxu1 %v6737_v47  ;;  %5810 = vmatpush3.bf16.msra.mxu0 %v8164_v4  ;;  %v6374_v4 = vpop.f32.mrf.mxu0  ;;  %v6749_v47 = vld [vmem:[%s7574_s29 + $0x1ac] ss:$100 sps:$4 sm:$0xff]  }
 0x1fc   : > { %5832 = vmatpush3.bf16.msra.mxu1 %v8321_v22  ;;  %5811 = vmatprep.subr.bf16.mxu0 %v8171_v5  ;;  %v5556_v22 = vpop.f32.mrf.mxu1 }
 0x1fd   : > { %5833 = vmatprep.subr.bf16.mxu1 %v8333_v25  ;;  %3569 = vmatprep.mubr.bf16.mxu0 %v6740_v51  ;;  %v5557_v5 = vadd.f32 %v5556_v22, %v5555_v45  ;;  %v10617_v25 = vld [vmem:[#allocation21_spill] sm:$0xff] }
 0x1fe   : > { %3610 = vmatprep.mubr.bf16.mxu1 %v6743_v55  ;;  %v10631_v55 = vld [vmem:[#allocation35_spill] sm:$0xff]  ;;  %v10633_v45 = vld [vmem:[#allocation37_spill] sm:$0xff] }
 0x1ff   : > { %5812 = vmatpush3.bf16.msra.mxu0 %v8185_v7  ;;  %v10614_v7 = vld [vmem:[#allocation3_spill] sm:$0xff] }
 0x200   : > { %5834 = vmatpush3.bf16.msra.mxu1 %v8345_v31  ;;  %5813 = vmatprep.subr.bf16.mxu0 %v8192_v8  ;;  %v10615_v8 = vld [vmem:[#allocation19_spill] sm:$0xff]  ;;  %v10620_v31 = vld [vmem:[#allocation6_spill] sm:$0xff] }
 0x201   : > { %5835 = vmatprep.subr.bf16.mxu1 %v8357_v37  ;;  %v10622_v37 = vld [vmem:[#allocation7_spill] sm:$0xff] }
 0x203   : > { %5814 = vmatpush3.bf16.msra.mxu0 %v8205_v11  ;;  %v10616_v11 = vld [vmem:[#allocation4_spill] sm:$0xff] }
 0x204   : > { %5836 = vmatpush3.bf16.msra.mxu1 %v8369_v43  ;;  %5815 = vmatprep.subr.bf16.mxu0 %v8212_v12  ;;  %v10618_v12 = vld [vmem:[#allocation5_spill] sm:$0xff]  ;;  %v10624_v43 = vld [vmem:[#allocation8_spill] sm:$0xff] }
 0x205   : > { %5837 = vmatprep.subr.bf16.mxu1 %v8381_v49  ;;  %v10625_v49 = vld [vmem:[#allocation29_spill] sm:$0xff] }
 0x207   : > { %5816 = vmatpush3.bf16.msra.mxu0 %v8224_v14  ;;  %v10619_v14 = vld [vmem:[#allocation23_spill] sm:$0xff] }
 0x208   : > { %5838 = vmatpush3.bf16.msra.mxu1 %v8393_v20  ;;  %5817 = vmatprep.subr.bf16.mxu0 %v8231_v15  ;;  %v10621_v15 = vld [vmem:[#allocation25_spill] sm:$0xff] }
 0x209   : > { %5839 = vmatprep.subr.bf16.mxu1 %v8405_v0  ;;  %v10623_v0 = vld [vmem:[#allocation27_spill] sm:$0xff]  ;;  %v6738_v20 = vld [vmem:[%s7574_s29 + $0x190] ss:$100 sps:$4 sm:$0xff]  }
 0x20b   : > { %5818 = vmatpush3.bf16.msra.mxu0 %v10614_v7 }
 0x20c   : > { %5840 = vmatpush3.bf16.msra.mxu1 %v10615_v8  ;;  %5819 = vmatprep.subr.bf16.mxu0 %v10616_v11  ;;  %v10634_v11 = vld [vmem:[#allocation13_spill] sm:$0xff] }
 0x20d   : > { %5841 = vmatprep.subr.bf16.mxu1 %v10617_v25  ;;  %v10635_v25 = vld [vmem:[#allocation39_spill] sm:$0xff] }
 0x20f   : > { %5820 = vmatpush3.bf16.msra.mxu0 %v10618_v12 }
 0x210   : > { %5842 = vmatpush3.bf16.msra.mxu1 %v10619_v14  ;;  %5821 = vmatprep.subr.bf16.mxu0 %v10620_v31  ;;  %v10636_v14 = vld [vmem:[#allocation14_spill] sm:$0xff] }
 0x211   : > { %5843 = vmatprep.subr.bf16.mxu1 %v10621_v15 }
 0x213   : > { %5822 = vmatpush3.bf16.msra.mxu0 %v10622_v37 }
 0x214   : > { %5844 = vmatpush3.bf16.msra.mxu1 %v10623_v0  ;;  %5823 = vmatprep.subr.bf16.mxu0 %v10624_v43  ;;  %v10637_v0 = vld [vmem:[#allocation41_spill] sm:$0xff] }
 0x215   : > { %5845 = vmatprep.subr.bf16.mxu1 %v10625_v49 }
 0x217   : > { %5824 = vmatpush3.bf16.msra.mxu0 %v10626_v24  ;;  %v10639_v24 = vld [vmem:[#allocation43_spill] sm:$0xff] }
 0x218   : > { %5846 = vmatpush3.bf16.msra.mxu1 %v10627_v58  ;;  %5853 = vmatprep.subr.bf16.mxu0 %v10628_v62  ;;  %v10641_v58 = vld [vmem:[#allocation45_spill] sm:$0xff] }
 0x219   : > { %5875 = vmatprep.subr.bf16.mxu1 %v10629_v21  ;;  %v5596_v51 = vpop.f32.mrf.mxu1  ;;  %v10642_v62 = vld [vmem:[#allocation17_spill] sm:$0xff]  ;;  %v10643_v21 = vld [vmem:[#allocation47_spill] sm:$0xff] }
 0x21a   : > { %v5574_v13 = vpop.f32.mrf.mxu0  ;;  %3570 = vmatmul.mubr.bf16.vlgmr.msra.gmra.mxu0 %v6738_v20  ;;  %v10638_v20 = vld [vmem:[#allocation15_spill] sm:$0xff] }
 0x21b   : > { %3611 = vmatmul.mubr.bf16.vlgmr.msra.gmra.mxu1 %v6741_v26  ;;  %5854 = vmatpush3.bf16.msra.mxu0 %v10630_v53  ;;  %v5597_v27 = vpop.f32.mrf.mxu1  ;;  %v10649_v53 = vld [vmem:[#allocation53_spill] sm:$0xff] }
 0x21c   : > { %5876 = vmatpush3.bf16.msra.mxu1 %v10631_v55  ;;  %v5575_v19 = vpop.f32.mrf.mxu0  ;;  %5855 = vmatprep.subr.bf16.mxu0 %v10632_v57  ;;  %v5598_v4 = vadd.f32 %v5597_v27, %v5596_v51  ;;  %v10648_v51 = vld [vmem:[#allocation22_spill] sm:$0xff]  ;;  %v10650_v55 = vld [vmem:[#allocation24_spill] sm:$0xff] }
 0x21d   : > { %v5576_v59 = vadd.f32 %v5575_v19, %v5574_v13  ;;  %5877 = vmatprep.subr.bf16.mxu1 %v10633_v45  ;;  %3651 = vmatprep.mubr.bf16.mxu0 %v6746_v61  ;;  %v5599_v8 = vpop.f32.mrf.mxu1  ;;  %v10644_v61 = vld [vmem:[#allocation18_spill] sm:$0xff]  ;;  %v10645_v13 = vld [vmem:[#allocation49_spill] sm:$0xff]  ;;  %v10651_v19 = vld [vmem:[#allocation55_spill] sm:$0xff] }
 0x21e   : > { %v5577_v22 = vpop.f32.mrf.mxu0  ;;  %3692 = vmatprep.mubr.bf16.mxu1 %v6749_v47  ;;  %v10647_v47 = vld [vmem:[#allocation51_spill] sm:$0xff]  ;;  %v10652_v57 = vld [vmem:[#allocation26_spill] sm:$0xff]  ;;  %v10654_v27 = vld [vmem:[#allocation28_spill] sm:$0xff] }
 0x21f   : > { %v2925_v7 = vadd.f32 %v5576_v59, %v5554_v1  ;;  %5856 = vmatpush3.bf16.msra.mxu0 %v10634_v11  ;;  %v5600_v37 = vpop.f32.mrf.mxu1  ;;  %v10640_v1 = vld [vmem:[#allocation16_spill] sm:$0xff]  ;;  %v10653_v59 = vld [vmem:[#allocation57_spill] sm:$0xff]  ;;  %v10655_v45 = vld [vmem:[#allocation59_spill] sm:$0xff] }
 0x220   : > { %5878 = vmatpush3.bf16.msra.mxu1 %v10635_v25  ;;  %v5578_v12 = vpop.f32.mrf.mxu0  ;;  %5857 = vmatprep.subr.bf16.mxu0 %v10636_v14  ;;  %v5601_v43 = vadd.f32 %v5600_v37, %v5599_v8  ;;  %v10658_v8 = vld [vmem:[#allocation32_spill] sm:$0xff]  ;;  %v10659_v25 = vld [vmem:[#allocation63_spill] sm:$0xff]  ;;  %v10661_v14 = vld [vmem:[#allocation65_spill] sm:$0xff] }
 0x221   : > { %v2966_v31 = vadd.f32 %v5598_v4, %v2925_v7  ;;  %v5579_v15 = vadd.f32 %v5578_v12, %v5577_v22  ;;  %5879 = vmatprep.subr.bf16.mxu1 %v10637_v0  ;;  %v10656_v4 = vld [vmem:[#allocation30_spill] sm:$0xff]  ;;  %v10657_v22 = vld [vmem:[#allocation61_spill] sm:$0xff]  ;;  %v6744_v7 = vld [vmem:[%s7574_s29 + $0x1a0] ss:$100 sps:$4 sm:$0xff]  }
 0x222   : > { %v6747_v11 = vld [vmem:[%s7574_s29 + $0x1a8] ss:$100 sps:$4 sm:$0xff]   ;;  %v10660_v12 = vld [vmem:[#allocation34_spill] sm:$0xff] }
 0x223   : > { %v2928_v49 = vadd.f32 %v5579_v15, %v5557_v5  ;;  %5858 = vmatpush3.bf16.msra.mxu0 %v10638_v20  ;;  %v10646_v5 = vld [vmem:[#allocation20_spill] sm:$0xff]  ;;  %v6752_v15 = vld [vmem:[%s7574_s29 + $0x1b4] ss:$100 sps:$4 sm:$0xff]   ;;  %v6755_v0 = vld [vmem:[%s7574_s29 + $0x1bc] ss:$100 sps:$4 sm:$0xff]  }
 0x224   : > { %5880 = vmatpush3.bf16.msra.mxu1 %v10639_v24  ;;  %5859 = vmatprep.subr.bf16.mxu0 %v10640_v1  ;;  %v10663_v20 = vld [vmem:[#allocation67_spill] sm:$0xff]  ;;  %v10664_v1 = vld [vmem:[#allocation38_spill] sm:$0xff] }
 0x225   : > { %v2969_v26 = vadd.f32 %v5601_v43, %v2928_v49  ;;  %5881 = vmatprep.subr.bf16.mxu1 %v10641_v58  ;;  %v10662_v49 = vld [vmem:[#allocation36_spill] sm:$0xff] }
 0x227   : > { %5860 = vmatpush3.bf16.msra.mxu0 %v10642_v62 }
 0x228   : > { %5882 = vmatpush3.bf16.msra.mxu1 %v10643_v21  ;;  %5861 = vmatprep.subr.bf16.mxu0 %v10644_v61  ;;  %v10665_v21 = vld [vmem:[#allocation69_spill] sm:$0xff] }
 0x229   : > { %5883 = vmatprep.subr.bf16.mxu1 %v10645_v13 }
 0x22b   : > { %5862 = vmatpush3.bf16.msra.mxu0 %v10646_v5 }
 0x22c   : > { %5884 = vmatpush3.bf16.msra.mxu1 %v10647_v47  ;;  %5863 = vmatprep.subr.bf16.mxu0 %v10648_v51  ;;  %v10666_v51 = vld [vmem:[#allocation40_spill] sm:$0xff] }
 0x22d   : > { %5885 = vmatprep.subr.bf16.mxu1 %v10649_v53  ;;  %v10667_v53 = vld [vmem:[#allocation71_spill] sm:$0xff] }
 0x22f   : > { %5864 = vmatpush3.bf16.msra.mxu0 %v10650_v55 }
 0x230   : > { %5886 = vmatpush3.bf16.msra.mxu1 %v10651_v19  ;;  %5865 = vmatprep.subr.bf16.mxu0 %v10652_v57  ;;  %v10668_v19 = vld [vmem:[#allocation42_spill] sm:$0xff] }
 0x231   : > { %5887 = vmatprep.subr.bf16.mxu1 %v10653_v59 }
 0x233   : > { %5866 = vmatpush3.bf16.msra.mxu0 %v10654_v27 }
 0x234   : > { %5888 = vmatpush3.bf16.msra.mxu1 %v10655_v45  ;;  %5867 = vmatprep.subr.bf16.mxu0 %v10656_v4  ;;  %v10669_v45 = vld [vmem:[#allocation73_spill] sm:$0xff] }
 0x235   : > { %5889 = vmatprep.subr.bf16.mxu1 %v10657_v22 }
 0x237   : > { %5868 = vmatpush3.bf16.msra.mxu0 %v10658_v8  ;;  %v10671_v8 = vld [vmem:[#allocation75_spill] sm:$0xff] }
 0x238   : > { %5890 = vmatpush3.bf16.msra.mxu1 %v10659_v25  ;;  %5897 = vmatprep.subr.bf16.mxu0 %v10660_v12  ;;  %v10673_v25 = vld [vmem:[#allocation77_spill] sm:$0xff]  ;;  %v10674_v12 = vld [vmem:[#allocation48_spill] sm:$0xff] }
 0x239   : > { %5919 = vmatprep.subr.bf16.mxu1 %v10661_v14  ;;  %v10675_v14 = vld [vmem:[#allocation79_spill] sm:$0xff] }
 0x23a   : > { %v5618_v37 = vpop.f32.mrf.mxu0  ;;  %3652 = vmatmul.mubr.bf16.vlgmr.msra.gmra.mxu0 %v6744_v7  ;;  %v10670_v7 = vld [vmem:[#allocation44_spill] sm:$0xff] }
 0x23b   : > { %v5640_v43 = vpop.f32.mrf.mxu1  ;;  %3693 = vmatmul.mubr.bf16.vlgmr.msra.gmra.mxu1 %v6747_v11  ;;  %5898 = vmatpush3.bf16.msra.mxu0 %v10662_v49  ;;  %v10681_v49 = vld [vmem:[#allocation85_spill] sm:$0xff] }
 0x23c   : > { %5920 = vmatpush3.bf16.msra.mxu1 %v10663_v20  ;;  %v5619_v24 = vpop.f32.mrf.mxu0  ;;  %5899 = vmatprep.subr.bf16.mxu0 %v10664_v1  ;;  %v10682_v20 = vld [vmem:[#allocation56_spill] sm:$0xff]  ;;  %v10684_v1 = vld [vmem:[#allocation58_spill] sm:$0xff] }
 0x23d   : > { %v5620_v58 = vadd.f32 %v5619_v24, %v5618_v37  ;;  %v5641_v62 = vpop.f32.mrf.mxu1  ;;  %5921 = vmatprep.subr.bf16.mxu1 %v10665_v21  ;;  %3733 = vmatprep.mubr.bf16.mxu0 %v6752_v15  ;;  %v10676_v15 = vld [vmem:[#allocation50_spill] sm:$0xff]  ;;  %v10677_v37 = vld [vmem:[#allocation81_spill] sm:$0xff]  ;;  %v10683_v24 = vld [vmem:[#allocation87_spill] sm:$0xff] }
 0x23e   : > { %v5642_v61 = vadd.f32 %v5641_v62, %v5640_v43  ;;  %v5621_v13 = vpop.f32.mrf.mxu0  ;;  %3774 = vmatprep.mubr.bf16.mxu1 %v6755_v0  ;;  %v10679_v0 = vld [vmem:[#allocation83_spill] sm:$0xff]  ;;  %v10680_v43 = vld [vmem:[#allocation54_spill] sm:$0xff]  ;;  %v10686_v62 = vld [vmem:[#allocation60_spill] sm:$0xff] }
 0x23f   : > { %v3007_v5 = vadd.f32 %v5620_v58, %v2966_v31  ;;  %v5643_v47 = vpop.f32.mrf.mxu1  ;;  %5900 = vmatpush3.bf16.msra.mxu0 %v10666_v51  ;;  %v10672_v31 = vld [vmem:[#allocation46_spill] sm:$0xff]  ;;  %v10685_v58 = vld [vmem:[#allocation89_spill] sm:$0xff]  ;;  %v10687_v21 = vld [vmem:[#allocation91_spill] sm:$0xff] }
 0x240   : > { %5922 = vmatpush3.bf16.msra.mxu1 %v10667_v53  ;;  %v5622_v55 = vpop.f32.mrf.mxu0  ;;  %5901 = vmatprep.subr.bf16.mxu0 %v10668_v19  ;;  %v6753_v51 = vld [vmem:[%s7574_s29 + $0x1b8] ss:$100 sps:$4 sm:$0xff]   ;;  %v10691_v53 = vld [vmem:[#allocation95_spill] sm:$0xff] }
 0x241   : > { %v3048_v57 = vadd.f32 %v5642_v61, %v3007_v5  ;;  %v5623_v59 = vadd.f32 %v5622_v55, %v5621_v13  ;;  %v5644_v27 = vpop.f32.mrf.mxu1  ;;  %5923 = vmatprep.subr.bf16.mxu1 %v10669_v45  ;;  %v10688_v61 = vld [vmem:[#allocation62_spill] sm:$0xff]  ;;  %v10689_v13 = vld [vmem:[#allocation93_spill] sm:$0xff]  ;;  %v6758_v19 = vld [vmem:[%s7574_s29 + $0x1c4] ss:$100 sps:$4 sm:$0xff]  }
 0x242   : > { %v5645_v4 = vadd.f32 %v5644_v27, %v5643_v47  ;;  %v6750_v5 = vld [vmem:[%s7574_s29 + $0x1b0] ss:$100 sps:$4 sm:$0xff]   ;;  %v10690_v47 = vld [vmem:[#allocation64_spill] sm:$0xff]  ;;  %v10692_v55 = vld [vmem:[#allocation66_spill] sm:$0xff] }
 0x243   : > { %v3010_v22 = vadd.f32 %v5623_v59, %v2969_v26  ;;  %5902 = vmatpush3.bf16.msra.mxu0 %v10670_v7  ;;  %v10678_v26 = vld [vmem:[#allocation52_spill] sm:$0xff]  ;;  %v10694_v7 = vld [vmem:[#allocation70_spill] sm:$0xff] }
 0x244   : > { %5924 = vmatpush3.bf16.msra.mxu1 %v10671_v8  ;;  %5903 = vmatprep.subr.bf16.mxu0 %v10672_v31  ;;  %v6761_v27 = vld [vmem:[%s7574_s29 + $0x1cc] ss:$100 sps:$4 sm:$0xff]  }
 0x245   : > { %v3051_v11 = vadd.f32 %v5645_v4, %v3010_v22  ;;  %5925 = vmatprep.subr.bf16.mxu1 %v10673_v25  ;;  %v10693_v4 = vld [vmem:[#allocation68_spill] sm:$0xff] }
 0x247   : > { %5904 = vmatpush3.bf16.msra.mxu0 %v10674_v12 }
 0x248   : > { %5926 = vmatpush3.bf16.msra.mxu1 %v10675_v14  ;;  %5905 = vmatprep.subr.bf16.mxu0 %v10676_v15  ;;  %v10695_v15 = vld [vmem:[#allocation72_spill] sm:$0xff] }
 0x249   : > { %5927 = vmatprep.subr.bf16.mxu1 %v10677_v37  ;;  %v10696_v37 = vld [vmem:[#allocation100_spill] sm:$0xff] }
 0x24b   : > { %5906 = vmatpush3.bf16.msra.mxu0 %v10678_v26 }
 0x24c   : > { %5928 = vmatpush3.bf16.msra.mxu1 %v10679_v0  ;;  %5907 = vmatprep.subr.bf16.mxu0 %v10680_v43  ;;  %v10697_v0 = vld [vmem:[#allocation74_spill] sm:$0xff] }
 0x24d   : > { %5929 = vmatprep.subr.bf16.mxu1 %v10681_v49 }
 0x24f   : > { %5908 = vmatpush3.bf16.msra.mxu0 %v10682_v20  ;;  %v10698_v20 = vld [vmem:[#allocation102_spill] sm:$0xff] }
 0x250   : > { %5930 = vmatpush3.bf16.msra.mxu1 %v10683_v24  ;;  %5909 = vmatprep.subr.bf16.mxu0 %v10684_v1  ;;  %v10699_v1 = vld [vmem:[#allocation76_spill] sm:$0xff] }
 0x251   : > { %5931 = vmatprep.subr.bf16.mxu1 %v10685_v58  ;;  %v10700_v58 = vld [vmem:[#allocation104_spill] sm:$0xff] }
 0x253   : > { %5910 = vmatpush3.bf16.msra.mxu0 %v10686_v62 }
 0x254   : > { %5932 = vmatpush3.bf16.msra.mxu1 %v10687_v21  ;;  %5911 = vmatprep.subr.bf16.mxu0 %v10688_v61  ;;  %v10702_v21 = vld [vmem:[#allocation106_spill] sm:$0xff]  ;;  %v10703_v61 = vld [vmem:[#allocation80_spill] sm:$0xff] }
 0x255   : > { %5933 = vmatprep.subr.bf16.mxu1 %v10689_v13  ;;  %v10704_v13 = vld [vmem:[#allocation108_spill] sm:$0xff] }
 0x257   : > { %5912 = vmatpush3.bf16.msra.mxu0 %v10690_v47  ;;  %v10706_v47 = vld [vmem:[#allocation110_spill] sm:$0xff] }
 0x258   : > { %5934 = vmatpush3.bf16.msra.mxu1 %v10691_v53  ;;  %5941 = vmatprep.subr.bf16.mxu0 %v10692_v55  ;;  %v10709_v53 = vld [vmem:[#allocation86_spill] sm:$0xff] }
 0x259   : > { %5963 = vmatprep.subr.bf16.mxu1 %v8907_v18  ;;  %v10710_v55 = vld [vmem:[#allocation114_spill] sm:$0xff] }
 0x25a   : > { %v5662_v59 = vpop.f32.mrf.mxu0  ;;  %3734 = vmatmul.mubr.bf16.vlgmr.msra.gmra.mxu0 %v6750_v5  ;;  %v10705_v5 = vld [vmem:[#allocation82_spill] sm:$0xff] }
 0x25b   : > { %v5684_v45 = vpop.f32.mrf.mxu1  ;;  %3775 = vmatmul.mubr.bf16.vlgmr.msra.gmra.mxu1 %v6753_v51  ;;  %5942 = vmatpush3.bf16.msra.mxu0 %v10693_v4  ;;  %v10708_v51 = vld [vmem:[#allocation112_spill] sm:$0xff] }
 0x25c   : > { %5964 = vmatpush3.bf16.msra.mxu1 %v8922_v41  ;;  %v5663_v22 = vpop.f32.mrf.mxu0  ;;  %5943 = vmatprep.subr.bf16.mxu0 %v10694_v7  ;;  %v10715_v4 = vld [vmem:[#allocation92_spill] sm:$0xff]  ;;  %v10717_v7 = vld [vmem:[#allocation94_spill] sm:$0xff] }
 0x25d   : > { %v5664_v8 = vadd.f32 %v5663_v22, %v5662_v59  ;;  %v5685_v31 = vpop.f32.mrf.mxu1  ;;  %5965 = vmatprep.subr.bf16.mxu1 %v8936_v35  ;;  %3815 = vmatprep.mubr.bf16.mxu0 %v6758_v19  ;;  %v10711_v19 = vld [vmem:[#allocation88_spill] sm:$0xff] }
 0x25e   : > { %v5686_v25 = vadd.f32 %v5685_v31, %v5684_v45  ;;  %v5665_v18 = vpop.f32.mrf.mxu0  ;;  %3856 = vmatprep.mubr.bf16.mxu1 %v6761_v27  ;;  %v10712_v59 = vld [vmem:[#allocation116_spill] sm:$0xff]  ;;  %v10713_v27 = vld [vmem:[#allocation90_spill] sm:$0xff]  ;;  %v6756_v31 = vld [vmem:[%s7574_s29 + $0x1c0] ss:$100 sps:$4 sm:$0xff]  }
 0x25f   : > { %v3089_v12 = vadd.f32 %v5664_v8, %v3048_v57  ;;  %v5687_v14 = vpop.f32.mrf.mxu1  ;;  %5944 = vmatpush3.bf16.msra.mxu0 %v10695_v15  ;;  %v10701_v57 = vld [vmem:[#allocation78_spill] sm:$0xff]  ;;  %v10716_v22 = vld [vmem:[#allocation120_spill] sm:$0xff] }
 0x260   : > { %5966 = vmatpush3.bf16.msra.mxu1 %v10696_v37  ;;  %v5666_v26 = vpop.f32.mrf.mxu0  ;;  %5945 = vmatprep.subr.bf16.mxu0 %v10697_v0  ;;  %v10714_v45 = vld [vmem:[#allocation118_spill] sm:$0xff] }
 0x261   : > { %v3130_v41 = vadd.f32 %v5686_v25, %v3089_v12  ;;  %v5667_v43 = vadd.f32 %v5666_v26, %v5665_v18  ;;  %v5688_v49 = vpop.f32.mrf.mxu1  ;;  %5967 = vmatprep.subr.bf16.mxu1 %v10698_v20  ;;  %v10718_v8 = vld [vmem:[#allocation122_spill] sm:$0xff]  ;;  %v10719_v25 = vld [vmem:[#allocation96_spill] sm:$0xff]  ;;  %v10724_v20 = vld [vmem:[#allocation127_spill] sm:$0xff] }
 0x262   : > { %v5689_v24 = vadd.f32 %v5688_v49, %v5687_v14  ;;  %v6759_v18 = vld [vmem:[%s7574_s29 + $0x1c8] ss:$100 sps:$4 sm:$0xff]   ;;  %v10721_v14 = vld [vmem:[#allocation97_spill] sm:$0xff]  ;;  %v10722_v15 = vld [vmem:[#allocation126_spill] sm:$0xff] }
 0x263   : > { %v3092_v35 = vadd.f32 %v5667_v43, %v3051_v11  ;;  %5946 = vmatpush3.bf16.msra.mxu0 %v10699_v1  ;;  %v10707_v11 = vld [vmem:[#allocation84_spill] sm:$0xff]  ;;  %v6764_v37 = vld [vmem:[%s7574_s29 + $0x1d4] ss:$100 sps:$4 sm:$0xff]   ;;  %v6767_v0 = vld [vmem:[%s7574_s29 + $0x1dc] ss:$100 sps:$4 sm:$0xff]  }
 0x264   : > { %5968 = vmatpush3.bf16.msra.mxu1 %v10700_v58  ;;  %5947 = vmatprep.subr.bf16.mxu0 %v10701_v57  ;;  %v10720_v12 = vld [vmem:[#allocation124_spill] sm:$0xff]  ;;  %v10723_v49 = vld [vmem:[#allocation98_spill] sm:$0xff] }
 0x265   : > { %v3133_v62 = vadd.f32 %v5689_v24, %v3092_v35  ;;  %5969 = vmatprep.subr.bf16.mxu1 %v10702_v21  ;;  %v10725_v35 = vld [vmem:[#allocation99_spill] sm:$0xff] }
 0x267   : > { %5948 = vmatpush3.bf16.msra.mxu0 %v10703_v61 }
 0x268   : > { %5970 = vmatpush3.bf16.msra.mxu1 %v10704_v13  ;;  %5949 = vmatprep.subr.bf16.mxu0 %v10705_v5  ;;  %v10726_v5 = vld [vmem:[#allocation101_spill] sm:$0xff] }
 0x269   : > { %5971 = vmatprep.subr.bf16.mxu1 %v10706_v47 }
 0x26b   : > { %5950 = vmatpush3.bf16.msra.mxu0 %v10707_v11  ;;  %v10727_v11 = vld [vmem:[#allocation103_spill] sm:$0xff] }
 0x26c   : > { %5972 = vmatpush3.bf16.msra.mxu1 %v10708_v51  ;;  %5951 = vmatprep.subr.bf16.mxu0 %v10709_v53 }
 0x26d   : > { %5973 = vmatprep.subr.bf16.mxu1 %v10710_v55 }
 0x26f   : > { %5952 = vmatpush3.bf16.msra.mxu0 %v10711_v19 }
 0x270   : > { %5974 = vmatpush3.bf16.msra.mxu1 %v10712_v59  ;;  %5953 = vmatprep.subr.bf16.mxu0 %v10713_v27  ;;  %v10728_v59 = vld [vmem:[#allocation105_spill] sm:$0xff] }
 0x271   : > { %5975 = vmatprep.subr.bf16.mxu1 %v10714_v45  ;;  %v10731_v45 = vld [vmem:[#allocation111_spill] sm:$0xff] }
 0x273   : > { %5954 = vmatpush3.bf16.msra.mxu0 %v10715_v4  ;;  %v6765_v4 = vld [vmem:[%s7574_s29 + $0x1d8] ss:$100 sps:$4 sm:$0xff]  }
 0x274   : > { %5976 = vmatpush3.bf16.msra.mxu1 %v10716_v22  ;;  %5955 = vmatprep.subr.bf16.mxu0 %v10717_v7  ;;  %v6773_v22 = vld [vmem:[%s7574_s29 + $0x1ec] ss:$100 sps:$4 sm:$0xff]   ;;  %v9518_v7 = vld [vmem:[%s10358_s1 + $0x538] sm:$0xff]  }
 0x275   : > { %5977 = vmatprep.subr.bf16.mxu1 %v10718_v8 }
 0x277   : > { %5956 = vmatpush3.bf16.msra.mxu0 %v10719_v25 }
 0x278   : > { %5978 = vmatpush3.bf16.msra.mxu1 %v10720_v12  ;;  %5985 = vmatprep.subr.bf16.mxu0 %v10721_v14 }
 0x279   : > { %6007 = vmatprep.subr.bf16.mxu1 %v10722_v15 }
 0x27a   : > { %v5706_v26 = vpop.f32.mrf.mxu0  ;;  %3816 = vmatmul.mubr.bf16.vlgmr.msra.gmra.mxu0 %v6756_v31 }
 0x27b   : > { %v5728_v43 = vpop.f32.mrf.mxu1  ;;  %3857 = vmatmul.mubr.bf16.vlgmr.msra.gmra.mxu1 %v6759_v18  ;;  %5986 = vmatpush3.bf16.msra.mxu0 %v10723_v49 }
 0x27c   : > { %6008 = vmatpush3.bf16.msra.mxu1 %v10724_v20  ;;  %v5707_v24 = vpop.f32.mrf.mxu0  ;;  %5987 = vmatprep.subr.bf16.mxu0 %v10725_v35  ;;  %v9555_v20 = vld [vmem:[%s10358_s1 + $0x560] sm:$0xff]   ;;  %v9610_v35 = vld [vmem:[%s10358_s1 + $0x5c8] sm:$0xff]  }
 0x27d   : > { %v5708_v1 = vadd.f32 %v5707_v24, %v5706_v26  ;;  %v5729_v58 = vpop.f32.mrf.mxu1  ;;  %6009 = vmatprep.subr.bf16.mxu1 %v9126_v39  ;;  %3897 = vmatprep.mubr.bf16.mxu0 %v6764_v37 }
 0x27e   : > { %v5730_v57 = vadd.f32 %v5729_v58, %v5728_v43  ;;  %v5709_v21 = vpop.f32.mrf.mxu0  ;;  %3938 = vmatprep.mubr.bf16.mxu1 %v6767_v0  ;;  %v9622_v58 = vld [vmem:[%s10358_s1 + $0x588] sm:$0xff]  }
 0x27f   : > { %v3171_v61 = vadd.f32 %v5708_v1, %v3130_v41  ;;  %v5731_v13 = vpop.f32.mrf.mxu1  ;;  %5988 = vmatpush3.bf16.msra.mxu0 %v10726_v5  ;;  %v10729_v41 = vld [vmem:[#allocation107_spill] sm:$0xff]  ;;  %v9616_v1 = vld [vmem:[%s10358_s1 + $0x508] sm:$0xff]  }
 0x280   : > { %6010 = vmatpush3.bf16.msra.mxu1 %v9135_v30  ;;  %v5710_v47 = vpop.f32.mrf.mxu0  ;;  %5989 = vmatprep.subr.bf16.mxu0 %v10727_v11  ;;  %v10730_v30 = vld [vmem:[#allocation109_spill] sm:$0xff]  ;;  %v6771_v5 = vld [vmem:[%s7574_s29 + $0x1e8] ss:$100 sps:$4 sm:$0xff]   ;;  %v7004_v11 = vld [vmem:[%s10358_s1 + $0x78] sm:$0xff]  }
 0x281   : > { %v3212_v51 = vadd.f32 %v5730_v57, %v3171_v61  ;;  %v5711_v53 = vadd.f32 %v5710_v47, %v5709_v21  ;;  %v5732_v55 = vpop.f32.mrf.mxu1  ;;  %6011 = vmatprep.subr.bf16.mxu1 %v9143_v33  ;;  %v10732_v33 = vld [vmem:[#allocation113_spill] sm:$0xff]  ;;  %v9628_v57 = vld [vmem:[%s10358_s1 + $0x540] sm:$0xff]  }
 0x282   : > { %v5733_v19 = vadd.f32 %v5732_v55, %v5731_v13  ;;  %v9634_v21 = vld [vmem:[%s10358_s1 + $0x5c0] sm:$0xff]  }
 0x283   : > { %v3174_v39 = vadd.f32 %v5711_v53, %v3133_v62  ;;  %5990 = vmatpush3.bf16.msra.mxu0 %v10728_v59  ;;  %v10734_v62 = vld [vmem:[#allocation117_spill] sm:$0xff]  ;;  %v6768_v61 = vld [vmem:[%s7574_s29 + $0x1e0] ss:$100 sps:$4 sm:$0xff]  }
 0x284   : > { %6012 = vmatpush3.bf16.msra.mxu1 %v9152_v10  ;;  %5991 = vmatprep.subr.bf16.mxu0 %v10729_v41  ;;  %v10733_v10 = vld [vmem:[#allocation115_spill] sm:$0xff] }
 0x285   : > { %v3215_v27 = vadd.f32 %v5733_v19, %v3174_v39  ;;  %6013 = vmatprep.subr.bf16.mxu1 %v9159_v34  ;;  %v10735_v34 = vld [vmem:[#allocation119_spill] sm:$0xff]  ;;  %v9659_v19 = vld [vmem:[%s10358_s1 + $0x638] sm:$0xff]  }
 0x286   : > { %v9641_v13 = vld [vmem:[%s10358_s1 + $0x500] sm:$0xff]   ;;  %v7006_v39 = vld [vmem:[%s10358_s1 + $0x38] sm:$0xff]  }
 0x287   : > { %5992 = vmatpush3.bf16.msra.mxu0 %v10730_v30  ;;  %v9648_v47 = vld [vmem:[%s10358_s1 + $0x580] sm:$0xff]   ;;  %v7007_v30 = vld [vmem:[%s10358_s1 + $0x70] sm:$0xff]  }
 0x288   : > { %6014 = vmatpush3.bf16.msra.mxu1 %v9166_v36  ;;  %5993 = vmatprep.subr.bf16.mxu0 %v10731_v45  ;;  %v10736_v36 = vld [vmem:[#allocation121_spill] sm:$0xff]  ;;  %v6777_v53 = vld [vmem:[%s7574_s29 + $0x25c] ss:$100 sps:$4 sm:$0xff]  }
 0x289   : > { %6015 = vmatprep.subr.bf16.mxu1 %v9173_v38  ;;  %v10737_v38 = vld [vmem:[#allocation123_spill] sm:$0xff] }
 0x28b   : > { %5994 = vmatpush3.bf16.msra.mxu0 %v10732_v33 }
 0x28c   : > { %6016 = vmatpush3.bf16.msra.mxu1 %v9180_v40  ;;  %5995 = vmatprep.subr.bf16.mxu0 %v10733_v10  ;;  %v6762_v40 = vld [vmem:[%s7574_s29 + $0x1d0] ss:$100 sps:$4 sm:$0xff]  }
 0x28d   : > { %6017 = vmatprep.subr.bf16.mxu1 %v9187_v42  ;;  %v10738_v42 = vld [vmem:[#allocation125_spill] sm:$0xff] }
 0x28f   : > { %5996 = vmatpush3.bf16.msra.mxu0 %v10734_v62  ;;  %v9675_v62 = vld [vmem:[%s10358_s1 + $0x630] sm:$0xff]  }
 0x290   : > { %6018 = vmatpush3.bf16.msra.mxu1 %v9194_v44  ;;  %5997 = vmatprep.subr.bf16.mxu0 %v10735_v34  ;;  %v9509_v44 = vld [vmem:[%s10358_s1 + $0x578] sm:$0xff]   ;;  %v7009_v34 = vld [vmem:[%s10358_s1 + $0x30] sm:$0xff]  }
 0x291   : > { %6019 = vmatprep.subr.bf16.mxu1 %v9201_v46  ;;  %v6770_v46 = vld [vmem:[%s7574_s29 + $0x1e4] ss:$100 sps:$4 sm:$0xff]  }
 0x293   : > { %5998 = vmatpush3.bf16.msra.mxu0 %v10736_v36 }
 0x294   : > { %6020 = vmatpush3.bf16.msra.mxu1 %v9208_v48  ;;  %5999 = vmatprep.subr.bf16.mxu0 %v10737_v38 }
 0x295   : > { %6021 = vmatprep.subr.bf16.mxu1 %v9215_v50 }
 0x297   : > { %6000 = vmatpush3.bf16.msra.mxu0 %v10738_v42 }
 0x298   : > { %6022 = vmatpush3.bf16.msra.mxu1 %v9223_v52  ;;  %6029 = vmatprep.subr.bf16.mxu0 %v9509_v44 }
 0x299   : > { %6051 = vmatprep.subr.bf16.mxu1 %v9231_v54  ;;  %v9525_v54 = vld [vmem:[%s10358_s1 + $0x570] sm:$0xff]  }
 0x29a   : > { %v5750_v48 = vpop.f32.mrf.mxu0  ;;  %3898 = vmatmul.mubr.bf16.vlgmr.msra.gmra.mxu0 %v6762_v40 }
 0x29b   : > { %v5772_v50 = vpop.f32.mrf.mxu1  ;;  %3939 = vmatmul.mubr.bf16.vlgmr.msra.gmra.mxu1 %v6765_v4  ;;  %6030 = vmatpush3.bf16.msra.mxu0 %v9518_v7  ;;  %v7010_v4 = vld [vmem:[%s10358_s1 + $0x68] sm:$0xff]  }
 0x29c   : > { %6052 = vmatpush3.bf16.msra.mxu1 %v9239_v28  ;;  %v5751_v52 = vpop.f32.mrf.mxu0  ;;  %6031 = vmatprep.subr.bf16.mxu0 %v9525_v54  ;;  %v9532_v28 = vld [vmem:[%s10358_s1 + $0x530] sm:$0xff]  }
 0x29d   : > { %v5752_v8 = vadd.f32 %v5751_v52, %v5750_v48  ;;  %v5773_v31 = vpop.f32.mrf.mxu1  ;;  %6053 = vmatprep.subr.bf16.mxu1 %v9246_v17  ;;  %3979 = vmatprep.mubr.bf16.mxu0 %v6770_v46  ;;  %v9539_v17 = vld [vmem:[%s10358_s1 + $0x568] sm:$0xff]  }
 0x29e   : > { %v5774_v25 = vadd.f32 %v5773_v31, %v5772_v50  ;;  %v5753_v18 = vpop.f32.mrf.mxu0  ;;  %4020 = vmatprep.mubr.bf16.mxu1 %v6773_v22  ;;  %v9691_v48 = vld [vmem:[%s10358_s1 + $0x628] sm:$0xff]   ;;  %v9708_v31 = vld [vmem:[%s10358_s1 + $0x620] sm:$0xff]  }
 0x29f   : > { %v3253_v12 = vadd.f32 %v5752_v8, %v3212_v51  ;;  %v5775_v14 = vpop.f32.mrf.mxu1  ;;  %6032 = vmatpush3.bf16.msra.mxu0 %v9532_v28  ;;  %v7012_v50 = vld [vmem:[%s10358_s1 + $0x28] sm:$0xff]   ;;  %v7013_v8 = vld [vmem:[%s10358_s1 + $0x60] sm:$0xff]  }
 0x2a0   : > { %6054 = vmatpush3.bf16.msra.mxu1 %v9256_v23  ;;  %v5754_v15 = vpop.f32.mrf.mxu0  ;;  %6033 = vmatprep.subr.bf16.mxu0 %v9539_v17  ;;  %v9548_v23 = vld [vmem:[%s10358_s1 + $0x528] sm:$0xff]  }
 0x2a1   : > { %v9542_v37 = vadd.f32 %v5774_v25, %v3253_v12  ;;  %v5755_v26 = vadd.f32 %v5754_v15, %v5753_v18  ;;  %v5776_v0 = vpop.f32.mrf.mxu1  ;;  %6055 = vmatprep.subr.bf16.mxu1 %v9263_v56  ;;  %v9564_v56 = vld [vmem:[%s10358_s1 + $0x520] sm:$0xff]   ;;  %v7016_v12 = vld [vmem:[%s10358_s1 + $0x58] sm:$0xff]  }
 0x2a2   : > { %v5777_v43 = vadd.f32 %v5776_v0, %v5775_v14  ;;  %v7015_v18 = vld [vmem:[%s10358_s1 + $0x20] sm:$0xff]   ;;  %v9723_v14 = vld [vmem:[%s10358_s1 + $0x618] sm:$0xff]   ;;  %v7021_v0 = vld [vmem:[%s10358_s1 + $0x10] sm:$0xff]  }
 0x2a3   : > { %v3256_v49 = vadd.f32 %v5755_v26, %v3215_v27  ;;  %6034 = vmatpush3.bf16.msra.mxu0 %v9548_v23  ;;  %v7018_v15 = vld [vmem:[%s10358_s1 + $0x18] sm:$0xff]   ;;  %v9736_v26 = vld [vmem:[%s10358_s1 + $0x610] sm:$0xff]  }
 0x2a4   : > { %6056 = vmatpush3.bf16.msra.mxu1 %v9271_v3  ;;  %6035 = vmatprep.subr.bf16.mxu0 %v9555_v20  ;;  %v9571_v3 = vld [vmem:[%s10358_s1 + $0x558] sm:$0xff]  }
 0x2a5   : > { %v9558_v24 = vadd.f32 %v5777_v43, %v3256_v49  ;;  %6057 = vmatprep.subr.bf16.mxu1 %v9278_v32  ;;  %v9578_v32 = vld [vmem:[%s10358_s1 + $0x518] sm:$0xff]   ;;  %v7022_v43 = vld [vmem:[%s10358_s1 + $0x48] sm:$0xff]  }
 0x2a6   : > { %v9749_v49 = vld [vmem:[%s10358_s1 + $0x608] sm:$0xff]  }
 0x2a7   : > { %6036 = vmatpush3.bf16.msra.mxu0 %v9564_v56 }
 0x2a8   : > { %6058 = vmatpush3.bf16.msra.mxu1 %v9285_v29  ;;  %6037 = vmatprep.subr.bf16.mxu0 %v9571_v3  ;;  %v9585_v29 = vld [vmem:[%s10358_s1 + $0x550] sm:$0xff]  }
 0x2a9   : > { %6059 = vmatprep.subr.bf16.mxu1 %v9292_v6  ;;  %v9592_v6 = vld [vmem:[%s10358_s1 + $0x510] sm:$0xff]  }
 0x2ab   : > { %6038 = vmatpush3.bf16.msra.mxu0 %v9578_v32 }
 0x2ac   : > { %6060 = vmatpush3.bf16.msra.mxu1 %v9299_v2  ;;  %6039 = vmatprep.subr.bf16.mxu0 %v9585_v29  ;;  %v9598_v2 = vld [vmem:[%s10358_s1 + $0x590] sm:$0xff]  }
 0x2ad   : > { %6061 = vmatprep.subr.bf16.mxu1 %v9306_v9  ;;  %v9604_v9 = vld [vmem:[%s10358_s1 + $0x548] sm:$0xff]  }
 0x2af   : > { %6040 = vmatpush3.bf16.msra.mxu0 %v9592_v6 }
 0x2b0   : > { %6062 = vmatpush3.bf16.msra.mxu1 %v9598_v2  ;;  %6041 = vmatprep.subr.bf16.mxu0 %v9604_v9 }
 0x2b1   : > { %6063 = vmatprep.subr.bf16.mxu1 %v9610_v35 }
 0x2b3   : > { %6042 = vmatpush3.bf16.msra.mxu0 %v9616_v1 }
 0x2b4   : > { %6064 = vmatpush3.bf16.msra.mxu1 %v9622_v58  ;;  %6043 = vmatprep.subr.bf16.mxu0 %v9628_v57 }
 0x2b5   : > { %6065 = vmatprep.subr.bf16.mxu1 %v9634_v21 }
 0x2b7   : > { %6044 = vmatpush3.bf16.msra.mxu0 %v9641_v13 }
 0x2b8   : > { %6066 = vmatpush3.bf16.msra.mxu1 %v9648_v47  ;;  %6395 = vmatprep.subr.bf16.mxu0 %v10613_v60 }
 0x2b9   : > { %6082 = vmatprep.subr.bf16.mxu1 %v7004_v11  ;;  %v9763_v11 = vld [vmem:[%s10358_s1 + $0x600] sm:$0xff]  }
 0x2ba   : > { %v5794_v51 = vpop.f32.mrf.mxu0  ;;  %3980 = vmatmul.mubr.bf16.vlgmr.msra.gmra.mxu0 %v6768_v61  ;;  %v7025_v61 = vld [vmem:[%s10358_s1 + $0x40] sm:$0xff]  }
 0x2bb   : > { %v3375_v55 = vpop.f32.mrf.mxu1  ;;  %4021 = vmatmul.mubr.bf16.vlgmr.msra.gmra.mxu1 %v6771_v5  ;;  %6396 = vmatpush3.bf16.msra.mxu0 %v9659_v19  ;;  %v6774_v5 = vld [vmem:[%s7574_s29 + $0x1f0] ss:$100 sps:$4 sm:$0xff]  }
 0x2bc   : > { %6083 = vmatpush3.bf16.msra.mxu1 %v7006_v39  ;;  %v5795_v59 = vpop.f32.mrf.mxu0  ;;  %6397 = vmatprep.subr.bf16.mxu0 %v10613_v60  ;;  %v7029_v39 = vld [vmem:[%s10358_s1 + $0x178] sm:$0xff]  }
 0x2bd   : > { %v5796_v41 = vadd.f32 %v5795_v59, %v5794_v51  ;;  %v6393_v27 = vpop.f32.mrf.mxu1  ;;  %6084 = vmatprep.subr.bf16.mxu1 %v7007_v30  ;;  %6411 = vmatprep.mubr.msk.bf16.mxu0 %vm7208_vm0, %v10613_v60  ;;  %v6775_v51 = vld [vmem:[%s7574_s29 + $0x258] ss:$100 sps:$4 sm:$0xff]   ;;  %v6780_v59 = vld [vmem:[%s7574_s29 + $0x264] ss:$100 sps:$4 sm:$0xff]  }
 0x2be   : > { %v5797_v45 = vpop.f32.mrf.mxu0  ;;  %4257 = vmatprep.mubr.bf16.mxu1 %v6777_v53  ;;  %v7027_v53 = vld [vmem:[%s10358_s1] sm:$0xff]   ;;  %v6783_v27 = vld [vmem:[%s7574_s29 + $0x26c] ss:$100 sps:$4 sm:$0xff]  }
 0x2bf   : > { %v3335_v33 = vadd.f32 %v5796_v41, %v9542_v37  ;;  %v3378_v10 = vpop.f32.mrf.mxu1  ;;  %6398 = vmatpush3.bf16.msra.mxu0 %v9675_v62  ;;  %v7019_v37 = vld [vmem:[%s10358_s1 + $0x50] sm:$0xff]  }
 0x2c0   : > { %6085 = vmatpush3.bf16.msra.mxu1 %v7009_v34  ;;  %v5798_v36 = vpop.f32.mrf.mxu0  ;;  %6399 = vmatprep.subr.bf16.mxu0 %v10613_v60  ;;  %v7032_v34 = vld [vmem:[%s10358_s1 + $0xf0] sm:$0xff]  }
 0x2c1   : > { %v9682_v38 = vadd.f32 %v3375_v55, %v3335_v33  ;;  %v5799_v40 = vadd.f32 %v5798_v36, %v5797_v45  ;;  %v6394_v42 = vpop.f32.mrf.mxu1  ;;  %6086 = vmatprep.subr.bf16.mxu1 %v7010_v4  ;;  %v7028_v55 = vld [vmem:[%s10358_s1 + $0xf8] sm:$0xff]  }
 0x2c2   : > { %v7030_v45 = vld [vmem:[%s10358_s1 + $0xb8] sm:$0xff]   ;;  %v7033_v42 = vld [vmem:[%s10358_s1 + $0x170] sm:$0xff]  }
 0x2c3   : > { %v3338_v46 = vadd.f32 %v5799_v40, %v9558_v24  ;;  %6400 = vmatpush3.bf16.msra.mxu0 %v9691_v48  ;;  %v3382_v22 = vmax.f32 %v9326_v16, %v9682_v38  ;;  %v7024_v24 = vld [vmem:[%s10358_s1 + $0x8] sm:$0xff]   ;;  %v7031_v33 = vld [vmem:[%s10358_s1 + $0x138] sm:$0xff]  }
 0x2c4   : > { %6087 = vmatpush3.bf16.msra.mxu1 %v7012_v50  ;;  %6401 = vmatprep.subr.bf16.mxu0 %v10613_v60 }
 0x2c5   : > { %v9700_v52 = vadd.f32 %v3378_v10, %v3338_v46  ;;  %6088 = vmatprep.subr.bf16.mxu1 %v7013_v8  ;;  %v7034_v8 = vld [vmem:[%s10358_s1 + $0xb0] sm:$0xff]  }
 0x2c7   : > { %6402 = vmatpush3.bf16.msra.mxu0 %v9708_v31  ;;  %v3383_v25 = vmax.f32 %v9332_v63, %v9700_v52 }
 0x2c8   : > { %6089 = vmatpush3.bf16.msra.mxu1 %v7015_v18  ;;  %6403 = vmatprep.subr.bf16.mxu0 %v10613_v60 }
 0x2c9   : > { %6090 = vmatprep.subr.bf16.mxu1 %v7016_v12  ;;  %v7035_v12 = vld [vmem:[%s10358_s1 + $0x130] sm:$0xff]  }
 0x2cb   : > { %6404 = vmatpush3.bf16.msra.mxu0 %v9723_v14 }
 0x2cc   : > { %6091 = vmatpush3.bf16.msra.mxu1 %v7018_v15  ;;  %6405 = vmatprep.subr.bf16.mxu0 %v10613_v60 }
 0x2cd   : > { %6092 = vmatprep.subr.bf16.mxu1 %v7019_v37  ;;  %v7036_v37 = vld [vmem:[%s10358_s1 + $0xe8] sm:$0xff]  }
 0x2cf   : > { %6406 = vmatpush3.bf16.msra.mxu0 %v9736_v26 }
 0x2d0   : > { %6093 = vmatpush3.bf16.msra.mxu1 %v7021_v0  ;;  %6407 = vmatprep.subr.bf16.mxu0 %v10613_v60 }
 0x2d1   : > { %6094 = vmatprep.subr.bf16.mxu1 %v7022_v43 }
 0x2d3   : > { %6408 = vmatpush3.bf16.msra.mxu0 %v9749_v49 }
 0x2d4   : > { %6095 = vmatpush3.bf16.msra.mxu1 %v7024_v24  ;;  %6409 = vmatprep.subr.bf16.mxu0 %v10613_v60  ;;  %v7037_v24 = vld [vmem:[%s10358_s1 + $0x168] sm:$0xff]  }
 0x2d5   : > { %6096 = vmatprep.subr.bf16.mxu1 %v7025_v61 }
 0x2d7   : > { %6410 = vmatpush3.bf16.msra.mxu0 %v9763_v11 }
 0x2d8   : > { %6097 = vmatpush3.bf16.msra.mxu1 %v7027_v53  ;;  %6104 = vmatprep.subr.bf16.mxu0 %v7028_v55  ;;  %v7039_v53 = vld [vmem:[%s10358_s1 + $0x128] sm:$0xff]   ;;  %v7040_v55 = vld [vmem:[%s10358_s1 + $0xe0] sm:$0xff]  }
 0x2d9   : > { %6126 = vmatprep.subr.bf16.mxu1 %v7029_v39  ;;  %v7041_v39 = vld [vmem:[%s10358_s1 + $0x160] sm:$0xff]  }
 0x2da   : > { %v5825_v41 = vpop.f32.mrf.mxu0  ;;  %6412 = vmatmul.mubr.bf16.vlgmr.msra.gmra.mxu0 %v6774_v5  ;;  %v7038_v5 = vld [vmem:[%s10358_s1 + $0xa8] sm:$0xff]  }
 0x2db   : > { %v5847_v30 = vpop.f32.mrf.mxu1  ;;  %4258 = vmatmul.mubr.bf16.vlgmr.msra.gmra.mxu1 %v6775_v51  ;;  %6105 = vmatpush3.bf16.msra.mxu0 %v7030_v45  ;;  %v7046_v45 = vld [vmem:[%s10358_s1 + $0x98] sm:$0xff]  }
 0x2dc   : > { %6127 = vmatpush3.bf16.msra.mxu1 %v7031_v33  ;;  %v5826_v10 = vpop.f32.mrf.mxu0  ;;  %6106 = vmatprep.subr.bf16.mxu0 %v7032_v34  ;;  %v7047_v33 = vld [vmem:[%s10358_s1 + $0x118] sm:$0xff]   ;;  %v7049_v34 = vld [vmem:[%s10358_s1 + $0x150] sm:$0xff]  }
 0x2dd   : > { %v5827_v36 = vadd.f32 %v5826_v10, %v5825_v41  ;;  %v5848_v40 = vpop.f32.mrf.mxu1  ;;  %6128 = vmatprep.subr.bf16.mxu1 %v7033_v42  ;;  %4298 = vmatprep.mubr.bf16.mxu0 %v6780_v59  ;;  %v7042_v59 = vld [vmem:[%s10358_s1 + $0xa0] sm:$0xff]   ;;  %v7048_v10 = vld [vmem:[%s10358_s1 + $0xd0] sm:$0xff]   ;;  %v7052_v42 = vld [vmem:[%s10358_s1 + $0xc8] sm:$0xff]  }
 0x2de   : > { %v5849_v4 = vadd.f32 %v5848_v40, %v5847_v30  ;;  %v5828_v46 = vpop.f32.mrf.mxu0  ;;  %4339 = vmatprep.mubr.bf16.mxu1 %v6783_v27  ;;  %v7043_v41 = vld [vmem:[%s10358_s1 + $0x120] sm:$0xff]   ;;  %v7044_v27 = vld [vmem:[%s10358_s1 + $0xd8] sm:$0xff]   ;;  %v7051_v40 = vld [vmem:[%s10358_s1 + $0x110] sm:$0xff]  }
 0x2df   : > { %v5850_v50 = vpop.f32.mrf.mxu1  ;;  %6107 = vmatpush3.bf16.msra.mxu0 %v7034_v8  ;;  %v7045_v30 = vld [vmem:[%s10358_s1 + $0x158] sm:$0xff]   ;;  %v7056_v8 = vld [vmem:[%s10358_s1 + $0xc0] sm:$0xff]  }
 0x2e0   : > { %v9793_v18 = vadd.f32 %v5849_v4, %v5827_v36  ;;  %6129 = vmatpush3.bf16.msra.mxu1 %v7035_v12  ;;  %v5829_v15 = vpop.f32.mrf.mxu0  ;;  %6108 = vmatprep.subr.bf16.mxu0 %v7036_v37  ;;  %v7050_v36 = vld [vmem:[%s10358_s1 + $0x90] sm:$0xff]   ;;  %v7053_v4 = vld [vmem:[%s10358_s1 + $0x148] sm:$0xff]   ;;  %v7057_v12 = vld [vmem:[%s10358_s1 + $0x140] sm:$0xff]  }
 0x2e1   : > { %v5830_v0 = vadd.f32 %v5829_v15, %v5828_v46  ;;  %v5851_v43 = vpop.f32.mrf.mxu1  ;;  %6130 = vmatprep.subr.bf16.mxu1 %v7037_v24  ;;  %v7054_v46 = vld [vmem:[%s10358_s1 + $0x88] sm:$0xff]   ;;  %v6778_v15 = vld [vmem:[%s7574_s29 + $0x260] ss:$100 sps:$4 sm:$0xff]   ;;  %v7060_v24 = vld [vmem:[%s10358_s1 + $0x1f8] sm:$0xff]  }
 0x2e2   : > { %v5852_v61 = vadd.f32 %v5851_v43, %v5850_v50  ;;  %v7055_v50 = vld [vmem:[%s10358_s1 + $0x108] sm:$0xff]   ;;  %v7058_v37 = vld [vmem:[%s10358_s1 + $0x80] sm:$0xff]  }
 0x2e3   : > { %6109 = vmatpush3.bf16.msra.mxu0 %v7038_v5  ;;  %v7059_v43 = vld [vmem:[%s10358_s1 + $0x100] sm:$0xff]   ;;  %v6786_v5 = vld [vmem:[%s7574_s29 + $0x274] ss:$100 sps:$4 sm:$0xff]  }
 0x2e4   : > { %v9807_v51 = vadd.f32 %v5852_v61, %v5830_v0  ;;  %6131 = vmatpush3.bf16.msra.mxu1 %v7039_v53  ;;  %6110 = vmatprep.subr.bf16.mxu0 %v7040_v55  ;;  %v6781_v0 = vld [vmem:[%s7574_s29 + $0x268] ss:$100 sps:$4 sm:$0xff]   ;;  %v7061_v61 = vld [vmem:[%s10358_s1 + $0x278] sm:$0xff]  }
 0x2e5   : > { %6132 = vmatprep.subr.bf16.mxu1 %v7041_v39  ;;  %v6789_v55 = vld [vmem:[%s7574_s29 + $0x27c] ss:$100 sps:$4 sm:$0xff]  }
 0x2e7   : > { %6111 = vmatpush3.bf16.msra.mxu0 %v7042_v59  ;;  %v7062_v59 = vld [vmem:[%s10358_s1 + $0x1b8] sm:$0xff]  }
 0x2e8   : > { %6133 = vmatpush3.bf16.msra.mxu1 %v7043_v41  ;;  %6112 = vmatprep.subr.bf16.mxu0 %v7044_v27  ;;  %v7063_v41 = vld [vmem:[%s10358_s1 + $0x238] sm:$0xff]  }
 0x2e9   : > { %6134 = vmatprep.subr.bf16.mxu1 %v7045_v30  ;;  %v7064_v30 = vld [vmem:[%s10358_s1 + $0x1f0] sm:$0xff]  }
 0x2eb   : > { %6113 = vmatpush3.bf16.msra.mxu0 %v7046_v45 }
 0x2ec   : > { %6135 = vmatpush3.bf16.msra.mxu1 %v7047_v33  ;;  %6114 = vmatprep.subr.bf16.mxu0 %v7048_v10  ;;  %v7065_v10 = vld [vmem:[%s10358_s1 + $0x270] sm:$0xff]  }
 0x2ed   : > { %6136 = vmatprep.subr.bf16.mxu1 %v7049_v34 }
 0x2ef   : > { %6115 = vmatpush3.bf16.msra.mxu0 %v7050_v36 }
 0x2f0   : > { %6137 = vmatpush3.bf16.msra.mxu1 %v7051_v40  ;;  %6116 = vmatprep.subr.bf16.mxu0 %v7052_v42 }
 0x2f1   : > { %6138 = vmatprep.subr.bf16.mxu1 %v7053_v4  ;;  %v7066_v4 = vld [vmem:[%s10358_s1 + $0x1b0] sm:$0xff]  }
 0x2f3   : > { %6117 = vmatpush3.bf16.msra.mxu0 %v7054_v46  ;;  %v7067_v46 = vld [vmem:[%s10358_s1 + $0x230] sm:$0xff]  }
 0x2f4   : > { %6139 = vmatpush3.bf16.msra.mxu1 %v7055_v50  ;;  %6118 = vmatprep.subr.bf16.mxu0 %v7056_v8  ;;  %v7068_v8 = vld [vmem:[%s10358_s1 + $0x1e8] sm:$0xff]  }
 0x2f5   : > { %6140 = vmatprep.subr.bf16.mxu1 %v7057_v12 }
 0x2f7   : > { %6119 = vmatpush3.bf16.msra.mxu0 %v7058_v37  ;;  %v7069_v37 = vld [vmem:[%s10358_s1 + $0x268] sm:$0xff]  }
 0x2f8   : > { %6141 = vmatpush3.bf16.msra.mxu1 %v7059_v43  ;;  %6148 = vmatprep.subr.bf16.mxu0 %v7060_v24  ;;  %v7070_v24 = vld [vmem:[%s10358_s1 + $0x1a8] sm:$0xff]  }
 0x2f9   : > { %6170 = vmatprep.subr.bf16.mxu1 %v7061_v61  ;;  %v7071_v61 = vld [vmem:[%s10358_s1 + $0x228] sm:$0xff]  }
 0x2fa   : > { %v5869_v53 = vpop.f32.mrf.mxu0  ;;  %4299 = vmatmul.mubr.bf16.vlgmr.msra.gmra.mxu0 %v6778_v15 }
 0x2fb   : > { %v5891_v39 = vpop.f32.mrf.mxu1  ;;  %4340 = vmatmul.mubr.bf16.vlgmr.msra.gmra.mxu1 %v6781_v0  ;;  %6149 = vmatpush3.bf16.msra.mxu0 %v7062_v59  ;;  %v7076_v59 = vld [vmem:[%s10358_s1 + $0x1d8] sm:$0xff]  }
 0x2fc   : > { %6171 = vmatpush3.bf16.msra.mxu1 %v7063_v41  ;;  %v5870_v27 = vpop.f32.mrf.mxu0  ;;  %6150 = vmatprep.subr.bf16.mxu0 %v7064_v30  ;;  %v7077_v41 = vld [vmem:[%s10358_s1 + $0x258] sm:$0xff]  }
 0x2fd   : > { %v5871_v45 = vadd.f32 %v5870_v27, %v5869_v53  ;;  %v5892_v33 = vpop.f32.mrf.mxu1  ;;  %6172 = vmatprep.subr.bf16.mxu1 %v7065_v10  ;;  %4380 = vmatprep.mubr.bf16.mxu0 %v6786_v5  ;;  %v7072_v5 = vld [vmem:[%s10358_s1 + $0x1e0] sm:$0xff]   ;;  %v7078_v27 = vld [vmem:[%s10358_s1 + $0x198] sm:$0xff]   ;;  %v7082_v10 = vld [vmem:[%s10358_s1 + $0x190] sm:$0xff]  }
 0x2fe   : > { %v5893_v34 = vadd.f32 %v5892_v33, %v5891_v39  ;;  %v5872_v36 = vpop.f32.mrf.mxu0  ;;  %4421 = vmatprep.mubr.bf16.mxu1 %v6789_v55  ;;  %v7074_v55 = vld [vmem:[%s10358_s1 + $0x1a0] sm:$0xff]   ;;  %v7079_v30 = vld [vmem:[%s10358_s1 + $0x218] sm:$0xff]   ;;  %v7081_v33 = vld [vmem:[%s10358_s1 + $0x250] sm:$0xff]  }
 0x2ff   : > { %v3654_v40 = vadd.f32 %v5871_v45, %v9793_v18  ;;  %v5894_v42 = vpop.f32.mrf.mxu1  ;;  %6151 = vmatpush3.bf16.msra.mxu0 %v7066_v4  ;;  %v7075_v39 = vld [vmem:[%s10358_s1 + $0x220] sm:$0xff]   ;;  %v7080_v45 = vld [vmem:[%s10358_s1 + $0x1d0] sm:$0xff]   ;;  %v7087_v4 = vld [vmem:[%s10358_s1 + $0x208] sm:$0xff]  }
 0x300   : > { %6173 = vmatpush3.bf16.msra.mxu1 %v7067_v46  ;;  %v5873_v50 = vpop.f32.mrf.mxu0  ;;  %6152 = vmatprep.subr.bf16.mxu0 %v7068_v8  ;;  %v7088_v46 = vld [vmem:[%s10358_s1 + $0x1c0] sm:$0xff]   ;;  %v6784_v8 = vld [vmem:[%s7574_s29 + $0x270] ss:$100 sps:$4 sm:$0xff]  }
 0x301   : > { %v9904_v12 = vadd.f32 %v5893_v34, %v3654_v40  ;;  %v5874_v18 = vadd.f32 %v5873_v50, %v5872_v36  ;;  %v5895_v15 = vpop.f32.mrf.mxu1  ;;  %6174 = vmatprep.subr.bf16.mxu1 %v7069_v37  ;;  %v7083_v34 = vld [vmem:[%s10358_s1 + $0x210] sm:$0xff]   ;;  %v7084_v36 = vld [vmem:[%s10358_s1 + $0x1c8] sm:$0xff]   ;;  %v7089_v50 = vld [vmem:[%s10358_s1 + $0x240] sm:$0xff]  }
 0x302   : > { %v5896_v0 = vadd.f32 %v5895_v15, %v5894_v42  ;;  %v7085_v40 = vld [vmem:[%s10358_s1 + $0x248] sm:$0xff]   ;;  %v6787_v15 = vld [vmem:[%s7574_s29 + $0x278] ss:$100 sps:$4 sm:$0xff]   ;;  %v7091_v37 = vld [vmem:[%s10358_s1 + $0x200] sm:$0xff]  }
 0x303   : > { %v3657_v43 = vadd.f32 %v5874_v18, %v9807_v51  ;;  %6153 = vmatpush3.bf16.msra.mxu0 %v7070_v24  ;;  %v7073_v51 = vld [vmem:[%s10358_s1 + $0x260] sm:$0xff]   ;;  %v7086_v42 = vld [vmem:[%s10358_s1 + $0x188] sm:$0xff]  }
 0x304   : > { %6175 = vmatpush3.bf16.msra.mxu1 %v7071_v61  ;;  %6154 = vmatprep.subr.bf16.mxu0 %v7072_v5  ;;  %v7090_v18 = vld [vmem:[%s10358_s1 + $0x180] sm:$0xff]   ;;  %v6795_v5 = vld [vmem:[%s7574_s29 + $0x28c] ss:$100 sps:$4 sm:$0xff]  }
 0x305   : > { %v9919_v53 = vadd.f32 %v5896_v0, %v3657_v43  ;;  %6176 = vmatprep.subr.bf16.mxu1 %v7073_v51  ;;  %v7092_v0 = vld [vmem:[%s10358_s1 + $0x2f8] sm:$0xff]   ;;  %v6792_v24 = vld [vmem:[%s7574_s29 + $0x284] ss:$100 sps:$4 sm:$0xff]  }
 0x306   : > { %v7093_v43 = vld [vmem:[%s10358_s1 + $0x378] sm:$0xff]  }
 0x307   : > { %6155 = vmatpush3.bf16.msra.mxu0 %v7074_v55  ;;  %v7094_v55 = vld [vmem:[%s10358_s1 + $0x2b8] sm:$0xff]  }
 0x308   : > { %6177 = vmatpush3.bf16.msra.mxu1 %v7075_v39  ;;  %6156 = vmatprep.subr.bf16.mxu0 %v7076_v59  ;;  %v7095_v39 = vld [vmem:[%s10358_s1 + $0x338] sm:$0xff]  }
 0x309   : > { %6178 = vmatprep.subr.bf16.mxu1 %v7077_v41  ;;  %v7096_v41 = vld [vmem:[%s10358_s1 + $0x2f0] sm:$0xff]  }
 0x30b   : > { %6157 = vmatpush3.bf16.msra.mxu0 %v7078_v27 }
 0x30c   : > { %6179 = vmatpush3.bf16.msra.mxu1 %v7079_v30  ;;  %6158 = vmatprep.subr.bf16.mxu0 %v7080_v45  ;;  %v7097_v45 = vld [vmem:[%s10358_s1 + $0x370] sm:$0xff]  }
 0x30d   : > { %6180 = vmatprep.subr.bf16.mxu1 %v7081_v33 }
 0x30f   : > { %6159 = vmatpush3.bf16.msra.mxu0 %v7082_v10 }
 0x310   : > { %6181 = vmatpush3.bf16.msra.mxu1 %v7083_v34  ;;  %6160 = vmatprep.subr.bf16.mxu0 %v7084_v36 }
 0x311   : > { %6182 = vmatprep.subr.bf16.mxu1 %v7085_v40  ;;  %v7098_v40 = vld [vmem:[%s10358_s1 + $0x2b0] sm:$0xff]  }
 0x313   : > { %6161 = vmatpush3.bf16.msra.mxu0 %v7086_v42  ;;  %v7099_v42 = vld [vmem:[%s10358_s1 + $0x330] sm:$0xff]  }
 0x314   : > { %6183 = vmatpush3.bf16.msra.mxu1 %v7087_v4  ;;  %6162 = vmatprep.subr.bf16.mxu0 %v7088_v46  ;;  %v7100_v46 = vld [vmem:[%s10358_s1 + $0x2e8] sm:$0xff]  }
 0x315   : > { %6184 = vmatprep.subr.bf16.mxu1 %v7089_v50 }
 0x317   : > { %6163 = vmatpush3.bf16.msra.mxu0 %v7090_v18  ;;  %v7101_v18 = vld [vmem:[%s10358_s1 + $0x368] sm:$0xff]  }
 0x318   : > { %6185 = vmatpush3.bf16.msra.mxu1 %v7091_v37  ;;  %6192 = vmatprep.subr.bf16.mxu0 %v7092_v0  ;;  %v7102_v0 = vld [vmem:[%s10358_s1 + $0x2a8] sm:$0xff]  }
 0x319   : > { %6214 = vmatprep.subr.bf16.mxu1 %v7093_v43  ;;  %v7103_v43 = vld [vmem:[%s10358_s1 + $0x328] sm:$0xff]  }
 0x31a   : > { %v5913_v61 = vpop.f32.mrf.mxu0  ;;  %4381 = vmatmul.mubr.bf16.vlgmr.msra.gmra.mxu0 %v6784_v8 }
 0x31b   : > { %v5935_v51 = vpop.f32.mrf.mxu1  ;;  %4422 = vmatmul.mubr.bf16.vlgmr.msra.gmra.mxu1 %v6787_v15  ;;  %6193 = vmatpush3.bf16.msra.mxu0 %v7094_v55  ;;  %v7108_v55 = vld [vmem:[%s10358_s1 + $0x2d8] sm:$0xff]  }
 0x31c   : > { %6215 = vmatpush3.bf16.msra.mxu1 %v7095_v39  ;;  %v5914_v59 = vpop.f32.mrf.mxu0  ;;  %6194 = vmatprep.subr.bf16.mxu0 %v7096_v41  ;;  %v7109_v39 = vld [vmem:[%s10358_s1 + $0x358] sm:$0xff]  }
 0x31d   : > { %v5915_v27 = vadd.f32 %v5914_v59, %v5913_v61  ;;  %v5936_v30 = vpop.f32.mrf.mxu1  ;;  %6216 = vmatprep.subr.bf16.mxu1 %v7097_v45  ;;  %4462 = vmatprep.mubr.bf16.mxu0 %v6792_v24  ;;  %v7104_v24 = vld [vmem:[%s10358_s1 + $0x2e0] sm:$0xff]   ;;  %v7110_v59 = vld [vmem:[%s10358_s1 + $0x298] sm:$0xff]   ;;  %v7114_v45 = vld [vmem:[%s10358_s1 + $0x290] sm:$0xff]  }
 0x31e   : > { %v5937_v33 = vadd.f32 %v5936_v30, %v5935_v51  ;;  %v5916_v10 = vpop.f32.mrf.mxu0  ;;  %4503 = vmatprep.mubr.bf16.mxu1 %v6795_v5  ;;  %v7106_v5 = vld [vmem:[%s10358_s1 + $0x2a0] sm:$0xff]   ;;  %v7111_v41 = vld [vmem:[%s10358_s1 + $0x318] sm:$0xff]   ;;  %v7113_v30 = vld [vmem:[%s10358_s1 + $0x350] sm:$0xff]  }
 0x31f   : > { %v3736_v34 = vadd.f32 %v5915_v27, %v9904_v12  ;;  %v5938_v36 = vpop.f32.mrf.mxu1  ;;  %6195 = vmatpush3.bf16.msra.mxu0 %v7098_v40  ;;  %v7107_v51 = vld [vmem:[%s10358_s1 + $0x320] sm:$0xff]   ;;  %v7112_v27 = vld [vmem:[%s10358_s1 + $0x2d0] sm:$0xff]   ;;  %v7119_v40 = vld [vmem:[%s10358_s1 + $0x308] sm:$0xff]  }
 0x320   : > { %6217 = vmatpush3.bf16.msra.mxu1 %v7099_v42  ;;  %v5917_v4 = vpop.f32.mrf.mxu0  ;;  %6196 = vmatprep.subr.bf16.mxu0 %v7100_v46  ;;  %v7120_v42 = vld [vmem:[%s10358_s1 + $0x2c0] sm:$0xff]  }
 0x321   : > { %v10010_v50 = vadd.f32 %v5937_v33, %v3736_v34  ;;  %v5918_v12 = vadd.f32 %v5917_v4, %v5916_v10  ;;  %v5939_v8 = vpop.f32.mrf.mxu1  ;;  %6218 = vmatprep.subr.bf16.mxu1 %v7101_v18  ;;  %v7115_v33 = vld [vmem:[%s10358_s1 + $0x310] sm:$0xff]   ;;  %v7116_v10 = vld [vmem:[%s10358_s1 + $0x2c8] sm:$0xff]   ;;  %v7121_v4 = vld [vmem:[%s10358_s1 + $0x340] sm:$0xff]  }
 0x322   : > { %v5940_v15 = vadd.f32 %v5939_v8, %v5938_v36  ;;  %v7117_v34 = vld [vmem:[%s10358_s1 + $0x348] sm:$0xff]   ;;  %v6790_v46 = vld [vmem:[%s7574_s29 + $0x280] ss:$100 sps:$4 sm:$0xff]  }
 0x323   : > { %v3739_v37 = vadd.f32 %v5918_v12, %v9919_v53  ;;  %6197 = vmatpush3.bf16.msra.mxu0 %v7102_v0  ;;  %v7105_v53 = vld [vmem:[%s10358_s1 + $0x360] sm:$0xff]   ;;  %v7118_v36 = vld [vmem:[%s10358_s1 + $0x288] sm:$0xff]   ;;  %v6798_v0 = vld [vmem:[%s7574_s29 + $0x294] ss:$100 sps:$4 sm:$0xff]  }
 0x324   : > { %6219 = vmatpush3.bf16.msra.mxu1 %v7103_v43  ;;  %6198 = vmatprep.subr.bf16.mxu0 %v7104_v24  ;;  %v7122_v12 = vld [vmem:[%s10358_s1 + $0x280] sm:$0xff]   ;;  %v6793_v8 = vld [vmem:[%s7574_s29 + $0x288] ss:$100 sps:$4 sm:$0xff]  }
 0x325   : > { %v10025_v61 = vadd.f32 %v5940_v15, %v3739_v37  ;;  %6220 = vmatprep.subr.bf16.mxu1 %v7105_v53  ;;  %v7123_v18 = vld [vmem:[%s10358_s1 + $0x300] sm:$0xff]   ;;  %v7124_v15 = vld [vmem:[%s10358_s1 + $0x3f8] sm:$0xff]  }
 0x326   : > { %v7125_v37 = vld [vmem:[%s10358_s1 + $0x478] sm:$0xff]  }
 0x327   : > { %6199 = vmatpush3.bf16.msra.mxu0 %v7106_v5  ;;  %v6801_v24 = vld [vmem:[%s7574_s29 + $0x29c] ss:$100 sps:$4 sm:$0xff]  }
 0x328   : > { %6221 = vmatpush3.bf16.msra.mxu1 %v7107_v51  ;;  %6200 = vmatprep.subr.bf16.mxu0 %v7108_v55  ;;  %v7126_v5 = vld [vmem:[%s10358_s1 + $0x3b8] sm:$0xff]  }
 0x329   : > { %6222 = vmatprep.subr.bf16.mxu1 %v7109_v39  ;;  %v7127_v51 = vld [vmem:[%s10358_s1 + $0x438] sm:$0xff]   ;;  %v7128_v39 = vld [vmem:[%s10358_s1 + $0x3f0] sm:$0xff]  }
 0x32b   : > { %6201 = vmatpush3.bf16.msra.mxu0 %v7110_v59 }
 0x32c   : > { %6223 = vmatpush3.bf16.msra.mxu1 %v7111_v41  ;;  %6202 = vmatprep.subr.bf16.mxu0 %v7112_v27  ;;  %v7129_v27 = vld [vmem:[%s10358_s1 + $0x470] sm:$0xff]  }
 0x32d   : > { %6224 = vmatprep.subr.bf16.mxu1 %v7113_v30 }
 0x32f   : > { %6203 = vmatpush3.bf16.msra.mxu0 %v7114_v45 }
 0x330   : > { %6225 = vmatpush3.bf16.msra.mxu1 %v7115_v33  ;;  %6204 = vmatprep.subr.bf16.mxu0 %v7116_v10  ;;  %v7130_v10 = vld [vmem:[%s10358_s1 + $0x3b0] sm:$0xff]  }
 0x331   : > { %6226 = vmatprep.subr.bf16.mxu1 %v7117_v34  ;;  %v7131_v34 = vld [vmem:[%s10358_s1 + $0x430] sm:$0xff]  }
 0x333   : > { %6205 = vmatpush3.bf16.msra.mxu0 %v7118_v36 }
 0x334   : > { %6227 = vmatpush3.bf16.msra.mxu1 %v7119_v40  ;;  %6206 = vmatprep.subr.bf16.mxu0 %v7120_v42  ;;  %v7132_v40 = vld [vmem:[%s10358_s1 + $0x3e8] sm:$0xff]  }
 0x335   : > { %6228 = vmatprep.subr.bf16.mxu1 %v7121_v4 }
 0x337   : > { %6207 = vmatpush3.bf16.msra.mxu0 %v7122_v12  ;;  %v7134_v12 = vld [vmem:[%s10358_s1 + $0x3a8] sm:$0xff]  }
 0x338   : > { %6229 = vmatpush3.bf16.msra.mxu1 %v7123_v18  ;;  %6236 = vmatprep.subr.bf16.mxu0 %v7124_v15  ;;  %v7136_v18 = vld [vmem:[%s10358_s1 + $0x3e0] sm:$0xff]  }
 0x339   : > { %6258 = vmatprep.subr.bf16.mxu1 %v7125_v37  ;;  %v7138_v15 = vld [vmem:[%s10358_s1 + $0x3a0] sm:$0xff]  }
 0x33a   : > { %v5957_v43 = vpop.f32.mrf.mxu0  ;;  %4463 = vmatmul.mubr.bf16.vlgmr.msra.gmra.mxu0 %v6790_v46  ;;  %v7139_v37 = vld [vmem:[%s10358_s1 + $0x420] sm:$0xff]  }
 0x33b   : > { %v5979_v53 = vpop.f32.mrf.mxu1  ;;  %4504 = vmatmul.mubr.bf16.vlgmr.msra.gmra.mxu1 %v6793_v8  ;;  %6237 = vmatpush3.bf16.msra.mxu0 %v7126_v5  ;;  %v7135_v8 = vld [vmem:[%s10358_s1 + $0x428] sm:$0xff]   ;;  %v7144_v5 = vld [vmem:[%s10358_s1 + $0x3d0] sm:$0xff]  }
 0x33c   : > { %6259 = vmatpush3.bf16.msra.mxu1 %v7127_v51  ;;  %v5958_v55 = vpop.f32.mrf.mxu0  ;;  %6238 = vmatprep.subr.bf16.mxu0 %v7128_v39  ;;  %v7145_v51 = vld [vmem:[%s10358_s1 + $0x450] sm:$0xff]  }
 0x33d   : > { %v5959_v59 = vadd.f32 %v5958_v55, %v5957_v43  ;;  %v5980_v41 = vpop.f32.mrf.mxu1  ;;  %6260 = vmatprep.subr.bf16.mxu1 %v7129_v27  ;;  %4544 = vmatprep.mubr.bf16.mxu0 %v6798_v0  ;;  %v7140_v0 = vld [vmem:[%s10358_s1 + $0x3d8] sm:$0xff]   ;;  %v7146_v55 = vld [vmem:[%s10358_s1 + $0x390] sm:$0xff]   ;;  %v7150_v27 = vld [vmem:[%s10358_s1 + $0x388] sm:$0xff]  }
 0x33e   : > { %v5981_v30 = vadd.f32 %v5980_v41, %v5979_v53  ;;  %v5960_v45 = vpop.f32.mrf.mxu0  ;;  %4585 = vmatprep.mubr.bf16.mxu1 %v6801_v24  ;;  %v7141_v43 = vld [vmem:[%s10358_s1 + $0x458] sm:$0xff]   ;;  %v7147_v39 = vld [vmem:[%s10358_s1 + $0x410] sm:$0xff]   ;;  %v7149_v41 = vld [vmem:[%s10358_s1 + $0x448] sm:$0xff]  }
 0x33f   : > { %v3818_v33 = vadd.f32 %v5959_v59, %v10010_v50  ;;  %6239 = vmatpush3.bf16.msra.mxu0 %v7130_v10  ;;  %v7133_v50 = vld [vmem:[%s10358_s1 + $0x468] sm:$0xff]   ;;  %v7142_v24 = vld [vmem:[%s10358_s1 + $0x398] sm:$0xff]   ;;  %v5982_v10 = vpop.f32.mrf.mxu1 }
 0x340   : > { %6261 = vmatpush3.bf16.msra.mxu1 %v7131_v34  ;;  %v5961_v36 = vpop.f32.mrf.mxu0  ;;  %6240 = vmatprep.subr.bf16.mxu0 %v7132_v40  ;;  %v7143_v53 = vld [vmem:[%s10358_s1 + $0x418] sm:$0xff]   ;;  %v7148_v59 = vld [vmem:[%s10358_s1 + $0x3c8] sm:$0xff]   ;;  %v6796_v34 = vld [vmem:[%s7574_s29 + $0x290] ss:$100 sps:$4 sm:$0xff]  }
 0x341   : > { %v10116_v42 = vadd.f32 %v5981_v30, %v3818_v33  ;;  %v5962_v4 = vadd.f32 %v5961_v36, %v5960_v45  ;;  %6262 = vmatprep.subr.bf16.mxu1 %v7133_v50  ;;  %v7151_v30 = vld [vmem:[%s10358_s1 + $0x408] sm:$0xff]   ;;  %v7152_v45 = vld [vmem:[%s10358_s1 + $0x3c0] sm:$0xff]   ;;  %v6799_v40 = vld [vmem:[%s7574_s29 + $0x298] ss:$100 sps:$4 sm:$0xff]  }
 0x342   : > { %v7153_v33 = vld [vmem:[%s10358_s1 + $0x440] sm:$0xff]   ;;  %v7156_v50 = vld [vmem:[%s10358_s1 + $0x4f8] sm:$0xff]  }
 0x343   : > { %v10122_v46 = vadd.f32 %v5962_v4, %v10025_v61  ;;  %6241 = vmatpush3.bf16.msra.mxu0 %v7134_v12  ;;  %v7137_v61 = vld [vmem:[%s10358_s1 + $0x460] sm:$0xff]  }
 0x344   : > { %6263 = vmatpush3.bf16.msra.mxu1 %v7135_v8  ;;  %6242 = vmatprep.subr.bf16.mxu0 %v7136_v18  ;;  %v7154_v36 = vld [vmem:[%s10358_s1 + $0x380] sm:$0xff]   ;;  %v5983_v8 = vpop.f32.mrf.mxu1 }
 0x345   : > { %6264 = vmatprep.subr.bf16.mxu1 %v7137_v61  ;;  %v7155_v4 = vld [vmem:[%s10358_s1 + $0x400] sm:$0xff]   ;;  %v6807_v61 = vld [vmem:[%s7574_s29 + $0x2ac] ss:$100 sps:$4 sm:$0xff]  }
 0x346   : > { %v6804_v12 = vld [vmem:[%s7574_s29 + $0x2a4] ss:$100 sps:$4 sm:$0xff]  }
 0x347   : > { %6243 = vmatpush3.bf16.msra.mxu0 %v7138_v15  ;;  %v7157_v15 = vld [vmem:[%s10358_s1 + $0x4b8] sm:$0xff]  }
 0x348   : > { %6265 = vmatpush3.bf16.msra.mxu1 %v7139_v37  ;;  %6244 = vmatprep.subr.bf16.mxu0 %v7140_v0  ;;  %v7158_v0 = vld [vmem:[%s10358_s1 + $0x4f0] sm:$0xff]  }
 0x349   : > { %6266 = vmatprep.subr.bf16.mxu1 %v7141_v43 }
 0x34b   : > { %6245 = vmatpush3.bf16.msra.mxu0 %v7142_v24 }
 0x34c   : > { %6267 = vmatpush3.bf16.msra.mxu1 %v7143_v53  ;;  %6246 = vmatprep.subr.bf16.mxu0 %v7144_v5 }
 0x34d   : > { %6268 = vmatprep.subr.bf16.mxu1 %v7145_v51  ;;  %v7160_v51 = vld [vmem:[%s10358_s1 + $0x4e8] sm:$0xff]  }
 0x34f   : > { %6247 = vmatpush3.bf16.msra.mxu0 %v7146_v55 }
 0x350   : > { %6269 = vmatpush3.bf16.msra.mxu1 %v7147_v39  ;;  %6248 = vmatprep.subr.bf16.mxu0 %v7148_v59  ;;  %v7161_v39 = vld [vmem:[%s10358_s1 + $0x4a8] sm:$0xff]  }
 0x351   : > { %6270 = vmatprep.subr.bf16.mxu1 %v7149_v41 }
 0x353   : > { %6249 = vmatpush3.bf16.msra.mxu0 %v7150_v27  ;;  %v6802_v27 = vld [vmem:[%s7574_s29 + $0x2a0] ss:$100 sps:$4 sm:$0xff]  }
 0x354   : > { %6271 = vmatpush3.bf16.msra.mxu1 %v7151_v30  ;;  %6250 = vmatprep.subr.bf16.mxu0 %v7152_v45  ;;  %v6805_v30 = vld [vmem:[%s7574_s29 + $0x2a8] ss:$100 sps:$4 sm:$0xff]  }
 0x355   : > { %6272 = vmatprep.subr.bf16.mxu1 %v7153_v33  ;;  %v6810_v33 = vld [vmem:[%s7574_s29 + $0x2b4] ss:$100 sps:$4 sm:$0xff]  }
 0x357   : > { %6251 = vmatpush3.bf16.msra.mxu0 %v7154_v36  ;;  %v7174_v36 = vld [vmem:[%s10358_s1 + $0x5f0] sm:$0xff]  }
 0x358   : > { %6273 = vmatpush3.bf16.msra.mxu1 %v7155_v4  ;;  %6280 = vmatprep.subr.bf16.mxu0 %v7156_v50 }
 0x359   : > { %6302 = vmatprep.subr.bf16.mxu1 %v9509_v44  ;;  %v5984_v44 = vadd.f32 %v5983_v8, %v5982_v10 }
 0x35a   : > { %v6001_v18 = vpop.f32.mrf.mxu0  ;;  %4545 = vmatmul.mubr.bf16.vlgmr.msra.gmra.mxu0 %v6796_v34  ;;  %v7173_v34 = vld [vmem:[%s10358_s1 + $0x5b8] sm:$0xff]  }
 0x35b   : > { %4586 = vmatmul.mubr.bf16.vlgmr.msra.gmra.mxu1 %v6799_v40  ;;  %6281 = vmatpush3.bf16.msra.mxu0 %v7157_v15 }
 0x35c   : > { %6303 = vmatpush3.bf16.msra.mxu1 %v9518_v7  ;;  %v6002_v37 = vpop.f32.mrf.mxu0  ;;  %6282 = vmatprep.subr.bf16.mxu0 %v7158_v0  ;;  %v7159_v7 = vld [vmem:[%s10358_s1 + $0x4b0] sm:$0xff]  }
 0x35d   : > { %v6003_v43 = vadd.f32 %v6002_v37, %v6001_v18  ;;  %6304 = vmatprep.subr.bf16.mxu1 %v9525_v54  ;;  %4626 = vmatprep.mubr.bf16.mxu0 %v6804_v12  ;;  %v3862_v54 = vadd.f32 %v5984_v44, %v10122_v46  ;;  %v7164_v46 = vld [vmem:[%s10358_s1 + $0x4d8] sm:$0xff]   ;;  %v7177_v44 = vld [vmem:[%s10358_s1 + $0x5a8] sm:$0xff]  }
 0x35e   : > { %v6004_v24 = vpop.f32.mrf.mxu0  ;;  %4667 = vmatprep.mubr.bf16.mxu1 %v6807_v61  ;;  %v7176_v61 = vld [vmem:[%s10358_s1 + $0x5e8] sm:$0xff]  }
 0x35f   : > { %v10207_v53 = vadd.f32 %v6003_v43, %v10116_v42  ;;  %6283 = vmatpush3.bf16.msra.mxu0 %v7159_v7  ;;  %v7179_v43 = vld [vmem:[%s10358_s1 + $0x5a0] sm:$0xff]  }
 0x360   : > { %6305 = vmatpush3.bf16.msra.mxu1 %v9532_v28  ;;  %v6005_v5 = vpop.f32.mrf.mxu0  ;;  %6284 = vmatprep.subr.bf16.mxu0 %v7160_v51  ;;  %v7162_v28 = vld [vmem:[%s10358_s1 + $0x4e0] sm:$0xff]  }
 0x361   : > { %v6006_v55 = vadd.f32 %v6005_v5, %v6004_v24  ;;  %6306 = vmatprep.subr.bf16.mxu1 %v9539_v17  ;;  %v7163_v17 = vld [vmem:[%s10358_s1 + $0x4a0] sm:$0xff]   ;;  %v7180_v24 = vld [vmem:[%s10358_s1 + $0x5d8] sm:$0xff]  }
 0x363   : > { %v10218_v42 = vadd.f32 %v6006_v55, %v3862_v54  ;;  %6285 = vmatpush3.bf16.msra.mxu0 %v7161_v39  ;;  %v6808_v54 = vld [vmem:[%s7574_s29 + $0x2b0] ss:$100 sps:$4 sm:$0xff]  }
 0x364   : > { %6307 = vmatpush3.bf16.msra.mxu1 %v9548_v23  ;;  %6286 = vmatprep.subr.bf16.mxu0 %v7162_v28  ;;  %v7165_v23 = vld [vmem:[%s10358_s1 + $0x498] sm:$0xff]  }
 0x365   : > { %6308 = vmatprep.subr.bf16.mxu1 %v9555_v20  ;;  %v7166_v20 = vld [vmem:[%s10358_s1 + $0x4d0] sm:$0xff]  }
 0x367   : > { %6287 = vmatpush3.bf16.msra.mxu0 %v7163_v17 }
 0x368   : > { %6309 = vmatpush3.bf16.msra.mxu1 %v9564_v56  ;;  %6288 = vmatprep.subr.bf16.mxu0 %v7164_v46  ;;  %v6023_v56 = vpop.f32.mrf.mxu1 }
 0x369   : > { %6310 = vmatprep.subr.bf16.mxu1 %v9571_v3  ;;  %v7167_v3 = vld [vmem:[%s10358_s1 + $0x490] sm:$0xff]  }
 0x36a   : > { %v6024_v59 = vpop.f32.mrf.mxu1 }
 0x36b   : > { %6289 = vmatpush3.bf16.msra.mxu0 %v7165_v23  ;;  %v6025_v45 = vadd.f32 %v6024_v59, %v6023_v56 }
 0x36c   : > { %6311 = vmatpush3.bf16.msra.mxu1 %v9578_v32  ;;  %6290 = vmatprep.subr.bf16.mxu0 %v7166_v20  ;;  %v7168_v32 = vld [vmem:[%s10358_s1 + $0x4c8] sm:$0xff]   ;;  %v6026_v41 = vpop.f32.mrf.mxu1 }
 0x36d   : > { %6312 = vmatprep.subr.bf16.mxu1 %v9585_v29  ;;  %v7169_v29 = vld [vmem:[%s10358_s1 + $0x488] sm:$0xff]   ;;  %v3941_v40 = vadd.f32 %v6025_v45, %v10207_v53  ;;  %v7181_v53 = vld [vmem:[%s10358_s1 + $0x598] sm:$0xff]  }
 0x36f   : > { %6291 = vmatpush3.bf16.msra.mxu0 %v7167_v3 }
 0x370   : > { %6313 = vmatpush3.bf16.msra.mxu1 %v9592_v6  ;;  %6292 = vmatprep.subr.bf16.mxu0 %v7168_v32  ;;  %v7170_v6 = vld [vmem:[%s10358_s1 + $0x4c0] sm:$0xff]  }
 0x371   : > { %6314 = vmatprep.subr.bf16.mxu1 %v9604_v9  ;;  %v7171_v9 = vld [vmem:[%s10358_s1 + $0x480] sm:$0xff]  }
 0x373   : > { %6293 = vmatpush3.bf16.msra.mxu0 %v7169_v29 }
 0x374   : > { %6315 = vmatpush3.bf16.msra.mxu1 %v9616_v1  ;;  %6294 = vmatprep.subr.bf16.mxu0 %v7170_v6  ;;  %v7172_v1 = vld [vmem:[%s10358_s1 + $0x5f8] sm:$0xff]  }
 0x375   : > { %6316 = vmatprep.subr.bf16.mxu1 %v9628_v57  ;;  %v6027_v57 = vpop.f32.mrf.mxu1 }
 0x376   : > { %v6028_v4 = vadd.f32 %v6027_v57, %v6026_v41 }
 0x377   : > { %6295 = vmatpush3.bf16.msra.mxu0 %v7171_v9 }
 0x378   : > { %6317 = vmatpush3.bf16.msra.mxu1 %v9641_v13  ;;  %6324 = vmatprep.subr.bf16.mxu0 %v7172_v1  ;;  %v3944_v15 = vadd.f32 %v6028_v4, %v10218_v42 }
 0x379   : > { %6415 = vmatprep.subr.bf16.mxu1 %v10613_v60 }
 0x37a   : > { %v6045_v10 = vpop.f32.mrf.mxu0  ;;  %4627 = vmatmul.mubr.bf16.vlgmr.msra.gmra.mxu0 %v6802_v27 }
 0x37b   : > { %4668 = vmatmul.mubr.bf16.vlgmr.msra.gmra.mxu1 %v6805_v30  ;;  %6325 = vmatpush3.bf16.msra.mxu0 %v7173_v34 }
 0x37c   : > { %6416 = vmatpush3.bf16.msra.mxu1 %v9659_v19  ;;  %v6046_v13 = vpop.f32.mrf.mxu0  ;;  %6326 = vmatprep.subr.bf16.mxu0 %v7174_v36  ;;  %v7175_v19 = vld [vmem:[%s10358_s1 + $0x5b0] sm:$0xff]  }
 0x37d   : > { %v6047_v50 = vadd.f32 %v6046_v13, %v6045_v10  ;;  %6417 = vmatprep.subr.bf16.mxu1 %v10613_v60  ;;  %4708 = vmatprep.mubr.bf16.mxu0 %v6810_v33 }
 0x37e   : > { %v6048_v12 = vpop.f32.mrf.mxu0  ;;  %6431 = vmatprep.mubr.msk.bf16.mxu1 %vm7208_vm0, %v10613_v60 }
 0x37f   : > { %v3982_v8 = vadd.f32 %v6047_v50, %v3941_v40  ;;  %6327 = vmatpush3.bf16.msra.mxu0 %v7175_v19 }
 0x380   : > { %6418 = vmatpush3.bf16.msra.mxu1 %v9675_v62  ;;  %v6049_v18 = vpop.f32.mrf.mxu0  ;;  %6328 = vmatprep.subr.bf16.mxu0 %v7176_v61  ;;  %v7178_v62 = vld [vmem:[%s10358_s1 + $0x5e0] sm:$0xff]  }
 0x381   : > { %v6050_v37 = vadd.f32 %v6049_v18, %v6048_v12  ;;  %6419 = vmatprep.subr.bf16.mxu1 %v10613_v60 }
 0x383   : > { %v3985_v0 = vadd.f32 %v6050_v37, %v3944_v15  ;;  %6329 = vmatpush3.bf16.msra.mxu0 %v7177_v44 }
 0x384   : > { %6420 = vmatpush3.bf16.msra.mxu1 %v9691_v48  ;;  %6330 = vmatprep.subr.bf16.mxu0 %v7178_v62  ;;  %v6067_v48 = vpop.f32.mrf.mxu1 }
 0x385   : > { %6421 = vmatprep.subr.bf16.mxu1 %v10613_v60 }
 0x386   : > { %v6068_v7 = vpop.f32.mrf.mxu1 }
 0x387   : > { %6331 = vmatpush3.bf16.msra.mxu0 %v7179_v43 }
 0x388   : > { %6422 = vmatpush3.bf16.msra.mxu1 %v9708_v31  ;;  %6332 = vmatprep.subr.bf16.mxu0 %v7180_v24  ;;  %v7182_v31 = vld [vmem:[%s10358_s1 + $0x5d0] sm:$0xff]   ;;  %v6070_v5 = vpop.f32.mrf.mxu1 }
 0x389   : > { %6423 = vmatprep.subr.bf16.mxu1 %v10613_v60 }
 0x38a   : > { %v6071_v51 = vpop.f32.mrf.mxu1 }
 0x38b   : > { %6333 = vmatpush3.bf16.msra.mxu0 %v7181_v53 }
 0x38c   : > { %6424 = vmatpush3.bf16.msra.mxu1 %v9723_v14  ;;  %6334 = vmatprep.subr.bf16.mxu0 %v7182_v31  ;;  %v6069_v14 = vadd.f32 %v6068_v7, %v6067_v48 }
 0x38d   : > { %6425 = vmatprep.subr.bf16.mxu1 %v10613_v60 }
 0x38f   : > { %6335 = vmatpush3.bf16.msra.mxu0 %v9598_v2  ;;  %v6811_v2 = vld [vmem:[%s7574_s29 + $0x2b8] ss:$100 sps:$4 sm:$0xff]   ;;  %s4871_s29 = sshll.u32 %s4847_s15, 1 }
 0x390   : > { %6426 = vmatpush3.bf16.msra.mxu1 %v9736_v26  ;;  %6336 = vmatprep.subr.bf16.mxu0 %v9610_v35  ;;  %v6072_v35 = vadd.f32 %v6071_v51, %v6070_v5  ;;  %v4023_v26 = vadd.f32 %v6069_v14, %v3982_v8  ;;  %p405_p8 = scmp.lt.s32.totalorder %s4871_s29, 3 }
 0x391   : > { %6427 = vmatprep.subr.bf16.mxu1 %v10613_v60 }
 0x392   : > { %s10743_s29 = smov (!%p405_p8, %s4871_s29), 3 }
 0x393   : > { %6337 = vmatpush3.bf16.msra.mxu0 %v9622_v58  ;;  %s4872_s14 = sshll.u32 %s10743_s29, 2 }
 0x394   : > { %6428 = vmatpush3.bf16.msra.mxu1 %v9749_v49  ;;  %6338 = vmatprep.subr.bf16.mxu0 %v9634_v21  ;;  %s408_s18 = scalar_lea.vmem %s10360_s3, %s4872_s14 }
 0x395   : > { %6429 = vmatprep.subr.bf16.mxu1 %v10613_v60  ;;  %v4026_v60 = vadd.f32 %v6072_v35, %v3985_v0 }
 0x397   : > { %6339 = vmatpush3.bf16.msra.mxu0 %v9648_v47 }
 0x398   : > { %6430 = vmatpush3.bf16.msra.mxu1 %v9763_v11 }
 0x39a   : > { %v4063_v55 = vpop.f32.mrf.mxu0  ;;  %4709 = vmatmul.mubr.bf16.vlgmr.msra.gmra.mxu0 %v6808_v54 }
 0x39b   : > { %v4064_v42 = vadd.f32 %v4063_v55, %v4023_v26  ;;  %6432 = vmatmul.mubr.bf16.vlgmr.msra.gmra.mxu1 %v6811_v2  ;;  %v6098_v11 = vpop.f32.mrf.mxu1 }
 0x39c   : > { %v6413_v58 = vpop.f32.mrf.mxu0 }
 0x39d   : > { %v10330_v21 = vmax.f32 %v3382_v22, %v4064_v42  ;;  %v6099_v17 = vpop.f32.mrf.mxu1 }
 0x39e   : > { %v4066_v49 = vpop.f32.mrf.mxu0  ;;  %v6100_v4 = vadd.f32 %v6099_v17, %v6098_v11 }
 0x39f   : > { %v4067_v39 = vadd.f32 %v4066_v49, %v4026_v60  ;;  %v6101_v46 = vpop.f32.mrf.mxu1 }
 0x3a0   : > { %v6414_v28 = vpop.f32.mrf.mxu0 }
 0x3a1   : > { %v10335_v47 = vmax.f32 %v3383_v25, %v4067_v39  ;;  %v6102_v20 = vpop.f32.mrf.mxu1 }
 0x3a2   : > { %v6103_v61 = vadd.f32 %v6102_v20, %v6101_v46 }
 0x3ba   : > { %v6120_v23 = vpop.f32.mrf.mxu0 }
 0x3bb   : > { %v6142_v56 = vpop.f32.mrf.mxu1 }
 0x3bc   : > { %v6121_v3 = vpop.f32.mrf.mxu0 }
 0x3bd   : > { %v6143_v32 = vpop.f32.mrf.mxu1  ;;  %v6122_v36 = vadd.f32 %v6121_v3, %v6120_v23 }
 0x3be   : > { %v6123_v16 = vpop.f32.mrf.mxu0  ;;  %v6144_v19 = vadd.f32 %v6143_v32, %v6142_v56 }
 0x3bf   : > { %v6145_v38 = vpop.f32.mrf.mxu1  ;;  %v4301_v8 = vadd.f32 %v6122_v36, %v6100_v4 }
 0x3c0   : > { %v6124_v22 = vpop.f32.mrf.mxu0 }
 0x3c1   : > { %v6146_v29 = vpop.f32.mrf.mxu1  ;;  %v6125_v18 = vadd.f32 %v6124_v22, %v6123_v16  ;;  %v4342_v44 = vadd.f32 %v6144_v19, %v4301_v8 }
 0x3c2   : > { %v6147_v43 = vadd.f32 %v6146_v29, %v6145_v38 }
 0x3c3   : > { %v4304_v62 = vadd.f32 %v6125_v18, %v6103_v61 }
 0x3c5   : > { %v4345_v5 = vadd.f32 %v6147_v43, %v4304_v62 }
 0x3da   : > { %v6164_v59 = vpop.f32.mrf.mxu0 }
 0x3db   : > { %v6186_v6 = vpop.f32.mrf.mxu1 }
 0x3dc   : > { %v6165_v41 = vpop.f32.mrf.mxu0 }
 0x3dd   : > { %v6187_v27 = vpop.f32.mrf.mxu1  ;;  %v6166_v15 = vadd.f32 %v6165_v41, %v6164_v59 }
 0x3de   : > { %v6167_v9 = vpop.f32.mrf.mxu0  ;;  %v6188_v48 = vadd.f32 %v6187_v27, %v6186_v6 }
 0x3df   : > { %v6189_v63 = vpop.f32.mrf.mxu1  ;;  %v4383_v24 = vadd.f32 %v6166_v15, %v4342_v44 }
 0x3e0   : > { %v6168_v52 = vpop.f32.mrf.mxu0 }
 0x3e1   : > { %v6190_v30 = vpop.f32.mrf.mxu1  ;;  %v6169_v53 = vadd.f32 %v6168_v52, %v6167_v9  ;;  %v4424_v54 = vadd.f32 %v6188_v48, %v4383_v24 }
 0x3e2   : > { %v6191_v35 = vadd.f32 %v6190_v30, %v6189_v63 }
 0x3e3   : > { %v4386_v2 = vadd.f32 %v6169_v53, %v4345_v5 }
 0x3e5   : > { %v4427_v39 = vadd.f32 %v6191_v35, %v4386_v2 }
 0x3fa   : > { %v6208_v25 = vpop.f32.mrf.mxu0 }
 0x3fb   : > { %v6230_v1 = vpop.f32.mrf.mxu1 }
 0x3fc   : > { %v6209_v45 = vpop.f32.mrf.mxu0 }
 0x3fd   : > { %v6231_v33 = vpop.f32.mrf.mxu1  ;;  %v6210_v14 = vadd.f32 %v6209_v45, %v6208_v25 }
 0x3fe   : > { %v6211_v57 = vpop.f32.mrf.mxu0  ;;  %v6232_v42 = vadd.f32 %v6231_v33, %v6230_v1 }
 0x3ff   : > { %v6233_v10 = vpop.f32.mrf.mxu1  ;;  %v4465_v55 = vadd.f32 %v6210_v14, %v4424_v54 }
 0x400   : > { %v6212_v34 = vpop.f32.mrf.mxu0 }
 0x401   : > { %v6234_v40 = vpop.f32.mrf.mxu1  ;;  %v6213_v58 = vadd.f32 %v6212_v34, %v6211_v57  ;;  %v4506_v11 = vadd.f32 %v6232_v42, %v4465_v55 }
 0x402   : > { %v6235_v46 = vadd.f32 %v6234_v40, %v6233_v10 }
 0x403   : > { %v4468_v17 = vadd.f32 %v6213_v58, %v4427_v39 }
 0x405   : > { %v4509_v16 = vadd.f32 %v6235_v46, %v4468_v17 }
 0x41a   : > { %v6252_v13 = vpop.f32.mrf.mxu0 }
 0x41b   : > { %v6274_v50 = vpop.f32.mrf.mxu1 }
 0x41c   : > { %v6253_v12 = vpop.f32.mrf.mxu0 }
 0x41d   : > { %v6275_v37 = vpop.f32.mrf.mxu1  ;;  %v6254_v28 = vadd.f32 %v6253_v12, %v6252_v13 }
 0x41e   : > { %v6255_v0 = vpop.f32.mrf.mxu0  ;;  %v6276_v3 = vadd.f32 %v6275_v37, %v6274_v50  ;;  %v5251_v37 = vld [vmem:[%s10359_s2] ss:$0 sm:$0xff] }
 0x41f   : > { %v6277_v31 = vpop.f32.mrf.mxu1  ;;  %v4547_v56 = vadd.f32 %v6254_v28, %v4506_v11 }
 0x420   : > { %v6256_v7 = vpop.f32.mrf.mxu0 }
 0x421   : > { %v6278_v26 = vpop.f32.mrf.mxu1  ;;  %v6257_v32 = vadd.f32 %v6256_v7, %v6255_v0  ;;  %v4588_v29 = vadd.f32 %v6276_v3, %v4547_v56 }
 0x422   : > { %v6279_v41 = vadd.f32 %v6278_v26, %v6277_v31 }
 0x423   : > { %v4550_v6 = vadd.f32 %v6257_v32, %v4509_v16 }
 0x425   : > { %v4591_v30 = vadd.f32 %v6279_v41, %v4550_v6 }
 0x43a   : > { %v6296_v51 = vpop.f32.mrf.mxu0 }
 0x43b   : > { %v6318_v60 = vpop.f32.mrf.mxu1 }
 0x43c   : > { %v6297_v49 = vpop.f32.mrf.mxu0 }
 0x43d   : > { %v6319_v23 = vpop.f32.mrf.mxu1  ;;  %v6298_v38 = vadd.f32 %v6297_v49, %v6296_v51 }
 0x43e   : > { %v6299_v20 = vpop.f32.mrf.mxu0  ;;  %v6320_v9 = vadd.f32 %v6319_v23, %v6318_v60 }
 0x43f   : > { %v6321_v22 = vpop.f32.mrf.mxu1  ;;  %v4629_v27 = vadd.f32 %v6298_v38, %v4588_v29 }
 0x440   : > { %v6300_v59 = vpop.f32.mrf.mxu0 }
 0x441   : > { %v6301_v63 = vadd.f32 %v6300_v59, %v6299_v20  ;;  %v6322_v52 = vpop.f32.mrf.mxu1  ;;  %v4670_v33 = vadd.f32 %v6320_v9, %v4629_v27 }
 0x442   : > { %v6323_v10 = vadd.f32 %v6322_v52, %v6321_v22 }
 0x443   : > { %v4632_v57 = vadd.f32 %v6301_v63, %v4591_v30 }
 0x445   : > { %v4673_v12 = vadd.f32 %v6323_v10, %v4632_v57 }
 0x45a   : > { %v6340_v25 = vpop.f32.mrf.mxu0 }
 0x45b   : > { %v4751_v1 = vpop.f32.mrf.mxu1 }
 0x45c   : > { %v6341_v45 = vpop.f32.mrf.mxu0 }
 0x45d   : > { %v6342_v34 = vadd.f32 %v6341_v45, %v6340_v25  ;;  %v6433_v13 = vpop.f32.mrf.mxu1 }
 0x45e   : > { %v6343_v36 = vpop.f32.mrf.mxu0 }
 0x45f   : > { %v4711_v40 = vadd.f32 %v6342_v34, %v4670_v33  ;;  %v4754_v4 = vpop.f32.mrf.mxu1 }
 0x460   : > { %v6344_v50 = vpop.f32.mrf.mxu0 }
 0x461   : > { %v4752_v8 = vadd.f32 %v4751_v1, %v4711_v40  ;;  %v6345_v19 = vadd.f32 %v6344_v50, %v6343_v36  ;;  %v6434_v18 = vpop.f32.mrf.mxu1 }
 0x463   : > { %v4758_v61 = vmax.f32 %v10330_v21, %v4752_v8  ;;  %v4714_v15 = vadd.f32 %v6345_v19, %v4673_v12 }
 0x465   : > { %v4755_v0 = vadd.f32 %v4754_v4, %v4714_v15  ;;  %v4767_v44 = vadd.f32 %v5251_v37, %v4758_v61 }
 0x467   : > { %v4759_v62 = vmax.f32 %v10335_v47, %v4755_v0  ;;  %v4769_v24 = vmax.f32 %v4767_v44, 0.0 }
 0x469   : > { %v4768_v43 = vadd.f32 %v5251_v37, %v4759_v62 }
 0x46b   : > { %v4770_v48 = vmax.f32 %v4768_v43, 0.0 }
 0x46d   : > { %v5261_v53 = vpack.c.bf16 %v4770_v48, %v4769_v24 }
 0x46f   : > { %5262 = vst [vmem:[%s408_s18] sm:$0xff] %v5261_v53  }
 0x470 PF: > { %p10_p9 = scmp.ge.s32.totalorder %s7246_s16, 4   ;;  %s10739_s12 = smov %s7201_s13 }
 0x471   : > { %s10740_s13 = smov %s7255_s19  ;;  %s10741_s14 = smov %s7246_s16 }
 0x472   :  { %12 = sbr.rel (!%p10_p9) target bundleno = 2 (0x2), region = 102 }

// kernel: net_forward.5
= control target key start
LH: loop header
LB: loop body
LE: loop exit
PB: predicated region body
PF: predicated region fallthrough
CT: control target
= control target key end

     0   :  { %v538_v36 = vlaneseq  ;;  %v5689_v37 = vmov 1966171168   ;;  %s7522_s0 = inlined_call_operand.vmem [shape: bf16[2,2048], index: 0, kind: input, shape index: {}]   ;;  %s7523_s1 = inlined_call_operand.vmem [shape: bf16[2048,512], index: 1, kind: input, shape index: {}]   ;;  %s7524_s2 = inlined_call_operand.vmem [shape: f32[1,512], index: 2, kind: input, shape index: {}]   ;;  %s7525_s3 = inlined_call_operand.vmem [shape: bf16[512,10], index: 3, kind: input, shape index: {}]   ;;  %s7526_s4 = inlined_call_operand.vmem [shape: f32[1,10], index: 4, kind: input, shape index: {}]   ;;  %s7527_s5 = inlined_call_operand.hbm [shape: f32[2,10], index: 5, kind: output, shape index: {}]  }
   0x1   :  { %v4860_v0 = vld [vmem:[%s7523_s1 + $0xe4] ss:$16 sps:$4 sm:$0xff]   ;;  %v4864_v2 = vld [vmem:[%s7523_s1 + $0xe0] ss:$16 sps:$4 sm:$0xff]   ;;  %v562_v38 = vunpack.c.l.s4 %v5689_v37 }
   0x2   :  { %v4862_v1 = vld [vmem:[%s7523_s1 + $0x2e4] ss:$16 sps:$4 sm:$0xff]   ;;  %3234 = vmatprep.subr.bf16.mxu0 %v4860_v0  ;;  %v4865_v3 = vld [vmem:[%s7523_s1 + $0x2e0] ss:$16 sps:$4 sm:$0xff]   ;;  %v5838_v42 = vshrl.u32 %v538_v36, 7 }
   0x3   :  { %3275 = vmatprep.subr.bf16.mxu1 %v4862_v1  ;;  %v4866_v4 = vld [vmem:[%s7523_s1 + $0xc4] ss:$16 sps:$4 sm:$0xff]   ;;  %3235 = vmatpush1.bf16.msra.mxu0 %v4864_v2  ;;  %v4870_v6 = vld [vmem:[%s7523_s1 + $0xc0] ss:$16 sps:$4 sm:$0xff]   ;;  %v563_v43 = vunpack.c.0.s8 %v562_v38 }
   0x4   :  { %3276 = vmatpush1.bf16.msra.mxu1 %v4865_v3  ;;  %v4868_v5 = vld [vmem:[%s7523_s1 + $0x2c4] ss:$16 sps:$4 sm:$0xff]   ;;  %3236 = vmatprep.subr.bf16.mxu0 %v4866_v4  ;;  %v4871_v7 = vld [vmem:[%s7523_s1 + $0x2c0] ss:$16 sps:$4 sm:$0xff]  }
   0x5   :  { %3277 = vmatprep.subr.bf16.mxu1 %v4868_v5  ;;  %v4872_v8 = vld [vmem:[%s7523_s1 + $0xa4] ss:$16 sps:$4 sm:$0xff]   ;;  %v4876_v10 = vld [vmem:[%s7523_s1 + $0xa0] ss:$16 sps:$4 sm:$0xff]   ;;  %v5856_v49 = vsub.s32 %v563_v43, %v5838_v42 }
   0x6   :  { %v4874_v9 = vld [vmem:[%s7523_s1 + $0x2a4] ss:$16 sps:$4 sm:$0xff]   ;;  %v4877_v11 = vld [vmem:[%s7523_s1 + $0x2a0] ss:$16 sps:$4 sm:$0xff]  }
   0x7   :  { %3237 = vmatpush1.bf16.msra.mxu0 %v4870_v6  ;;  %v4878_v12 = vld [vmem:[%s7523_s1 + $0x84] ss:$16 sps:$4 sm:$0xff]   ;;  %v4882_v14 = vld [vmem:[%s7523_s1 + $0x80] ss:$16 sps:$4 sm:$0xff]  }
   0x8   :  { %3278 = vmatpush1.bf16.msra.mxu1 %v4871_v7  ;;  %3238 = vmatprep.subr.bf16.mxu0 %v4872_v8  ;;  %v4880_v13 = vld [vmem:[%s7523_s1 + $0x284] ss:$16 sps:$4 sm:$0xff]   ;;  %v4883_v15 = vld [vmem:[%s7523_s1 + $0x280] ss:$16 sps:$4 sm:$0xff]  }
   0x9   :  { %3279 = vmatprep.subr.bf16.mxu1 %v4874_v9  ;;  %v4884_v16 = vld [vmem:[%s7523_s1 + $0x64] ss:$16 sps:$4 sm:$0xff]   ;;  %v4888_v18 = vld [vmem:[%s7523_s1 + $0x60] ss:$16 sps:$4 sm:$0xff]  }
   0xa   :  { %v4886_v17 = vld [vmem:[%s7523_s1 + $0x264] ss:$16 sps:$4 sm:$0xff]   ;;  %v4889_v19 = vld [vmem:[%s7523_s1 + $0x260] ss:$16 sps:$4 sm:$0xff]  }
   0xb   :  { %3239 = vmatpush1.bf16.msra.mxu0 %v4876_v10  ;;  %v4890_v20 = vld [vmem:[%s7523_s1 + $0x44] ss:$16 sps:$4 sm:$0xff]   ;;  %v4894_v22 = vld [vmem:[%s7523_s1 + $0x40] ss:$16 sps:$4 sm:$0xff]  }
   0xc   :  { %3280 = vmatpush1.bf16.msra.mxu1 %v4877_v11  ;;  %3240 = vmatprep.subr.bf16.mxu0 %v4878_v12  ;;  %v4892_v21 = vld [vmem:[%s7523_s1 + $0x244] ss:$16 sps:$4 sm:$0xff]   ;;  %v4895_v23 = vld [vmem:[%s7523_s1 + $0x240] ss:$16 sps:$4 sm:$0xff]  }
   0xd   :  { %3281 = vmatprep.subr.bf16.mxu1 %v4880_v13  ;;  %v4896_v24 = vld [vmem:[%s7523_s1 + $0x24] ss:$16 sps:$4 sm:$0xff]   ;;  %v4900_v26 = vld [vmem:[%s7523_s1 + $0x20] ss:$16 sps:$4 sm:$0xff]  }
   0xe   :  { %v4898_v25 = vld [vmem:[%s7523_s1 + $0x224] ss:$16 sps:$4 sm:$0xff]   ;;  %v4901_v27 = vld [vmem:[%s7523_s1 + $0x220] ss:$16 sps:$4 sm:$0xff]  }
   0xf   :  { %3241 = vmatpush1.bf16.msra.mxu0 %v4882_v14  ;;  %v4902_v28 = vld [vmem:[%s7523_s1 + $0x4] ss:$16 sps:$4 sm:$0xff]   ;;  %v4906_v30 = vld [vmem:[%s7523_s1] ss:$16 sps:$4 sm:$0xff]  }
  0x10   :  { %3282 = vmatpush1.bf16.msra.mxu1 %v4883_v15  ;;  %3242 = vmatprep.subr.bf16.mxu0 %v4884_v16  ;;  %v4904_v29 = vld [vmem:[%s7523_s1 + $0x204] ss:$16 sps:$4 sm:$0xff]   ;;  %v4907_v31 = vld [vmem:[%s7523_s1 + $0x200] ss:$16 sps:$4 sm:$0xff]  }
  0x11   :  { %3283 = vmatprep.subr.bf16.mxu1 %v4886_v17  ;;  %v4908_v32 = vld [vmem:[%s7523_s1 + $0x1e4] ss:$16 sps:$4 sm:$0xff]   ;;  %v4912_v34 = vld [vmem:[%s7523_s1 + $0x1e0] ss:$16 sps:$4 sm:$0xff]  }
  0x12   :  { %v4910_v33 = vld [vmem:[%s7523_s1 + $0x3e4] ss:$16 sps:$4 sm:$0xff]   ;;  %v4913_v35 = vld [vmem:[%s7523_s1 + $0x3e0] ss:$16 sps:$4 sm:$0xff]  }
  0x13   :  { %3243 = vmatpush1.bf16.msra.mxu0 %v4888_v18  ;;  %v4914_v39 = vld [vmem:[%s7523_s1 + $0x1c4] ss:$16 sps:$4 sm:$0xff]   ;;  %v4918_v41 = vld [vmem:[%s7523_s1 + $0x1c0] ss:$16 sps:$4 sm:$0xff]  }
  0x14   :  { %3284 = vmatpush1.bf16.msra.mxu1 %v4889_v19  ;;  %3244 = vmatprep.subr.bf16.mxu0 %v4890_v20  ;;  %v4916_v40 = vld [vmem:[%s7523_s1 + $0x3c4] ss:$16 sps:$4 sm:$0xff]   ;;  %v4919_v44 = vld [vmem:[%s7523_s1 + $0x3c0] ss:$16 sps:$4 sm:$0xff]  }
  0x15   :  { %3285 = vmatprep.subr.bf16.mxu1 %v4892_v21  ;;  %v4920_v45 = vld [vmem:[%s7523_s1 + $0x1a4] ss:$16 sps:$4 sm:$0xff]   ;;  %v4924_v47 = vld [vmem:[%s7523_s1 + $0x1a0] ss:$16 sps:$4 sm:$0xff]  }
  0x16   :  { %v4922_v46 = vld [vmem:[%s7523_s1 + $0x3a4] ss:$16 sps:$4 sm:$0xff]   ;;  %v4925_v48 = vld [vmem:[%s7523_s1 + $0x3a0] ss:$16 sps:$4 sm:$0xff]  }
  0x17   :  { %3245 = vmatpush1.bf16.msra.mxu0 %v4894_v22  ;;  %v4926_v50 = vld [vmem:[%s7523_s1 + $0x184] ss:$16 sps:$4 sm:$0xff]   ;;  %v4930_v53 = vld [vmem:[%s7523_s1 + $0x180] ss:$16 sps:$4 sm:$0xff]  }
  0x18   :  { %3286 = vmatpush1.bf16.msra.mxu1 %v4895_v23  ;;  %3246 = vmatprep.subr.bf16.mxu0 %v4896_v24  ;;  %v4928_v51 = vld [vmem:[%s7523_s1 + $0x384] ss:$16 sps:$4 sm:$0xff]   ;;  %v4931_v55 = vld [vmem:[%s7523_s1 + $0x380] ss:$16 sps:$4 sm:$0xff]  }
  0x19   :  { %3287 = vmatprep.subr.bf16.mxu1 %v4898_v25  ;;  %v22_v52 = vld [vmem:[%s7522_s0] sm:$0xff] }
  0x1a   :  { %v567_v54 = vrot.slane %v22_v52, %v5856_v49  ;;  %v4932_v56 = vld [vmem:[%s7523_s1 + $0x164] ss:$16 sps:$4 sm:$0xff]   ;;  %v4936_v59 = vld [vmem:[%s7523_s1 + $0x160] ss:$16 sps:$4 sm:$0xff]   ;;  %v560_v1 = vcombine.high %v22_v52, %v22_v52 }
  0x1b   :  { %3247 = vmatpush1.bf16.msra.mxu0 %v4900_v26  ;;  %v4934_v57 = vld [vmem:[%s7523_s1 + $0x364] ss:$16 sps:$4 sm:$0xff]   ;;  %v4937_v61 = vld [vmem:[%s7523_s1 + $0x360] ss:$16 sps:$4 sm:$0xff]  }
  0x1c   :  { %3288 = vmatpush1.bf16.msra.mxu1 %v4901_v27  ;;  %3248 = vmatprep.subr.bf16.mxu0 %v4902_v28  ;;  %v575_v58 = vcombine.high %v567_v54, %v567_v54  ;;  %v4938_v62 = vld [vmem:[%s7523_s1 + $0x144] ss:$16 sps:$4 sm:$0xff]   ;;  %v4942_v2 = vld [vmem:[%s7523_s1 + $0x140] ss:$16 sps:$4 sm:$0xff]   ;;  %v5914_v6 = vrot.slane %v560_v1, %v5856_v49  ;;  %v5934_v13 = vrot.slane %v567_v54, %v5856_v49 }
  0x1d   :  { %3289 = vmatprep.subr.bf16.mxu1 %v4904_v29  ;;  %v4940_v63 = vld [vmem:[%s7523_s1 + $0x344] ss:$16 sps:$4 sm:$0xff]   ;;  %v4943_v3 = vld [vmem:[%s7523_s1 + $0x340] ss:$16 sps:$4 sm:$0xff]  }
  0x1e   :  { %v5884_v60 = vrot.slane %v575_v58, %v5856_v49  ;;  %v4944_v4 = vld [vmem:[%s7523_s1 + $0x124] ss:$16 sps:$4 sm:$0xff]   ;;  %v4948_v7 = vld [vmem:[%s7523_s1 + $0x120] ss:$16 sps:$4 sm:$0xff]   ;;  %v576_v11 = vcombine.high %v5914_v6, %v5914_v6  ;;  %v5950_v18 = vcombine.high %v5934_v13, %v5934_v13 }
  0x1f   :  { %3249 = vmatpush1.bf16.msra.mxu0 %v4906_v30  ;;  %v4946_v5 = vld [vmem:[%s7523_s1 + $0x324] ss:$16 sps:$4 sm:$0xff]   ;;  %v4949_v8 = vld [vmem:[%s7523_s1 + $0x320] ss:$16 sps:$4 sm:$0xff]  }
  0x20   :  { %3290 = vmatpush1.bf16.msra.mxu1 %v4907_v31  ;;  %3250 = vmatprep.subr.bf16.mxu0 %v4908_v32  ;;  %v5897_v0 = vcombine.high %v5884_v60, %v5884_v60  ;;  %v4950_v9 = vld [vmem:[%s7523_s1 + $0x104] ss:$16 sps:$4 sm:$0xff]   ;;  %v4954_v12 = vld [vmem:[%s7523_s1 + $0x100] ss:$16 sps:$4 sm:$0xff]   ;;  %v5946_v17 = vrot.slane %v576_v11, %v5856_v49 }
  0x21   :  { %3291 = vmatprep.subr.bf16.mxu1 %v4910_v33  ;;  %3266 = vmatprep.mubr.bf16.mxu0 %v5884_v60  ;;  %v4952_v10 = vld [vmem:[%s7523_s1 + $0x304] ss:$16 sps:$4 sm:$0xff]   ;;  %v4955_v14 = vld [vmem:[%s7523_s1 + $0x300] ss:$16 sps:$4 sm:$0xff]  }
  0x22   :  { %3307 = vmatprep.mubr.bf16.mxu1 %v5897_v0  ;;  %v4958_v15 = vld [vmem:[%s7523_s1 + $0x4e4] ss:$16 sps:$4 sm:$0xff]   ;;  %v4956_v19 = vld [vmem:[%s7523_s1 + $0x4e0] ss:$16 sps:$4 sm:$0xff]   ;;  %v5966_v23 = vcombine.high %v5946_v17, %v5946_v17 }
  0x23   :  { %3251 = vmatpush2.bf16.msra.mxu0 %v4912_v34  ;;  %v4961_v16 = vld [vmem:[%s7523_s1 + $0x6e4] ss:$16 sps:$4 sm:$0xff]   ;;  %v4959_v20 = vld [vmem:[%s7523_s1 + $0x6e0] ss:$16 sps:$4 sm:$0xff]  }
  0x24   :  { %3292 = vmatpush2.bf16.msra.mxu1 %v4913_v35  ;;  %3252 = vmatprep.subr.bf16.mxu0 %v4914_v39  ;;  %v4964_v21 = vld [vmem:[%s7523_s1 + $0x4c4] ss:$16 sps:$4 sm:$0xff]   ;;  %v4962_v24 = vld [vmem:[%s7523_s1 + $0x4c0] ss:$16 sps:$4 sm:$0xff]  }
  0x25   :  { %3293 = vmatprep.subr.bf16.mxu1 %v4916_v40  ;;  %v4967_v22 = vld [vmem:[%s7523_s1 + $0x6c4] ss:$16 sps:$4 sm:$0xff]   ;;  %v4965_v25 = vld [vmem:[%s7523_s1 + $0x6c0] ss:$16 sps:$4 sm:$0xff]  }
  0x26   :  { %v4970_v26 = vld [vmem:[%s7523_s1 + $0x4a4] ss:$16 sps:$4 sm:$0xff]   ;;  %v4968_v28 = vld [vmem:[%s7523_s1 + $0x4a0] ss:$16 sps:$4 sm:$0xff]  }
  0x27   :  { %3253 = vmatpush2.bf16.msra.mxu0 %v4918_v41  ;;  %v4973_v27 = vld [vmem:[%s7523_s1 + $0x6a4] ss:$16 sps:$4 sm:$0xff]   ;;  %v4971_v29 = vld [vmem:[%s7523_s1 + $0x6a0] ss:$16 sps:$4 sm:$0xff]  }
  0x28   :  { %3294 = vmatpush2.bf16.msra.mxu1 %v4919_v44  ;;  %3254 = vmatprep.subr.bf16.mxu0 %v4920_v45  ;;  %v4976_v30 = vld [vmem:[%s7523_s1 + $0x484] ss:$16 sps:$4 sm:$0xff]   ;;  %v4974_v32 = vld [vmem:[%s7523_s1 + $0x480] ss:$16 sps:$4 sm:$0xff]  }
  0x29   :  { %3295 = vmatprep.subr.bf16.mxu1 %v4922_v46  ;;  %v4979_v31 = vld [vmem:[%s7523_s1 + $0x684] ss:$16 sps:$4 sm:$0xff]   ;;  %v4977_v33 = vld [vmem:[%s7523_s1 + $0x680] ss:$16 sps:$4 sm:$0xff]  }
  0x2a   :  { %v4982_v34 = vld [vmem:[%s7523_s1 + $0x464] ss:$16 sps:$4 sm:$0xff]   ;;  %v4980_v36 = vld [vmem:[%s7523_s1 + $0x460] ss:$16 sps:$4 sm:$0xff]  }
  0x2b   :  { %3255 = vmatpush2.bf16.msra.mxu0 %v4924_v47  ;;  %v4985_v35 = vld [vmem:[%s7523_s1 + $0x664] ss:$16 sps:$4 sm:$0xff]   ;;  %v4983_v37 = vld [vmem:[%s7523_s1 + $0x660] ss:$16 sps:$4 sm:$0xff]  }
  0x2c   :  { %3296 = vmatpush2.bf16.msra.mxu1 %v4925_v48  ;;  %3256 = vmatprep.subr.bf16.mxu0 %v4926_v50  ;;  %v4988_v38 = vld [vmem:[%s7523_s1 + $0x444] ss:$16 sps:$4 sm:$0xff]   ;;  %v4986_v40 = vld [vmem:[%s7523_s1 + $0x440] ss:$16 sps:$4 sm:$0xff]  }
  0x2d   :  { %3297 = vmatprep.subr.bf16.mxu1 %v4928_v51  ;;  %v4991_v39 = vld [vmem:[%s7523_s1 + $0x644] ss:$16 sps:$4 sm:$0xff]   ;;  %v4989_v41 = vld [vmem:[%s7523_s1 + $0x640] ss:$16 sps:$4 sm:$0xff]  }
  0x2e   :  { %v4994_v43 = vld [vmem:[%s7523_s1 + $0x424] ss:$16 sps:$4 sm:$0xff]   ;;  %v4992_v45 = vld [vmem:[%s7523_s1 + $0x420] ss:$16 sps:$4 sm:$0xff]  }
  0x2f   :  { %3257 = vmatpush2.bf16.msra.mxu0 %v4930_v53  ;;  %v4997_v44 = vld [vmem:[%s7523_s1 + $0x624] ss:$16 sps:$4 sm:$0xff]   ;;  %v4995_v46 = vld [vmem:[%s7523_s1 + $0x620] ss:$16 sps:$4 sm:$0xff]  }
  0x30   :  { %3298 = vmatpush2.bf16.msra.mxu1 %v4931_v55  ;;  %3258 = vmatprep.subr.bf16.mxu0 %v4932_v56  ;;  %v5000_v47 = vld [vmem:[%s7523_s1 + $0x404] ss:$16 sps:$4 sm:$0xff]   ;;  %v4998_v50 = vld [vmem:[%s7523_s1 + $0x400] ss:$16 sps:$4 sm:$0xff]  }
  0x31   :  { %3299 = vmatprep.subr.bf16.mxu1 %v4934_v57  ;;  %v5003_v48 = vld [vmem:[%s7523_s1 + $0x604] ss:$16 sps:$4 sm:$0xff]   ;;  %v5001_v51 = vld [vmem:[%s7523_s1 + $0x600] ss:$16 sps:$4 sm:$0xff]  }
  0x32   :  { %v5006_v52 = vld [vmem:[%s7523_s1 + $0x5e4] ss:$16 sps:$4 sm:$0xff]   ;;  %v5004_v54 = vld [vmem:[%s7523_s1 + $0x5e0] ss:$16 sps:$4 sm:$0xff]  }
  0x33   :  { %3259 = vmatpush2.bf16.msra.mxu0 %v4936_v59  ;;  %v5009_v53 = vld [vmem:[%s7523_s1 + $0x7e4] ss:$16 sps:$4 sm:$0xff]   ;;  %v5007_v55 = vld [vmem:[%s7523_s1 + $0x7e0] ss:$16 sps:$4 sm:$0xff]  }
  0x34   :  { %3300 = vmatpush2.bf16.msra.mxu1 %v4937_v61  ;;  %3260 = vmatprep.subr.bf16.mxu0 %v4938_v62  ;;  %v5012_v56 = vld [vmem:[%s7523_s1 + $0x5c4] ss:$16 sps:$4 sm:$0xff]   ;;  %v5010_v58 = vld [vmem:[%s7523_s1 + $0x5c0] ss:$16 sps:$4 sm:$0xff]  }
  0x35   :  { %3301 = vmatprep.subr.bf16.mxu1 %v4940_v63  ;;  %v5015_v57 = vld [vmem:[%s7523_s1 + $0x7c4] ss:$16 sps:$4 sm:$0xff]   ;;  %v5013_v59 = vld [vmem:[%s7523_s1 + $0x7c0] ss:$16 sps:$4 sm:$0xff]  }
  0x36   :  { %v5018_v61 = vld [vmem:[%s7523_s1 + $0x5a4] ss:$16 sps:$4 sm:$0xff]   ;;  %v5016_v63 = vld [vmem:[%s7523_s1 + $0x5a0] ss:$16 sps:$4 sm:$0xff]  }
  0x37   :  { %3261 = vmatpush2.bf16.msra.mxu0 %v4942_v2  ;;  %v5021_v62 = vld [vmem:[%s7523_s1 + $0x7a4] ss:$16 sps:$4 sm:$0xff]   ;;  %v5019_v1 = vld [vmem:[%s7523_s1 + $0x7a0] ss:$16 sps:$4 sm:$0xff]  }
  0x38   :  { %3302 = vmatpush2.bf16.msra.mxu1 %v4943_v3  ;;  %3262 = vmatprep.subr.bf16.mxu0 %v4944_v4  ;;  %v5024_v2 = vld [vmem:[%s7523_s1 + $0x584] ss:$16 sps:$4 sm:$0xff]   ;;  %v5022_v4 = vld [vmem:[%s7523_s1 + $0x580] ss:$16 sps:$4 sm:$0xff]  }
  0x39   :  { %3303 = vmatprep.subr.bf16.mxu1 %v4946_v5  ;;  %v5027_v3 = vld [vmem:[%s7523_s1 + $0x784] ss:$16 sps:$4 sm:$0xff]   ;;  %v5025_v5 = vld [vmem:[%s7523_s1 + $0x780] ss:$16 sps:$4 sm:$0xff]  }
  0x3a   :  { %v5036_v11 = vld [vmem:[%s7523_s1 + $0x544] ss:$16 sps:$4 sm:$0xff]  }
  0x3b   :  { %3263 = vmatpush2.bf16.msra.mxu0 %v4948_v7  ;;  %v5030_v7 = vld [vmem:[%s7523_s1 + $0x564] ss:$16 sps:$4 sm:$0xff]  }
  0x3c   :  { %3304 = vmatpush2.bf16.msra.mxu1 %v4949_v8  ;;  %3264 = vmatprep.subr.bf16.mxu0 %v4950_v9  ;;  %v5033_v8 = vld [vmem:[%s7523_s1 + $0x764] ss:$16 sps:$4 sm:$0xff]   ;;  %v5028_v9 = vld [vmem:[%s7523_s1 + $0x560] ss:$16 sps:$4 sm:$0xff]  }
  0x3d   :  { %3305 = vmatprep.subr.bf16.mxu1 %v4952_v10  ;;  %v5031_v10 = vld [vmem:[%s7523_s1 + $0x760] ss:$16 sps:$4 sm:$0xff]  }
  0x3f   :  { %3265 = vmatpush2.bf16.msra.mxu0 %v4954_v12  ;;  %v5039_v12 = vld [vmem:[%s7523_s1 + $0x744] ss:$16 sps:$4 sm:$0xff]  }
  0x40   :  { %3306 = vmatpush2.bf16.msra.mxu1 %v4955_v14  ;;  %3316 = vmatprep.subr.bf16.mxu0 %v4958_v15  ;;  %v5034_v14 = vld [vmem:[%s7523_s1 + $0x540] ss:$16 sps:$4 sm:$0xff]  }
  0x41   :  { %3357 = vmatprep.subr.bf16.mxu1 %v4961_v16  ;;  %v5037_v15 = vld [vmem:[%s7523_s1 + $0x740] ss:$16 sps:$4 sm:$0xff]   ;;  %v5042_v16 = vld [vmem:[%s7523_s1 + $0x524] ss:$16 sps:$4 sm:$0xff]  }
  0x42   :  { %3267 = vmatmul.mubr.bf16.vlgmr.msra.gmra.mxu0 %v5934_v13 }
  0x43   :  { %3308 = vmatmul.mubr.bf16.vlgmr.msra.gmra.mxu1 %v5950_v18  ;;  %3317 = vmatpush1.bf16.msra.mxu0 %v4956_v19  ;;  %v5045_v19 = vld [vmem:[%s7523_s1 + $0x724] ss:$16 sps:$4 sm:$0xff]  }
  0x44   :  { %3358 = vmatpush1.bf16.msra.mxu1 %v4959_v20  ;;  %3318 = vmatprep.subr.bf16.mxu0 %v4964_v21  ;;  %v5040_v20 = vld [vmem:[%s7523_s1 + $0x520] ss:$16 sps:$4 sm:$0xff]  }
  0x45   :  { %3359 = vmatprep.subr.bf16.mxu1 %v4967_v22  ;;  %3348 = vmatprep.mubr.bf16.mxu0 %v5946_v17  ;;  %v5043_v21 = vld [vmem:[%s7523_s1 + $0x720] ss:$16 sps:$4 sm:$0xff]   ;;  %v5048_v22 = vld [vmem:[%s7523_s1 + $0x504] ss:$16 sps:$4 sm:$0xff]  }
  0x46   :  { %3389 = vmatprep.mubr.bf16.mxu1 %v5966_v23 }
  0x47   :  { %3319 = vmatpush1.bf16.msra.mxu0 %v4962_v24  ;;  %v5051_v24 = vld [vmem:[%s7523_s1 + $0x704] ss:$16 sps:$4 sm:$0xff]  }
  0x48   :  { %3360 = vmatpush1.bf16.msra.mxu1 %v4965_v25  ;;  %3320 = vmatprep.subr.bf16.mxu0 %v4970_v26  ;;  %v5046_v25 = vld [vmem:[%s7523_s1 + $0x500] ss:$16 sps:$4 sm:$0xff]   ;;  %v6145_v26 = vrot.slane %v5914_v6, %v5856_v49 }
  0x49   :  { %3361 = vmatprep.subr.bf16.mxu1 %v4973_v27  ;;  %v5049_v27 = vld [vmem:[%s7523_s1 + $0x700] ss:$16 sps:$4 sm:$0xff]  }
  0x4a   :  { %v6158_v6 = vcombine.high %v6145_v26, %v6145_v26 }
  0x4b   :  { %3321 = vmatpush1.bf16.msra.mxu0 %v4968_v28  ;;  %v5055_v28 = vld [vmem:[%s7523_s1 + $0x8e4] ss:$16 sps:$4 sm:$0xff]  }
  0x4c   :  { %3362 = vmatpush1.bf16.msra.mxu1 %v4971_v29  ;;  %3322 = vmatprep.subr.bf16.mxu0 %v4976_v30  ;;  %v5058_v29 = vld [vmem:[%s7523_s1 + $0xae4] ss:$16 sps:$4 sm:$0xff]   ;;  %v5053_v30 = vld [vmem:[%s7523_s1 + $0x8e0] ss:$16 sps:$4 sm:$0xff]  }
  0x4d   :  { %3363 = vmatprep.subr.bf16.mxu1 %v4979_v31  ;;  %v5056_v31 = vld [vmem:[%s7523_s1 + $0xae0] ss:$16 sps:$4 sm:$0xff]  }
  0x4f   :  { %3323 = vmatpush1.bf16.msra.mxu0 %v4974_v32  ;;  %v6169_v32 = vld [vmem:[%s7522_s0 + $0x8] sm:$0xff] }
  0x50   :  { %3364 = vmatpush1.bf16.msra.mxu1 %v4977_v33  ;;  %3324 = vmatprep.subr.bf16.mxu0 %v4982_v34  ;;  %v5061_v33 = vld [vmem:[%s7523_s1 + $0x8c4] ss:$16 sps:$4 sm:$0xff]  }
  0x51   :  { %3365 = vmatprep.subr.bf16.mxu1 %v4985_v35  ;;  %v5064_v34 = vld [vmem:[%s7523_s1 + $0xac4] ss:$16 sps:$4 sm:$0xff]   ;;  %v6179_v35 = vrot.slane %v6169_v32, %v5856_v49 }
  0x53   :  { %3325 = vmatpush1.bf16.msra.mxu0 %v4980_v36  ;;  %v624_v36 = vcombine.high %v6179_v35, %v6179_v35 }
  0x54   :  { %3366 = vmatpush1.bf16.msra.mxu1 %v4983_v37  ;;  %3326 = vmatprep.subr.bf16.mxu0 %v4988_v38  ;;  %v5059_v37 = vld [vmem:[%s7523_s1 + $0x8c0] ss:$16 sps:$4 sm:$0xff]  }
  0x55   :  { %3367 = vmatprep.subr.bf16.mxu1 %v4991_v39  ;;  %v5062_v38 = vld [vmem:[%s7523_s1 + $0xac0] ss:$16 sps:$4 sm:$0xff]   ;;  %v5067_v39 = vld [vmem:[%s7523_s1 + $0x8a4] ss:$16 sps:$4 sm:$0xff]  }
  0x57   :  { %3327 = vmatpush1.bf16.msra.mxu0 %v4986_v40  ;;  %v5070_v40 = vld [vmem:[%s7523_s1 + $0xaa4] ss:$16 sps:$4 sm:$0xff]  }
  0x58   :  { %3368 = vmatpush1.bf16.msra.mxu1 %v4989_v41  ;;  %3328 = vmatprep.subr.bf16.mxu0 %v4994_v43  ;;  %v6198_v41 = vrot.slane %v624_v36, %v5856_v49  ;;  %v5131_v36 = vld [vmem:[%s7523_s1 + $0x940] ss:$16 sps:$4 sm:$0xff]  }
  0x59   :  { %3369 = vmatprep.subr.bf16.mxu1 %v4997_v44  ;;  %v5065_v44 = vld [vmem:[%s7523_s1 + $0x8a0] ss:$16 sps:$4 sm:$0xff]  }
  0x5a   :  { %v6203_v43 = vcombine.high %v6198_v41, %v6198_v41 }
  0x5b   :  { %3329 = vmatpush1.bf16.msra.mxu0 %v4992_v45  ;;  %v5068_v45 = vld [vmem:[%s7523_s1 + $0xaa0] ss:$16 sps:$4 sm:$0xff]  }
  0x5c   :  { %3370 = vmatpush1.bf16.msra.mxu1 %v4995_v46  ;;  %3330 = vmatprep.subr.bf16.mxu0 %v5000_v47  ;;  %v5073_v46 = vld [vmem:[%s7523_s1 + $0x884] ss:$16 sps:$4 sm:$0xff]  }
  0x5d   :  { %3371 = vmatprep.subr.bf16.mxu1 %v5003_v48  ;;  %v5076_v47 = vld [vmem:[%s7523_s1 + $0xa84] ss:$16 sps:$4 sm:$0xff]   ;;  %v5071_v48 = vld [vmem:[%s7523_s1 + $0x880] ss:$16 sps:$4 sm:$0xff]  }
  0x5f   :  { %3331 = vmatpush1.bf16.msra.mxu0 %v4998_v50  ;;  %v5074_v50 = vld [vmem:[%s7523_s1 + $0xa80] ss:$16 sps:$4 sm:$0xff]  }
  0x60   :  { %3372 = vmatpush1.bf16.msra.mxu1 %v5001_v51  ;;  %3332 = vmatprep.subr.bf16.mxu0 %v5006_v52  ;;  %v5079_v51 = vld [vmem:[%s7523_s1 + $0x864] ss:$16 sps:$4 sm:$0xff]  }
  0x61   :  { %3373 = vmatprep.subr.bf16.mxu1 %v5009_v53  ;;  %v5082_v52 = vld [vmem:[%s7523_s1 + $0xa64] ss:$16 sps:$4 sm:$0xff]   ;;  %v5077_v53 = vld [vmem:[%s7523_s1 + $0x860] ss:$16 sps:$4 sm:$0xff]  }
  0x63   :  { %3333 = vmatpush2.bf16.msra.mxu0 %v5004_v54  ;;  %v5080_v54 = vld [vmem:[%s7523_s1 + $0xa60] ss:$16 sps:$4 sm:$0xff]  }
  0x64   :  { %3374 = vmatpush2.bf16.msra.mxu1 %v5007_v55  ;;  %3334 = vmatprep.subr.bf16.mxu0 %v5012_v56  ;;  %v5085_v55 = vld [vmem:[%s7523_s1 + $0x844] ss:$16 sps:$4 sm:$0xff]  }
  0x65   :  { %3375 = vmatprep.subr.bf16.mxu1 %v5015_v57  ;;  %v5088_v56 = vld [vmem:[%s7523_s1 + $0xa44] ss:$16 sps:$4 sm:$0xff]   ;;  %v5083_v57 = vld [vmem:[%s7523_s1 + $0x840] ss:$16 sps:$4 sm:$0xff]  }
  0x67   :  { %3335 = vmatpush2.bf16.msra.mxu0 %v5010_v58  ;;  %v5086_v58 = vld [vmem:[%s7523_s1 + $0xa40] ss:$16 sps:$4 sm:$0xff]  }
  0x68   :  { %3376 = vmatpush2.bf16.msra.mxu1 %v5013_v59  ;;  %3336 = vmatprep.subr.bf16.mxu0 %v5018_v61  ;;  %v5091_v59 = vld [vmem:[%s7523_s1 + $0x824] ss:$16 sps:$4 sm:$0xff]  }
  0x69   :  { %3377 = vmatprep.subr.bf16.mxu1 %v5021_v62  ;;  %v5094_v61 = vld [vmem:[%s7523_s1 + $0xa24] ss:$16 sps:$4 sm:$0xff]   ;;  %v5089_v62 = vld [vmem:[%s7523_s1 + $0x820] ss:$16 sps:$4 sm:$0xff]  }
  0x6b   :  { %3337 = vmatpush2.bf16.msra.mxu0 %v5016_v63  ;;  %v5092_v63 = vld [vmem:[%s7523_s1 + $0xa20] ss:$16 sps:$4 sm:$0xff]  }
  0x6c   :  { %3378 = vmatpush2.bf16.msra.mxu1 %v5019_v1  ;;  %3338 = vmatprep.subr.bf16.mxu0 %v5024_v2  ;;  %v5097_v1 = vld [vmem:[%s7523_s1 + $0x804] ss:$16 sps:$4 sm:$0xff]  }
  0x6d   :  { %3379 = vmatprep.subr.bf16.mxu1 %v5027_v3  ;;  %v5100_v2 = vld [vmem:[%s7523_s1 + $0xa04] ss:$16 sps:$4 sm:$0xff]   ;;  %v5095_v3 = vld [vmem:[%s7523_s1 + $0x800] ss:$16 sps:$4 sm:$0xff]  }
  0x6f   :  { %3339 = vmatpush2.bf16.msra.mxu0 %v5022_v4  ;;  %v5098_v4 = vld [vmem:[%s7523_s1 + $0xa00] ss:$16 sps:$4 sm:$0xff]  }
  0x70   :  { %3380 = vmatpush2.bf16.msra.mxu1 %v5025_v5  ;;  %3340 = vmatprep.subr.bf16.mxu0 %v5030_v7  ;;  %v5103_v5 = vld [vmem:[%s7523_s1 + $0x9e4] ss:$16 sps:$4 sm:$0xff]  }
  0x71   :  { %3381 = vmatprep.subr.bf16.mxu1 %v5033_v8  ;;  %v5106_v7 = vld [vmem:[%s7523_s1 + $0xbe4] ss:$16 sps:$4 sm:$0xff]   ;;  %v5101_v8 = vld [vmem:[%s7523_s1 + $0x9e0] ss:$16 sps:$4 sm:$0xff]  }
  0x73   :  { %3341 = vmatpush2.bf16.msra.mxu0 %v5028_v9  ;;  %v5104_v9 = vld [vmem:[%s7523_s1 + $0xbe0] ss:$16 sps:$4 sm:$0xff]  }
  0x74   :  { %3382 = vmatpush2.bf16.msra.mxu1 %v5031_v10  ;;  %3342 = vmatprep.subr.bf16.mxu0 %v5036_v11  ;;  %v5109_v10 = vld [vmem:[%s7523_s1 + $0x9c4] ss:$16 sps:$4 sm:$0xff]  }
  0x75   :  { %3383 = vmatprep.subr.bf16.mxu1 %v5039_v12  ;;  %v5112_v11 = vld [vmem:[%s7523_s1 + $0xbc4] ss:$16 sps:$4 sm:$0xff]   ;;  %v5107_v12 = vld [vmem:[%s7523_s1 + $0x9c0] ss:$16 sps:$4 sm:$0xff]  }
  0x77   :  { %3343 = vmatpush2.bf16.msra.mxu0 %v5034_v14  ;;  %v5110_v14 = vld [vmem:[%s7523_s1 + $0xbc0] ss:$16 sps:$4 sm:$0xff]  }
  0x78   :  { %3384 = vmatpush2.bf16.msra.mxu1 %v5037_v15  ;;  %3344 = vmatprep.subr.bf16.mxu0 %v5042_v16  ;;  %v5115_v15 = vld [vmem:[%s7523_s1 + $0x9a4] ss:$16 sps:$4 sm:$0xff]  }
  0x79   :  { %3385 = vmatprep.subr.bf16.mxu1 %v5045_v19  ;;  %v5118_v16 = vld [vmem:[%s7523_s1 + $0xba4] ss:$16 sps:$4 sm:$0xff]   ;;  %v5113_v19 = vld [vmem:[%s7523_s1 + $0x9a0] ss:$16 sps:$4 sm:$0xff]  }
  0x7b   :  { %3345 = vmatpush2.bf16.msra.mxu0 %v5040_v20  ;;  %v5116_v20 = vld [vmem:[%s7523_s1 + $0xba0] ss:$16 sps:$4 sm:$0xff]  }
  0x7c   :  { %3386 = vmatpush2.bf16.msra.mxu1 %v5043_v21  ;;  %3346 = vmatprep.subr.bf16.mxu0 %v5048_v22  ;;  %v5121_v21 = vld [vmem:[%s7523_s1 + $0x984] ss:$16 sps:$4 sm:$0xff]  }
  0x7d   :  { %3387 = vmatprep.subr.bf16.mxu1 %v5051_v24  ;;  %v5124_v22 = vld [vmem:[%s7523_s1 + $0xb84] ss:$16 sps:$4 sm:$0xff]   ;;  %v5119_v24 = vld [vmem:[%s7523_s1 + $0x980] ss:$16 sps:$4 sm:$0xff]  }
  0x7f   :  { %3347 = vmatpush2.bf16.msra.mxu0 %v5046_v25  ;;  %v5122_v25 = vld [vmem:[%s7523_s1 + $0xb80] ss:$16 sps:$4 sm:$0xff]  }
  0x80   :  { %3388 = vmatpush2.bf16.msra.mxu1 %v5049_v27  ;;  %3398 = vmatprep.subr.bf16.mxu0 %v5055_v28  ;;  %v5127_v27 = vld [vmem:[%s7523_s1 + $0x964] ss:$16 sps:$4 sm:$0xff]  }
  0x81   :  { %3439 = vmatprep.subr.bf16.mxu1 %v5058_v29  ;;  %v5130_v28 = vld [vmem:[%s7523_s1 + $0xb64] ss:$16 sps:$4 sm:$0xff]   ;;  %v5125_v29 = vld [vmem:[%s7523_s1 + $0x960] ss:$16 sps:$4 sm:$0xff]  }
  0x82   :  { %3349 = vmatmul.mubr.bf16.vlgmr.msra.gmra.mxu0 %v6145_v26 }
  0x83   :  { %3390 = vmatmul.mubr.bf16.vlgmr.msra.gmra.mxu1 %v6158_v6  ;;  %3399 = vmatpush1.bf16.msra.mxu0 %v5053_v30  ;;  %v5128_v30 = vld [vmem:[%s7523_s1 + $0xb60] ss:$16 sps:$4 sm:$0xff]  }
  0x84   :  { %3440 = vmatpush1.bf16.msra.mxu1 %v5056_v31  ;;  %3400 = vmatprep.subr.bf16.mxu0 %v5061_v33  ;;  %v5133_v31 = vld [vmem:[%s7523_s1 + $0x944] ss:$16 sps:$4 sm:$0xff]  }
  0x85   :  { %3441 = vmatprep.subr.bf16.mxu1 %v5064_v34  ;;  %3430 = vmatprep.mubr.bf16.mxu0 %v6198_v41  ;;  %v5136_v33 = vld [vmem:[%s7523_s1 + $0xb44] ss:$16 sps:$4 sm:$0xff]   ;;  %v609_v34 = vcombine.high %v6169_v32, %v6169_v32 }
  0x86   :  { %3471 = vmatprep.mubr.bf16.mxu1 %v6203_v43  ;;  %v5142_v32 = vld [vmem:[%s7523_s1 + $0xb24] ss:$16 sps:$4 sm:$0xff]  }
  0x87   :  { %3401 = vmatpush1.bf16.msra.mxu0 %v5059_v37  ;;  %v5134_v37 = vld [vmem:[%s7523_s1 + $0xb40] ss:$16 sps:$4 sm:$0xff]  }
  0x88   :  { %3442 = vmatpush1.bf16.msra.mxu1 %v5062_v38  ;;  %3402 = vmatprep.subr.bf16.mxu0 %v5067_v39  ;;  %v5139_v38 = vld [vmem:[%s7523_s1 + $0x924] ss:$16 sps:$4 sm:$0xff]   ;;  %v6353_v39 = vrot.slane %v609_v34, %v5856_v49  ;;  %v5200_v34 = vld [vmem:[%s7523_s1 + $0xfe0] ss:$16 sps:$4 sm:$0xff]  }
  0x89   :  { %3443 = vmatprep.subr.bf16.mxu1 %v5070_v40  ;;  %v5137_v40 = vld [vmem:[%s7523_s1 + $0x920] ss:$16 sps:$4 sm:$0xff]  }
  0x8b   :  { %3403 = vmatpush1.bf16.msra.mxu0 %v5065_v44  ;;  %v5140_v44 = vld [vmem:[%s7523_s1 + $0xb20] ss:$16 sps:$4 sm:$0xff]  }
  0x8c   :  { %3444 = vmatpush1.bf16.msra.mxu1 %v5068_v45  ;;  %3404 = vmatprep.subr.bf16.mxu0 %v5073_v46  ;;  %v5145_v45 = vld [vmem:[%s7523_s1 + $0x904] ss:$16 sps:$4 sm:$0xff]  }
  0x8d   :  { %3445 = vmatprep.subr.bf16.mxu1 %v5076_v47  ;;  %v5148_v46 = vld [vmem:[%s7523_s1 + $0xb04] ss:$16 sps:$4 sm:$0xff]   ;;  %v625_v47 = vcombine.high %v6353_v39, %v6353_v39 }
  0x8f   :  { %3405 = vmatpush1.bf16.msra.mxu0 %v5071_v48  ;;  %v5143_v48 = vld [vmem:[%s7523_s1 + $0x900] ss:$16 sps:$4 sm:$0xff]  }
  0x90   :  { %3446 = vmatpush1.bf16.msra.mxu1 %v5074_v50  ;;  %3406 = vmatprep.subr.bf16.mxu0 %v5079_v51  ;;  %v6374_v50 = vrot.slane %v6179_v35, %v5856_v49  ;;  %v5146_v51 = vld [vmem:[%s7523_s1 + $0xb00] ss:$16 sps:$4 sm:$0xff]  }
  0x91   :  { %3447 = vmatprep.subr.bf16.mxu1 %v5082_v52  ;;  %v5151_v52 = vld [vmem:[%s7523_s1 + $0xce4] ss:$16 sps:$4 sm:$0xff]  }
  0x92   :  { %v6390_v35 = vcombine.high %v6374_v50, %v6374_v50 }
  0x93   :  { %3407 = vmatpush1.bf16.msra.mxu0 %v5077_v53  ;;  %v5154_v53 = vld [vmem:[%s7523_s1 + $0xee4] ss:$16 sps:$4 sm:$0xff]  }
  0x94   :  { %3448 = vmatpush1.bf16.msra.mxu1 %v5080_v54  ;;  %3408 = vmatprep.subr.bf16.mxu0 %v5085_v55  ;;  %v6386_v54 = vrot.slane %v625_v47, %v5856_v49  ;;  %v5149_v55 = vld [vmem:[%s7523_s1 + $0xce0] ss:$16 sps:$4 sm:$0xff]   ;;  %v5217_v47 = vld [vmem:[%s7523_s1 + $0xd84] ss:$16 sps:$4 sm:$0xff]  }
  0x95   :  { %3449 = vmatprep.subr.bf16.mxu1 %v5088_v56  ;;  %v5152_v56 = vld [vmem:[%s7523_s1 + $0xee0] ss:$16 sps:$4 sm:$0xff]  }
  0x97   :  { %3409 = vmatpush1.bf16.msra.mxu0 %v5083_v57  ;;  %v5157_v57 = vld [vmem:[%s7523_s1 + $0xcc4] ss:$16 sps:$4 sm:$0xff]  }
  0x98   :  { %3450 = vmatpush1.bf16.msra.mxu1 %v5086_v58  ;;  %3410 = vmatprep.subr.bf16.mxu0 %v5091_v59  ;;  %v5160_v58 = vld [vmem:[%s7523_s1 + $0xec4] ss:$16 sps:$4 sm:$0xff]   ;;  %v6406_v59 = vcombine.high %v6386_v54, %v6386_v54 }
  0x99   :  { %3451 = vmatprep.subr.bf16.mxu1 %v5094_v61  ;;  %v5155_v61 = vld [vmem:[%s7523_s1 + $0xcc0] ss:$16 sps:$4 sm:$0xff]  }
  0x9b   :  { %3411 = vmatpush1.bf16.msra.mxu0 %v5089_v62  ;;  %v5158_v62 = vld [vmem:[%s7523_s1 + $0xec0] ss:$16 sps:$4 sm:$0xff]  }
  0x9c   :  { %3452 = vmatpush1.bf16.msra.mxu1 %v5092_v63  ;;  %3412 = vmatprep.subr.bf16.mxu0 %v5097_v1  ;;  %v5163_v63 = vld [vmem:[%s7523_s1 + $0xca4] ss:$16 sps:$4 sm:$0xff]  }
  0x9d   :  { %3453 = vmatprep.subr.bf16.mxu1 %v5100_v2  ;;  %v5166_v1 = vld [vmem:[%s7523_s1 + $0xea4] ss:$16 sps:$4 sm:$0xff]   ;;  %v5161_v2 = vld [vmem:[%s7523_s1 + $0xca0] ss:$16 sps:$4 sm:$0xff]  }
  0x9f   :  { %3413 = vmatpush1.bf16.msra.mxu0 %v5095_v3  ;;  %v5164_v3 = vld [vmem:[%s7523_s1 + $0xea0] ss:$16 sps:$4 sm:$0xff]  }
  0xa0   :  { %3454 = vmatpush1.bf16.msra.mxu1 %v5098_v4  ;;  %3414 = vmatprep.subr.bf16.mxu0 %v5103_v5  ;;  %v5169_v4 = vld [vmem:[%s7523_s1 + $0xc84] ss:$16 sps:$4 sm:$0xff]  }
  0xa1   :  { %3455 = vmatprep.subr.bf16.mxu1 %v5106_v7  ;;  %v5172_v5 = vld [vmem:[%s7523_s1 + $0xe84] ss:$16 sps:$4 sm:$0xff]   ;;  %v5167_v7 = vld [vmem:[%s7523_s1 + $0xc80] ss:$16 sps:$4 sm:$0xff]  }
  0xa3   :  { %3415 = vmatpush2.bf16.msra.mxu0 %v5101_v8  ;;  %v5170_v8 = vld [vmem:[%s7523_s1 + $0xe80] ss:$16 sps:$4 sm:$0xff]  }
  0xa4   :  { %3456 = vmatpush2.bf16.msra.mxu1 %v5104_v9  ;;  %3416 = vmatprep.subr.bf16.mxu0 %v5109_v10  ;;  %v5175_v9 = vld [vmem:[%s7523_s1 + $0xc64] ss:$16 sps:$4 sm:$0xff]  }
  0xa5   :  { %3457 = vmatprep.subr.bf16.mxu1 %v5112_v11  ;;  %v5178_v10 = vld [vmem:[%s7523_s1 + $0xe64] ss:$16 sps:$4 sm:$0xff]   ;;  %v5173_v11 = vld [vmem:[%s7523_s1 + $0xc60] ss:$16 sps:$4 sm:$0xff]  }
  0xa7   :  { %3417 = vmatpush2.bf16.msra.mxu0 %v5107_v12  ;;  %v5176_v12 = vld [vmem:[%s7523_s1 + $0xe60] ss:$16 sps:$4 sm:$0xff]  }
  0xa8   :  { %3458 = vmatpush2.bf16.msra.mxu1 %v5110_v14  ;;  %3418 = vmatprep.subr.bf16.mxu0 %v5115_v15  ;;  %v5181_v14 = vld [vmem:[%s7523_s1 + $0xc44] ss:$16 sps:$4 sm:$0xff]  }
  0xa9   :  { %3459 = vmatprep.subr.bf16.mxu1 %v5118_v16  ;;  %v5184_v15 = vld [vmem:[%s7523_s1 + $0xe44] ss:$16 sps:$4 sm:$0xff]   ;;  %v5179_v16 = vld [vmem:[%s7523_s1 + $0xc40] ss:$16 sps:$4 sm:$0xff]  }
  0xab   :  { %3419 = vmatpush2.bf16.msra.mxu0 %v5113_v19  ;;  %v5182_v19 = vld [vmem:[%s7523_s1 + $0xe40] ss:$16 sps:$4 sm:$0xff]  }
  0xac   :  { %3460 = vmatpush2.bf16.msra.mxu1 %v5116_v20  ;;  %3420 = vmatprep.subr.bf16.mxu0 %v5121_v21  ;;  %v5187_v20 = vld [vmem:[%s7523_s1 + $0xc24] ss:$16 sps:$4 sm:$0xff]  }
  0xad   :  { %3461 = vmatprep.subr.bf16.mxu1 %v5124_v22  ;;  %v5190_v21 = vld [vmem:[%s7523_s1 + $0xe24] ss:$16 sps:$4 sm:$0xff]   ;;  %v5185_v22 = vld [vmem:[%s7523_s1 + $0xc20] ss:$16 sps:$4 sm:$0xff]  }
  0xaf   :  { %3421 = vmatpush2.bf16.msra.mxu0 %v5119_v24  ;;  %v5188_v24 = vld [vmem:[%s7523_s1 + $0xe20] ss:$16 sps:$4 sm:$0xff]  }
  0xb0   :  { %3462 = vmatpush2.bf16.msra.mxu1 %v5122_v25  ;;  %3422 = vmatprep.subr.bf16.mxu0 %v5127_v27  ;;  %v5193_v25 = vld [vmem:[%s7523_s1 + $0xc04] ss:$16 sps:$4 sm:$0xff]  }
  0xb1   :  { %3463 = vmatprep.subr.bf16.mxu1 %v5130_v28  ;;  %v5196_v27 = vld [vmem:[%s7523_s1 + $0xe04] ss:$16 sps:$4 sm:$0xff]   ;;  %v5191_v28 = vld [vmem:[%s7523_s1 + $0xc00] ss:$16 sps:$4 sm:$0xff]  }
  0xb3   :  { %3423 = vmatpush2.bf16.msra.mxu0 %v5125_v29  ;;  %v5194_v29 = vld [vmem:[%s7523_s1 + $0xe00] ss:$16 sps:$4 sm:$0xff]  }
  0xb4   :  { %3464 = vmatpush2.bf16.msra.mxu1 %v5128_v30  ;;  %3424 = vmatprep.subr.bf16.mxu0 %v5133_v31  ;;  %v5199_v30 = vld [vmem:[%s7523_s1 + $0xde4] ss:$16 sps:$4 sm:$0xff]  }
  0xb5   :  { %3465 = vmatprep.subr.bf16.mxu1 %v5136_v33  ;;  %v5202_v31 = vld [vmem:[%s7523_s1 + $0xfe4] ss:$16 sps:$4 sm:$0xff]   ;;  %v5197_v33 = vld [vmem:[%s7523_s1 + $0xde0] ss:$16 sps:$4 sm:$0xff]  }
  0xb7   :  { %3425 = vmatpush2.bf16.msra.mxu0 %v5131_v36  ;;  %v5205_v36 = vld [vmem:[%s7523_s1 + $0xdc4] ss:$16 sps:$4 sm:$0xff]  }
  0xb8   :  { %3466 = vmatpush2.bf16.msra.mxu1 %v5134_v37  ;;  %3426 = vmatprep.subr.bf16.mxu0 %v5139_v38  ;;  %v5208_v37 = vld [vmem:[%s7523_s1 + $0xfc4] ss:$16 sps:$4 sm:$0xff]   ;;  %v5203_v38 = vld [vmem:[%s7523_s1 + $0xdc0] ss:$16 sps:$4 sm:$0xff]  }
  0xb9   :  { %3467 = vmatprep.subr.bf16.mxu1 %v5142_v32  ;;  %v5206_v32 = vld [vmem:[%s7523_s1 + $0xfc0] ss:$16 sps:$4 sm:$0xff]  }
  0xbb   :  { %3427 = vmatpush2.bf16.msra.mxu0 %v5137_v40  ;;  %v5211_v40 = vld [vmem:[%s7523_s1 + $0xda4] ss:$16 sps:$4 sm:$0xff]  }
  0xbc   :  { %3468 = vmatpush2.bf16.msra.mxu1 %v5140_v44  ;;  %3428 = vmatprep.subr.bf16.mxu0 %v5145_v45  ;;  %v5214_v44 = vld [vmem:[%s7523_s1 + $0xfa4] ss:$16 sps:$4 sm:$0xff]   ;;  %v5209_v45 = vld [vmem:[%s7523_s1 + $0xda0] ss:$16 sps:$4 sm:$0xff]  }
  0xbd   :  { %3469 = vmatprep.subr.bf16.mxu1 %v5148_v46  ;;  %v5212_v46 = vld [vmem:[%s7523_s1 + $0xfa0] ss:$16 sps:$4 sm:$0xff]  }
  0xbf   :  { %3429 = vmatpush2.bf16.msra.mxu0 %v5143_v48  ;;  %v5220_v48 = vld [vmem:[%s7523_s1 + $0xf84] ss:$16 sps:$4 sm:$0xff]  }
  0xc0   :  { %3470 = vmatpush2.bf16.msra.mxu1 %v5146_v51  ;;  %3480 = vmatprep.subr.bf16.mxu0 %v5151_v52  ;;  %v5215_v51 = vld [vmem:[%s7523_s1 + $0xd80] ss:$16 sps:$4 sm:$0xff]  }
  0xc1   :  { %3521 = vmatprep.subr.bf16.mxu1 %v5154_v53  ;;  %v5218_v52 = vld [vmem:[%s7523_s1 + $0xf80] ss:$16 sps:$4 sm:$0xff]   ;;  %v5223_v53 = vld [vmem:[%s7523_s1 + $0xd64] ss:$16 sps:$4 sm:$0xff]  }
  0xc2   :  { %3431 = vmatmul.mubr.bf16.vlgmr.msra.gmra.mxu0 %v6374_v50 }
  0xc3   :  { %3472 = vmatmul.mubr.bf16.vlgmr.msra.gmra.mxu1 %v6390_v35  ;;  %3481 = vmatpush1.bf16.msra.mxu0 %v5149_v55  ;;  %v5226_v55 = vld [vmem:[%s7523_s1 + $0xf64] ss:$16 sps:$4 sm:$0xff]  }
  0xc4   :  { %3522 = vmatpush1.bf16.msra.mxu1 %v5152_v56  ;;  %3482 = vmatprep.subr.bf16.mxu0 %v5157_v57  ;;  %v5221_v56 = vld [vmem:[%s7523_s1 + $0xd60] ss:$16 sps:$4 sm:$0xff]  }
  0xc5   :  { %3523 = vmatprep.subr.bf16.mxu1 %v5160_v58  ;;  %3512 = vmatprep.mubr.bf16.mxu0 %v6386_v54  ;;  %v5224_v57 = vld [vmem:[%s7523_s1 + $0xf60] ss:$16 sps:$4 sm:$0xff]   ;;  %v5229_v58 = vld [vmem:[%s7523_s1 + $0xd44] ss:$16 sps:$4 sm:$0xff]  }
  0xc6   :  { %3553 = vmatprep.mubr.bf16.mxu1 %v6406_v59 }
  0xc7   :  { %3483 = vmatpush1.bf16.msra.mxu0 %v5155_v61  ;;  %v5232_v61 = vld [vmem:[%s7523_s1 + $0xf44] ss:$16 sps:$4 sm:$0xff]  }
  0xc8   :  { %3524 = vmatpush1.bf16.msra.mxu1 %v5158_v62  ;;  %3484 = vmatprep.subr.bf16.mxu0 %v5163_v63  ;;  %v5227_v62 = vld [vmem:[%s7523_s1 + $0xd40] ss:$16 sps:$4 sm:$0xff]  }
  0xc9   :  { %3525 = vmatprep.subr.bf16.mxu1 %v5166_v1  ;;  %v5230_v63 = vld [vmem:[%s7523_s1 + $0xf40] ss:$16 sps:$4 sm:$0xff]   ;;  %v5235_v1 = vld [vmem:[%s7523_s1 + $0xd24] ss:$16 sps:$4 sm:$0xff]  }
  0xcb   :  { %3485 = vmatpush1.bf16.msra.mxu0 %v5161_v2  ;;  %v5238_v2 = vld [vmem:[%s7523_s1 + $0xf24] ss:$16 sps:$4 sm:$0xff]  }
  0xcc   :  { %3526 = vmatpush1.bf16.msra.mxu1 %v5164_v3  ;;  %3486 = vmatprep.subr.bf16.mxu0 %v5169_v4  ;;  %v5233_v3 = vld [vmem:[%s7523_s1 + $0xd20] ss:$16 sps:$4 sm:$0xff]  }
  0xcd   :  { %3527 = vmatprep.subr.bf16.mxu1 %v5172_v5  ;;  %v5236_v4 = vld [vmem:[%s7523_s1 + $0xf20] ss:$16 sps:$4 sm:$0xff]   ;;  %v5241_v5 = vld [vmem:[%s7523_s1 + $0xd04] ss:$16 sps:$4 sm:$0xff]  }
  0xcf   :  { %3487 = vmatpush1.bf16.msra.mxu0 %v5167_v7  ;;  %v5244_v7 = vld [vmem:[%s7523_s1 + $0xf04] ss:$16 sps:$4 sm:$0xff]  }
  0xd0   :  { %3528 = vmatpush1.bf16.msra.mxu1 %v5170_v8  ;;  %3488 = vmatprep.subr.bf16.mxu0 %v5175_v9  ;;  %v5239_v8 = vld [vmem:[%s7523_s1 + $0xd00] ss:$16 sps:$4 sm:$0xff]  }
  0xd1   :  { %3529 = vmatprep.subr.bf16.mxu1 %v5178_v10  ;;  %v5242_v9 = vld [vmem:[%s7523_s1 + $0xf00] ss:$16 sps:$4 sm:$0xff]   ;;  %v6588_v10 = vrot.slane %v6353_v39, %v5856_v49  ;;  %v544_v49 = vsub.s32 1, %v5838_v42 }
  0xd3   :  { %3489 = vmatpush1.bf16.msra.mxu0 %v5173_v11  ;;  %v536_v11 = vld [vmem:[%s7524_s2] sm:$0xf]  ;;  %v6603_v39 = vcombine.high %v6588_v10, %v6588_v10 }
  0xd4   :  { %3530 = vmatpush1.bf16.msra.mxu1 %v5176_v12  ;;  %3490 = vmatprep.subr.bf16.mxu0 %v5181_v14  ;;  %v540_v12 = vsub.s32 0, %v5838_v42  ;;  %v5248_v14 = vld [vmem:[%s7523_s1 + $0xec] ss:$16 sps:$4 sm:$0xff]  }
  0xd5   :  { %3531 = vmatprep.subr.bf16.mxu1 %v5184_v15  ;;  %v5251_v15 = vld [vmem:[%s7523_s1 + $0x2ec] ss:$16 sps:$4 sm:$0xff]  }
  0xd7   :  { %3491 = vmatpush1.bf16.msra.mxu0 %v5179_v16  ;;  %v5246_v16 = vld [vmem:[%s7523_s1 + $0xe8] ss:$16 sps:$4 sm:$0xff]  }
  0xd8   :  { %3532 = vmatpush1.bf16.msra.mxu1 %v5182_v19  ;;  %3492 = vmatprep.subr.bf16.mxu0 %v5187_v20  ;;  %v541_v19 = vrot.slane %v536_v11, %v540_v12  ;;  %v5249_v20 = vld [vmem:[%s7523_s1 + $0x2e8] ss:$16 sps:$4 sm:$0xff]   ;;  %v5299_v12 = vld [vmem:[%s7523_s1 + $0x3ec] ss:$16 sps:$4 sm:$0xff]  }
  0xd9   :  { %3533 = vmatprep.subr.bf16.mxu1 %v5190_v21  ;;  %v5254_v21 = vld [vmem:[%s7523_s1 + $0xcc] ss:$16 sps:$4 sm:$0xff]  }
  0xdb   :  { %3493 = vmatpush1.bf16.msra.mxu0 %v5185_v22  ;;  %v5257_v22 = vld [vmem:[%s7523_s1 + $0x2cc] ss:$16 sps:$4 sm:$0xff]  }
  0xdc   :  { %3534 = vmatpush1.bf16.msra.mxu1 %v5188_v24  ;;  %3494 = vmatprep.subr.bf16.mxu0 %v5193_v25  ;;  %v545_v24 = vrot.slane %v536_v11, %v544_v49  ;;  %v5296_v11 = vld [vmem:[%s7523_s1 + $0x1ec] ss:$16 sps:$4 sm:$0xff]  }
  0xdd   :  { %3535 = vmatprep.subr.bf16.mxu1 %v5196_v27  ;;  %v5302_v49 = vld [vmem:[%s7523_s1 + $0x1cc] ss:$16 sps:$4 sm:$0xff]  }
  0xdf   :  { %3495 = vmatpush1.bf16.msra.mxu0 %v5191_v28  ;;  %v5252_v28 = vld [vmem:[%s7523_s1 + $0xc8] ss:$16 sps:$4 sm:$0xff]  }
  0xe0   :  { %3536 = vmatpush1.bf16.msra.mxu1 %v5194_v29  ;;  %3496 = vmatprep.subr.bf16.mxu0 %v5199_v30  ;;  %v5255_v29 = vld [vmem:[%s7523_s1 + $0x2c8] ss:$16 sps:$4 sm:$0xff]  }
  0xe1   :  { %3537 = vmatprep.subr.bf16.mxu1 %v5202_v31 }
  0xe3   :  { %3497 = vmatpush2.bf16.msra.mxu0 %v5197_v33 }
  0xe4   :  { %3538 = vmatpush2.bf16.msra.mxu1 %v5200_v34  ;;  %3498 = vmatprep.subr.bf16.mxu0 %v5205_v36  ;;  %v5260_v34 = vld [vmem:[%s7523_s1 + $0xac] ss:$16 sps:$4 sm:$0xff]  }
  0xe5   :  { %3539 = vmatprep.subr.bf16.mxu1 %v5208_v37  ;;  %v5263_v36 = vld [vmem:[%s7523_s1 + $0x2ac] ss:$16 sps:$4 sm:$0xff]  }
  0xe7   :  { %3499 = vmatpush2.bf16.msra.mxu0 %v5203_v38 }
  0xe8   :  { %3540 = vmatpush2.bf16.msra.mxu1 %v5206_v32  ;;  %3500 = vmatprep.subr.bf16.mxu0 %v5211_v40  ;;  %v5258_v32 = vld [vmem:[%s7523_s1 + $0xa8] ss:$16 sps:$4 sm:$0xff]  }
  0xe9   :  { %3541 = vmatprep.subr.bf16.mxu1 %v5214_v44  ;;  %v5261_v40 = vld [vmem:[%s7523_s1 + $0x2a8] ss:$16 sps:$4 sm:$0xff]  }
  0xeb   :  { %3501 = vmatpush2.bf16.msra.mxu0 %v5209_v45 }
  0xec   :  { %3542 = vmatpush2.bf16.msra.mxu1 %v5212_v46  ;;  %3502 = vmatprep.subr.bf16.mxu0 %v5217_v47 }
  0xed   :  { %3543 = vmatprep.subr.bf16.mxu1 %v5220_v48 }
  0xef   :  { %3503 = vmatpush2.bf16.msra.mxu0 %v5215_v51  ;;  %v5266_v51 = vld [vmem:[%s7523_s1 + $0x8c] ss:$16 sps:$4 sm:$0xff]  }
  0xf0   :  { %3544 = vmatpush2.bf16.msra.mxu1 %v5218_v52  ;;  %3504 = vmatprep.subr.bf16.mxu0 %v5223_v53  ;;  %v5267_v52 = vld [vmem:[%s7523_s1 + $0x288] ss:$16 sps:$4 sm:$0xff]   ;;  %v5272_v53 = vld [vmem:[%s7523_s1 + $0x6c] ss:$16 sps:$4 sm:$0xff]  }
  0xf1   :  { %3545 = vmatprep.subr.bf16.mxu1 %v5226_v55  ;;  %v5275_v55 = vld [vmem:[%s7523_s1 + $0x26c] ss:$16 sps:$4 sm:$0xff]  }
  0xf3   :  { %3505 = vmatpush2.bf16.msra.mxu0 %v5221_v56  ;;  %v5270_v56 = vld [vmem:[%s7523_s1 + $0x68] ss:$16 sps:$4 sm:$0xff]  }
  0xf4   :  { %3546 = vmatpush2.bf16.msra.mxu1 %v5224_v57  ;;  %3506 = vmatprep.subr.bf16.mxu0 %v5229_v58  ;;  %v5273_v57 = vld [vmem:[%s7523_s1 + $0x268] ss:$16 sps:$4 sm:$0xff]   ;;  %v5278_v58 = vld [vmem:[%s7523_s1 + $0x4c] ss:$16 sps:$4 sm:$0xff]  }
  0xf5   :  { %3547 = vmatprep.subr.bf16.mxu1 %v5232_v61  ;;  %v5281_v61 = vld [vmem:[%s7523_s1 + $0x24c] ss:$16 sps:$4 sm:$0xff]  }
  0xf7   :  { %3507 = vmatpush2.bf16.msra.mxu0 %v5227_v62  ;;  %v5276_v62 = vld [vmem:[%s7523_s1 + $0x48] ss:$16 sps:$4 sm:$0xff]  }
  0xf8   :  { %3548 = vmatpush2.bf16.msra.mxu1 %v5230_v63  ;;  %3508 = vmatprep.subr.bf16.mxu0 %v5235_v1  ;;  %v5279_v63 = vld [vmem:[%s7523_s1 + $0x248] ss:$16 sps:$4 sm:$0xff]   ;;  %v5284_v1 = vld [vmem:[%s7523_s1 + $0x2c] ss:$16 sps:$4 sm:$0xff]  }
  0xf9   :  { %3549 = vmatprep.subr.bf16.mxu1 %v5238_v2  ;;  %v5287_v2 = vld [vmem:[%s7523_s1 + $0x22c] ss:$16 sps:$4 sm:$0xff]  }
  0xfb   :  { %3509 = vmatpush2.bf16.msra.mxu0 %v5233_v3  ;;  %v5282_v3 = vld [vmem:[%s7523_s1 + $0x28] ss:$16 sps:$4 sm:$0xff]  }
  0xfc   :  { %3550 = vmatpush2.bf16.msra.mxu1 %v5236_v4  ;;  %3510 = vmatprep.subr.bf16.mxu0 %v5241_v5  ;;  %v5285_v4 = vld [vmem:[%s7523_s1 + $0x228] ss:$16 sps:$4 sm:$0xff]   ;;  %v5290_v5 = vld [vmem:[%s7523_s1 + $0xc] ss:$16 sps:$4 sm:$0xff]  }
  0xfd   :  { %3551 = vmatprep.subr.bf16.mxu1 %v5244_v7  ;;  %v5293_v7 = vld [vmem:[%s7523_s1 + $0x20c] ss:$16 sps:$4 sm:$0xff]  }
  0xff   :  { %3511 = vmatpush2.bf16.msra.mxu0 %v5239_v8  ;;  %v5288_v8 = vld [vmem:[%s7523_s1 + $0x8] ss:$16 sps:$4 sm:$0xff]  }
 0x100   :  { %3552 = vmatpush2.bf16.msra.mxu1 %v5242_v9  ;;  %3562 = vmatprep.subr.bf16.mxu0 %v5248_v14  ;;  %v5291_v9 = vld [vmem:[%s7523_s1 + $0x208] ss:$16 sps:$4 sm:$0xff]  }
 0x101   :  { %3603 = vmatprep.subr.bf16.mxu1 %v5251_v15  ;;  %v5294_v14 = vld [vmem:[%s7523_s1 + $0x1e8] ss:$16 sps:$4 sm:$0xff]  }
 0x102   :  { %v3268_v25 = vpop.f32.mrf.mxu0  ;;  %3513 = vmatmul.mubr.bf16.vlgmr.msra.gmra.mxu0 %v6588_v10  ;;  %v5297_v15 = vld [vmem:[%s7523_s1 + $0x3e8] ss:$16 sps:$4 sm:$0xff]  }
 0x103   :  { %v3309_v27 = vpop.f32.mrf.mxu1  ;;  %3554 = vmatmul.mubr.bf16.vlgmr.msra.gmra.mxu1 %v6603_v39  ;;  %v3269_v30 = vadd.f32 %v3268_v25, %v541_v19  ;;  %3563 = vmatpush1.bf16.msra.mxu0 %v5246_v16  ;;  %v5305_v16 = vld [vmem:[%s7523_s1 + $0x3cc] ss:$16 sps:$4 sm:$0xff]   ;;  %v5300_v19 = vld [vmem:[%s7523_s1 + $0x1c8] ss:$16 sps:$4 sm:$0xff]  }
 0x104   :  { %3604 = vmatpush1.bf16.msra.mxu1 %v5249_v20  ;;  %v3270_v31 = vpop.f32.mrf.mxu0  ;;  %3564 = vmatprep.subr.bf16.mxu0 %v5254_v21  ;;  %v5303_v20 = vld [vmem:[%s7523_s1 + $0x3c8] ss:$16 sps:$4 sm:$0xff]   ;;  %v5308_v21 = vld [vmem:[%s7523_s1 + $0x1ac] ss:$16 sps:$4 sm:$0xff]  }
 0x105   :  { %v3311_v33 = vpop.f32.mrf.mxu1  ;;  %3605 = vmatprep.subr.bf16.mxu1 %v5257_v22  ;;  %v6631_v37 = vadd.f32 %v3309_v27, %v3269_v30  ;;  %v3271_v38 = vadd.f32 %v3270_v31, %v545_v24  ;;  %3594 = vmatprep.mubr.bf16.mxu0 %v5884_v60  ;;  %v5269_v60 = vld [vmem:[%s7523_s1 + $0x28c] ss:$16 sps:$4 sm:$0xff]   ;;  %v5306_v24 = vld [vmem:[%s7523_s1 + $0x1a8] ss:$16 sps:$4 sm:$0xff]  }
 0x106   :  { %3635 = vmatprep.mubr.bf16.mxu1 %v5897_v0  ;;  %v3272_v44 = vpop.f32.mrf.mxu0  ;;  %v5264_v0 = vld [vmem:[%s7523_s1 + $0x88] ss:$16 sps:$4 sm:$0xff]   ;;  %v5311_v22 = vld [vmem:[%s7523_s1 + $0x3ac] ss:$16 sps:$4 sm:$0xff]  }
 0x107   :  { %v3313_v45 = vpop.f32.mrf.mxu1  ;;  %v6641_v46 = vadd.f32 %v3311_v33, %v3271_v38  ;;  %3565 = vmatpush1.bf16.msra.mxu0 %v5252_v28  ;;  %v5309_v25 = vld [vmem:[%s7523_s1 + $0x3a8] ss:$16 sps:$4 sm:$0xff]   ;;  %v5314_v27 = vld [vmem:[%s7523_s1 + $0x18c] ss:$16 sps:$4 sm:$0xff]  }
 0x108   :  { %3606 = vmatpush1.bf16.msra.mxu1 %v5255_v29  ;;  %v3273_v47 = vpop.f32.mrf.mxu0  ;;  %3566 = vmatprep.subr.bf16.mxu0 %v5260_v34  ;;  %v5317_v28 = vld [vmem:[%s7523_s1 + $0x38c] ss:$16 sps:$4 sm:$0xff]   ;;  %v5312_v29 = vld [vmem:[%s7523_s1 + $0x188] ss:$16 sps:$4 sm:$0xff]  }
 0x109   :  { %v3314_v48 = vpop.f32.mrf.mxu1  ;;  %3607 = vmatprep.subr.bf16.mxu1 %v5263_v36  ;;  %v5315_v30 = vld [vmem:[%s7523_s1 + $0x388] ss:$16 sps:$4 sm:$0xff]   ;;  %v5320_v31 = vld [vmem:[%s7523_s1 + $0x16c] ss:$16 sps:$4 sm:$0xff]  }
 0x10a   :  { %v5323_v33 = vld [vmem:[%s7523_s1 + $0x36c] ss:$16 sps:$4 sm:$0xff]   ;;  %v5318_v34 = vld [vmem:[%s7523_s1 + $0x168] ss:$16 sps:$4 sm:$0xff]  }
 0x10b   :  { %3567 = vmatpush1.bf16.msra.mxu0 %v5258_v32  ;;  %v5321_v36 = vld [vmem:[%s7523_s1 + $0x368] ss:$16 sps:$4 sm:$0xff]   ;;  %v5326_v38 = vld [vmem:[%s7523_s1 + $0x14c] ss:$16 sps:$4 sm:$0xff]  }
 0x10c   :  { %3608 = vmatpush1.bf16.msra.mxu1 %v5261_v40  ;;  %3568 = vmatprep.subr.bf16.mxu0 %v5266_v51  ;;  %v5329_v32 = vld [vmem:[%s7523_s1 + $0x34c] ss:$16 sps:$4 sm:$0xff]   ;;  %v5324_v40 = vld [vmem:[%s7523_s1 + $0x148] ss:$16 sps:$4 sm:$0xff]  }
 0x10d   :  { %3609 = vmatprep.subr.bf16.mxu1 %v5269_v60  ;;  %v5327_v44 = vld [vmem:[%s7523_s1 + $0x348] ss:$16 sps:$4 sm:$0xff]   ;;  %v5332_v45 = vld [vmem:[%s7523_s1 + $0x12c] ss:$16 sps:$4 sm:$0xff]  }
 0x10e   :  { %v5335_v47 = vld [vmem:[%s7523_s1 + $0x32c] ss:$16 sps:$4 sm:$0xff]   ;;  %v5330_v48 = vld [vmem:[%s7523_s1 + $0x128] ss:$16 sps:$4 sm:$0xff]  }
 0x10f   :  { %3569 = vmatpush1.bf16.msra.mxu0 %v5264_v0  ;;  %v5333_v51 = vld [vmem:[%s7523_s1 + $0x328] ss:$16 sps:$4 sm:$0xff]   ;;  %v5338_v60 = vld [vmem:[%s7523_s1 + $0x10c] ss:$16 sps:$4 sm:$0xff]  }
 0x110   :  { %3610 = vmatpush1.bf16.msra.mxu1 %v5267_v52  ;;  %3570 = vmatprep.subr.bf16.mxu0 %v5272_v53  ;;  %v5341_v0 = vld [vmem:[%s7523_s1 + $0x30c] ss:$16 sps:$4 sm:$0xff]   ;;  %v5336_v52 = vld [vmem:[%s7523_s1 + $0x108] ss:$16 sps:$4 sm:$0xff]  }
 0x111   :  { %3611 = vmatprep.subr.bf16.mxu1 %v5275_v55  ;;  %v5339_v53 = vld [vmem:[%s7523_s1 + $0x308] ss:$16 sps:$4 sm:$0xff]   ;;  %v5344_v55 = vld [vmem:[%s7523_s1 + $0x4ec] ss:$16 sps:$4 sm:$0xff]  }
 0x113   :  { %3571 = vmatpush1.bf16.msra.mxu0 %v5270_v56  ;;  %v5347_v56 = vld [vmem:[%s7523_s1 + $0x6ec] ss:$16 sps:$4 sm:$0xff]  }
 0x114   :  { %3612 = vmatpush1.bf16.msra.mxu1 %v5273_v57  ;;  %3572 = vmatprep.subr.bf16.mxu0 %v5278_v58  ;;  %v5342_v57 = vld [vmem:[%s7523_s1 + $0x4e8] ss:$16 sps:$4 sm:$0xff]  }
 0x115   :  { %3613 = vmatprep.subr.bf16.mxu1 %v5281_v61  ;;  %v5345_v58 = vld [vmem:[%s7523_s1 + $0x6e8] ss:$16 sps:$4 sm:$0xff]   ;;  %v5350_v61 = vld [vmem:[%s7523_s1 + $0x4cc] ss:$16 sps:$4 sm:$0xff]  }
 0x117   :  { %3573 = vmatpush1.bf16.msra.mxu0 %v5276_v62  ;;  %v5353_v62 = vld [vmem:[%s7523_s1 + $0x6cc] ss:$16 sps:$4 sm:$0xff]  }
 0x118   :  { %3614 = vmatpush1.bf16.msra.mxu1 %v5279_v63  ;;  %3574 = vmatprep.subr.bf16.mxu0 %v5284_v1  ;;  %v5348_v63 = vld [vmem:[%s7523_s1 + $0x4c8] ss:$16 sps:$4 sm:$0xff]  }
 0x119   :  { %3615 = vmatprep.subr.bf16.mxu1 %v5287_v2  ;;  %v5351_v1 = vld [vmem:[%s7523_s1 + $0x6c8] ss:$16 sps:$4 sm:$0xff]  }
 0x11b   :  { %3575 = vmatpush1.bf16.msra.mxu0 %v5282_v3 }
 0x11c   :  { %3616 = vmatpush1.bf16.msra.mxu1 %v5285_v4  ;;  %3576 = vmatprep.subr.bf16.mxu0 %v5290_v5 }
 0x11d   :  { %3617 = vmatprep.subr.bf16.mxu1 %v5293_v7 }
 0x11f   :  { %3577 = vmatpush1.bf16.msra.mxu0 %v5288_v8  ;;  %v5356_v8 = vld [vmem:[%s7523_s1 + $0x4ac] ss:$16 sps:$4 sm:$0xff]  }
 0x120   :  { %3618 = vmatpush1.bf16.msra.mxu1 %v5291_v9  ;;  %3578 = vmatprep.subr.bf16.mxu0 %v5296_v11  ;;  %v5359_v9 = vld [vmem:[%s7523_s1 + $0x6ac] ss:$16 sps:$4 sm:$0xff]  }
 0x121   :  { %3619 = vmatprep.subr.bf16.mxu1 %v5299_v12 }
 0x123   :  { %3579 = vmatpush2.bf16.msra.mxu0 %v5294_v14 }
 0x124   :  { %3620 = vmatpush2.bf16.msra.mxu1 %v5297_v15  ;;  %3580 = vmatprep.subr.bf16.mxu0 %v5302_v49 }
 0x125   :  { %3621 = vmatprep.subr.bf16.mxu1 %v5305_v16  ;;  %v5362_v16 = vld [vmem:[%s7523_s1 + $0x48c] ss:$16 sps:$4 sm:$0xff]  }
 0x127   :  { %3581 = vmatpush2.bf16.msra.mxu0 %v5300_v19  ;;  %v5363_v19 = vld [vmem:[%s7523_s1 + $0x688] ss:$16 sps:$4 sm:$0xff]  }
 0x128   :  { %3622 = vmatpush2.bf16.msra.mxu1 %v5303_v20  ;;  %3582 = vmatprep.subr.bf16.mxu0 %v5308_v21  ;;  %v5368_v20 = vld [vmem:[%s7523_s1 + $0x46c] ss:$16 sps:$4 sm:$0xff]  }
 0x129   :  { %3623 = vmatprep.subr.bf16.mxu1 %v5311_v22  ;;  %v5371_v21 = vld [vmem:[%s7523_s1 + $0x66c] ss:$16 sps:$4 sm:$0xff]   ;;  %v5366_v22 = vld [vmem:[%s7523_s1 + $0x468] ss:$16 sps:$4 sm:$0xff]  }
 0x12b   :  { %3583 = vmatpush2.bf16.msra.mxu0 %v5306_v24  ;;  %v5369_v24 = vld [vmem:[%s7523_s1 + $0x668] ss:$16 sps:$4 sm:$0xff]  }
 0x12c   :  { %3624 = vmatpush2.bf16.msra.mxu1 %v5309_v25  ;;  %3584 = vmatprep.subr.bf16.mxu0 %v5314_v27  ;;  %v5374_v25 = vld [vmem:[%s7523_s1 + $0x44c] ss:$16 sps:$4 sm:$0xff]  }
 0x12d   :  { %3625 = vmatprep.subr.bf16.mxu1 %v5317_v28  ;;  %v5377_v27 = vld [vmem:[%s7523_s1 + $0x64c] ss:$16 sps:$4 sm:$0xff]   ;;  %v5372_v28 = vld [vmem:[%s7523_s1 + $0x448] ss:$16 sps:$4 sm:$0xff]  }
 0x12f   :  { %3585 = vmatpush2.bf16.msra.mxu0 %v5312_v29  ;;  %v5375_v29 = vld [vmem:[%s7523_s1 + $0x648] ss:$16 sps:$4 sm:$0xff]  }
 0x130   :  { %3626 = vmatpush2.bf16.msra.mxu1 %v5315_v30  ;;  %3586 = vmatprep.subr.bf16.mxu0 %v5320_v31  ;;  %v5380_v30 = vld [vmem:[%s7523_s1 + $0x42c] ss:$16 sps:$4 sm:$0xff]  }
 0x131   :  { %3627 = vmatprep.subr.bf16.mxu1 %v5323_v33  ;;  %v5383_v31 = vld [vmem:[%s7523_s1 + $0x62c] ss:$16 sps:$4 sm:$0xff]   ;;  %v5378_v33 = vld [vmem:[%s7523_s1 + $0x428] ss:$16 sps:$4 sm:$0xff]  }
 0x133   :  { %3587 = vmatpush2.bf16.msra.mxu0 %v5318_v34  ;;  %v5381_v34 = vld [vmem:[%s7523_s1 + $0x628] ss:$16 sps:$4 sm:$0xff]  }
 0x134   :  { %3628 = vmatpush2.bf16.msra.mxu1 %v5321_v36  ;;  %3588 = vmatprep.subr.bf16.mxu0 %v5326_v38  ;;  %v5386_v36 = vld [vmem:[%s7523_s1 + $0x40c] ss:$16 sps:$4 sm:$0xff]  }
 0x135   :  { %3629 = vmatprep.subr.bf16.mxu1 %v5329_v32  ;;  %v5389_v38 = vld [vmem:[%s7523_s1 + $0x60c] ss:$16 sps:$4 sm:$0xff]   ;;  %v5384_v32 = vld [vmem:[%s7523_s1 + $0x408] ss:$16 sps:$4 sm:$0xff]  }
 0x137   :  { %3589 = vmatpush2.bf16.msra.mxu0 %v5324_v40  ;;  %v5387_v40 = vld [vmem:[%s7523_s1 + $0x608] ss:$16 sps:$4 sm:$0xff]  }
 0x138   :  { %3630 = vmatpush2.bf16.msra.mxu1 %v5327_v44  ;;  %3590 = vmatprep.subr.bf16.mxu0 %v5332_v45  ;;  %v5392_v44 = vld [vmem:[%s7523_s1 + $0x5ec] ss:$16 sps:$4 sm:$0xff]  }
 0x139   :  { %3631 = vmatprep.subr.bf16.mxu1 %v5335_v47  ;;  %v5395_v45 = vld [vmem:[%s7523_s1 + $0x7ec] ss:$16 sps:$4 sm:$0xff]   ;;  %v5390_v47 = vld [vmem:[%s7523_s1 + $0x5e8] ss:$16 sps:$4 sm:$0xff]  }
 0x13b   :  { %3591 = vmatpush2.bf16.msra.mxu0 %v5330_v48  ;;  %v5393_v48 = vld [vmem:[%s7523_s1 + $0x7e8] ss:$16 sps:$4 sm:$0xff]  }
 0x13c   :  { %3632 = vmatpush2.bf16.msra.mxu1 %v5333_v51  ;;  %3592 = vmatprep.subr.bf16.mxu0 %v5338_v60  ;;  %v5398_v51 = vld [vmem:[%s7523_s1 + $0x5cc] ss:$16 sps:$4 sm:$0xff]  }
 0x13d   :  { %3633 = vmatprep.subr.bf16.mxu1 %v5341_v0  ;;  %v5401_v60 = vld [vmem:[%s7523_s1 + $0x7cc] ss:$16 sps:$4 sm:$0xff]  }
 0x13f   :  { %3593 = vmatpush2.bf16.msra.mxu0 %v5336_v52 }
 0x140   :  { %3634 = vmatpush2.bf16.msra.mxu1 %v5339_v53  ;;  %3644 = vmatprep.subr.bf16.mxu0 %v5344_v55 }
 0x141   :  { %3685 = vmatprep.subr.bf16.mxu1 %v5347_v56 }
 0x142   :  { %v3350_v2 = vpop.f32.mrf.mxu0  ;;  %3595 = vmatmul.mubr.bf16.vlgmr.msra.gmra.mxu0 %v5934_v13 }
 0x143   :  { %v3391_v3 = vpop.f32.mrf.mxu1  ;;  %3636 = vmatmul.mubr.bf16.vlgmr.msra.gmra.mxu1 %v5950_v18  ;;  %v3351_v4 = vadd.f32 %v3350_v2, %v6631_v37  ;;  %3645 = vmatpush1.bf16.msra.mxu0 %v5342_v57  ;;  %v5354_v18 = vld [vmem:[%s7523_s1 + $0x4a8] ss:$16 sps:$4 sm:$0xff]  }
 0x144   :  { %3686 = vmatpush1.bf16.msra.mxu1 %v5345_v58  ;;  %v3352_v5 = vpop.f32.mrf.mxu0  ;;  %3646 = vmatprep.subr.bf16.mxu0 %v5350_v61  ;;  %v5357_v37 = vld [vmem:[%s7523_s1 + $0x6a8] ss:$16 sps:$4 sm:$0xff]  }
 0x145   :  { %v3393_v7 = vpop.f32.mrf.mxu1  ;;  %3687 = vmatprep.subr.bf16.mxu1 %v5353_v62  ;;  %v6832_v11 = vadd.f32 %v3391_v3, %v3351_v4  ;;  %v3353_v13 = vadd.f32 %v3352_v5, %v6641_v46  ;;  %3676 = vmatprep.mubr.bf16.mxu0 %v5946_v17  ;;  %v5365_v17 = vld [vmem:[%s7523_s1 + $0x68c] ss:$16 sps:$4 sm:$0xff]  }
 0x146   :  { %3717 = vmatprep.mubr.bf16.mxu1 %v5966_v23  ;;  %v3354_v12 = vpop.f32.mrf.mxu0  ;;  %v5360_v23 = vld [vmem:[%s7523_s1 + $0x488] ss:$16 sps:$4 sm:$0xff]  }
 0x147   :  { %v3395_v14 = vpop.f32.mrf.mxu1  ;;  %v6843_v15 = vadd.f32 %v3393_v7, %v3353_v13  ;;  %3647 = vmatpush1.bf16.msra.mxu0 %v5348_v63 }
 0x148   :  { %3688 = vmatpush1.bf16.msra.mxu1 %v5351_v1  ;;  %v3355_v49 = vpop.f32.mrf.mxu0  ;;  %3648 = vmatprep.subr.bf16.mxu0 %v5356_v8 }
 0x149   :  { %v3396_v46 = vpop.f32.mrf.mxu1  ;;  %3689 = vmatprep.subr.bf16.mxu1 %v5359_v9 }
 0x14b   :  { %3649 = vmatpush1.bf16.msra.mxu0 %v5354_v18 }
 0x14c   :  { %3690 = vmatpush1.bf16.msra.mxu1 %v5357_v37  ;;  %3650 = vmatprep.subr.bf16.mxu0 %v5362_v16 }
 0x14d   :  { %3691 = vmatprep.subr.bf16.mxu1 %v5365_v17 }
 0x14f   :  { %3651 = vmatpush1.bf16.msra.mxu0 %v5360_v23 }
 0x150   :  { %3692 = vmatpush1.bf16.msra.mxu1 %v5363_v19  ;;  %3652 = vmatprep.subr.bf16.mxu0 %v5368_v20 }
 0x151   :  { %3693 = vmatprep.subr.bf16.mxu1 %v5371_v21 }
 0x153   :  { %3653 = vmatpush1.bf16.msra.mxu0 %v5366_v22 }
 0x154   :  { %3694 = vmatpush1.bf16.msra.mxu1 %v5369_v24  ;;  %3654 = vmatprep.subr.bf16.mxu0 %v5374_v25 }
 0x155   :  { %3695 = vmatprep.subr.bf16.mxu1 %v5377_v27 }
 0x157   :  { %3655 = vmatpush1.bf16.msra.mxu0 %v5372_v28 }
 0x158   :  { %3696 = vmatpush1.bf16.msra.mxu1 %v5375_v29  ;;  %3656 = vmatprep.subr.bf16.mxu0 %v5380_v30 }
 0x159   :  { %3697 = vmatprep.subr.bf16.mxu1 %v5383_v31 }
 0x15b   :  { %3657 = vmatpush1.bf16.msra.mxu0 %v5378_v33 }
 0x15c   :  { %3698 = vmatpush1.bf16.msra.mxu1 %v5381_v34  ;;  %3658 = vmatprep.subr.bf16.mxu0 %v5386_v36 }
 0x15d   :  { %3699 = vmatprep.subr.bf16.mxu1 %v5389_v38 }
 0x15f   :  { %3659 = vmatpush1.bf16.msra.mxu0 %v5384_v32 }
 0x160   :  { %3700 = vmatpush1.bf16.msra.mxu1 %v5387_v40  ;;  %3660 = vmatprep.subr.bf16.mxu0 %v5392_v44 }
 0x161   :  { %3701 = vmatprep.subr.bf16.mxu1 %v5395_v45 }
 0x162   :  { %10 = vsyncpa [#allocation3], 0  ;;  %v5396_v0 = vld [vmem:[%s7523_s1 + $0x5c8] ss:$16 sps:$4 sm:$0xff]   ;;  %v5404_v53 = vld [vmem:[%s7523_s1 + $0x5ac] ss:$16 sps:$4 sm:$0xff]  }
 0x163   :  { %3661 = vmatpush2.bf16.msra.mxu0 %v5390_v47  ;;  %v5399_v52 = vld [vmem:[%s7523_s1 + $0x7c8] ss:$16 sps:$4 sm:$0xff]   ;;  %v5407_v55 = vld [vmem:[%s7523_s1 + $0x7ac] ss:$16 sps:$4 sm:$0xff]   ;;  %vm4241_vm0 = vcmask 74752  }
 0x164   :  { %3702 = vmatpush2.bf16.msra.mxu1 %v5393_v48  ;;  %3662 = vmatprep.subr.bf16.mxu0 %v5398_v51  ;;  %v5402_v56 = vld [vmem:[%s7523_s1 + $0x5a8] ss:$16 sps:$4 sm:$0xff]   ;;  %v5410_v58 = vld [vmem:[%s7523_s1 + $0x58c] ss:$16 sps:$4 sm:$0xff]  }
 0x165   :  { %3703 = vmatprep.subr.bf16.mxu1 %v5401_v60  ;;  %v5405_v57 = vld [vmem:[%s7523_s1 + $0x7a8] ss:$16 sps:$4 sm:$0xff]   ;;  %v5413_v61 = vld [vmem:[%s7523_s1 + $0x78c] ss:$16 sps:$4 sm:$0xff]  }
 0x166   :  { %v5408_v62 = vld [vmem:[%s7523_s1 + $0x588] ss:$16 sps:$4 sm:$0xff]   ;;  %v5416_v1 = vld [vmem:[%s7523_s1 + $0x56c] ss:$16 sps:$4 sm:$0xff]  }
 0x167   :  { %3663 = vmatpush2.bf16.msra.mxu0 %v5396_v0  ;;  %v5411_v63 = vld [vmem:[%s7523_s1 + $0x788] ss:$16 sps:$4 sm:$0xff]   ;;  %v5419_v2 = vld [vmem:[%s7523_s1 + $0x76c] ss:$16 sps:$4 sm:$0xff]  }
 0x168   :  { %3704 = vmatpush2.bf16.msra.mxu1 %v5399_v52  ;;  %3664 = vmatprep.subr.bf16.mxu0 %v5404_v53  ;;  %v5414_v3 = vld [vmem:[%s7523_s1 + $0x568] ss:$16 sps:$4 sm:$0xff]   ;;  %v5422_v5 = vld [vmem:[%s7523_s1 + $0x54c] ss:$16 sps:$4 sm:$0xff]  }
 0x169   :  { %3705 = vmatprep.subr.bf16.mxu1 %v5407_v55  ;;  %v5417_v4 = vld [vmem:[%s7523_s1 + $0x768] ss:$16 sps:$4 sm:$0xff]   ;;  %v5425_v7 = vld [vmem:[%s7523_s1 + $0x74c] ss:$16 sps:$4 sm:$0xff]  }
 0x16a   :  { %v5420_v8 = vld [vmem:[%s7523_s1 + $0x548] ss:$16 sps:$4 sm:$0xff]   ;;  %v5428_v13 = vld [vmem:[%s7523_s1 + $0x52c] ss:$16 sps:$4 sm:$0xff]  }
 0x16b   :  { %3665 = vmatpush2.bf16.msra.mxu0 %v5402_v56  ;;  %v5423_v9 = vld [vmem:[%s7523_s1 + $0x748] ss:$16 sps:$4 sm:$0xff]   ;;  %v5431_v18 = vld [vmem:[%s7523_s1 + $0x72c] ss:$16 sps:$4 sm:$0xff]  }
 0x16c   :  { %3706 = vmatpush2.bf16.msra.mxu1 %v5405_v57  ;;  %3666 = vmatprep.subr.bf16.mxu0 %v5410_v58  ;;  %v5426_v37 = vld [vmem:[%s7523_s1 + $0x528] ss:$16 sps:$4 sm:$0xff]   ;;  %v5434_v14 = vld [vmem:[%s7523_s1 + $0x50c] ss:$16 sps:$4 sm:$0xff]  }
 0x16d   :  { %3707 = vmatprep.subr.bf16.mxu1 %v5413_v61  ;;  %v5429_v12 = vld [vmem:[%s7523_s1 + $0x728] ss:$16 sps:$4 sm:$0xff]   ;;  %v5437_v49 = vld [vmem:[%s7523_s1 + $0x70c] ss:$16 sps:$4 sm:$0xff]  }
 0x16e   :  { %v5432_v46 = vld [vmem:[%s7523_s1 + $0x508] ss:$16 sps:$4 sm:$0xff]   ;;  %v5440_v17 = vld [vmem:[%s7523_s1 + $0x8ec] ss:$16 sps:$4 sm:$0xff]  }
 0x16f   :  { %3667 = vmatpush2.bf16.msra.mxu0 %v5408_v62  ;;  %v5435_v16 = vld [vmem:[%s7523_s1 + $0x708] ss:$16 sps:$4 sm:$0xff]   ;;  %v5443_v23 = vld [vmem:[%s7523_s1 + $0xaec] ss:$16 sps:$4 sm:$0xff]  }
 0x170   :  { %3708 = vmatpush2.bf16.msra.mxu1 %v5411_v63  ;;  %3668 = vmatprep.subr.bf16.mxu0 %v5416_v1  ;;  %v5438_v19 = vld [vmem:[%s7523_s1 + $0x8e8] ss:$16 sps:$4 sm:$0xff]   ;;  %v5446_v21 = vld [vmem:[%s7523_s1 + $0x8cc] ss:$16 sps:$4 sm:$0xff]  }
 0x171   :  { %3709 = vmatprep.subr.bf16.mxu1 %v5419_v2  ;;  %v5441_v20 = vld [vmem:[%s7523_s1 + $0xae8] ss:$16 sps:$4 sm:$0xff]   ;;  %v5449_v22 = vld [vmem:[%s7523_s1 + $0xacc] ss:$16 sps:$4 sm:$0xff]  }
 0x172   :  { %v5444_v28 = vld [vmem:[%s7523_s1 + $0x8c8] ss:$16 sps:$4 sm:$0xff]   ;;  %v5464_v48 = vld [vmem:[%s7523_s1 + $0x86c] ss:$16 sps:$4 sm:$0xff]  }
 0x173   :  { %3669 = vmatpush2.bf16.msra.mxu0 %v5414_v3  ;;  %v5447_v29 = vld [vmem:[%s7523_s1 + $0xac8] ss:$16 sps:$4 sm:$0xff]   ;;  %v5467_v51 = vld [vmem:[%s7523_s1 + $0xa6c] ss:$16 sps:$4 sm:$0xff]  }
 0x174   :  { %3710 = vmatpush2.bf16.msra.mxu1 %v5417_v4  ;;  %3670 = vmatprep.subr.bf16.mxu0 %v5422_v5  ;;  %v5450_v32 = vld [vmem:[%s7523_s1 + $0x8a8] ss:$16 sps:$4 sm:$0xff]   ;;  %v5470_v52 = vld [vmem:[%s7523_s1 + $0x84c] ss:$16 sps:$4 sm:$0xff]  }
 0x175   :  { %3711 = vmatprep.subr.bf16.mxu1 %v5425_v7  ;;  %v5453_v40 = vld [vmem:[%s7523_s1 + $0xaa8] ss:$16 sps:$4 sm:$0xff]   ;;  %v5473_v53 = vld [vmem:[%s7523_s1 + $0xa4c] ss:$16 sps:$4 sm:$0xff]  }
 0x176   :  { %v5456_v45 = vld [vmem:[%s7523_s1 + $0x888] ss:$16 sps:$4 sm:$0xff]   ;;  %v5476_v57 = vld [vmem:[%s7523_s1 + $0x82c] ss:$16 sps:$4 sm:$0xff]  }
 0x177   :  { %3671 = vmatpush2.bf16.msra.mxu0 %v5420_v8  ;;  %v5459_v47 = vld [vmem:[%s7523_s1 + $0xa88] ss:$16 sps:$4 sm:$0xff]   ;;  %v5479_v58 = vld [vmem:[%s7523_s1 + $0xa2c] ss:$16 sps:$4 sm:$0xff]  }
 0x178   :  { %3712 = vmatpush2.bf16.msra.mxu1 %v5423_v9  ;;  %3672 = vmatprep.subr.bf16.mxu0 %v5428_v13  ;;  %v5462_v60 = vld [vmem:[%s7523_s1 + $0x868] ss:$16 sps:$4 sm:$0xff]   ;;  %v5482_v63 = vld [vmem:[%s7523_s1 + $0x80c] ss:$16 sps:$4 sm:$0xff]  }
 0x179   :  { %3713 = vmatprep.subr.bf16.mxu1 %v5431_v18  ;;  %v5465_v0 = vld [vmem:[%s7523_s1 + $0xa68] ss:$16 sps:$4 sm:$0xff]   ;;  %v5485_v1 = vld [vmem:[%s7523_s1 + $0xa0c] ss:$16 sps:$4 sm:$0xff]  }
 0x17a   :  { %v5468_v55 = vld [vmem:[%s7523_s1 + $0x848] ss:$16 sps:$4 sm:$0xff]   ;;  %v5488_v4 = vld [vmem:[%s7523_s1 + $0x9ec] ss:$16 sps:$4 sm:$0xff]  }
 0x17b   :  { %3673 = vmatpush2.bf16.msra.mxu0 %v5426_v37  ;;  %v5471_v56 = vld [vmem:[%s7523_s1 + $0xa48] ss:$16 sps:$4 sm:$0xff]   ;;  %v5491_v5 = vld [vmem:[%s7523_s1 + $0xbec] ss:$16 sps:$4 sm:$0xff]  }
 0x17c   :  { %3714 = vmatpush2.bf16.msra.mxu1 %v5429_v12  ;;  %3674 = vmatprep.subr.bf16.mxu0 %v5434_v14  ;;  %v5474_v61 = vld [vmem:[%s7523_s1 + $0x828] ss:$16 sps:$4 sm:$0xff]   ;;  %v5494_v9 = vld [vmem:[%s7523_s1 + $0x9cc] ss:$16 sps:$4 sm:$0xff]  }
 0x17d   :  { %3715 = vmatprep.subr.bf16.mxu1 %v5437_v49  ;;  %v5477_v62 = vld [vmem:[%s7523_s1 + $0xa28] ss:$16 sps:$4 sm:$0xff]   ;;  %v5497_v13 = vld [vmem:[%s7523_s1 + $0xbcc] ss:$16 sps:$4 sm:$0xff]  }
 0x17e   :  { %v5480_v2 = vld [vmem:[%s7523_s1 + $0x808] ss:$16 sps:$4 sm:$0xff]   ;;  %v5500_v12 = vld [vmem:[%s7523_s1 + $0x9ac] ss:$16 sps:$4 sm:$0xff]  }
 0x17f   :  { %3675 = vmatpush2.bf16.msra.mxu0 %v5432_v46  ;;  %v5483_v3 = vld [vmem:[%s7523_s1 + $0xa08] ss:$16 sps:$4 sm:$0xff]   ;;  %v5503_v14 = vld [vmem:[%s7523_s1 + $0xbac] ss:$16 sps:$4 sm:$0xff]  }
 0x180   :  { %3716 = vmatpush2.bf16.msra.mxu1 %v5435_v16  ;;  %3726 = vmatprep.subr.bf16.mxu0 %v5440_v17  ;;  %v5486_v7 = vld [vmem:[%s7523_s1 + $0x9e8] ss:$16 sps:$4 sm:$0xff]   ;;  %v5506_v16 = vld [vmem:[%s7523_s1 + $0x98c] ss:$16 sps:$4 sm:$0xff]  }
 0x181   :  { %3767 = vmatprep.subr.bf16.mxu1 %v5443_v23  ;;  %v5489_v8 = vld [vmem:[%s7523_s1 + $0xbe8] ss:$16 sps:$4 sm:$0xff]   ;;  %v5509_v17 = vld [vmem:[%s7523_s1 + $0xb8c] ss:$16 sps:$4 sm:$0xff]  }
 0x182   :  { %v3432_v24 = vpop.f32.mrf.mxu0  ;;  %3677 = vmatmul.mubr.bf16.vlgmr.msra.gmra.mxu0 %v6145_v26  ;;  %v5452_v26 = vld [vmem:[%s7523_s1 + $0x8ac] ss:$16 sps:$4 sm:$0xff]   ;;  %v5492_v18 = vld [vmem:[%s7523_s1 + $0x9c8] ss:$16 sps:$4 sm:$0xff]  }
 0x183   :  { %v3473_v25 = vpop.f32.mrf.mxu1  ;;  %3718 = vmatmul.mubr.bf16.vlgmr.msra.gmra.mxu1 %v6158_v6  ;;  %v3433_v27 = vadd.f32 %v3432_v24, %v6832_v11  ;;  %3727 = vmatpush1.bf16.msra.mxu0 %v5438_v19  ;;  %v5455_v6 = vld [vmem:[%s7523_s1 + $0xaac] ss:$16 sps:$4 sm:$0xff]   ;;  %v5495_v37 = vld [vmem:[%s7523_s1 + $0xbc8] ss:$16 sps:$4 sm:$0xff]  }
 0x184   :  { %3768 = vmatpush1.bf16.msra.mxu1 %v5441_v20  ;;  %v3434_v30 = vpop.f32.mrf.mxu0  ;;  %3728 = vmatprep.subr.bf16.mxu0 %v5446_v21  ;;  %v5498_v49 = vld [vmem:[%s7523_s1 + $0x9a8] ss:$16 sps:$4 sm:$0xff]   ;;  %v5512_v20 = vld [vmem:[%s7523_s1 + $0x96c] ss:$16 sps:$4 sm:$0xff]  }
 0x185   :  { %v3475_v31 = vpop.f32.mrf.mxu1  ;;  %3769 = vmatprep.subr.bf16.mxu1 %v5449_v22  ;;  %v7034_v11 = vadd.f32 %v3473_v25, %v3433_v27  ;;  %v3435_v33 = vadd.f32 %v3434_v30, %v6843_v15  ;;  %3758 = vmatprep.mubr.bf16.mxu0 %v6198_v41  ;;  %v5458_v41 = vld [vmem:[%s7523_s1 + $0x88c] ss:$16 sps:$4 sm:$0xff]   ;;  %v5501_v46 = vld [vmem:[%s7523_s1 + $0xba8] ss:$16 sps:$4 sm:$0xff]  }
 0x186   :  { %3799 = vmatprep.mubr.bf16.mxu1 %v6203_v43  ;;  %v3436_v34 = vpop.f32.mrf.mxu0  ;;  %v5461_v43 = vld [vmem:[%s7523_s1 + $0xa8c] ss:$16 sps:$4 sm:$0xff]   ;;  %v5504_v23 = vld [vmem:[%s7523_s1 + $0x988] ss:$16 sps:$4 sm:$0xff]  }
 0x187   :  { %v3477_v36 = vpop.f32.mrf.mxu1  ;;  %v7039_v38 = vadd.f32 %v3475_v31, %v3435_v33  ;;  %3729 = vmatpush1.bf16.msra.mxu0 %v5444_v28  ;;  %v5507_v19 = vld [vmem:[%s7523_s1 + $0xb88] ss:$16 sps:$4 sm:$0xff]   ;;  %v5515_v21 = vld [vmem:[%s7523_s1 + $0xb6c] ss:$16 sps:$4 sm:$0xff]  }
 0x188   :  { %3770 = vmatpush1.bf16.msra.mxu1 %v5447_v29  ;;  %v3437_v44 = vpop.f32.mrf.mxu0  ;;  %3730 = vmatprep.subr.bf16.mxu0 %v5452_v26  ;;  %v5510_v22 = vld [vmem:[%s7523_s1 + $0x968] ss:$16 sps:$4 sm:$0xff]   ;;  %v5518_v25 = vld [vmem:[%s7523_s1 + $0x94c] ss:$16 sps:$4 sm:$0xff]  }
 0x189   :  { %v3478_v15 = vpop.f32.mrf.mxu1  ;;  %3771 = vmatprep.subr.bf16.mxu1 %v5455_v6  ;;  %v5513_v24 = vld [vmem:[%s7523_s1 + $0xb68] ss:$16 sps:$4 sm:$0xff]   ;;  %v5521_v27 = vld [vmem:[%s7523_s1 + $0xb4c] ss:$16 sps:$4 sm:$0xff]  }
 0x18a   :  { %v5516_v28 = vld [vmem:[%s7523_s1 + $0x948] ss:$16 sps:$4 sm:$0xff]   ;;  %v5524_v30 = vld [vmem:[%s7523_s1 + $0x92c] ss:$16 sps:$4 sm:$0xff]  }
 0x18b   :  { %3731 = vmatpush1.bf16.msra.mxu0 %v5450_v32  ;;  %v5519_v29 = vld [vmem:[%s7523_s1 + $0xb48] ss:$16 sps:$4 sm:$0xff]   ;;  %v5527_v31 = vld [vmem:[%s7523_s1 + $0xb2c] ss:$16 sps:$4 sm:$0xff]  }
 0x18c   :  { %3772 = vmatpush1.bf16.msra.mxu1 %v5453_v40  ;;  %3732 = vmatprep.subr.bf16.mxu0 %v5458_v41  ;;  %v5522_v26 = vld [vmem:[%s7523_s1 + $0x928] ss:$16 sps:$4 sm:$0xff]   ;;  %v5530_v33 = vld [vmem:[%s7523_s1 + $0x90c] ss:$16 sps:$4 sm:$0xff]  }
 0x18d   :  { %3773 = vmatprep.subr.bf16.mxu1 %v5461_v43  ;;  %v5525_v6 = vld [vmem:[%s7523_s1 + $0xb28] ss:$16 sps:$4 sm:$0xff]   ;;  %v5533_v34 = vld [vmem:[%s7523_s1 + $0xb0c] ss:$16 sps:$4 sm:$0xff]  }
 0x18e   :  { %v5528_v36 = vld [vmem:[%s7523_s1 + $0x908] ss:$16 sps:$4 sm:$0xff]   ;;  %v5536_v40 = vld [vmem:[%s7523_s1 + $0xcec] ss:$16 sps:$4 sm:$0xff]  }
 0x18f   :  { %3733 = vmatpush1.bf16.msra.mxu0 %v5456_v45  ;;  %v5531_v32 = vld [vmem:[%s7523_s1 + $0xb08] ss:$16 sps:$4 sm:$0xff]   ;;  %v5539_v44 = vld [vmem:[%s7523_s1 + $0xeec] ss:$16 sps:$4 sm:$0xff]  }
 0x190   :  { %3774 = vmatpush1.bf16.msra.mxu1 %v5459_v47  ;;  %3734 = vmatprep.subr.bf16.mxu0 %v5464_v48  ;;  %v5534_v15 = vld [vmem:[%s7523_s1 + $0xce8] ss:$16 sps:$4 sm:$0xff]   ;;  %v5542_v43 = vld [vmem:[%s7523_s1 + $0xccc] ss:$16 sps:$4 sm:$0xff]  }
 0x191   :  { %3775 = vmatprep.subr.bf16.mxu1 %v5467_v51  ;;  %v5537_v41 = vld [vmem:[%s7523_s1 + $0xee8] ss:$16 sps:$4 sm:$0xff]   ;;  %v5545_v45 = vld [vmem:[%s7523_s1 + $0xecc] ss:$16 sps:$4 sm:$0xff]  }
 0x193   :  { %3735 = vmatpush1.bf16.msra.mxu0 %v5462_v60  ;;  %v5540_v60 = vld [vmem:[%s7523_s1 + $0xcc8] ss:$16 sps:$4 sm:$0xff]  }
 0x194   :  { %3776 = vmatpush1.bf16.msra.mxu1 %v5465_v0  ;;  %3736 = vmatprep.subr.bf16.mxu0 %v5470_v52  ;;  %v5543_v0 = vld [vmem:[%s7523_s1 + $0xec8] ss:$16 sps:$4 sm:$0xff]  }
 0x195   :  { %3777 = vmatprep.subr.bf16.mxu1 %v5473_v53 }
 0x197   :  { %3737 = vmatpush1.bf16.msra.mxu0 %v5468_v55 }
 0x198   :  { %3778 = vmatpush1.bf16.msra.mxu1 %v5471_v56  ;;  %3738 = vmatprep.subr.bf16.mxu0 %v5476_v57  ;;  %v5546_v57 = vld [vmem:[%s7523_s1 + $0xca8] ss:$16 sps:$4 sm:$0xff]  }
 0x199   :  { %3779 = vmatprep.subr.bf16.mxu1 %v5479_v58  ;;  %v5549_v58 = vld [vmem:[%s7523_s1 + $0xea8] ss:$16 sps:$4 sm:$0xff]  }
 0x19b   :  { %3739 = vmatpush1.bf16.msra.mxu0 %v5474_v61 }
 0x19c   :  { %3780 = vmatpush1.bf16.msra.mxu1 %v5477_v62  ;;  %3740 = vmatprep.subr.bf16.mxu0 %v5482_v63  ;;  %v5552_v63 = vld [vmem:[%s7523_s1 + $0xc88] ss:$16 sps:$4 sm:$0xff]  }
 0x19d   :  { %3781 = vmatprep.subr.bf16.mxu1 %v5485_v1  ;;  %v5555_v1 = vld [vmem:[%s7523_s1 + $0xe88] ss:$16 sps:$4 sm:$0xff]  }
 0x19f   :  { %3741 = vmatpush1.bf16.msra.mxu0 %v5480_v2  ;;  %v5560_v2 = vld [vmem:[%s7523_s1 + $0xc6c] ss:$16 sps:$4 sm:$0xff]  }
 0x1a0   :  { %3782 = vmatpush1.bf16.msra.mxu1 %v5483_v3  ;;  %3742 = vmatprep.subr.bf16.mxu0 %v5488_v4  ;;  %v5563_v3 = vld [vmem:[%s7523_s1 + $0xe6c] ss:$16 sps:$4 sm:$0xff]   ;;  %v5558_v4 = vld [vmem:[%s7523_s1 + $0xc68] ss:$16 sps:$4 sm:$0xff]  }
 0x1a1   :  { %3783 = vmatprep.subr.bf16.mxu1 %v5491_v5  ;;  %v5561_v5 = vld [vmem:[%s7523_s1 + $0xe68] ss:$16 sps:$4 sm:$0xff]  }
 0x1a3   :  { %3743 = vmatpush2.bf16.msra.mxu0 %v5486_v7  ;;  %v5566_v7 = vld [vmem:[%s7523_s1 + $0xc4c] ss:$16 sps:$4 sm:$0xff]  }
 0x1a4   :  { %3784 = vmatpush2.bf16.msra.mxu1 %v5489_v8  ;;  %3744 = vmatprep.subr.bf16.mxu0 %v5494_v9  ;;  %v5569_v8 = vld [vmem:[%s7523_s1 + $0xe4c] ss:$16 sps:$4 sm:$0xff]   ;;  %v5564_v9 = vld [vmem:[%s7523_s1 + $0xc48] ss:$16 sps:$4 sm:$0xff]  }
 0x1a5   :  { %3785 = vmatprep.subr.bf16.mxu1 %v5497_v13  ;;  %v5567_v13 = vld [vmem:[%s7523_s1 + $0xe48] ss:$16 sps:$4 sm:$0xff]  }
 0x1a7   :  { %3745 = vmatpush2.bf16.msra.mxu0 %v5492_v18  ;;  %v5572_v18 = vld [vmem:[%s7523_s1 + $0xc2c] ss:$16 sps:$4 sm:$0xff]  }
 0x1a8   :  { %3786 = vmatpush2.bf16.msra.mxu1 %v5495_v37  ;;  %3746 = vmatprep.subr.bf16.mxu0 %v5500_v12  ;;  %v5575_v37 = vld [vmem:[%s7523_s1 + $0xe2c] ss:$16 sps:$4 sm:$0xff]   ;;  %v5570_v12 = vld [vmem:[%s7523_s1 + $0xc28] ss:$16 sps:$4 sm:$0xff]  }
 0x1a9   :  { %3787 = vmatprep.subr.bf16.mxu1 %v5503_v14  ;;  %v5573_v14 = vld [vmem:[%s7523_s1 + $0xe28] ss:$16 sps:$4 sm:$0xff]  }
 0x1ab   :  { %3747 = vmatpush2.bf16.msra.mxu0 %v5498_v49  ;;  %v5578_v49 = vld [vmem:[%s7523_s1 + $0xc0c] ss:$16 sps:$4 sm:$0xff]  }
 0x1ac   :  { %3788 = vmatpush2.bf16.msra.mxu1 %v5501_v46  ;;  %3748 = vmatprep.subr.bf16.mxu0 %v5506_v16  ;;  %v5581_v46 = vld [vmem:[%s7523_s1 + $0xe0c] ss:$16 sps:$4 sm:$0xff]   ;;  %v5576_v16 = vld [vmem:[%s7523_s1 + $0xc08] ss:$16 sps:$4 sm:$0xff]  }
 0x1ad   :  { %3789 = vmatprep.subr.bf16.mxu1 %v5509_v17  ;;  %v5579_v17 = vld [vmem:[%s7523_s1 + $0xe08] ss:$16 sps:$4 sm:$0xff]  }
 0x1af   :  { %3749 = vmatpush2.bf16.msra.mxu0 %v5504_v23  ;;  %v5584_v23 = vld [vmem:[%s7523_s1 + $0xdec] ss:$16 sps:$4 sm:$0xff]  }
 0x1b0   :  { %3790 = vmatpush2.bf16.msra.mxu1 %v5507_v19  ;;  %3750 = vmatprep.subr.bf16.mxu0 %v5512_v20  ;;  %v5587_v19 = vld [vmem:[%s7523_s1 + $0xfec] ss:$16 sps:$4 sm:$0xff]   ;;  %v5582_v20 = vld [vmem:[%s7523_s1 + $0xde8] ss:$16 sps:$4 sm:$0xff]  }
 0x1b1   :  { %3791 = vmatprep.subr.bf16.mxu1 %v5515_v21  ;;  %v5585_v21 = vld [vmem:[%s7523_s1 + $0xfe8] ss:$16 sps:$4 sm:$0xff]  }
 0x1b3   :  { %3751 = vmatpush2.bf16.msra.mxu0 %v5510_v22  ;;  %v5590_v22 = vld [vmem:[%s7523_s1 + $0xdcc] ss:$16 sps:$4 sm:$0xff]  }
 0x1b4   :  { %3792 = vmatpush2.bf16.msra.mxu1 %v5513_v24  ;;  %3752 = vmatprep.subr.bf16.mxu0 %v5518_v25  ;;  %v5593_v24 = vld [vmem:[%s7523_s1 + $0xfcc] ss:$16 sps:$4 sm:$0xff]   ;;  %v5588_v25 = vld [vmem:[%s7523_s1 + $0xdc8] ss:$16 sps:$4 sm:$0xff]  }
 0x1b5   :  { %3793 = vmatprep.subr.bf16.mxu1 %v5521_v27  ;;  %v5591_v27 = vld [vmem:[%s7523_s1 + $0xfc8] ss:$16 sps:$4 sm:$0xff]  }
 0x1b7   :  { %3753 = vmatpush2.bf16.msra.mxu0 %v5516_v28  ;;  %v5596_v28 = vld [vmem:[%s7523_s1 + $0xdac] ss:$16 sps:$4 sm:$0xff]  }
 0x1b8   :  { %3794 = vmatpush2.bf16.msra.mxu1 %v5519_v29  ;;  %3754 = vmatprep.subr.bf16.mxu0 %v5524_v30  ;;  %v5599_v29 = vld [vmem:[%s7523_s1 + $0xfac] ss:$16 sps:$4 sm:$0xff]   ;;  %v5594_v30 = vld [vmem:[%s7523_s1 + $0xda8] ss:$16 sps:$4 sm:$0xff]  }
 0x1b9   :  { %3795 = vmatprep.subr.bf16.mxu1 %v5527_v31  ;;  %v5597_v31 = vld [vmem:[%s7523_s1 + $0xfa8] ss:$16 sps:$4 sm:$0xff]  }
 0x1bb   :  { %3755 = vmatpush2.bf16.msra.mxu0 %v5522_v26  ;;  %v5602_v26 = vld [vmem:[%s7523_s1 + $0xd8c] ss:$16 sps:$4 sm:$0xff]  }
 0x1bc   :  { %3796 = vmatpush2.bf16.msra.mxu1 %v5525_v6  ;;  %3756 = vmatprep.subr.bf16.mxu0 %v5530_v33  ;;  %v5605_v6 = vld [vmem:[%s7523_s1 + $0xf8c] ss:$16 sps:$4 sm:$0xff]   ;;  %v5600_v33 = vld [vmem:[%s7523_s1 + $0xd88] ss:$16 sps:$4 sm:$0xff]  }
 0x1bd   :  { %3797 = vmatprep.subr.bf16.mxu1 %v5533_v34  ;;  %v5603_v34 = vld [vmem:[%s7523_s1 + $0xf88] ss:$16 sps:$4 sm:$0xff]  }
 0x1bf   :  { %3757 = vmatpush2.bf16.msra.mxu0 %v5528_v36  ;;  %v5608_v36 = vld [vmem:[%s7523_s1 + $0xd6c] ss:$16 sps:$4 sm:$0xff]  }
 0x1c0   :  { %3798 = vmatpush2.bf16.msra.mxu1 %v5531_v32  ;;  %3808 = vmatprep.subr.bf16.mxu0 %v5536_v40  ;;  %v5611_v32 = vld [vmem:[%s7523_s1 + $0xf6c] ss:$16 sps:$4 sm:$0xff]   ;;  %v5606_v40 = vld [vmem:[%s7523_s1 + $0xd68] ss:$16 sps:$4 sm:$0xff]  }
 0x1c1   :  { %3849 = vmatprep.subr.bf16.mxu1 %v5539_v44  ;;  %v5609_v44 = vld [vmem:[%s7523_s1 + $0xf68] ss:$16 sps:$4 sm:$0xff]  }
 0x1c2   :  { %v3514_v47 = vpop.f32.mrf.mxu0  ;;  %3759 = vmatmul.mubr.bf16.vlgmr.msra.gmra.mxu0 %v6374_v50  ;;  %v5548_v50 = vld [vmem:[%s7523_s1 + $0xcac] ss:$16 sps:$4 sm:$0xff]  }
 0x1c3   :  { %v3555_v48 = vpop.f32.mrf.mxu1  ;;  %3800 = vmatmul.mubr.bf16.vlgmr.msra.gmra.mxu1 %v6390_v35  ;;  %v3515_v51 = vadd.f32 %v3514_v47, %v7034_v11  ;;  %3809 = vmatpush1.bf16.msra.mxu0 %v5534_v15  ;;  %v5551_v35 = vld [vmem:[%s7523_s1 + $0xeac] ss:$16 sps:$4 sm:$0xff]  }
 0x1c4   :  { %3850 = vmatpush1.bf16.msra.mxu1 %v5537_v41  ;;  %v7230_v52 = vpop.f32.mrf.mxu0  ;;  %3810 = vmatprep.subr.bf16.mxu0 %v5542_v43  ;;  %v5614_v15 = vld [vmem:[%s7523_s1 + $0xd4c] ss:$16 sps:$4 sm:$0xff]   ;;  %v5612_v43 = vld [vmem:[%s7523_s1 + $0xd48] ss:$16 sps:$4 sm:$0xff]  }
 0x1c5   :  { %v7232_v53 = vpop.f32.mrf.mxu1  ;;  %3851 = vmatprep.subr.bf16.mxu1 %v5545_v45  ;;  %v7240_v11 = vadd.f32 %v3555_v48, %v3515_v51  ;;  %3840 = vmatprep.mubr.bf16.mxu0 %v6386_v54  ;;  %v5554_v54 = vld [vmem:[%s7523_s1 + $0xc8c] ss:$16 sps:$4 sm:$0xff]   ;;  %v5615_v45 = vld [vmem:[%s7523_s1 + $0xf48] ss:$16 sps:$4 sm:$0xff]   ;;  %v3517_v51 = vadd.f32 %v7230_v52, %v7039_v38 }
 0x1c6   :  { %3881 = vmatprep.mubr.bf16.mxu1 %v6406_v59  ;;  %v3518_v55 = vpop.f32.mrf.mxu0  ;;  %v5557_v59 = vld [vmem:[%s7523_s1 + $0xe8c] ss:$16 sps:$4 sm:$0xff]  }
 0x1c7   :  { %v3559_v56 = vpop.f32.mrf.mxu1  ;;  %3811 = vmatpush1.bf16.msra.mxu0 %v5540_v60  ;;  %v5617_v41 = vld [vmem:[%s7523_s1 + $0xf4c] ss:$16 sps:$4 sm:$0xff]   ;;  %v5618_v60 = vld [vmem:[%s7523_s1 + $0xd28] ss:$16 sps:$4 sm:$0xff]   ;;  %v3558_v52 = vadd.f32 %v7232_v53, %v3517_v51  ;;  %v552_v53 = vsub.s32 3, %v5838_v42 }
 0x1c8   :  { %3852 = vmatpush1.bf16.msra.mxu1 %v5543_v0  ;;  %v3519_v61 = vpop.f32.mrf.mxu0  ;;  %3812 = vmatprep.subr.bf16.mxu0 %v5548_v50  ;;  %v5620_v47 = vld [vmem:[%s7523_s1 + $0xd2c] ss:$16 sps:$4 sm:$0xff]   ;;  %v5621_v0 = vld [vmem:[%s7523_s1 + $0xf28] ss:$16 sps:$4 sm:$0xff]   ;;  %v548_v56 = vsub.s32 2, %v5838_v42 }
 0x1c9   :  { %v3560_v62 = vpop.f32.mrf.mxu1  ;;  %3853 = vmatprep.subr.bf16.mxu1 %v5551_v35  ;;  %v5623_v48 = vld [vmem:[%s7523_s1 + $0xf2c] ss:$16 sps:$4 sm:$0xff]   ;;  %v5624_v35 = vld [vmem:[%s7523_s1 + $0xd08] ss:$16 sps:$4 sm:$0xff]   ;;  %v5666_v61 = vld [vmem:[%s7524_s2] sm:$0xf] }
 0x1ca   :  { %v5626_v50 = vld [vmem:[%s7523_s1 + $0xd0c] ss:$16 sps:$4 sm:$0xff]   ;;  %v5627_v55 = vld [vmem:[%s7523_s1 + $0xf08] ss:$16 sps:$4 sm:$0xff]   ;;  %v549_v62 = vrot.slane %v5666_v61, %v548_v56  ;;  %v5661_v56 = vld [vmem:[%s7525_s3 + $0x80] sm:$0xff]  }
 0x1cb   :  { %3813 = vmatpush1.bf16.msra.mxu0 %v5546_v57  ;;  %v5629_v38 = vld [vmem:[%s7523_s1 + $0xf0c] ss:$16 sps:$4 sm:$0xff]  }
 0x1cc   :  { %3854 = vmatpush1.bf16.msra.mxu1 %v5549_v58  ;;  %3814 = vmatprep.subr.bf16.mxu0 %v5554_v54  ;;  %v5630_v57 = vld [vmem:[%s7525_s3 + $0x78] sm:$0xff]   ;;  %v3891_v58 = vmax.f32 %v3558_v52, 0.0 }
 0x1cd   :  { %3855 = vmatprep.subr.bf16.mxu1 %v5557_v59  ;;  %v5631_v54 = vld [vmem:[%s7525_s3 + $0x38] sm:$0xff]   ;;  %v5632_v59 = vld [vmem:[%s7525_s3 + $0x70] sm:$0xff]  }
 0x1cf   :  { %3815 = vmatpush1.bf16.msra.mxu0 %v5552_v63  ;;  %v3895_v63 = vpack.c.bf16 %v3891_v58, %v3891_v58 }
 0x1d0   :  { %3856 = vmatpush1.bf16.msra.mxu1 %v5555_v1  ;;  %3816 = vmatprep.subr.bf16.mxu0 %v5560_v2  ;;  %v553_v1 = vrot.slane %v5666_v61, %v552_v53 }
 0x1d1   :  { %3857 = vmatprep.subr.bf16.mxu1 %v5563_v3 }
 0x1d3   :  { %3817 = vmatpush1.bf16.msra.mxu0 %v5558_v4  ;;  %v5633_v4 = vld [vmem:[%s7525_s3 + $0x30] sm:$0xff]  }
 0x1d4   :  { %3858 = vmatpush1.bf16.msra.mxu1 %v5561_v5  ;;  %3818 = vmatprep.subr.bf16.mxu0 %v5566_v7 }
 0x1d5   :  { %3859 = vmatprep.subr.bf16.mxu1 %v5569_v8  ;;  %v5634_v8 = vld [vmem:[%s7525_s3 + $0x68] sm:$0xff]  }
 0x1d7   :  { %3819 = vmatpush1.bf16.msra.mxu0 %v5564_v9 }
 0x1d8   :  { %3860 = vmatpush1.bf16.msra.mxu1 %v5567_v13  ;;  %3820 = vmatprep.subr.bf16.mxu0 %v5572_v18 }
 0x1d9   :  { %3861 = vmatprep.subr.bf16.mxu1 %v5575_v37 }
 0x1db   :  { %3821 = vmatpush1.bf16.msra.mxu0 %v5570_v12  ;;  %v5636_v12 = vld [vmem:[%s7525_s3 + $0x60] sm:$0xff]  }
 0x1dc   :  { %3862 = vmatpush1.bf16.msra.mxu1 %v5573_v14  ;;  %3822 = vmatprep.subr.bf16.mxu0 %v5578_v49 }
 0x1dd   :  { %3863 = vmatprep.subr.bf16.mxu1 %v5581_v46  ;;  %v5646_v46 = vld [vmem:[%s7525_s3 + $0xf8] sm:$0xff]  }
 0x1df   :  { %3823 = vmatpush1.bf16.msra.mxu0 %v5576_v16  ;;  %v5647_v16 = vld [vmem:[%s7525_s3 + $0xb8] sm:$0xff]  }
 0x1e0   :  { %3864 = vmatpush1.bf16.msra.mxu1 %v5579_v17  ;;  %3824 = vmatprep.subr.bf16.mxu0 %v5584_v23  ;;  %v5648_v17 = vld [vmem:[%s7525_s3 + $0xf0] sm:$0xff]   ;;  %v5637_v23 = vld [vmem:[%s7525_s3 + $0x20] sm:$0xff]  }
 0x1e1   :  { %3865 = vmatprep.subr.bf16.mxu1 %v5587_v19  ;;  %v5649_v19 = vld [vmem:[%s7525_s3 + $0xb0] sm:$0xff]  }
 0x1e3   :  { %3825 = vmatpush2.bf16.msra.mxu0 %v5582_v20  ;;  %v5638_v20 = vld [vmem:[%s7525_s3 + $0x58] sm:$0xff]  }
 0x1e4   :  { %3866 = vmatpush2.bf16.msra.mxu1 %v5585_v21  ;;  %3826 = vmatprep.subr.bf16.mxu0 %v5590_v22  ;;  %v5650_v21 = vld [vmem:[%s7525_s3 + $0xe8] sm:$0xff]   ;;  %v5639_v22 = vld [vmem:[%s7525_s3 + $0x18] sm:$0xff]  }
 0x1e5   :  { %3867 = vmatprep.subr.bf16.mxu1 %v5593_v24  ;;  %v5651_v24 = vld [vmem:[%s7525_s3 + $0xa8] sm:$0xff]  }
 0x1e7   :  { %3827 = vmatpush2.bf16.msra.mxu0 %v5588_v25  ;;  %v5640_v25 = vld [vmem:[%s7525_s3 + $0x50] sm:$0xff]  }
 0x1e8   :  { %3868 = vmatpush2.bf16.msra.mxu1 %v5591_v27  ;;  %3828 = vmatprep.subr.bf16.mxu0 %v5596_v28  ;;  %v5652_v27 = vld [vmem:[%s7525_s3 + $0xe0] sm:$0xff]   ;;  %v5641_v28 = vld [vmem:[%s7525_s3 + $0x10] sm:$0xff]  }
 0x1e9   :  { %3869 = vmatprep.subr.bf16.mxu1 %v5599_v29  ;;  %v5653_v29 = vld [vmem:[%s7525_s3 + $0xa0] sm:$0xff]  }
 0x1eb   :  { %3829 = vmatpush2.bf16.msra.mxu0 %v5594_v30  ;;  %v5642_v30 = vld [vmem:[%s7525_s3 + $0x48] sm:$0xff]  }
 0x1ec   :  { %3870 = vmatpush2.bf16.msra.mxu1 %v5597_v31  ;;  %3830 = vmatprep.subr.bf16.mxu0 %v5602_v26  ;;  %v5654_v31 = vld [vmem:[%s7525_s3 + $0xd8] sm:$0xff]   ;;  %v5643_v26 = vld [vmem:[%s7525_s3 + $0x8] sm:$0xff]  }
 0x1ed   :  { %3871 = vmatprep.subr.bf16.mxu1 %v5605_v6  ;;  %v5655_v6 = vld [vmem:[%s7525_s3 + $0x98] sm:$0xff]  }
 0x1ef   :  { %3831 = vmatpush2.bf16.msra.mxu0 %v5600_v33  ;;  %v5644_v33 = vld [vmem:[%s7525_s3 + $0x40] sm:$0xff]  }
 0x1f0   :  { %3872 = vmatpush2.bf16.msra.mxu1 %v5603_v34  ;;  %3832 = vmatprep.subr.bf16.mxu0 %v5608_v36  ;;  %v5645_v34 = vld [vmem:[%s7525_s3] sm:$0xff]   ;;  %v3890_v36 = vmax.f32 %v7240_v11, 0.0  ;;  %v5658_v11 = vld [vmem:[%s7525_s3 + $0xc8] sm:$0xff]  }
 0x1f1   :  { %3873 = vmatprep.subr.bf16.mxu1 %v5611_v32 }
 0x1f2   :  { %v3894_v32 = vpack.c.bf16 %v3890_v36, %v3890_v36 }
 0x1f3   :  { %3833 = vmatpush2.bf16.msra.mxu0 %v5606_v40  ;;  %v5656_v40 = vld [vmem:[%s7525_s3 + $0xd0] sm:$0xff]  }
 0x1f4   :  { %3874 = vmatpush2.bf16.msra.mxu1 %v5609_v44  ;;  %3834 = vmatprep.subr.bf16.mxu0 %v5614_v15  ;;  %v5657_v44 = vld [vmem:[%s7525_s3 + $0x90] sm:$0xff]  }
 0x1f5   :  { %3875 = vmatprep.subr.bf16.mxu1 %v5617_v41 }
 0x1f7   :  { %3835 = vmatpush2.bf16.msra.mxu0 %v5612_v43 }
 0x1f8   :  { %3876 = vmatpush2.bf16.msra.mxu1 %v5615_v45  ;;  %3836 = vmatprep.subr.bf16.mxu0 %v5620_v47 }
 0x1f9   :  { %3877 = vmatprep.subr.bf16.mxu1 %v5623_v48 }
 0x1fb   :  { %3837 = vmatpush2.bf16.msra.mxu0 %v5618_v60  ;;  %v5659_v60 = vld [vmem:[%s7525_s3 + $0x88] sm:$0xff]  }
 0x1fc   :  { %3878 = vmatpush2.bf16.msra.mxu1 %v5621_v0  ;;  %3838 = vmatprep.subr.bf16.mxu0 %v5626_v50 }
 0x1fd   :  { %3879 = vmatprep.subr.bf16.mxu1 %v5629_v38 }
 0x1ff   :  { %3839 = vmatpush2.bf16.msra.mxu0 %v5624_v35 }
 0x200   :  { %3880 = vmatpush2.bf16.msra.mxu1 %v5627_v55  ;;  %4814 = vmatprep.subr.bf16.mxu0 %v5630_v57  ;;  %v5660_v55 = vld [vmem:[%s7525_s3 + $0xc0] sm:$0xff]  }
 0x201   :  { %4836 = vmatprep.subr.bf16.mxu1 %v5646_v46 }
 0x202   :  { %v3596_v2 = vpop.f32.mrf.mxu0  ;;  %3841 = vmatmul.mubr.bf16.vlgmr.msra.gmra.mxu0 %v6588_v10 }
 0x203   :  { %v3637_v42 = vpop.f32.mrf.mxu1  ;;  %3882 = vmatmul.mubr.bf16.vlgmr.msra.gmra.mxu1 %v6603_v39  ;;  %v3597_v3 = vadd.f32 %v3596_v2, %v549_v62  ;;  %4815 = vmatpush3.bf16.msra.mxu0 %v5631_v54  ;;  %v5635_v39 = vld [vmem:[%s7525_s3 + $0x28] sm:$0xff]  }
 0x204   :  { %4193 = vmatprep.mubr.bf16.mxu0 %v3895_v63  ;;  %v3598_v5 = vpop.f32.mrf.mxu0  ;;  %4816 = vmatprep.subr.bf16.mxu0 %v5632_v59 }
 0x205   :  { %v3639_v7 = vpop.f32.mrf.mxu1  ;;  %v3638_v9 = vadd.f32 %v3637_v42, %v3597_v3  ;;  %v3599_v13 = vadd.f32 %v3598_v5, %v553_v1  ;;  %4837 = vmatpush3.bf16.msra.mxu1 %v5647_v16 }
 0x206   :  { %v3600_v18 = vpop.f32.mrf.mxu0  ;;  %4838 = vmatprep.subr.bf16.mxu1 %v5648_v17 }
 0x207   :  { %v3641_v10 = vpop.f32.mrf.mxu1  ;;  %v3640_v37 = vadd.f32 %v3639_v7, %v3599_v13  ;;  %4817 = vmatpush3.bf16.msra.mxu0 %v5633_v4 }
 0x208   :  { %v3601_v14 = vpop.f32.mrf.mxu0  ;;  %4818 = vmatprep.subr.bf16.mxu0 %v5634_v8 }
 0x209   :  { %v3642_v49 = vpop.f32.mrf.mxu1  ;;  %4839 = vmatpush3.bf16.msra.mxu1 %v5649_v19 }
 0x20a   :  { %4840 = vmatprep.subr.bf16.mxu1 %v5650_v21 }
 0x20b   :  { %4819 = vmatpush3.bf16.msra.mxu0 %v5635_v39 }
 0x20c   :  { %4820 = vmatprep.subr.bf16.mxu0 %v5636_v12 }
 0x20d   :  { %4841 = vmatpush3.bf16.msra.mxu1 %v5651_v24  ;;  %v4781_v24 = vld [vmem:[%s7526_s4] ss:$0 sm:$0xff]  ;;  %s5690_s4 = smov [#allocation2]  }
 0x20e   :  { %4842 = vmatprep.subr.bf16.mxu1 %v5652_v27  ;;  %s4261_s27 = sshll.u32 %s5690_s4, 4  ;;  %s4262_s27 = int_to_ptr.vmem [resolvable:$true] %s4261_s27 }
 0x20f   :  { %4821 = vmatpush3.bf16.msra.mxu0 %v5637_v23  ;;  %s5667_s28 = scalar_lea.vmem %s4262_s27, 32  ;;  %p5672_p1 = scmp.lt.s32.totalorder %s4262_s27, %s4262_s27 }
 0x210   :  { %4822 = vmatprep.subr.bf16.mxu0 %v5638_v20  ;;  %p5668_p0 = scmp.ne.s32.totalorder %s4262_s27, %s5667_s28  ;;  %p5673_p2 = scmp.lt.s32.totalorder %s5667_s28, %s5667_s28 }
 0x211   :  { %4843 = vmatpush3.bf16.msra.mxu1 %v5653_v29 }
 0x212   :  { %4844 = vmatprep.subr.bf16.mxu1 %v5654_v31  ;;  %p5674_p3 = por %p5673_p2, %p5672_p1 }
 0x213   :  { %4823 = vmatpush3.bf16.msra.mxu0 %v5639_v22 }
 0x214   :  { %4824 = vmatprep.subr.bf16.mxu0 %v5640_v25  ;;  %p5675_p4 = pnand %p5674_p3, %p5668_p0 }
 0x215   :  { %4845 = vmatpush3.bf16.msra.mxu1 %v5655_v6 }
 0x216   :  { %4846 = vmatprep.subr.bf16.mxu1 %v5656_v40 }
 0x217   :  { %4825 = vmatpush3.bf16.msra.mxu0 %v5641_v28 }
 0x218   :  { %4826 = vmatprep.subr.bf16.mxu0 %v5642_v30 }
 0x219   :  { %4847 = vmatpush3.bf16.msra.mxu1 %v5657_v44 }
 0x21a   :  { %4848 = vmatprep.subr.bf16.mxu1 %v5658_v11 }
 0x21b   :  { %4827 = vmatpush3.bf16.msra.mxu0 %v5643_v26 }
 0x21c   :  { %4828 = vmatprep.subr.bf16.mxu0 %v5644_v33 }
 0x21d   :  { %4849 = vmatpush3.bf16.msra.mxu1 %v5659_v60 }
 0x21e   :  { %4850 = vmatprep.subr.bf16.mxu1 %v5660_v55 }
 0x21f   :  { %4829 = vmatpush3.bf16.msra.mxu0 %v5645_v34 }
 0x221   :  { %4851 = vmatpush3.bf16.msra.mxu1 %v5661_v56 }
 0x222   :  { %4194 = vmatmul.mubr.bf16.vlgmr.msra.gmra.mxu0 %v3894_v32 }
 0x242   :  { %v3678_v15 = vpop.f32.mrf.mxu0 }
 0x243   :  { %v3719_v41 = vpop.f32.mrf.mxu1  ;;  %v3679_v43 = vadd.f32 %v3678_v15, %v3638_v9 }
 0x244   :  { %v3680_v45 = vpop.f32.mrf.mxu0 }
 0x245   :  { %v3721_v47 = vpop.f32.mrf.mxu1  ;;  %v3720_v48 = vadd.f32 %v3719_v41, %v3679_v43  ;;  %v3681_v51 = vadd.f32 %v3680_v45, %v3640_v37 }
 0x246   :  { %v3682_v0 = vpop.f32.mrf.mxu0 }
 0x247   :  { %v3723_v50 = vpop.f32.mrf.mxu1  ;;  %v3722_v38 = vadd.f32 %v3721_v47, %v3681_v51 }
 0x248   :  { %v3683_v52 = vpop.f32.mrf.mxu0 }
 0x249   :  { %v3724_v35 = vpop.f32.mrf.mxu1 }
 0x282   :  { %v3760_v57 = vpop.f32.mrf.mxu0 }
 0x283   :  { %v3801_v58 = vpop.f32.mrf.mxu1  ;;  %v3761_v53 = vadd.f32 %v3760_v57, %v3720_v48 }
 0x284   :  { %v3762_v61 = vpop.f32.mrf.mxu0 }
 0x285   :  { %v3803_v62 = vpop.f32.mrf.mxu1  ;;  %v3802_v54 = vadd.f32 %v3801_v58, %v3761_v53  ;;  %v3763_v42 = vadd.f32 %v3762_v61, %v3722_v38 }
 0x286   :  { %v3764_v59 = vpop.f32.mrf.mxu0 }
 0x287   :  { %v3805_v63 = vpop.f32.mrf.mxu1  ;;  %v3804_v5 = vadd.f32 %v3803_v62, %v3763_v42 }
 0x288   :  { %v3765_v1 = vpop.f32.mrf.mxu0 }
 0x289   :  { %v3806_v2 = vpop.f32.mrf.mxu1 }
 0x2c2   :  { %v3842_v3 = vpop.f32.mrf.mxu0 }
 0x2c3   :  { %v3883_v4 = vpop.f32.mrf.mxu1  ;;  %v3843_v7 = vadd.f32 %v3842_v3, %v3802_v54 }
 0x2c4   :  { %v3844_v8 = vpop.f32.mrf.mxu0 }
 0x2c5   :  { %v3885_v9 = vpop.f32.mrf.mxu1  ;;  %v3884_v13 = vadd.f32 %v3883_v4, %v3843_v7  ;;  %v3845_v18 = vadd.f32 %v3844_v8, %v3804_v5 }
 0x2c6   :  { %v3846_v10 = vpop.f32.mrf.mxu0 }
 0x2c7   :  { %v3887_v37 = vpop.f32.mrf.mxu1  ;;  %v3886_v39 = vadd.f32 %v3885_v9, %v3845_v18  ;;  %v3892_v12 = vmax.f32 %v3884_v13, 0.0 }
 0x2c8   :  { %v3847_v14 = vpop.f32.mrf.mxu0 }
 0x2c9   :  { %v3888_v49 = vpop.f32.mrf.mxu1  ;;  %v3893_v46 = vmax.f32 %v3886_v39, 0.0  ;;  %v3896_v17 = vpack.c.bf16 %v3892_v12, %v3892_v12 }
 0x2cb   :  { %v3897_v16 = vpack.c.bf16 %v3893_v46, %v3893_v46 }
 0x2cd   :  { %4233 = vmatprep.mubr.bf16.mxu1 %v3897_v16 }
 0x2ce   :  { %4234 = vmatmul.mubr.bf16.vlgmr.msra.gmra.mxu1 %v3896_v17 }
 0x2e2   :  { %v4830_v23 = vpop.f32.mrf.mxu0 }
 0x2e4   :  { %v4831_v19 = vpop.f32.mrf.mxu0 }
 0x2e5   :  { %v4832_v20 = vadd.f32 %v4831_v19, %v4830_v23 }
 0x2e6   :  { %v4833_v21 = vpop.f32.mrf.mxu0 }
 0x2e7   :  { %v4196_v28 = vadd.f32 %v4832_v20, %v4781_v24 }
 0x2e8   :  { %v4834_v22 = vpop.f32.mrf.mxu0 }
 0x38e   :  { %v4852_v25 = vpop.f32.mrf.mxu1 }
 0x390   :  { %v4853_v27 = vpop.f32.mrf.mxu1 }
 0x391   :  { %v4854_v29 = vadd.f32 %v4853_v27, %v4852_v25 }
 0x392   :  { %v4855_v30 = vpop.f32.mrf.mxu1 }
 0x393   :  { %v4236_v31 = vadd.f32 %v4854_v29, %v4196_v28 }
 0x394   :  { %v4856_v26 = vpop.f32.mrf.mxu1 }
 0x395   :  { %v4242_v6 = vsel %vm4241_vm0, %v4236_v31, -inf }
 0x396   :  { %4243 = vmax.xlane.f32.xlu0 %v4242_v6 }
 0x41f   :  { %v4244_v33 = vpop.xlane.xlu0 %4243 }
 0x420   :  { %v4245_v34 = vsub.f32 %v4236_v31, %v4244_v33 }
 0x422   :  { %v4246_v36 = vmul.f32 1.442695, %v4245_v34 }
 0x424   :  { %5662 = vpow2.f32 %v4246_v36 }
 0x431   :  { %v5663_v32 = vpop.eup %5662 }
 0x432   :  { %v4248_v40 = vsel %vm4241_vm0, %v5663_v32, 0.0 }
 0x433   :  { %4249 = vadd.xlane.f32.xlu0 %v4248_v40 }
 0x4bc   :  { %v4250_v44 = vpop.xlane.xlu0 %4249 }
 0x4bd   :  { %5664 = vlog2.f32 %v4250_v44 }
 0x4ca   :  { %v5665_v15 = vpop.eup %5664 }
 0x4cb   :  { %v4252_v41 = vmul.f32 0.6931472, %v5665_v15 }
 0x4cd   :  { %v4253_v43 = vsub.f32 %v4245_v34, %v4252_v41 }
 0x4cf   :  { %4254 = vst.msk [vmem:[#allocation2] sm:$0x3] %vm4241_vm0, %v4253_v43 }
 0x4d0   :  { %5678 = shalt.err (!%p5675_p4)
}
 0x4d1   :  { %4264 = dma.vmem_to_hbm [thread:$0]  %s4262_s27, 32, %s7527_s5, [#allocation3]  }
 0x4d2   :  { %5687 = dma.done.wait [#allocation3], 32  }
 0x4d3   :  { %5688 = vsyncadd [#allocation3], 4294967264 }
 0x4d4   :  { %4268 = vsyncpa [#allocation3], 1 }

</bundles_post_ra>
